<compile_context>
chip_gen: v7x
topology: tpu7x:2x2x1
jax: 0.10.0
libtpu: 0.0.40
codegen_flags: <defaults>
</compile_context>

<pallas_src>
import jax
import jax.numpy as jnp
from jax import lax
from jax.experimental import pallas as pl
from jax.experimental.pallas import tpu as pltpu

HIDDEN = 256
GATES = 4 * HIDDEN  # PyTorch LSTM gate order: i, f, g, o


def _make_kernel(T, B):
    TB = T * B
    H = HIDDEN

    def kernel(states_ref, table_ref, whh_ref, w2_ref, b2_ref, w3_ref, b3_ref,
               o_ref, xg_scr, h_scr):
        # ---- Phase 1: embedding gather (+ folded input projection / biases).
        # table_ref is (n_obs, 1, 4H): dynamic indexing on the leading axis is a
        # plain tile-aligned address offset (no sublane shifting).  Destination
        # rows are static, so only the table-row index is dynamic.
        for r in range(TB):                                   # static unroll
            idx = states_ref[r]                               # SMEM scalar read
            xg_scr[pl.ds(r, 1), :] = table_ref[idx]           # (1, 4H) row copy

        # ---- Phase 2: the sequential LSTM recurrence.  Only h @ W_hh^T plus the
        # cheap gate nonlinearity / cell update sits on the serial path.
        h = jnp.zeros((B, H), jnp.float32)
        c = jnp.zeros((B, H), jnp.float32)
        for t in range(T):                                    # static unroll
            xg_t = xg_scr[pl.ds(t * B, B), :]                 # (B, 4H) aligned
            if t == 0:
                gates = xg_t                                  # h == 0: skip matmul
            else:
                gates = xg_t + jnp.dot(h, whh_ref[...],
                                       preferred_element_type=jnp.float32)
            i_g = jax.nn.sigmoid(gates[:, 0 * H:1 * H])
            f_g = jax.nn.sigmoid(gates[:, 1 * H:2 * H])
            g_g = jnp.tanh(gates[:, 2 * H:3 * H])
            o_g = jax.nn.sigmoid(gates[:, 3 * H:4 * H])
            c = f_g * c + i_g * g_g
            h = o_g * jnp.tanh(c)
            h_scr[pl.ds(t * B, B), :] = h                     # stash for the head

        # ---- Phase 3: one batched head over all T*B rows (off the serial path):
        # fc2 + ReLU on the MXU/VPU, fc3 as a VPU multiply + lane reduction with
        # b3 folded in (no (256,1) MXU matmul, no extra wrapper op).
        hid = jnp.maximum(
            jnp.dot(h_scr[...], w2_ref[...], preferred_element_type=jnp.float32)
            + b2_ref[...],
            0.0)                                              # (T*B, H)
        v = jnp.sum(hid * w3_ref[...], axis=-1, keepdims=True) + b3_ref[0]
        o_ref[...] = v.astype(o_ref.dtype)                    # (T*B, 1)

    return kernel


@jax.jit
def recurrent_critic_forward(states, emb, w_ih, w_hh, b_ih, b_hh,
                             w2, b2, w3, b3):
    """states: (T, B) int32; returns (T, B, 1) float32 state values."""
    T, B = states.shape
    H = HIDDEN
    n_obs = emb.shape[0]

    # Fold embedding + input projection + both LSTM biases into one small table:
    #   table[s] = emb[s] @ W_ih^T + b_ih + b_hh            -> (n_obs, 4H)
    # Reshaped to (n_obs, 1, 4H) so in-kernel gather indexes a leading axis.
    table = (emb @ w_ih.T + (b_ih + b_hh)).reshape(n_obs, 1, GATES)

    whh_t = w_hh.T                                  # (256, 1024) kernel layout
    w2_t = w2.T                                     # (256, 256)
    b2_2d = b2.reshape(1, H)
    w3_row = w3.reshape(1, H)
    b3_1d = b3.reshape(1).astype(jnp.float32)
    states_flat = states.reshape(T * B).astype(jnp.int32)

    vmem = pltpu.MemorySpace.VMEM
    smem = pltpu.MemorySpace.SMEM

    out = pl.pallas_call(
        _make_kernel(T, B),
        out_shape=jax.ShapeDtypeStruct((T * B, 1), jnp.float32),
        in_specs=[
            pl.BlockSpec(memory_space=smem),        # observation ids (T*B,)
            pl.BlockSpec(memory_space=vmem),        # fused table (n_obs,1,4H)
            pl.BlockSpec(memory_space=vmem),        # W_hh^T (VMEM-resident)
            pl.BlockSpec(memory_space=vmem),        # W2^T
            pl.BlockSpec(memory_space=vmem),        # b2 row
            pl.BlockSpec(memory_space=vmem),        # w3 row
            pl.BlockSpec(memory_space=smem),        # b3 scalar
        ],
        out_specs=pl.BlockSpec(memory_space=vmem),
        scratch_shapes=[
            pltpu.VMEM((T * B, GATES), jnp.float32),   # gathered gate pre-acts
            pltpu.VMEM((T * B, HIDDEN), jnp.float32),  # all h_t for batched head
        ],
    )(states_flat, table, whh_t, w2_t, b2_2d, w3_row, b3_1d)

    # Row-major (T*B,1) -> (T,B,1) is a free bitcast-reshape inside the jit.
    return out.reshape(T, B, 1)


def reference_forward(states, emb, w_ih, w_hh, b_ih, b_hh, w2, b2, w3, b3):
    T, B = states.shape
    H = HIDDEN
    x = jnp.take(emb, states, axis=0)               # (T, B, 256)

    def step(carry, x_t):
        h, c = carry
        gates = x_t @ w_ih.T + b_ih + h @ w_hh.T + b_hh
        i_g = jax.nn.sigmoid(gates[:, 0 * H:1 * H])
        f_g = jax.nn.sigmoid(gates[:, 1 * H:2 * H])
        g_g = jnp.tanh(gates[:, 2 * H:3 * H])
        o_g = jax.nn.sigmoid(gates[:, 3 * H:4 * H])
        c = f_g * c + i_g * g_g
        h = o_g * jnp.tanh(c)
        return (h, c), h

    init = (jnp.zeros((B, H), jnp.float32), jnp.zeros((B, H), jnp.float32))
    _, hs = lax.scan(step, init, x)                 # (T, B, 256)
    hid = jnp.maximum(hs @ w2.T + b2, 0.0)
    return hid @ w3.T + b3                          # (T, B, 1)


if __name__ == "__main__":
    key = jax.random.PRNGKey(0)
    keys = jax.random.split(key, 10)

    n_obs = 16   # env.observation_space.n
    T, B = 8, 8  # (seq_len, batch)
    H = HIDDEN

    emb = jax.random.normal(keys[0], (n_obs, H), jnp.float32)
    lim = 1.0 / jnp.sqrt(H)
    w_ih = jax.random.uniform(keys[1], (4 * H, H), jnp.float32, -lim, lim)
    w_hh = jax.random.uniform(keys[2], (4 * H, H), jnp.float32, -lim, lim)
    b_ih = jax.random.uniform(keys[3], (4 * H,), jnp.float32, -lim, lim)
    b_hh = jax.random.uniform(keys[4], (4 * H,), jnp.float32, -lim, lim)
    w2 = jax.random.uniform(keys[5], (H, H), jnp.float32, -lim, lim)
    b2 = jax.random.uniform(keys[6], (H,), jnp.float32, -lim, lim)
    w3 = jax.random.uniform(keys[7], (1, H), jnp.float32, -lim, lim)
    b3 = jax.random.uniform(keys[8], (1,), jnp.float32, -lim, lim)
    states = jax.random.randint(keys[9], (T, B), 0, n_obs, dtype=jnp.int32)

    values = jax.block_until_ready(
        recurrent_critic_forward(states, emb, w_ih, w_hh, b_ih, b_hh,
                                 w2, b2, w3, b3))
    ref = jax.block_until_ready(
        reference_forward(states, emb, w_ih, w_hh, b_ih, b_hh,
                          w2, b2, w3, b3))

    assert values.shape == (T, B, 1)
    assert jnp.allclose(values, ref, atol=1e-3, rtol=1e-3), "mismatch vs reference"
    print("KERNEL_OK")
</pallas_src>

<mosaic_0001>
module attributes {stable_mosaic.version = 11 : i64} {
  func.func @kernel(%arg0: memref<64xi32, #tpu.memory_space<smem>>, %arg1: memref<16x1x1024xf32, #tpu.memory_space<vmem>>, %arg2: memref<256x1024xf32, #tpu.memory_space<vmem>>, %arg3: memref<256x256xf32, #tpu.memory_space<vmem>>, %arg4: memref<1x256xf32, #tpu.memory_space<vmem>>, %arg5: memref<1x256xf32, #tpu.memory_space<vmem>>, %arg6: memref<1xf32, #tpu.memory_space<smem>>, %arg7: memref<64x1xf32, #tpu.memory_space<vmem>>, %arg8: memref<64x1024xf32, #tpu.memory_space<vmem>>, %arg9: memref<64x256xf32, #tpu.memory_space<vmem>>) attributes {dimension_semantics = [], scalar_prefetch = 0 : i64, scratch_operands = 2 : i64, tpu.core_type = #tpu.core_type<tc>} {
    %c0 = arith.constant 0 : index
    %0 = memref.load %arg0[%c0] : memref<64xi32, #tpu.memory_space<smem>>
    %1 = arith.index_cast %0 : i32 to index
    %c0_0 = arith.constant 0 : index
    %c0_1 = arith.constant 0 : index
    %2 = vector.load %arg1[%1, %c0_0, %c0_1] : memref<16x1x1024xf32, #tpu.memory_space<vmem>>, vector<1x1x1024xf32>
    %3 = vector.shape_cast %2 : vector<1x1x1024xf32> to vector<1x1024xf32>
    %c0_2 = arith.constant 0 : index
    %c0_3 = arith.constant 0 : index
    %4 = vector.load %arg8[%c0_2, %c0_3] : memref<64x1024xf32, #tpu.memory_space<vmem>>, vector<1x1024xf32>
    tpu.vector_store %arg8[%c0_2, %c0_3], %3 {strides = array<i32>} : memref<64x1024xf32, #tpu.memory_space<vmem>>, vector<1x1024xf32>,
    %c1 = arith.constant 1 : index
    %5 = memref.load %arg0[%c1] : memref<64xi32, #tpu.memory_space<smem>>
    %6 = arith.index_cast %5 : i32 to index
    %c0_4 = arith.constant 0 : index
    %c0_5 = arith.constant 0 : index
    %7 = vector.load %arg1[%6, %c0_4, %c0_5] : memref<16x1x1024xf32, #tpu.memory_space<vmem>>, vector<1x1x1024xf32>
    %8 = vector.shape_cast %7 : vector<1x1x1024xf32> to vector<1x1024xf32>
    %c1_6 = arith.constant 1 : index
    %c0_7 = arith.constant 0 : index
    %9 = vector.load %arg8[%c1_6, %c0_7] : memref<64x1024xf32, #tpu.memory_space<vmem>>, vector<1x1024xf32>
    tpu.vector_store %arg8[%c1_6, %c0_7], %8 {strides = array<i32>} : memref<64x1024xf32, #tpu.memory_space<vmem>>, vector<1x1024xf32>,
    %c2 = arith.constant 2 : index
    %10 = memref.load %arg0[%c2] : memref<64xi32, #tpu.memory_space<smem>>
    %11 = arith.index_cast %10 : i32 to index
    %c0_8 = arith.constant 0 : index
    %c0_9 = arith.constant 0 : index
    %12 = vector.load %arg1[%11, %c0_8, %c0_9] : memref<16x1x1024xf32, #tpu.memory_space<vmem>>, vector<1x1x1024xf32>
    %13 = vector.shape_cast %12 : vector<1x1x1024xf32> to vector<1x1024xf32>
    %c2_10 = arith.constant 2 : index
    %c0_11 = arith.constant 0 : index
    %14 = vector.load %arg8[%c2_10, %c0_11] : memref<64x1024xf32, #tpu.memory_space<vmem>>, vector<1x1024xf32>
    tpu.vector_store %arg8[%c2_10, %c0_11], %13 {strides = array<i32>} : memref<64x1024xf32, #tpu.memory_space<vmem>>, vector<1x1024xf32>,
    %c3 = arith.constant 3 : index
    %15 = memref.load %arg0[%c3] : memref<64xi32, #tpu.memory_space<smem>>
    %16 = arith.index_cast %15 : i32 to index
    %c0_12 = arith.constant 0 : index
    %c0_13 = arith.constant 0 : index
    %17 = vector.load %arg1[%16, %c0_12, %c0_13] : memref<16x1x1024xf32, #tpu.memory_space<vmem>>, vector<1x1x1024xf32>
    %18 = vector.shape_cast %17 : vector<1x1x1024xf32> to vector<1x1024xf32>
    %c3_14 = arith.constant 3 : index
    %c0_15 = arith.constant 0 : index
    %19 = vector.load %arg8[%c3_14, %c0_15] : memref<64x1024xf32, #tpu.memory_space<vmem>>, vector<1x1024xf32>
    tpu.vector_store %arg8[%c3_14, %c0_15], %18 {strides = array<i32>} : memref<64x1024xf32, #tpu.memory_space<vmem>>, vector<1x1024xf32>,
    %c4 = arith.constant 4 : index
    %20 = memref.load %arg0[%c4] : memref<64xi32, #tpu.memory_space<smem>>
    %21 = arith.index_cast %20 : i32 to index
    %c0_16 = arith.constant 0 : index
    %c0_17 = arith.constant 0 : index
    %22 = vector.load %arg1[%21, %c0_16, %c0_17] : memref<16x1x1024xf32, #tpu.memory_space<vmem>>, vector<1x1x1024xf32>
    %23 = vector.shape_cast %22 : vector<1x1x1024xf32> to vector<1x1024xf32>
    %c4_18 = arith.constant 4 : index
    %c0_19 = arith.constant 0 : index
    %24 = vector.load %arg8[%c4_18, %c0_19] : memref<64x1024xf32, #tpu.memory_space<vmem>>, vector<1x1024xf32>
    tpu.vector_store %arg8[%c4_18, %c0_19], %23 {strides = array<i32>} : memref<64x1024xf32, #tpu.memory_space<vmem>>, vector<1x1024xf32>,
    %c5 = arith.constant 5 : index
    %25 = memref.load %arg0[%c5] : memref<64xi32, #tpu.memory_space<smem>>
    %26 = arith.index_cast %25 : i32 to index
    %c0_20 = arith.constant 0 : index
    %c0_21 = arith.constant 0 : index
    %27 = vector.load %arg1[%26, %c0_20, %c0_21] : memref<16x1x1024xf32, #tpu.memory_space<vmem>>, vector<1x1x1024xf32>
    %28 = vector.shape_cast %27 : vector<1x1x1024xf32> to vector<1x1024xf32>
    %c5_22 = arith.constant 5 : index
    %c0_23 = arith.constant 0 : index
    %29 = vector.load %arg8[%c5_22, %c0_23] : memref<64x1024xf32, #tpu.memory_space<vmem>>, vector<1x1024xf32>
    tpu.vector_store %arg8[%c5_22, %c0_23], %28 {strides = array<i32>} : memref<64x1024xf32, #tpu.memory_space<vmem>>, vector<1x1024xf32>,
    %c6 = arith.constant 6 : index
    %30 = memref.load %arg0[%c6] : memref<64xi32, #tpu.memory_space<smem>>
    %31 = arith.index_cast %30 : i32 to index
    %c0_24 = arith.constant 0 : index
    %c0_25 = arith.constant 0 : index
    %32 = vector.load %arg1[%31, %c0_24, %c0_25] : memref<16x1x1024xf32, #tpu.memory_space<vmem>>, vector<1x1x1024xf32>
    %33 = vector.shape_cast %32 : vector<1x1x1024xf32> to vector<1x1024xf32>
    %c6_26 = arith.constant 6 : index
    %c0_27 = arith.constant 0 : index
    %34 = vector.load %arg8[%c6_26, %c0_27] : memref<64x1024xf32, #tpu.memory_space<vmem>>, vector<1x1024xf32>
    tpu.vector_store %arg8[%c6_26, %c0_27], %33 {strides = array<i32>} : memref<64x1024xf32, #tpu.memory_space<vmem>>, vector<1x1024xf32>,
    %c7 = arith.constant 7 : index
    %35 = memref.load %arg0[%c7] : memref<64xi32, #tpu.memory_space<smem>>
    %36 = arith.index_cast %35 : i32 to index
    %c0_28 = arith.constant 0 : index
    %c0_29 = arith.constant 0 : index
    %37 = vector.load %arg1[%36, %c0_28, %c0_29] : memref<16x1x1024xf32, #tpu.memory_space<vmem>>, vector<1x1x1024xf32>
    %38 = vector.shape_cast %37 : vector<1x1x1024xf32> to vector<1x1024xf32>
    %c7_30 = arith.constant 7 : index
    %c0_31 = arith.constant 0 : index
    %39 = vector.load %arg8[%c7_30, %c0_31] : memref<64x1024xf32, #tpu.memory_space<vmem>>, vector<1x1024xf32>
    tpu.vector_store %arg8[%c7_30, %c0_31], %38 {strides = array<i32>} : memref<64x1024xf32, #tpu.memory_space<vmem>>, vector<1x1024xf32>,
    %c8 = arith.constant 8 : index
    %40 = memref.load %arg0[%c8] : memref<64xi32, #tpu.memory_space<smem>>
    %41 = arith.index_cast %40 : i32 to index
    %c0_32 = arith.constant 0 : index
    %c0_33 = arith.constant 0 : index
    %42 = vector.load %arg1[%41, %c0_32, %c0_33] : memref<16x1x1024xf32, #tpu.memory_space<vmem>>, vector<1x1x1024xf32>
    %43 = vector.shape_cast %42 : vector<1x1x1024xf32> to vector<1x1024xf32>
    %c8_34 = arith.constant 8 : index
    %c0_35 = arith.constant 0 : index
    %44 = vector.load %arg8[%c8_34, %c0_35] : memref<64x1024xf32, #tpu.memory_space<vmem>>, vector<1x1024xf32>
    tpu.vector_store %arg8[%c8_34, %c0_35], %43 {strides = array<i32>} : memref<64x1024xf32, #tpu.memory_space<vmem>>, vector<1x1024xf32>,
    %c9 = arith.constant 9 : index
    %45 = memref.load %arg0[%c9] : memref<64xi32, #tpu.memory_space<smem>>
    %46 = arith.index_cast %45 : i32 to index
    %c0_36 = arith.constant 0 : index
    %c0_37 = arith.constant 0 : index
    %47 = vector.load %arg1[%46, %c0_36, %c0_37] : memref<16x1x1024xf32, #tpu.memory_space<vmem>>, vector<1x1x1024xf32>
    %48 = vector.shape_cast %47 : vector<1x1x1024xf32> to vector<1x1024xf32>
    %c9_38 = arith.constant 9 : index
    %c0_39 = arith.constant 0 : index
    %49 = vector.load %arg8[%c9_38, %c0_39] : memref<64x1024xf32, #tpu.memory_space<vmem>>, vector<1x1024xf32>
    tpu.vector_store %arg8[%c9_38, %c0_39], %48 {strides = array<i32>} : memref<64x1024xf32, #tpu.memory_space<vmem>>, vector<1x1024xf32>,
    %c10 = arith.constant 10 : index
    %50 = memref.load %arg0[%c10] : memref<64xi32, #tpu.memory_space<smem>>
    %51 = arith.index_cast %50 : i32 to index
    %c0_40 = arith.constant 0 : index
    %c0_41 = arith.constant 0 : index
    %52 = vector.load %arg1[%51, %c0_40, %c0_41] : memref<16x1x1024xf32, #tpu.memory_space<vmem>>, vector<1x1x1024xf32>
    %53 = vector.shape_cast %52 : vector<1x1x1024xf32> to vector<1x1024xf32>
    %c10_42 = arith.constant 10 : index
    %c0_43 = arith.constant 0 : index
    %54 = vector.load %arg8[%c10_42, %c0_43] : memref<64x1024xf32, #tpu.memory_space<vmem>>, vector<1x1024xf32>
    tpu.vector_store %arg8[%c10_42, %c0_43], %53 {strides = array<i32>} : memref<64x1024xf32, #tpu.memory_space<vmem>>, vector<1x1024xf32>,
    %c11 = arith.constant 11 : index
    %55 = memref.load %arg0[%c11] : memref<64xi32, #tpu.memory_space<smem>>
    %56 = arith.index_cast %55 : i32 to index
    %c0_44 = arith.constant 0 : index
    %c0_45 = arith.constant 0 : index
    %57 = vector.load %arg1[%56, %c0_44, %c0_45] : memref<16x1x1024xf32, #tpu.memory_space<vmem>>, vector<1x1x1024xf32>
    %58 = vector.shape_cast %57 : vector<1x1x1024xf32> to vector<1x1024xf32>
    %c11_46 = arith.constant 11 : index
    %c0_47 = arith.constant 0 : index
    %59 = vector.load %arg8[%c11_46, %c0_47] : memref<64x1024xf32, #tpu.memory_space<vmem>>, vector<1x1024xf32>
    tpu.vector_store %arg8[%c11_46, %c0_47], %58 {strides = array<i32>} : memref<64x1024xf32, #tpu.memory_space<vmem>>, vector<1x1024xf32>,
    %c12 = arith.constant 12 : index
    %60 = memref.load %arg0[%c12] : memref<64xi32, #tpu.memory_space<smem>>
    %61 = arith.index_cast %60 : i32 to index
    %c0_48 = arith.constant 0 : index
    %c0_49 = arith.constant 0 : index
    %62 = vector.load %arg1[%61, %c0_48, %c0_49] : memref<16x1x1024xf32, #tpu.memory_space<vmem>>, vector<1x1x1024xf32>
    %63 = vector.shape_cast %62 : vector<1x1x1024xf32> to vector<1x1024xf32>
    %c12_50 = arith.constant 12 : index
    %c0_51 = arith.constant 0 : index
    %64 = vector.load %arg8[%c12_50, %c0_51] : memref<64x1024xf32, #tpu.memory_space<vmem>>, vector<1x1024xf32>
    tpu.vector_store %arg8[%c12_50, %c0_51], %63 {strides = array<i32>} : memref<64x1024xf32, #tpu.memory_space<vmem>>, vector<1x1024xf32>,
    %c13 = arith.constant 13 : index
    %65 = memref.load %arg0[%c13] : memref<64xi32, #tpu.memory_space<smem>>
    %66 = arith.index_cast %65 : i32 to index
    %c0_52 = arith.constant 0 : index
    %c0_53 = arith.constant 0 : index
    %67 = vector.load %arg1[%66, %c0_52, %c0_53] : memref<16x1x1024xf32, #tpu.memory_space<vmem>>, vector<1x1x1024xf32>
    %68 = vector.shape_cast %67 : vector<1x1x1024xf32> to vector<1x1024xf32>
    %c13_54 = arith.constant 13 : index
    %c0_55 = arith.constant 0 : index
    %69 = vector.load %arg8[%c13_54, %c0_55] : memref<64x1024xf32, #tpu.memory_space<vmem>>, vector<1x1024xf32>
    tpu.vector_store %arg8[%c13_54, %c0_55], %68 {strides = array<i32>} : memref<64x1024xf32, #tpu.memory_space<vmem>>, vector<1x1024xf32>,
    %c14 = arith.constant 14 : index
    %70 = memref.load %arg0[%c14] : memref<64xi32, #tpu.memory_space<smem>>
    %71 = arith.index_cast %70 : i32 to index
    %c0_56 = arith.constant 0 : index
    %c0_57 = arith.constant 0 : index
    %72 = vector.load %arg1[%71, %c0_56, %c0_57] : memref<16x1x1024xf32, #tpu.memory_space<vmem>>, vector<1x1x1024xf32>
    %73 = vector.shape_cast %72 : vector<1x1x1024xf32> to vector<1x1024xf32>
    %c14_58 = arith.constant 14 : index
    %c0_59 = arith.constant 0 : index
    %74 = vector.load %arg8[%c14_58, %c0_59] : memref<64x1024xf32, #tpu.memory_space<vmem>>, vector<1x1024xf32>
    tpu.vector_store %arg8[%c14_58, %c0_59], %73 {strides = array<i32>} : memref<64x1024xf32, #tpu.memory_space<vmem>>, vector<1x1024xf32>,
    %c15 = arith.constant 15 : index
    %75 = memref.load %arg0[%c15] : memref<64xi32, #tpu.memory_space<smem>>
    %76 = arith.index_cast %75 : i32 to index
    %c0_60 = arith.constant 0 : index
    %c0_61 = arith.constant 0 : index
    %77 = vector.load %arg1[%76, %c0_60, %c0_61] : memref<16x1x1024xf32, #tpu.memory_space<vmem>>, vector<1x1x1024xf32>
    %78 = vector.shape_cast %77 : vector<1x1x1024xf32> to vector<1x1024xf32>
    %c15_62 = arith.constant 15 : index
    %c0_63 = arith.constant 0 : index
    %79 = vector.load %arg8[%c15_62, %c0_63] : memref<64x1024xf32, #tpu.memory_space<vmem>>, vector<1x1024xf32>
    tpu.vector_store %arg8[%c15_62, %c0_63], %78 {strides = array<i32>} : memref<64x1024xf32, #tpu.memory_space<vmem>>, vector<1x1024xf32>,
    %c16 = arith.constant 16 : index
    %80 = memref.load %arg0[%c16] : memref<64xi32, #tpu.memory_space<smem>>
    %81 = arith.index_cast %80 : i32 to index
    %c0_64 = arith.constant 0 : index
    %c0_65 = arith.constant 0 : index
    %82 = vector.load %arg1[%81, %c0_64, %c0_65] : memref<16x1x1024xf32, #tpu.memory_space<vmem>>, vector<1x1x1024xf32>
    %83 = vector.shape_cast %82 : vector<1x1x1024xf32> to vector<1x1024xf32>
    %c16_66 = arith.constant 16 : index
    %c0_67 = arith.constant 0 : index
    %84 = vector.load %arg8[%c16_66, %c0_67] : memref<64x1024xf32, #tpu.memory_space<vmem>>, vector<1x1024xf32>
    tpu.vector_store %arg8[%c16_66, %c0_67], %83 {strides = array<i32>} : memref<64x1024xf32, #tpu.memory_space<vmem>>, vector<1x1024xf32>,
    %c17 = arith.constant 17 : index
    %85 = memref.load %arg0[%c17] : memref<64xi32, #tpu.memory_space<smem>>
    %86 = arith.index_cast %85 : i32 to index
    %c0_68 = arith.constant 0 : index
    %c0_69 = arith.constant 0 : index
    %87 = vector.load %arg1[%86, %c0_68, %c0_69] : memref<16x1x1024xf32, #tpu.memory_space<vmem>>, vector<1x1x1024xf32>
    %88 = vector.shape_cast %87 : vector<1x1x1024xf32> to vector<1x1024xf32>
    %c17_70 = arith.constant 17 : index
    %c0_71 = arith.constant 0 : index
    %89 = vector.load %arg8[%c17_70, %c0_71] : memref<64x1024xf32, #tpu.memory_space<vmem>>, vector<1x1024xf32>
    tpu.vector_store %arg8[%c17_70, %c0_71], %88 {strides = array<i32>} : memref<64x1024xf32, #tpu.memory_space<vmem>>, vector<1x1024xf32>,
    %c18 = arith.constant 18 : index
    %90 = memref.load %arg0[%c18] : memref<64xi32, #tpu.memory_space<smem>>
    %91 = arith.index_cast %90 : i32 to index
    %c0_72 = arith.constant 0 : index
    %c0_73 = arith.constant 0 : index
    %92 = vector.load %arg1[%91, %c0_72, %c0_73] : memref<16x1x1024xf32, #tpu.memory_space<vmem>>, vector<1x1x1024xf32>
    %93 = vector.shape_cast %92 : vector<1x1x1024xf32> to vector<1x1024xf32>
    %c18_74 = arith.constant 18 : index
    %c0_75 = arith.constant 0 : index
    %94 = vector.load %arg8[%c18_74, %c0_75] : memref<64x1024xf32, #tpu.memory_space<vmem>>, vector<1x1024xf32>
    tpu.vector_store %arg8[%c18_74, %c0_75], %93 {strides = array<i32>} : memref<64x1024xf32, #tpu.memory_space<vmem>>, vector<1x1024xf32>,
    %c19 = arith.constant 19 : index
    %95 = memref.load %arg0[%c19] : memref<64xi32, #tpu.memory_space<smem>>
    %96 = arith.index_cast %95 : i32 to index
    %c0_76 = arith.constant 0 : index
    %c0_77 = arith.constant 0 : index
    %97 = vector.load %arg1[%96, %c0_76, %c0_77] : memref<16x1x1024xf32, #tpu.memory_space<vmem>>, vector<1x1x1024xf32>
    %98 = vector.shape_cast %97 : vector<1x1x1024xf32> to vector<1x1024xf32>
    %c19_78 = arith.constant 19 : index
    %c0_79 = arith.constant 0 : index
    %99 = vector.load %arg8[%c19_78, %c0_79] : memref<64x1024xf32, #tpu.memory_space<vmem>>, vector<1x1024xf32>
    tpu.vector_store %arg8[%c19_78, %c0_79], %98 {strides = array<i32>} : memref<64x1024xf32, #tpu.memory_space<vmem>>, vector<1x1024xf32>,
    %c20 = arith.constant 20 : index
    %100 = memref.load %arg0[%c20] : memref<64xi32, #tpu.memory_space<smem>>
    %101 = arith.index_cast %100 : i32 to index
    %c0_80 = arith.constant 0 : index
    %c0_81 = arith.constant 0 : index
    %102 = vector.load %arg1[%101, %c0_80, %c0_81] : memref<16x1x1024xf32, #tpu.memory_space<vmem>>, vector<1x1x1024xf32>
    %103 = vector.shape_cast %102 : vector<1x1x1024xf32> to vector<1x1024xf32>
    %c20_82 = arith.constant 20 : index
    %c0_83 = arith.constant 0 : index
    %104 = vector.load %arg8[%c20_82, %c0_83] : memref<64x1024xf32, #tpu.memory_space<vmem>>, vector<1x1024xf32>
    tpu.vector_store %arg8[%c20_82, %c0_83], %103 {strides = array<i32>} : memref<64x1024xf32, #tpu.memory_space<vmem>>, vector<1x1024xf32>,
    %c21 = arith.constant 21 : index
    %105 = memref.load %arg0[%c21] : memref<64xi32, #tpu.memory_space<smem>>
    %106 = arith.index_cast %105 : i32 to index
    %c0_84 = arith.constant 0 : index
    %c0_85 = arith.constant 0 : index
    %107 = vector.load %arg1[%106, %c0_84, %c0_85] : memref<16x1x1024xf32, #tpu.memory_space<vmem>>, vector<1x1x1024xf32>
    %108 = vector.shape_cast %107 : vector<1x1x1024xf32> to vector<1x1024xf32>
    %c21_86 = arith.constant 21 : index
    %c0_87 = arith.constant 0 : index
    %109 = vector.load %arg8[%c21_86, %c0_87] : memref<64x1024xf32, #tpu.memory_space<vmem>>, vector<1x1024xf32>
    tpu.vector_store %arg8[%c21_86, %c0_87], %108 {strides = array<i32>} : memref<64x1024xf32, #tpu.memory_space<vmem>>, vector<1x1024xf32>,
    %c22 = arith.constant 22 : index
    %110 = memref.load %arg0[%c22] : memref<64xi32, #tpu.memory_space<smem>>
    %111 = arith.index_cast %110 : i32 to index
    %c0_88 = arith.constant 0 : index
    %c0_89 = arith.constant 0 : index
    %112 = vector.load %arg1[%111, %c0_88, %c0_89] : memref<16x1x1024xf32, #tpu.memory_space<vmem>>, vector<1x1x1024xf32>
    %113 = vector.shape_cast %112 : vector<1x1x1024xf32> to vector<1x1024xf32>
    %c22_90 = arith.constant 22 : index
    %c0_91 = arith.constant 0 : index
    %114 = vector.load %arg8[%c22_90, %c0_91] : memref<64x1024xf32, #tpu.memory_space<vmem>>, vector<1x1024xf32>
    tpu.vector_store %arg8[%c22_90, %c0_91], %113 {strides = array<i32>} : memref<64x1024xf32, #tpu.memory_space<vmem>>, vector<1x1024xf32>,
    %c23 = arith.constant 23 : index
    %115 = memref.load %arg0[%c23] : memref<64xi32, #tpu.memory_space<smem>>
    %116 = arith.index_cast %115 : i32 to index
    %c0_92 = arith.constant 0 : index
    %c0_93 = arith.constant 0 : index
    %117 = vector.load %arg1[%116, %c0_92, %c0_93] : memref<16x1x1024xf32, #tpu.memory_space<vmem>>, vector<1x1x1024xf32>
    %118 = vector.shape_cast %117 : vector<1x1x1024xf32> to vector<1x1024xf32>
    %c23_94 = arith.constant 23 : index
    %c0_95 = arith.constant 0 : index
    %119 = vector.load %arg8[%c23_94, %c0_95] : memref<64x1024xf32, #tpu.memory_space<vmem>>, vector<1x1024xf32>
    tpu.vector_store %arg8[%c23_94, %c0_95], %118 {strides = array<i32>} : memref<64x1024xf32, #tpu.memory_space<vmem>>, vector<1x1024xf32>,
    %c24 = arith.constant 24 : index
    %120 = memref.load %arg0[%c24] : memref<64xi32, #tpu.memory_space<smem>>
    %121 = arith.index_cast %120 : i32 to index
    %c0_96 = arith.constant 0 : index
    %c0_97 = arith.constant 0 : index
    %122 = vector.load %arg1[%121, %c0_96, %c0_97] : memref<16x1x1024xf32, #tpu.memory_space<vmem>>, vector<1x1x1024xf32>
    %123 = vector.shape_cast %122 : vector<1x1x1024xf32> to vector<1x1024xf32>
    %c24_98 = arith.constant 24 : index
    %c0_99 = arith.constant 0 : index
    %124 = vector.load %arg8[%c24_98, %c0_99] : memref<64x1024xf32, #tpu.memory_space<vmem>>, vector<1x1024xf32>
    tpu.vector_store %arg8[%c24_98, %c0_99], %123 {strides = array<i32>} : memref<64x1024xf32, #tpu.memory_space<vmem>>, vector<1x1024xf32>,
    %c25 = arith.constant 25 : index
    %125 = memref.load %arg0[%c25] : memref<64xi32, #tpu.memory_space<smem>>
    %126 = arith.index_cast %125 : i32 to index
    %c0_100 = arith.constant 0 : index
    %c0_101 = arith.constant 0 : index
    %127 = vector.load %arg1[%126, %c0_100, %c0_101] : memref<16x1x1024xf32, #tpu.memory_space<vmem>>, vector<1x1x1024xf32>
    %128 = vector.shape_cast %127 : vector<1x1x1024xf32> to vector<1x1024xf32>
    %c25_102 = arith.constant 25 : index
    %c0_103 = arith.constant 0 : index
    %129 = vector.load %arg8[%c25_102, %c0_103] : memref<64x1024xf32, #tpu.memory_space<vmem>>, vector<1x1024xf32>
    tpu.vector_store %arg8[%c25_102, %c0_103], %128 {strides = array<i32>} : memref<64x1024xf32, #tpu.memory_space<vmem>>, vector<1x1024xf32>,
    %c26 = arith.constant 26 : index
    %130 = memref.load %arg0[%c26] : memref<64xi32, #tpu.memory_space<smem>>
    %131 = arith.index_cast %130 : i32 to index
    %c0_104 = arith.constant 0 : index
    %c0_105 = arith.constant 0 : index
    %132 = vector.load %arg1[%131, %c0_104, %c0_105] : memref<16x1x1024xf32, #tpu.memory_space<vmem>>, vector<1x1x1024xf32>
    %133 = vector.shape_cast %132 : vector<1x1x1024xf32> to vector<1x1024xf32>
    %c26_106 = arith.constant 26 : index
    %c0_107 = arith.constant 0 : index
    %134 = vector.load %arg8[%c26_106, %c0_107] : memref<64x1024xf32, #tpu.memory_space<vmem>>, vector<1x1024xf32>
    tpu.vector_store %arg8[%c26_106, %c0_107], %133 {strides = array<i32>} : memref<64x1024xf32, #tpu.memory_space<vmem>>, vector<1x1024xf32>,
    %c27 = arith.constant 27 : index
    %135 = memref.load %arg0[%c27] : memref<64xi32, #tpu.memory_space<smem>>
    %136 = arith.index_cast %135 : i32 to index
    %c0_108 = arith.constant 0 : index
    %c0_109 = arith.constant 0 : index
    %137 = vector.load %arg1[%136, %c0_108, %c0_109] : memref<16x1x1024xf32, #tpu.memory_space<vmem>>, vector<1x1x1024xf32>
    %138 = vector.shape_cast %137 : vector<1x1x1024xf32> to vector<1x1024xf32>
    %c27_110 = arith.constant 27 : index
    %c0_111 = arith.constant 0 : index
    %139 = vector.load %arg8[%c27_110, %c0_111] : memref<64x1024xf32, #tpu.memory_space<vmem>>, vector<1x1024xf32>
    tpu.vector_store %arg8[%c27_110, %c0_111], %138 {strides = array<i32>} : memref<64x1024xf32, #tpu.memory_space<vmem>>, vector<1x1024xf32>,
    %c28 = arith.constant 28 : index
    %140 = memref.load %arg0[%c28] : memref<64xi32, #tpu.memory_space<smem>>
    %141 = arith.index_cast %140 : i32 to index
    %c0_112 = arith.constant 0 : index
    %c0_113 = arith.constant 0 : index
    %142 = vector.load %arg1[%141, %c0_112, %c0_113] : memref<16x1x1024xf32, #tpu.memory_space<vmem>>, vector<1x1x1024xf32>
    %143 = vector.shape_cast %142 : vector<1x1x1024xf32> to vector<1x1024xf32>
    %c28_114 = arith.constant 28 : index
    %c0_115 = arith.constant 0 : index
    %144 = vector.load %arg8[%c28_114, %c0_115] : memref<64x1024xf32, #tpu.memory_space<vmem>>, vector<1x1024xf32>
    tpu.vector_store %arg8[%c28_114, %c0_115], %143 {strides = array<i32>} : memref<64x1024xf32, #tpu.memory_space<vmem>>, vector<1x1024xf32>,
    %c29 = arith.constant 29 : index
    %145 = memref.load %arg0[%c29] : memref<64xi32, #tpu.memory_space<smem>>
    %146 = arith.index_cast %145 : i32 to index
    %c0_116 = arith.constant 0 : index
    %c0_117 = arith.constant 0 : index
    %147 = vector.load %arg1[%146, %c0_116, %c0_117] : memref<16x1x1024xf32, #tpu.memory_space<vmem>>, vector<1x1x1024xf32>
    %148 = vector.shape_cast %147 : vector<1x1x1024xf32> to vector<1x1024xf32>
    %c29_118 = arith.constant 29 : index
    %c0_119 = arith.constant 0 : index
    %149 = vector.load %arg8[%c29_118, %c0_119] : memref<64x1024xf32, #tpu.memory_space<vmem>>, vector<1x1024xf32>
    tpu.vector_store %arg8[%c29_118, %c0_119], %148 {strides = array<i32>} : memref<64x1024xf32, #tpu.memory_space<vmem>>, vector<1x1024xf32>,
    %c30 = arith.constant 30 : index
    %150 = memref.load %arg0[%c30] : memref<64xi32, #tpu.memory_space<smem>>
    %151 = arith.index_cast %150 : i32 to index
    %c0_120 = arith.constant 0 : index
    %c0_121 = arith.constant 0 : index
    %152 = vector.load %arg1[%151, %c0_120, %c0_121] : memref<16x1x1024xf32, #tpu.memory_space<vmem>>, vector<1x1x1024xf32>
    %153 = vector.shape_cast %152 : vector<1x1x1024xf32> to vector<1x1024xf32>
    %c30_122 = arith.constant 30 : index
    %c0_123 = arith.constant 0 : index
    %154 = vector.load %arg8[%c30_122, %c0_123] : memref<64x1024xf32, #tpu.memory_space<vmem>>, vector<1x1024xf32>
    tpu.vector_store %arg8[%c30_122, %c0_123], %153 {strides = array<i32>} : memref<64x1024xf32, #tpu.memory_space<vmem>>, vector<1x1024xf32>,
    %c31 = arith.constant 31 : index
    %155 = memref.load %arg0[%c31] : memref<64xi32, #tpu.memory_space<smem>>
    %156 = arith.index_cast %155 : i32 to index
    %c0_124 = arith.constant 0 : index
    %c0_125 = arith.constant 0 : index
    %157 = vector.load %arg1[%156, %c0_124, %c0_125] : memref<16x1x1024xf32, #tpu.memory_space<vmem>>, vector<1x1x1024xf32>
    %158 = vector.shape_cast %157 : vector<1x1x1024xf32> to vector<1x1024xf32>
    %c31_126 = arith.constant 31 : index
    %c0_127 = arith.constant 0 : index
    %159 = vector.load %arg8[%c31_126, %c0_127] : memref<64x1024xf32, #tpu.memory_space<vmem>>, vector<1x1024xf32>
    tpu.vector_store %arg8[%c31_126, %c0_127], %158 {strides = array<i32>} : memref<64x1024xf32, #tpu.memory_space<vmem>>, vector<1x1024xf32>,
    %c32 = arith.constant 32 : index
    %160 = memref.load %arg0[%c32] : memref<64xi32, #tpu.memory_space<smem>>
    %161 = arith.index_cast %160 : i32 to index
    %c0_128 = arith.constant 0 : index
    %c0_129 = arith.constant 0 : index
    %162 = vector.load %arg1[%161, %c0_128, %c0_129] : memref<16x1x1024xf32, #tpu.memory_space<vmem>>, vector<1x1x1024xf32>
    %163 = vector.shape_cast %162 : vector<1x1x1024xf32> to vector<1x1024xf32>
    %c32_130 = arith.constant 32 : index
    %c0_131 = arith.constant 0 : index
    %164 = vector.load %arg8[%c32_130, %c0_131] : memref<64x1024xf32, #tpu.memory_space<vmem>>, vector<1x1024xf32>
    tpu.vector_store %arg8[%c32_130, %c0_131], %163 {strides = array<i32>} : memref<64x1024xf32, #tpu.memory_space<vmem>>, vector<1x1024xf32>,
    %c33 = arith.constant 33 : index
    %165 = memref.load %arg0[%c33] : memref<64xi32, #tpu.memory_space<smem>>
    %166 = arith.index_cast %165 : i32 to index
    %c0_132 = arith.constant 0 : index
    %c0_133 = arith.constant 0 : index
    %167 = vector.load %arg1[%166, %c0_132, %c0_133] : memref<16x1x1024xf32, #tpu.memory_space<vmem>>, vector<1x1x1024xf32>
    %168 = vector.shape_cast %167 : vector<1x1x1024xf32> to vector<1x1024xf32>
    %c33_134 = arith.constant 33 : index
    %c0_135 = arith.constant 0 : index
    %169 = vector.load %arg8[%c33_134, %c0_135] : memref<64x1024xf32, #tpu.memory_space<vmem>>, vector<1x1024xf32>
    tpu.vector_store %arg8[%c33_134, %c0_135], %168 {strides = array<i32>} : memref<64x1024xf32, #tpu.memory_space<vmem>>, vector<1x1024xf32>,
    %c34 = arith.constant 34 : index
    %170 = memref.load %arg0[%c34] : memref<64xi32, #tpu.memory_space<smem>>
    %171 = arith.index_cast %170 : i32 to index
    %c0_136 = arith.constant 0 : index
    %c0_137 = arith.constant 0 : index
    %172 = vector.load %arg1[%171, %c0_136, %c0_137] : memref<16x1x1024xf32, #tpu.memory_space<vmem>>, vector<1x1x1024xf32>
    %173 = vector.shape_cast %172 : vector<1x1x1024xf32> to vector<1x1024xf32>
    %c34_138 = arith.constant 34 : index
    %c0_139 = arith.constant 0 : index
    %174 = vector.load %arg8[%c34_138, %c0_139] : memref<64x1024xf32, #tpu.memory_space<vmem>>, vector<1x1024xf32>
    tpu.vector_store %arg8[%c34_138, %c0_139], %173 {strides = array<i32>} : memref<64x1024xf32, #tpu.memory_space<vmem>>, vector<1x1024xf32>,
    %c35 = arith.constant 35 : index
    %175 = memref.load %arg0[%c35] : memref<64xi32, #tpu.memory_space<smem>>
    %176 = arith.index_cast %175 : i32 to index
    %c0_140 = arith.constant 0 : index
    %c0_141 = arith.constant 0 : index
    %177 = vector.load %arg1[%176, %c0_140, %c0_141] : memref<16x1x1024xf32, #tpu.memory_space<vmem>>, vector<1x1x1024xf32>
    %178 = vector.shape_cast %177 : vector<1x1x1024xf32> to vector<1x1024xf32>
    %c35_142 = arith.constant 35 : index
    %c0_143 = arith.constant 0 : index
    %179 = vector.load %arg8[%c35_142, %c0_143] : memref<64x1024xf32, #tpu.memory_space<vmem>>, vector<1x1024xf32>
    tpu.vector_store %arg8[%c35_142, %c0_143], %178 {strides = array<i32>} : memref<64x1024xf32, #tpu.memory_space<vmem>>, vector<1x1024xf32>,
    %c36 = arith.constant 36 : index
    %180 = memref.load %arg0[%c36] : memref<64xi32, #tpu.memory_space<smem>>
    %181 = arith.index_cast %180 : i32 to index
    %c0_144 = arith.constant 0 : index
    %c0_145 = arith.constant 0 : index
    %182 = vector.load %arg1[%181, %c0_144, %c0_145] : memref<16x1x1024xf32, #tpu.memory_space<vmem>>, vector<1x1x1024xf32>
    %183 = vector.shape_cast %182 : vector<1x1x1024xf32> to vector<1x1024xf32>
    %c36_146 = arith.constant 36 : index
    %c0_147 = arith.constant 0 : index
    %184 = vector.load %arg8[%c36_146, %c0_147] : memref<64x1024xf32, #tpu.memory_space<vmem>>, vector<1x1024xf32>
    tpu.vector_store %arg8[%c36_146, %c0_147], %183 {strides = array<i32>} : memref<64x1024xf32, #tpu.memory_space<vmem>>, vector<1x1024xf32>,
    %c37 = arith.constant 37 : index
    %185 = memref.load %arg0[%c37] : memref<64xi32, #tpu.memory_space<smem>>
    %186 = arith.index_cast %185 : i32 to index
    %c0_148 = arith.constant 0 : index
    %c0_149 = arith.constant 0 : index
    %187 = vector.load %arg1[%186, %c0_148, %c0_149] : memref<16x1x1024xf32, #tpu.memory_space<vmem>>, vector<1x1x1024xf32>
    %188 = vector.shape_cast %187 : vector<1x1x1024xf32> to vector<1x1024xf32>
    %c37_150 = arith.constant 37 : index
    %c0_151 = arith.constant 0 : index
    %189 = vector.load %arg8[%c37_150, %c0_151] : memref<64x1024xf32, #tpu.memory_space<vmem>>, vector<1x1024xf32>
    tpu.vector_store %arg8[%c37_150, %c0_151], %188 {strides = array<i32>} : memref<64x1024xf32, #tpu.memory_space<vmem>>, vector<1x1024xf32>,
    %c38 = arith.constant 38 : index
    %190 = memref.load %arg0[%c38] : memref<64xi32, #tpu.memory_space<smem>>
    %191 = arith.index_cast %190 : i32 to index
    %c0_152 = arith.constant 0 : index
    %c0_153 = arith.constant 0 : index
    %192 = vector.load %arg1[%191, %c0_152, %c0_153] : memref<16x1x1024xf32, #tpu.memory_space<vmem>>, vector<1x1x1024xf32>
    %193 = vector.shape_cast %192 : vector<1x1x1024xf32> to vector<1x1024xf32>
    %c38_154 = arith.constant 38 : index
    %c0_155 = arith.constant 0 : index
    %194 = vector.load %arg8[%c38_154, %c0_155] : memref<64x1024xf32, #tpu.memory_space<vmem>>, vector<1x1024xf32>
    tpu.vector_store %arg8[%c38_154, %c0_155], %193 {strides = array<i32>} : memref<64x1024xf32, #tpu.memory_space<vmem>>, vector<1x1024xf32>,
    %c39 = arith.constant 39 : index
    %195 = memref.load %arg0[%c39] : memref<64xi32, #tpu.memory_space<smem>>
    %196 = arith.index_cast %195 : i32 to index
    %c0_156 = arith.constant 0 : index
    %c0_157 = arith.constant 0 : index
    %197 = vector.load %arg1[%196, %c0_156, %c0_157] : memref<16x1x1024xf32, #tpu.memory_space<vmem>>, vector<1x1x1024xf32>
    %198 = vector.shape_cast %197 : vector<1x1x1024xf32> to vector<1x1024xf32>
    %c39_158 = arith.constant 39 : index
    %c0_159 = arith.constant 0 : index
    %199 = vector.load %arg8[%c39_158, %c0_159] : memref<64x1024xf32, #tpu.memory_space<vmem>>, vector<1x1024xf32>
    tpu.vector_store %arg8[%c39_158, %c0_159], %198 {strides = array<i32>} : memref<64x1024xf32, #tpu.memory_space<vmem>>, vector<1x1024xf32>,
    %c40 = arith.constant 40 : index
    %200 = memref.load %arg0[%c40] : memref<64xi32, #tpu.memory_space<smem>>
    %201 = arith.index_cast %200 : i32 to index
    %c0_160 = arith.constant 0 : index
    %c0_161 = arith.constant 0 : index
    %202 = vector.load %arg1[%201, %c0_160, %c0_161] : memref<16x1x1024xf32, #tpu.memory_space<vmem>>, vector<1x1x1024xf32>
    %203 = vector.shape_cast %202 : vector<1x1x1024xf32> to vector<1x1024xf32>
    %c40_162 = arith.constant 40 : index
    %c0_163 = arith.constant 0 : index
    %204 = vector.load %arg8[%c40_162, %c0_163] : memref<64x1024xf32, #tpu.memory_space<vmem>>, vector<1x1024xf32>
    tpu.vector_store %arg8[%c40_162, %c0_163], %203 {strides = array<i32>} : memref<64x1024xf32, #tpu.memory_space<vmem>>, vector<1x1024xf32>,
    %c41 = arith.constant 41 : index
    %205 = memref.load %arg0[%c41] : memref<64xi32, #tpu.memory_space<smem>>
    %206 = arith.index_cast %205 : i32 to index
    %c0_164 = arith.constant 0 : index
    %c0_165 = arith.constant 0 : index
    %207 = vector.load %arg1[%206, %c0_164, %c0_165] : memref<16x1x1024xf32, #tpu.memory_space<vmem>>, vector<1x1x1024xf32>
    %208 = vector.shape_cast %207 : vector<1x1x1024xf32> to vector<1x1024xf32>
    %c41_166 = arith.constant 41 : index
    %c0_167 = arith.constant 0 : index
    %209 = vector.load %arg8[%c41_166, %c0_167] : memref<64x1024xf32, #tpu.memory_space<vmem>>, vector<1x1024xf32>
    tpu.vector_store %arg8[%c41_166, %c0_167], %208 {strides = array<i32>} : memref<64x1024xf32, #tpu.memory_space<vmem>>, vector<1x1024xf32>,
    %c42 = arith.constant 42 : index
    %210 = memref.load %arg0[%c42] : memref<64xi32, #tpu.memory_space<smem>>
    %211 = arith.index_cast %210 : i32 to index
    %c0_168 = arith.constant 0 : index
    %c0_169 = arith.constant 0 : index
    %212 = vector.load %arg1[%211, %c0_168, %c0_169] : memref<16x1x1024xf32, #tpu.memory_space<vmem>>, vector<1x1x1024xf32>
    %213 = vector.shape_cast %212 : vector<1x1x1024xf32> to vector<1x1024xf32>
    %c42_170 = arith.constant 42 : index
    %c0_171 = arith.constant 0 : index
    %214 = vector.load %arg8[%c42_170, %c0_171] : memref<64x1024xf32, #tpu.memory_space<vmem>>, vector<1x1024xf32>
    tpu.vector_store %arg8[%c42_170, %c0_171], %213 {strides = array<i32>} : memref<64x1024xf32, #tpu.memory_space<vmem>>, vector<1x1024xf32>,
    %c43 = arith.constant 43 : index
    %215 = memref.load %arg0[%c43] : memref<64xi32, #tpu.memory_space<smem>>
    %216 = arith.index_cast %215 : i32 to index
    %c0_172 = arith.constant 0 : index
    %c0_173 = arith.constant 0 : index
    %217 = vector.load %arg1[%216, %c0_172, %c0_173] : memref<16x1x1024xf32, #tpu.memory_space<vmem>>, vector<1x1x1024xf32>
    %218 = vector.shape_cast %217 : vector<1x1x1024xf32> to vector<1x1024xf32>
    %c43_174 = arith.constant 43 : index
    %c0_175 = arith.constant 0 : index
    %219 = vector.load %arg8[%c43_174, %c0_175] : memref<64x1024xf32, #tpu.memory_space<vmem>>, vector<1x1024xf32>
    tpu.vector_store %arg8[%c43_174, %c0_175], %218 {strides = array<i32>} : memref<64x1024xf32, #tpu.memory_space<vmem>>, vector<1x1024xf32>,
    %c44 = arith.constant 44 : index
    %220 = memref.load %arg0[%c44] : memref<64xi32, #tpu.memory_space<smem>>
    %221 = arith.index_cast %220 : i32 to index
    %c0_176 = arith.constant 0 : index
    %c0_177 = arith.constant 0 : index
    %222 = vector.load %arg1[%221, %c0_176, %c0_177] : memref<16x1x1024xf32, #tpu.memory_space<vmem>>, vector<1x1x1024xf32>
    %223 = vector.shape_cast %222 : vector<1x1x1024xf32> to vector<1x1024xf32>
    %c44_178 = arith.constant 44 : index
    %c0_179 = arith.constant 0 : index
    %224 = vector.load %arg8[%c44_178, %c0_179] : memref<64x1024xf32, #tpu.memory_space<vmem>>, vector<1x1024xf32>
    tpu.vector_store %arg8[%c44_178, %c0_179], %223 {strides = array<i32>} : memref<64x1024xf32, #tpu.memory_space<vmem>>, vector<1x1024xf32>,
    %c45 = arith.constant 45 : index
    %225 = memref.load %arg0[%c45] : memref<64xi32, #tpu.memory_space<smem>>
    %226 = arith.index_cast %225 : i32 to index
    %c0_180 = arith.constant 0 : index
    %c0_181 = arith.constant 0 : index
    %227 = vector.load %arg1[%226, %c0_180, %c0_181] : memref<16x1x1024xf32, #tpu.memory_space<vmem>>, vector<1x1x1024xf32>
    %228 = vector.shape_cast %227 : vector<1x1x1024xf32> to vector<1x1024xf32>
    %c45_182 = arith.constant 45 : index
    %c0_183 = arith.constant 0 : index
    %229 = vector.load %arg8[%c45_182, %c0_183] : memref<64x1024xf32, #tpu.memory_space<vmem>>, vector<1x1024xf32>
    tpu.vector_store %arg8[%c45_182, %c0_183], %228 {strides = array<i32>} : memref<64x1024xf32, #tpu.memory_space<vmem>>, vector<1x1024xf32>,
    %c46 = arith.constant 46 : index
    %230 = memref.load %arg0[%c46] : memref<64xi32, #tpu.memory_space<smem>>
    %231 = arith.index_cast %230 : i32 to index
    %c0_184 = arith.constant 0 : index
    %c0_185 = arith.constant 0 : index
    %232 = vector.load %arg1[%231, %c0_184, %c0_185] : memref<16x1x1024xf32, #tpu.memory_space<vmem>>, vector<1x1x1024xf32>
    %233 = vector.shape_cast %232 : vector<1x1x1024xf32> to vector<1x1024xf32>
    %c46_186 = arith.constant 46 : index
    %c0_187 = arith.constant 0 : index
    %234 = vector.load %arg8[%c46_186, %c0_187] : memref<64x1024xf32, #tpu.memory_space<vmem>>, vector<1x1024xf32>
    tpu.vector_store %arg8[%c46_186, %c0_187], %233 {strides = array<i32>} : memref<64x1024xf32, #tpu.memory_space<vmem>>, vector<1x1024xf32>,
    %c47 = arith.constant 47 : index
    %235 = memref.load %arg0[%c47] : memref<64xi32, #tpu.memory_space<smem>>
    %236 = arith.index_cast %235 : i32 to index
    %c0_188 = arith.constant 0 : index
    %c0_189 = arith.constant 0 : index
    %237 = vector.load %arg1[%236, %c0_188, %c0_189] : memref<16x1x1024xf32, #tpu.memory_space<vmem>>, vector<1x1x1024xf32>
    %238 = vector.shape_cast %237 : vector<1x1x1024xf32> to vector<1x1024xf32>
    %c47_190 = arith.constant 47 : index
    %c0_191 = arith.constant 0 : index
    %239 = vector.load %arg8[%c47_190, %c0_191] : memref<64x1024xf32, #tpu.memory_space<vmem>>, vector<1x1024xf32>
    tpu.vector_store %arg8[%c47_190, %c0_191], %238 {strides = array<i32>} : memref<64x1024xf32, #tpu.memory_space<vmem>>, vector<1x1024xf32>,
    %c48 = arith.constant 48 : index
    %240 = memref.load %arg0[%c48] : memref<64xi32, #tpu.memory_space<smem>>
    %241 = arith.index_cast %240 : i32 to index
    %c0_192 = arith.constant 0 : index
    %c0_193 = arith.constant 0 : index
    %242 = vector.load %arg1[%241, %c0_192, %c0_193] : memref<16x1x1024xf32, #tpu.memory_space<vmem>>, vector<1x1x1024xf32>
    %243 = vector.shape_cast %242 : vector<1x1x1024xf32> to vector<1x1024xf32>
    %c48_194 = arith.constant 48 : index
    %c0_195 = arith.constant 0 : index
    %244 = vector.load %arg8[%c48_194, %c0_195] : memref<64x1024xf32, #tpu.memory_space<vmem>>, vector<1x1024xf32>
    tpu.vector_store %arg8[%c48_194, %c0_195], %243 {strides = array<i32>} : memref<64x1024xf32, #tpu.memory_space<vmem>>, vector<1x1024xf32>,
    %c49 = arith.constant 49 : index
    %245 = memref.load %arg0[%c49] : memref<64xi32, #tpu.memory_space<smem>>
    %246 = arith.index_cast %245 : i32 to index
    %c0_196 = arith.constant 0 : index
    %c0_197 = arith.constant 0 : index
    %247 = vector.load %arg1[%246, %c0_196, %c0_197] : memref<16x1x1024xf32, #tpu.memory_space<vmem>>, vector<1x1x1024xf32>
    %248 = vector.shape_cast %247 : vector<1x1x1024xf32> to vector<1x1024xf32>
    %c49_198 = arith.constant 49 : index
    %c0_199 = arith.constant 0 : index
    %249 = vector.load %arg8[%c49_198, %c0_199] : memref<64x1024xf32, #tpu.memory_space<vmem>>, vector<1x1024xf32>
    tpu.vector_store %arg8[%c49_198, %c0_199], %248 {strides = array<i32>} : memref<64x1024xf32, #tpu.memory_space<vmem>>, vector<1x1024xf32>,
    %c50 = arith.constant 50 : index
    %250 = memref.load %arg0[%c50] : memref<64xi32, #tpu.memory_space<smem>>
    %251 = arith.index_cast %250 : i32 to index
    %c0_200 = arith.constant 0 : index
    %c0_201 = arith.constant 0 : index
    %252 = vector.load %arg1[%251, %c0_200, %c0_201] : memref<16x1x1024xf32, #tpu.memory_space<vmem>>, vector<1x1x1024xf32>
    %253 = vector.shape_cast %252 : vector<1x1x1024xf32> to vector<1x1024xf32>
    %c50_202 = arith.constant 50 : index
    %c0_203 = arith.constant 0 : index
    %254 = vector.load %arg8[%c50_202, %c0_203] : memref<64x1024xf32, #tpu.memory_space<vmem>>, vector<1x1024xf32>
    tpu.vector_store %arg8[%c50_202, %c0_203], %253 {strides = array<i32>} : memref<64x1024xf32, #tpu.memory_space<vmem>>, vector<1x1024xf32>,
    %c51 = arith.constant 51 : index
    %255 = memref.load %arg0[%c51] : memref<64xi32, #tpu.memory_space<smem>>
    %256 = arith.index_cast %255 : i32 to index
    %c0_204 = arith.constant 0 : index
    %c0_205 = arith.constant 0 : index
    %257 = vector.load %arg1[%256, %c0_204, %c0_205] : memref<16x1x1024xf32, #tpu.memory_space<vmem>>, vector<1x1x1024xf32>
    %258 = vector.shape_cast %257 : vector<1x1x1024xf32> to vector<1x1024xf32>
    %c51_206 = arith.constant 51 : index
    %c0_207 = arith.constant 0 : index
    %259 = vector.load %arg8[%c51_206, %c0_207] : memref<64x1024xf32, #tpu.memory_space<vmem>>, vector<1x1024xf32>
    tpu.vector_store %arg8[%c51_206, %c0_207], %258 {strides = array<i32>} : memref<64x1024xf32, #tpu.memory_space<vmem>>, vector<1x1024xf32>,
    %c52 = arith.constant 52 : index
    %260 = memref.load %arg0[%c52] : memref<64xi32, #tpu.memory_space<smem>>
    %261 = arith.index_cast %260 : i32 to index
    %c0_208 = arith.constant 0 : index
    %c0_209 = arith.constant 0 : index
    %262 = vector.load %arg1[%261, %c0_208, %c0_209] : memref<16x1x1024xf32, #tpu.memory_space<vmem>>, vector<1x1x1024xf32>
    %263 = vector.shape_cast %262 : vector<1x1x1024xf32> to vector<1x1024xf32>
    %c52_210 = arith.constant 52 : index
    %c0_211 = arith.constant 0 : index
    %264 = vector.load %arg8[%c52_210, %c0_211] : memref<64x1024xf32, #tpu.memory_space<vmem>>, vector<1x1024xf32>
    tpu.vector_store %arg8[%c52_210, %c0_211], %263 {strides = array<i32>} : memref<64x1024xf32, #tpu.memory_space<vmem>>, vector<1x1024xf32>,
    %c53 = arith.constant 53 : index
    %265 = memref.load %arg0[%c53] : memref<64xi32, #tpu.memory_space<smem>>
    %266 = arith.index_cast %265 : i32 to index
    %c0_212 = arith.constant 0 : index
    %c0_213 = arith.constant 0 : index
    %267 = vector.load %arg1[%266, %c0_212, %c0_213] : memref<16x1x1024xf32, #tpu.memory_space<vmem>>, vector<1x1x1024xf32>
    %268 = vector.shape_cast %267 : vector<1x1x1024xf32> to vector<1x1024xf32>
    %c53_214 = arith.constant 53 : index
    %c0_215 = arith.constant 0 : index
    %269 = vector.load %arg8[%c53_214, %c0_215] : memref<64x1024xf32, #tpu.memory_space<vmem>>, vector<1x1024xf32>
    tpu.vector_store %arg8[%c53_214, %c0_215], %268 {strides = array<i32>} : memref<64x1024xf32, #tpu.memory_space<vmem>>, vector<1x1024xf32>,
    %c54 = arith.constant 54 : index
    %270 = memref.load %arg0[%c54] : memref<64xi32, #tpu.memory_space<smem>>
    %271 = arith.index_cast %270 : i32 to index
    %c0_216 = arith.constant 0 : index
    %c0_217 = arith.constant 0 : index
    %272 = vector.load %arg1[%271, %c0_216, %c0_217] : memref<16x1x1024xf32, #tpu.memory_space<vmem>>, vector<1x1x1024xf32>
    %273 = vector.shape_cast %272 : vector<1x1x1024xf32> to vector<1x1024xf32>
    %c54_218 = arith.constant 54 : index
    %c0_219 = arith.constant 0 : index
    %274 = vector.load %arg8[%c54_218, %c0_219] : memref<64x1024xf32, #tpu.memory_space<vmem>>, vector<1x1024xf32>
    tpu.vector_store %arg8[%c54_218, %c0_219], %273 {strides = array<i32>} : memref<64x1024xf32, #tpu.memory_space<vmem>>, vector<1x1024xf32>,
    %c55 = arith.constant 55 : index
    %275 = memref.load %arg0[%c55] : memref<64xi32, #tpu.memory_space<smem>>
    %276 = arith.index_cast %275 : i32 to index
    %c0_220 = arith.constant 0 : index
    %c0_221 = arith.constant 0 : index
    %277 = vector.load %arg1[%276, %c0_220, %c0_221] : memref<16x1x1024xf32, #tpu.memory_space<vmem>>, vector<1x1x1024xf32>
    %278 = vector.shape_cast %277 : vector<1x1x1024xf32> to vector<1x1024xf32>
    %c55_222 = arith.constant 55 : index
    %c0_223 = arith.constant 0 : index
    %279 = vector.load %arg8[%c55_222, %c0_223] : memref<64x1024xf32, #tpu.memory_space<vmem>>, vector<1x1024xf32>
    tpu.vector_store %arg8[%c55_222, %c0_223], %278 {strides = array<i32>} : memref<64x1024xf32, #tpu.memory_space<vmem>>, vector<1x1024xf32>,
    %c56 = arith.constant 56 : index
    %280 = memref.load %arg0[%c56] : memref<64xi32, #tpu.memory_space<smem>>
    %281 = arith.index_cast %280 : i32 to index
    %c0_224 = arith.constant 0 : index
    %c0_225 = arith.constant 0 : index
    %282 = vector.load %arg1[%281, %c0_224, %c0_225] : memref<16x1x1024xf32, #tpu.memory_space<vmem>>, vector<1x1x1024xf32>
    %283 = vector.shape_cast %282 : vector<1x1x1024xf32> to vector<1x1024xf32>
    %c56_226 = arith.constant 56 : index
    %c0_227 = arith.constant 0 : index
    %284 = vector.load %arg8[%c56_226, %c0_227] : memref<64x1024xf32, #tpu.memory_space<vmem>>, vector<1x1024xf32>
    tpu.vector_store %arg8[%c56_226, %c0_227], %283 {strides = array<i32>} : memref<64x1024xf32, #tpu.memory_space<vmem>>, vector<1x1024xf32>,
    %c57 = arith.constant 57 : index
    %285 = memref.load %arg0[%c57] : memref<64xi32, #tpu.memory_space<smem>>
    %286 = arith.index_cast %285 : i32 to index
    %c0_228 = arith.constant 0 : index
    %c0_229 = arith.constant 0 : index
    %287 = vector.load %arg1[%286, %c0_228, %c0_229] : memref<16x1x1024xf32, #tpu.memory_space<vmem>>, vector<1x1x1024xf32>
    %288 = vector.shape_cast %287 : vector<1x1x1024xf32> to vector<1x1024xf32>
    %c57_230 = arith.constant 57 : index
    %c0_231 = arith.constant 0 : index
    %289 = vector.load %arg8[%c57_230, %c0_231] : memref<64x1024xf32, #tpu.memory_space<vmem>>, vector<1x1024xf32>
    tpu.vector_store %arg8[%c57_230, %c0_231], %288 {strides = array<i32>} : memref<64x1024xf32, #tpu.memory_space<vmem>>, vector<1x1024xf32>,
    %c58 = arith.constant 58 : index
    %290 = memref.load %arg0[%c58] : memref<64xi32, #tpu.memory_space<smem>>
    %291 = arith.index_cast %290 : i32 to index
    %c0_232 = arith.constant 0 : index
    %c0_233 = arith.constant 0 : index
    %292 = vector.load %arg1[%291, %c0_232, %c0_233] : memref<16x1x1024xf32, #tpu.memory_space<vmem>>, vector<1x1x1024xf32>
    %293 = vector.shape_cast %292 : vector<1x1x1024xf32> to vector<1x1024xf32>
    %c58_234 = arith.constant 58 : index
    %c0_235 = arith.constant 0 : index
    %294 = vector.load %arg8[%c58_234, %c0_235] : memref<64x1024xf32, #tpu.memory_space<vmem>>, vector<1x1024xf32>
    tpu.vector_store %arg8[%c58_234, %c0_235], %293 {strides = array<i32>} : memref<64x1024xf32, #tpu.memory_space<vmem>>, vector<1x1024xf32>,
    %c59 = arith.constant 59 : index
    %295 = memref.load %arg0[%c59] : memref<64xi32, #tpu.memory_space<smem>>
    %296 = arith.index_cast %295 : i32 to index
    %c0_236 = arith.constant 0 : index
    %c0_237 = arith.constant 0 : index
    %297 = vector.load %arg1[%296, %c0_236, %c0_237] : memref<16x1x1024xf32, #tpu.memory_space<vmem>>, vector<1x1x1024xf32>
    %298 = vector.shape_cast %297 : vector<1x1x1024xf32> to vector<1x1024xf32>
    %c59_238 = arith.constant 59 : index
    %c0_239 = arith.constant 0 : index
    %299 = vector.load %arg8[%c59_238, %c0_239] : memref<64x1024xf32, #tpu.memory_space<vmem>>, vector<1x1024xf32>
    tpu.vector_store %arg8[%c59_238, %c0_239], %298 {strides = array<i32>} : memref<64x1024xf32, #tpu.memory_space<vmem>>, vector<1x1024xf32>,
    %c60 = arith.constant 60 : index
    %300 = memref.load %arg0[%c60] : memref<64xi32, #tpu.memory_space<smem>>
    %301 = arith.index_cast %300 : i32 to index
    %c0_240 = arith.constant 0 : index
    %c0_241 = arith.constant 0 : index
    %302 = vector.load %arg1[%301, %c0_240, %c0_241] : memref<16x1x1024xf32, #tpu.memory_space<vmem>>, vector<1x1x1024xf32>
    %303 = vector.shape_cast %302 : vector<1x1x1024xf32> to vector<1x1024xf32>
    %c60_242 = arith.constant 60 : index
    %c0_243 = arith.constant 0 : index
    %304 = vector.load %arg8[%c60_242, %c0_243] : memref<64x1024xf32, #tpu.memory_space<vmem>>, vector<1x1024xf32>
    tpu.vector_store %arg8[%c60_242, %c0_243], %303 {strides = array<i32>} : memref<64x1024xf32, #tpu.memory_space<vmem>>, vector<1x1024xf32>,
    %c61 = arith.constant 61 : index
    %305 = memref.load %arg0[%c61] : memref<64xi32, #tpu.memory_space<smem>>
    %306 = arith.index_cast %305 : i32 to index
    %c0_244 = arith.constant 0 : index
    %c0_245 = arith.constant 0 : index
    %307 = vector.load %arg1[%306, %c0_244, %c0_245] : memref<16x1x1024xf32, #tpu.memory_space<vmem>>, vector<1x1x1024xf32>
    %308 = vector.shape_cast %307 : vector<1x1x1024xf32> to vector<1x1024xf32>
    %c61_246 = arith.constant 61 : index
    %c0_247 = arith.constant 0 : index
    %309 = vector.load %arg8[%c61_246, %c0_247] : memref<64x1024xf32, #tpu.memory_space<vmem>>, vector<1x1024xf32>
    tpu.vector_store %arg8[%c61_246, %c0_247], %308 {strides = array<i32>} : memref<64x1024xf32, #tpu.memory_space<vmem>>, vector<1x1024xf32>,
    %c62 = arith.constant 62 : index
    %310 = memref.load %arg0[%c62] : memref<64xi32, #tpu.memory_space<smem>>
    %311 = arith.index_cast %310 : i32 to index
    %c0_248 = arith.constant 0 : index
    %c0_249 = arith.constant 0 : index
    %312 = vector.load %arg1[%311, %c0_248, %c0_249] : memref<16x1x1024xf32, #tpu.memory_space<vmem>>, vector<1x1x1024xf32>
    %313 = vector.shape_cast %312 : vector<1x1x1024xf32> to vector<1x1024xf32>
    %c62_250 = arith.constant 62 : index
    %c0_251 = arith.constant 0 : index
    %314 = vector.load %arg8[%c62_250, %c0_251] : memref<64x1024xf32, #tpu.memory_space<vmem>>, vector<1x1024xf32>
    tpu.vector_store %arg8[%c62_250, %c0_251], %313 {strides = array<i32>} : memref<64x1024xf32, #tpu.memory_space<vmem>>, vector<1x1024xf32>,
    %c63 = arith.constant 63 : index
    %315 = memref.load %arg0[%c63] : memref<64xi32, #tpu.memory_space<smem>>
    %316 = arith.index_cast %315 : i32 to index
    %c0_252 = arith.constant 0 : index
    %c0_253 = arith.constant 0 : index
    %317 = vector.load %arg1[%316, %c0_252, %c0_253] : memref<16x1x1024xf32, #tpu.memory_space<vmem>>, vector<1x1x1024xf32>
    %318 = vector.shape_cast %317 : vector<1x1x1024xf32> to vector<1x1024xf32>
    %c63_254 = arith.constant 63 : index
    %c0_255 = arith.constant 0 : index
    %319 = vector.load %arg8[%c63_254, %c0_255] : memref<64x1024xf32, #tpu.memory_space<vmem>>, vector<1x1024xf32>
    tpu.vector_store %arg8[%c63_254, %c0_255], %318 {strides = array<i32>} : memref<64x1024xf32, #tpu.memory_space<vmem>>, vector<1x1024xf32>,
    %cst = arith.constant 0.000000e+00 : f32
    %320 = vector.broadcast %cst : f32 to vector<8x256xf32>
    %c0_256 = arith.constant 0 : index
    %c0_257 = arith.constant 0 : index
    %321 = vector.load %arg8[%c0_256, %c0_257] : memref<64x1024xf32, #tpu.memory_space<vmem>>, vector<8x1024xf32>
    %322 = vector.extract_strided_slice %321 {offsets = [0, 0], sizes = [8, 256], strides = [1, 1]} : vector<8x1024xf32> to vector<8x256xf32>
    %323 = arith.negf %322 : vector<8x256xf32>
    %324 = math.exp %323 : vector<8x256xf32>
    %cst_258 = arith.constant 1.000000e+00 : f32
    %325 = vector.broadcast %cst_258 : f32 to vector<8x256xf32>
    %326 = arith.addf %325, %324 : vector<8x256xf32>
    %327 = arith.divf %325, %326 : vector<8x256xf32>
    %328 = vector.extract_strided_slice %321 {offsets = [0, 256], sizes = [8, 256], strides = [1, 1]} : vector<8x1024xf32> to vector<8x256xf32>
    %329 = arith.negf %328 : vector<8x256xf32>
    %330 = math.exp %329 : vector<8x256xf32>
    %cst_259 = arith.constant 1.000000e+00 : f32
    %331 = vector.broadcast %cst_259 : f32 to vector<8x256xf32>
    %332 = arith.addf %331, %330 : vector<8x256xf32>
    %333 = arith.divf %331, %332 : vector<8x256xf32>
    %334 = vector.extract_strided_slice %321 {offsets = [0, 512], sizes = [8, 256], strides = [1, 1]} : vector<8x1024xf32> to vector<8x256xf32>
    %335 = math.tanh %334 : vector<8x256xf32>
    %336 = vector.extract_strided_slice %321 {offsets = [0, 768], sizes = [8, 256], strides = [1, 1]} : vector<8x1024xf32> to vector<8x256xf32>
    %337 = arith.negf %336 : vector<8x256xf32>
    %338 = math.exp %337 : vector<8x256xf32>
    %cst_260 = arith.constant 1.000000e+00 : f32
    %339 = vector.broadcast %cst_260 : f32 to vector<8x256xf32>
    %340 = arith.addf %339, %338 : vector<8x256xf32>
    %341 = arith.divf %339, %340 : vector<8x256xf32>
    %342 = arith.mulf %333, %320 : vector<8x256xf32>
    %343 = arith.mulf %327, %335 : vector<8x256xf32>
    %344 = arith.addf %342, %343 : vector<8x256xf32>
    %345 = math.tanh %344 : vector<8x256xf32>
    %346 = arith.mulf %341, %345 : vector<8x256xf32>
    %c0_261 = arith.constant 0 : index
    %c0_262 = arith.constant 0 : index
    %347 = vector.load %arg9[%c0_261, %c0_262] : memref<64x256xf32, #tpu.memory_space<vmem>>, vector<8x256xf32>
    tpu.vector_store %arg9[%c0_261, %c0_262], %346 {strides = array<i32>} : memref<64x256xf32, #tpu.memory_space<vmem>>, vector<8x256xf32>,
    %c8_263 = arith.constant 8 : index
    %c0_264 = arith.constant 0 : index
    %348 = vector.load %arg8[%c8_263, %c0_264] : memref<64x1024xf32, #tpu.memory_space<vmem>>, vector<8x1024xf32>
    %c0_265 = arith.constant 0 : index
    %c0_266 = arith.constant 0 : index
    %349 = vector.load %arg2[%c0_265, %c0_266] : memref<256x1024xf32, #tpu.memory_space<vmem>>, vector<256x1024xf32>
    %cst_267 = arith.constant dense<0.000000e+00> : vector<8x1024xf32>
    %350 = tpu.matmul %346, %349, %cst_267 {dimension_numbers = #tpu.dot_dimension_numbers<[1], [0], [0], [1], [0, 0, 1, 1], [], []>} : vector<8x256xf32>, vector<256x1024xf32>, vector<8x1024xf32> -> vector<8x1024xf32>
    %351 = arith.addf %348, %350 : vector<8x1024xf32>
    %352 = vector.extract_strided_slice %351 {offsets = [0, 0], sizes = [8, 256], strides = [1, 1]} : vector<8x1024xf32> to vector<8x256xf32>
    %353 = arith.negf %352 : vector<8x256xf32>
    %354 = math.exp %353 : vector<8x256xf32>
    %cst_268 = arith.constant 1.000000e+00 : f32
    %355 = vector.broadcast %cst_268 : f32 to vector<8x256xf32>
    %356 = arith.addf %355, %354 : vector<8x256xf32>
    %357 = arith.divf %355, %356 : vector<8x256xf32>
    %358 = vector.extract_strided_slice %351 {offsets = [0, 256], sizes = [8, 256], strides = [1, 1]} : vector<8x1024xf32> to vector<8x256xf32>
    %359 = arith.negf %358 : vector<8x256xf32>
    %360 = math.exp %359 : vector<8x256xf32>
    %cst_269 = arith.constant 1.000000e+00 : f32
    %361 = vector.broadcast %cst_269 : f32 to vector<8x256xf32>
    %362 = arith.addf %361, %360 : vector<8x256xf32>
    %363 = arith.divf %361, %362 : vector<8x256xf32>
    %364 = vector.extract_strided_slice %351 {offsets = [0, 512], sizes = [8, 256], strides = [1, 1]} : vector<8x1024xf32> to vector<8x256xf32>
    %365 = math.tanh %364 : vector<8x256xf32>
    %366 = vector.extract_strided_slice %351 {offsets = [0, 768], sizes = [8, 256], strides = [1, 1]} : vector<8x1024xf32> to vector<8x256xf32>
    %367 = arith.negf %366 : vector<8x256xf32>
    %368 = math.exp %367 : vector<8x256xf32>
    %cst_270 = arith.constant 1.000000e+00 : f32
    %369 = vector.broadcast %cst_270 : f32 to vector<8x256xf32>
    %370 = arith.addf %369, %368 : vector<8x256xf32>
    %371 = arith.divf %369, %370 : vector<8x256xf32>
    %372 = arith.mulf %363, %344 : vector<8x256xf32>
    %373 = arith.mulf %357, %365 : vector<8x256xf32>
    %374 = arith.addf %372, %373 : vector<8x256xf32>
    %375 = math.tanh %374 : vector<8x256xf32>
    %376 = arith.mulf %371, %375 : vector<8x256xf32>
    %c8_271 = arith.constant 8 : index
    %c0_272 = arith.constant 0 : index
    %377 = vector.load %arg9[%c8_271, %c0_272] : memref<64x256xf32, #tpu.memory_space<vmem>>, vector<8x256xf32>
    tpu.vector_store %arg9[%c8_271, %c0_272], %376 {strides = array<i32>} : memref<64x256xf32, #tpu.memory_space<vmem>>, vector<8x256xf32>,
    %c16_273 = arith.constant 16 : index
    %c0_274 = arith.constant 0 : index
    %378 = vector.load %arg8[%c16_273, %c0_274] : memref<64x1024xf32, #tpu.memory_space<vmem>>, vector<8x1024xf32>
    %c0_275 = arith.constant 0 : index
    %c0_276 = arith.constant 0 : index
    %379 = vector.load %arg2[%c0_275, %c0_276] : memref<256x1024xf32, #tpu.memory_space<vmem>>, vector<256x1024xf32>
    %cst_277 = arith.constant dense<0.000000e+00> : vector<8x1024xf32>
    %380 = tpu.matmul %376, %379, %cst_277 {dimension_numbers = #tpu.dot_dimension_numbers<[1], [0], [0], [1], [0, 0, 1, 1], [], []>} : vector<8x256xf32>, vector<256x1024xf32>, vector<8x1024xf32> -> vector<8x1024xf32>
    %381 = arith.addf %378, %380 : vector<8x1024xf32>
    %382 = vector.extract_strided_slice %381 {offsets = [0, 0], sizes = [8, 256], strides = [1, 1]} : vector<8x1024xf32> to vector<8x256xf32>
    %383 = arith.negf %382 : vector<8x256xf32>
    %384 = math.exp %383 : vector<8x256xf32>
    %cst_278 = arith.constant 1.000000e+00 : f32
    %385 = vector.broadcast %cst_278 : f32 to vector<8x256xf32>
    %386 = arith.addf %385, %384 : vector<8x256xf32>
    %387 = arith.divf %385, %386 : vector<8x256xf32>
    %388 = vector.extract_strided_slice %381 {offsets = [0, 256], sizes = [8, 256], strides = [1, 1]} : vector<8x1024xf32> to vector<8x256xf32>
    %389 = arith.negf %388 : vector<8x256xf32>
    %390 = math.exp %389 : vector<8x256xf32>
    %cst_279 = arith.constant 1.000000e+00 : f32
    %391 = vector.broadcast %cst_279 : f32 to vector<8x256xf32>
    %392 = arith.addf %391, %390 : vector<8x256xf32>
    %393 = arith.divf %391, %392 : vector<8x256xf32>
    %394 = vector.extract_strided_slice %381 {offsets = [0, 512], sizes = [8, 256], strides = [1, 1]} : vector<8x1024xf32> to vector<8x256xf32>
    %395 = math.tanh %394 : vector<8x256xf32>
    %396 = vector.extract_strided_slice %381 {offsets = [0, 768], sizes = [8, 256], strides = [1, 1]} : vector<8x1024xf32> to vector<8x256xf32>
    %397 = arith.negf %396 : vector<8x256xf32>
    %398 = math.exp %397 : vector<8x256xf32>
    %cst_280 = arith.constant 1.000000e+00 : f32
    %399 = vector.broadcast %cst_280 : f32 to vector<8x256xf32>
    %400 = arith.addf %399, %398 : vector<8x256xf32>
    %401 = arith.divf %399, %400 : vector<8x256xf32>
    %402 = arith.mulf %393, %374 : vector<8x256xf32>
    %403 = arith.mulf %387, %395 : vector<8x256xf32>
    %404 = arith.addf %402, %403 : vector<8x256xf32>
    %405 = math.tanh %404 : vector<8x256xf32>
    %406 = arith.mulf %401, %405 : vector<8x256xf32>
    %c16_281 = arith.constant 16 : index
    %c0_282 = arith.constant 0 : index
    %407 = vector.load %arg9[%c16_281, %c0_282] : memref<64x256xf32, #tpu.memory_space<vmem>>, vector<8x256xf32>
    tpu.vector_store %arg9[%c16_281, %c0_282], %406 {strides = array<i32>} : memref<64x256xf32, #tpu.memory_space<vmem>>, vector<8x256xf32>,
    %c24_283 = arith.constant 24 : index
    %c0_284 = arith.constant 0 : index
    %408 = vector.load %arg8[%c24_283, %c0_284] : memref<64x1024xf32, #tpu.memory_space<vmem>>, vector<8x1024xf32>
    %c0_285 = arith.constant 0 : index
    %c0_286 = arith.constant 0 : index
    %409 = vector.load %arg2[%c0_285, %c0_286] : memref<256x1024xf32, #tpu.memory_space<vmem>>, vector<256x1024xf32>
    %cst_287 = arith.constant dense<0.000000e+00> : vector<8x1024xf32>
    %410 = tpu.matmul %406, %409, %cst_287 {dimension_numbers = #tpu.dot_dimension_numbers<[1], [0], [0], [1], [0, 0, 1, 1], [], []>} : vector<8x256xf32>, vector<256x1024xf32>, vector<8x1024xf32> -> vector<8x1024xf32>
    %411 = arith.addf %408, %410 : vector<8x1024xf32>
    %412 = vector.extract_strided_slice %411 {offsets = [0, 0], sizes = [8, 256], strides = [1, 1]} : vector<8x1024xf32> to vector<8x256xf32>
    %413 = arith.negf %412 : vector<8x256xf32>
    %414 = math.exp %413 : vector<8x256xf32>
    %cst_288 = arith.constant 1.000000e+00 : f32
    %415 = vector.broadcast %cst_288 : f32 to vector<8x256xf32>
    %416 = arith.addf %415, %414 : vector<8x256xf32>
    %417 = arith.divf %415, %416 : vector<8x256xf32>
    %418 = vector.extract_strided_slice %411 {offsets = [0, 256], sizes = [8, 256], strides = [1, 1]} : vector<8x1024xf32> to vector<8x256xf32>
    %419 = arith.negf %418 : vector<8x256xf32>
    %420 = math.exp %419 : vector<8x256xf32>
    %cst_289 = arith.constant 1.000000e+00 : f32
    %421 = vector.broadcast %cst_289 : f32 to vector<8x256xf32>
    %422 = arith.addf %421, %420 : vector<8x256xf32>
    %423 = arith.divf %421, %422 : vector<8x256xf32>
    %424 = vector.extract_strided_slice %411 {offsets = [0, 512], sizes = [8, 256], strides = [1, 1]} : vector<8x1024xf32> to vector<8x256xf32>
    %425 = math.tanh %424 : vector<8x256xf32>
    %426 = vector.extract_strided_slice %411 {offsets = [0, 768], sizes = [8, 256], strides = [1, 1]} : vector<8x1024xf32> to vector<8x256xf32>
    %427 = arith.negf %426 : vector<8x256xf32>
    %428 = math.exp %427 : vector<8x256xf32>
    %cst_290 = arith.constant 1.000000e+00 : f32
    %429 = vector.broadcast %cst_290 : f32 to vector<8x256xf32>
    %430 = arith.addf %429, %428 : vector<8x256xf32>
    %431 = arith.divf %429, %430 : vector<8x256xf32>
    %432 = arith.mulf %423, %404 : vector<8x256xf32>
    %433 = arith.mulf %417, %425 : vector<8x256xf32>
    %434 = arith.addf %432, %433 : vector<8x256xf32>
    %435 = math.tanh %434 : vector<8x256xf32>
    %436 = arith.mulf %431, %435 : vector<8x256xf32>
    %c24_291 = arith.constant 24 : index
    %c0_292 = arith.constant 0 : index
    %437 = vector.load %arg9[%c24_291, %c0_292] : memref<64x256xf32, #tpu.memory_space<vmem>>, vector<8x256xf32>
    tpu.vector_store %arg9[%c24_291, %c0_292], %436 {strides = array<i32>} : memref<64x256xf32, #tpu.memory_space<vmem>>, vector<8x256xf32>,
    %c32_293 = arith.constant 32 : index
    %c0_294 = arith.constant 0 : index
    %438 = vector.load %arg8[%c32_293, %c0_294] : memref<64x1024xf32, #tpu.memory_space<vmem>>, vector<8x1024xf32>
    %c0_295 = arith.constant 0 : index
    %c0_296 = arith.constant 0 : index
    %439 = vector.load %arg2[%c0_295, %c0_296] : memref<256x1024xf32, #tpu.memory_space<vmem>>, vector<256x1024xf32>
    %cst_297 = arith.constant dense<0.000000e+00> : vector<8x1024xf32>
    %440 = tpu.matmul %436, %439, %cst_297 {dimension_numbers = #tpu.dot_dimension_numbers<[1], [0], [0], [1], [0, 0, 1, 1], [], []>} : vector<8x256xf32>, vector<256x1024xf32>, vector<8x1024xf32> -> vector<8x1024xf32>
    %441 = arith.addf %438, %440 : vector<8x1024xf32>
    %442 = vector.extract_strided_slice %441 {offsets = [0, 0], sizes = [8, 256], strides = [1, 1]} : vector<8x1024xf32> to vector<8x256xf32>
    %443 = arith.negf %442 : vector<8x256xf32>
    %444 = math.exp %443 : vector<8x256xf32>
    %cst_298 = arith.constant 1.000000e+00 : f32
    %445 = vector.broadcast %cst_298 : f32 to vector<8x256xf32>
    %446 = arith.addf %445, %444 : vector<8x256xf32>
    %447 = arith.divf %445, %446 : vector<8x256xf32>
    %448 = vector.extract_strided_slice %441 {offsets = [0, 256], sizes = [8, 256], strides = [1, 1]} : vector<8x1024xf32> to vector<8x256xf32>
    %449 = arith.negf %448 : vector<8x256xf32>
    %450 = math.exp %449 : vector<8x256xf32>
    %cst_299 = arith.constant 1.000000e+00 : f32
    %451 = vector.broadcast %cst_299 : f32 to vector<8x256xf32>
    %452 = arith.addf %451, %450 : vector<8x256xf32>
    %453 = arith.divf %451, %452 : vector<8x256xf32>
    %454 = vector.extract_strided_slice %441 {offsets = [0, 512], sizes = [8, 256], strides = [1, 1]} : vector<8x1024xf32> to vector<8x256xf32>
    %455 = math.tanh %454 : vector<8x256xf32>
    %456 = vector.extract_strided_slice %441 {offsets = [0, 768], sizes = [8, 256], strides = [1, 1]} : vector<8x1024xf32> to vector<8x256xf32>
    %457 = arith.negf %456 : vector<8x256xf32>
    %458 = math.exp %457 : vector<8x256xf32>
    %cst_300 = arith.constant 1.000000e+00 : f32
    %459 = vector.broadcast %cst_300 : f32 to vector<8x256xf32>
    %460 = arith.addf %459, %458 : vector<8x256xf32>
    %461 = arith.divf %459, %460 : vector<8x256xf32>
    %462 = arith.mulf %453, %434 : vector<8x256xf32>
    %463 = arith.mulf %447, %455 : vector<8x256xf32>
    %464 = arith.addf %462, %463 : vector<8x256xf32>
    %465 = math.tanh %464 : vector<8x256xf32>
    %466 = arith.mulf %461, %465 : vector<8x256xf32>
    %c32_301 = arith.constant 32 : index
    %c0_302 = arith.constant 0 : index
    %467 = vector.load %arg9[%c32_301, %c0_302] : memref<64x256xf32, #tpu.memory_space<vmem>>, vector<8x256xf32>
    tpu.vector_store %arg9[%c32_301, %c0_302], %466 {strides = array<i32>} : memref<64x256xf32, #tpu.memory_space<vmem>>, vector<8x256xf32>,
    %c40_303 = arith.constant 40 : index
    %c0_304 = arith.constant 0 : index
    %468 = vector.load %arg8[%c40_303, %c0_304] : memref<64x1024xf32, #tpu.memory_space<vmem>>, vector<8x1024xf32>
    %c0_305 = arith.constant 0 : index
    %c0_306 = arith.constant 0 : index
    %469 = vector.load %arg2[%c0_305, %c0_306] : memref<256x1024xf32, #tpu.memory_space<vmem>>, vector<256x1024xf32>
    %cst_307 = arith.constant dense<0.000000e+00> : vector<8x1024xf32>
    %470 = tpu.matmul %466, %469, %cst_307 {dimension_numbers = #tpu.dot_dimension_numbers<[1], [0], [0], [1], [0, 0, 1, 1], [], []>} : vector<8x256xf32>, vector<256x1024xf32>, vector<8x1024xf32> -> vector<8x1024xf32>
    %471 = arith.addf %468, %470 : vector<8x1024xf32>
    %472 = vector.extract_strided_slice %471 {offsets = [0, 0], sizes = [8, 256], strides = [1, 1]} : vector<8x1024xf32> to vector<8x256xf32>
    %473 = arith.negf %472 : vector<8x256xf32>
    %474 = math.exp %473 : vector<8x256xf32>
    %cst_308 = arith.constant 1.000000e+00 : f32
    %475 = vector.broadcast %cst_308 : f32 to vector<8x256xf32>
    %476 = arith.addf %475, %474 : vector<8x256xf32>
    %477 = arith.divf %475, %476 : vector<8x256xf32>
    %478 = vector.extract_strided_slice %471 {offsets = [0, 256], sizes = [8, 256], strides = [1, 1]} : vector<8x1024xf32> to vector<8x256xf32>
    %479 = arith.negf %478 : vector<8x256xf32>
    %480 = math.exp %479 : vector<8x256xf32>
    %cst_309 = arith.constant 1.000000e+00 : f32
    %481 = vector.broadcast %cst_309 : f32 to vector<8x256xf32>
    %482 = arith.addf %481, %480 : vector<8x256xf32>
    %483 = arith.divf %481, %482 : vector<8x256xf32>
    %484 = vector.extract_strided_slice %471 {offsets = [0, 512], sizes = [8, 256], strides = [1, 1]} : vector<8x1024xf32> to vector<8x256xf32>
    %485 = math.tanh %484 : vector<8x256xf32>
    %486 = vector.extract_strided_slice %471 {offsets = [0, 768], sizes = [8, 256], strides = [1, 1]} : vector<8x1024xf32> to vector<8x256xf32>
    %487 = arith.negf %486 : vector<8x256xf32>
    %488 = math.exp %487 : vector<8x256xf32>
    %cst_310 = arith.constant 1.000000e+00 : f32
    %489 = vector.broadcast %cst_310 : f32 to vector<8x256xf32>
    %490 = arith.addf %489, %488 : vector<8x256xf32>
    %491 = arith.divf %489, %490 : vector<8x256xf32>
    %492 = arith.mulf %483, %464 : vector<8x256xf32>
    %493 = arith.mulf %477, %485 : vector<8x256xf32>
    %494 = arith.addf %492, %493 : vector<8x256xf32>
    %495 = math.tanh %494 : vector<8x256xf32>
    %496 = arith.mulf %491, %495 : vector<8x256xf32>
    %c40_311 = arith.constant 40 : index
    %c0_312 = arith.constant 0 : index
    %497 = vector.load %arg9[%c40_311, %c0_312] : memref<64x256xf32, #tpu.memory_space<vmem>>, vector<8x256xf32>
    tpu.vector_store %arg9[%c40_311, %c0_312], %496 {strides = array<i32>} : memref<64x256xf32, #tpu.memory_space<vmem>>, vector<8x256xf32>,
    %c48_313 = arith.constant 48 : index
    %c0_314 = arith.constant 0 : index
    %498 = vector.load %arg8[%c48_313, %c0_314] : memref<64x1024xf32, #tpu.memory_space<vmem>>, vector<8x1024xf32>
    %c0_315 = arith.constant 0 : index
    %c0_316 = arith.constant 0 : index
    %499 = vector.load %arg2[%c0_315, %c0_316] : memref<256x1024xf32, #tpu.memory_space<vmem>>, vector<256x1024xf32>
    %cst_317 = arith.constant dense<0.000000e+00> : vector<8x1024xf32>
    %500 = tpu.matmul %496, %499, %cst_317 {dimension_numbers = #tpu.dot_dimension_numbers<[1], [0], [0], [1], [0, 0, 1, 1], [], []>} : vector<8x256xf32>, vector<256x1024xf32>, vector<8x1024xf32> -> vector<8x1024xf32>
    %501 = arith.addf %498, %500 : vector<8x1024xf32>
    %502 = vector.extract_strided_slice %501 {offsets = [0, 0], sizes = [8, 256], strides = [1, 1]} : vector<8x1024xf32> to vector<8x256xf32>
    %503 = arith.negf %502 : vector<8x256xf32>
    %504 = math.exp %503 : vector<8x256xf32>
    %cst_318 = arith.constant 1.000000e+00 : f32
    %505 = vector.broadcast %cst_318 : f32 to vector<8x256xf32>
    %506 = arith.addf %505, %504 : vector<8x256xf32>
    %507 = arith.divf %505, %506 : vector<8x256xf32>
    %508 = vector.extract_strided_slice %501 {offsets = [0, 256], sizes = [8, 256], strides = [1, 1]} : vector<8x1024xf32> to vector<8x256xf32>
    %509 = arith.negf %508 : vector<8x256xf32>
    %510 = math.exp %509 : vector<8x256xf32>
    %cst_319 = arith.constant 1.000000e+00 : f32
    %511 = vector.broadcast %cst_319 : f32 to vector<8x256xf32>
    %512 = arith.addf %511, %510 : vector<8x256xf32>
    %513 = arith.divf %511, %512 : vector<8x256xf32>
    %514 = vector.extract_strided_slice %501 {offsets = [0, 512], sizes = [8, 256], strides = [1, 1]} : vector<8x1024xf32> to vector<8x256xf32>
    %515 = math.tanh %514 : vector<8x256xf32>
    %516 = vector.extract_strided_slice %501 {offsets = [0, 768], sizes = [8, 256], strides = [1, 1]} : vector<8x1024xf32> to vector<8x256xf32>
    %517 = arith.negf %516 : vector<8x256xf32>
    %518 = math.exp %517 : vector<8x256xf32>
    %cst_320 = arith.constant 1.000000e+00 : f32
    %519 = vector.broadcast %cst_320 : f32 to vector<8x256xf32>
    %520 = arith.addf %519, %518 : vector<8x256xf32>
    %521 = arith.divf %519, %520 : vector<8x256xf32>
    %522 = arith.mulf %513, %494 : vector<8x256xf32>
    %523 = arith.mulf %507, %515 : vector<8x256xf32>
    %524 = arith.addf %522, %523 : vector<8x256xf32>
    %525 = math.tanh %524 : vector<8x256xf32>
    %526 = arith.mulf %521, %525 : vector<8x256xf32>
    %c48_321 = arith.constant 48 : index
    %c0_322 = arith.constant 0 : index
    %527 = vector.load %arg9[%c48_321, %c0_322] : memref<64x256xf32, #tpu.memory_space<vmem>>, vector<8x256xf32>
    tpu.vector_store %arg9[%c48_321, %c0_322], %526 {strides = array<i32>} : memref<64x256xf32, #tpu.memory_space<vmem>>, vector<8x256xf32>,
    %c56_323 = arith.constant 56 : index
    %c0_324 = arith.constant 0 : index
    %528 = vector.load %arg8[%c56_323, %c0_324] : memref<64x1024xf32, #tpu.memory_space<vmem>>, vector<8x1024xf32>
    %c0_325 = arith.constant 0 : index
    %c0_326 = arith.constant 0 : index
    %529 = vector.load %arg2[%c0_325, %c0_326] : memref<256x1024xf32, #tpu.memory_space<vmem>>, vector<256x1024xf32>
    %cst_327 = arith.constant dense<0.000000e+00> : vector<8x1024xf32>
    %530 = tpu.matmul %526, %529, %cst_327 {dimension_numbers = #tpu.dot_dimension_numbers<[1], [0], [0], [1], [0, 0, 1, 1], [], []>} : vector<8x256xf32>, vector<256x1024xf32>, vector<8x1024xf32> -> vector<8x1024xf32>
    %531 = arith.addf %528, %530 : vector<8x1024xf32>
    %532 = vector.extract_strided_slice %531 {offsets = [0, 0], sizes = [8, 256], strides = [1, 1]} : vector<8x1024xf32> to vector<8x256xf32>
    %533 = arith.negf %532 : vector<8x256xf32>
    %534 = math.exp %533 : vector<8x256xf32>
    %cst_328 = arith.constant 1.000000e+00 : f32
    %535 = vector.broadcast %cst_328 : f32 to vector<8x256xf32>
    %536 = arith.addf %535, %534 : vector<8x256xf32>
    %537 = arith.divf %535, %536 : vector<8x256xf32>
    %538 = vector.extract_strided_slice %531 {offsets = [0, 256], sizes = [8, 256], strides = [1, 1]} : vector<8x1024xf32> to vector<8x256xf32>
    %539 = arith.negf %538 : vector<8x256xf32>
    %540 = math.exp %539 : vector<8x256xf32>
    %cst_329 = arith.constant 1.000000e+00 : f32
    %541 = vector.broadcast %cst_329 : f32 to vector<8x256xf32>
    %542 = arith.addf %541, %540 : vector<8x256xf32>
    %543 = arith.divf %541, %542 : vector<8x256xf32>
    %544 = vector.extract_strided_slice %531 {offsets = [0, 512], sizes = [8, 256], strides = [1, 1]} : vector<8x1024xf32> to vector<8x256xf32>
    %545 = math.tanh %544 : vector<8x256xf32>
    %546 = vector.extract_strided_slice %531 {offsets = [0, 768], sizes = [8, 256], strides = [1, 1]} : vector<8x1024xf32> to vector<8x256xf32>
    %547 = arith.negf %546 : vector<8x256xf32>
    %548 = math.exp %547 : vector<8x256xf32>
    %cst_330 = arith.constant 1.000000e+00 : f32
    %549 = vector.broadcast %cst_330 : f32 to vector<8x256xf32>
    %550 = arith.addf %549, %548 : vector<8x256xf32>
    %551 = arith.divf %549, %550 : vector<8x256xf32>
    %552 = arith.mulf %543, %524 : vector<8x256xf32>
    %553 = arith.mulf %537, %545 : vector<8x256xf32>
    %554 = arith.addf %552, %553 : vector<8x256xf32>
    %555 = math.tanh %554 : vector<8x256xf32>
    %556 = arith.mulf %551, %555 : vector<8x256xf32>
    %c56_331 = arith.constant 56 : index
    %c0_332 = arith.constant 0 : index
    %557 = vector.load %arg9[%c56_331, %c0_332] : memref<64x256xf32, #tpu.memory_space<vmem>>, vector<8x256xf32>
    tpu.vector_store %arg9[%c56_331, %c0_332], %556 {strides = array<i32>} : memref<64x256xf32, #tpu.memory_space<vmem>>, vector<8x256xf32>,
    %c0_333 = arith.constant 0 : index
    %c0_334 = arith.constant 0 : index
    %558 = vector.load %arg9[%c0_333, %c0_334] : memref<64x256xf32, #tpu.memory_space<vmem>>, vector<64x256xf32>
    %c0_335 = arith.constant 0 : index
    %c0_336 = arith.constant 0 : index
    %559 = vector.load %arg3[%c0_335, %c0_336] : memref<256x256xf32, #tpu.memory_space<vmem>>, vector<256x256xf32>
    %cst_337 = arith.constant dense<0.000000e+00> : vector<64x256xf32>
    %560 = tpu.matmul %558, %559, %cst_337 {dimension_numbers = #tpu.dot_dimension_numbers<[1], [0], [0], [1], [0, 0, 1, 1], [], []>} : vector<64x256xf32>, vector<256x256xf32>, vector<64x256xf32> -> vector<64x256xf32>
    %c0_338 = arith.constant 0 : index
    %c0_339 = arith.constant 0 : index
    %561 = vector.load %arg4[%c0_338, %c0_339] : memref<1x256xf32, #tpu.memory_space<vmem>>, vector<1x256xf32>
    %562 = vector.broadcast %561 : vector<1x256xf32> to vector<64x256xf32>
    %563 = arith.addf %560, %562 : vector<64x256xf32>
    %cst_340 = arith.constant 0.000000e+00 : f32
    %564 = vector.broadcast %cst_340 : f32 to vector<64x256xf32>
    %565 = arith.maximumf %563, %564 : vector<64x256xf32>
    %c0_341 = arith.constant 0 : index
    %c0_342 = arith.constant 0 : index
    %566 = vector.load %arg5[%c0_341, %c0_342] : memref<1x256xf32, #tpu.memory_space<vmem>>, vector<1x256xf32>
    %567 = vector.broadcast %566 : vector<1x256xf32> to vector<64x256xf32>
    %568 = arith.mulf %565, %567 : vector<64x256xf32>
    %cst_343 = arith.constant dense<0.000000e+00> : vector<64xf32>
    %569 = vector.multi_reduction <add>, %568, %cst_343 [1] : vector<64x256xf32> to vector<64xf32>
    %570 = vector.shape_cast %569 : vector<64xf32> to vector<64x1xf32>
    %c0_344 = arith.constant 0 : index
    %571 = memref.load %arg6[%c0_344] : memref<1xf32, #tpu.memory_space<smem>>
    %572 = vector.broadcast %571 : f32 to vector<64x1xf32>
    %573 = arith.addf %570, %572 : vector<64x1xf32>
    %c0_345 = arith.constant 0 : index
    %c0_346 = arith.constant 0 : index
    %574 = vector.load %arg7[%c0_345, %c0_346] : memref<64x1xf32, #tpu.memory_space<vmem>>, vector<64x1xf32>
    tpu.vector_store %arg7[%c0_345, %c0_346], %573 {strides = array<i32>} : memref<64x1xf32, #tpu.memory_space<vmem>>, vector<64x1xf32>,
    return
  }
}

</mosaic_0001>

<bundles_post_ra>
// kernel: recurrent_critic_forward.1
= control target key start
LH: loop header
LB: loop body
LE: loop exit
PB: predicated region body
PF: predicated region fallthrough
CT: control target
= control target key end

     0   :  { %13 = vsyncpa [#allocation6], 0  ;;  %s13621_s0 = inlined_call_operand.vmem [shape: s32[64], index: 0, kind: input, shape index: {}]   ;;  %s13622_s1 = inlined_call_operand.vmem [shape: f32[16,1,1024], index: 1, kind: input, shape index: {}]   ;;  %s13623_s2 = inlined_call_operand.vmem [shape: f32[256,1024], index: 2, kind: input, shape index: {}]   ;;  %s13624_s3 = inlined_call_operand.vmem [shape: f32[256,256], index: 3, kind: input, shape index: {}]   ;;  %s13625_s4 = inlined_call_operand.vmem [shape: f32[1,256], index: 4, kind: input, shape index: {}]   ;;  %s13626_s5 = inlined_call_operand.vmem [shape: f32[1,256], index: 5, kind: input, shape index: {}]   ;;  %s13627_s6 = inlined_call_operand.<no memory space> [shape: f32[1], index: 6, kind: input, shape index: {}]   ;;  %s13628_s7 = inlined_call_operand.vmem [shape: f32[64,1], index: 7, kind: output, shape index: {}]  }
   0x1   :  { %s20_s26 = sshll.u32 %s13621_s0, 4  ;;  %s21_s26 = int_to_ptr.vmem [resolvable:$true] %s20_s26 }
   0x2   :  { %s7500_s27 = scalar_lea.vmem %s21_s26, 16  ;;  %p7505_p1 = scmp.lt.s32.totalorder %s21_s26, %s21_s26 }
   0x3   :  { %p7501_p0 = scmp.ne.s32.totalorder %s21_s26, %s7500_s27  ;;  %p7506_p2 = scmp.lt.s32.totalorder %s7500_s27, %s7500_s27 }
   0x5   :  { %p7507_p3 = por %p7506_p2, %p7505_p1 }
   0x7   :  { %p7508_p4 = pnand %p7507_p3, %p7501_p0 }
   0x9   :  { %7511 = shalt.err (!%p7508_p4)
}
   0xa   :  { %s7514_s28 = smov [#allocation5]  }
   0xb   :  { %23 = dma.vmem_to_smem %s21_s26, 16, %s7514_s28, [#allocation6]  }
   0xc   :  { %7512 = dma.done.wait [#allocation6], 16  }
   0xd   :  { %7513 = vsyncadd [#allocation6], 4294967280 }
   0xe   :  { %39 = sfence }
   0xf   :  { %v554_v0 = vld [vmem:[%s13623_s2 + $0x8] sm:$0xff]  ;;  %v553_v2 = vld [vmem:[%s13623_s2] sm:$0xff]  ;;  %s7696_s25 = sld [smem:[#allocation5]]  ;;  %s7698_s26 = sld [smem:[#allocation5 + $0x1]]  ;;  %vm5070_vm0 = vcmask 7168  }
  0x10   :  { %v562_v1 = vld [vmem:[%s13623_s2 + $0x48] sm:$0xff]  ;;  %v561_v4 = vld [vmem:[%s13623_s2 + $0x40] sm:$0xff]  ;;  %s7724_s19 = sld [smem:[#allocation5 + $0x2]]  ;;  %s7726_s20 = sld [smem:[#allocation5 + $0x3]] }
  0x11   :  { %v5387_v3 = vpack.c.bf16 %v562_v1, %v554_v0  ;;  %v570_v5 = vld [vmem:[%s13623_s2 + $0x88] sm:$0xff]  ;;  %v5389_v7 = vpack.c.bf16 %v561_v4, %v553_v2  ;;  %v569_v9 = vld [vmem:[%s13623_s2 + $0x80] sm:$0xff]  ;;  %s7734_s27 = sld [smem:[#allocation5 + $0x4]]  ;;  %s7736_s28 = sld [smem:[#allocation5 + $0x5]] }
  0x12   :  { %v578_v6 = vld [vmem:[%s13623_s2 + $0xc8] sm:$0xff]  ;;  %v577_v10 = vld [vmem:[%s13623_s2 + $0xc0] sm:$0xff]  ;;  %s7744_s0 = sld [smem:[#allocation5 + $0x6]]  ;;  %s7746_s10 = sld [smem:[#allocation5 + $0x7]] }
  0x13   :  { %v5391_v8 = vpack.c.bf16 %v578_v6, %v570_v5  ;;  %v586_v11 = vld [vmem:[%s13623_s2 + $0x108] sm:$0xff]  ;;  %5388 = vmatprep.subr.bf16.mxu1 %v5387_v3  ;;  %v5393_v13 = vpack.c.bf16 %v577_v10, %v569_v9  ;;  %v585_v14 = vld [vmem:[%s13623_s2 + $0x100] sm:$0xff]  ;;  %s8060_s15 = sld [smem:[#allocation5 + $0xa]]  ;;  %s8062_s16 = sld [smem:[#allocation5 + $0xb]] }
  0x14   :  { %v594_v12 = vld [vmem:[%s13623_s2 + $0x148] sm:$0xff]  ;;  %5390 = vmatpush1.bf16.msra.mxu1 %v5389_v7  ;;  %v593_v16 = vld [vmem:[%s13623_s2 + $0x140] sm:$0xff]  ;;  %s8075_s29 = sld [smem:[#allocation5 + $0xd]]  ;;  %s8083_s11 = sld [smem:[#allocation5 + $0xe]] }
  0x15   :  { %5392 = vmatprep.subr.bf16.mxu1 %v5391_v8  ;;  %v5395_v15 = vpack.c.bf16 %v594_v12, %v586_v11  ;;  %v558_v17 = vld [vmem:[%s13623_s2 + $0x28] sm:$0xff]  ;;  %v557_v22 = vld [vmem:[%s13623_s2 + $0x20] sm:$0xff]  ;;  %v5397_v24 = vpack.c.bf16 %v593_v16, %v585_v14  ;;  %s5212_s21 = sshll.u32 %s7696_s25, 3  ;;  %s5214_s22 = sshll.u32 %s7698_s26, 3 }
  0x16   :  { %v566_v18 = vld [vmem:[%s13623_s2 + $0x68] sm:$0xff]  ;;  %v565_v23 = vld [vmem:[%s13623_s2 + $0x60] sm:$0xff]  ;;  %s7783_s17 = scalar_lea.vmem %s13622_s1, %s5212_s21  ;;  %s7788_s24 = scalar_lea.vmem %s13622_s1, %s5214_s22 }
  0x17   :  { %v602_v19 = vld [vmem:[%s13623_s2 + $0x188] sm:$0xff]  ;;  %v5515_v21 = vpack.c.bf16 %v566_v18, %v558_v17  ;;  %v601_v25 = vld [vmem:[%s13623_s2 + $0x180] sm:$0xff]  ;;  %v5517_v26 = vpack.c.bf16 %v565_v23, %v557_v22  ;;  %s5216_s25 = sshll.u32 %s7724_s19, 3  ;;  %s5218_s21 = sshll.u32 %s7726_s20, 3 }
  0x18   :  { %v610_v20 = vld [vmem:[%s13623_s2 + $0x1c8] sm:$0xff]  ;;  %5394 = vmatpush1.bf16.msra.mxu1 %v5393_v13  ;;  %v609_v30 = vld [vmem:[%s13623_s2 + $0x1c0] sm:$0xff]  ;;  %s5220_s13 = sshll.u32 %s7734_s27, 3  ;;  %s5222_s14 = sshll.u32 %s7736_s28, 3 }
  0x19   :  { %5516 = vmatprep.subr.bf16.mxu0 %v5515_v21  ;;  %v574_v27 = vld [vmem:[%s13623_s2 + $0xa8] sm:$0xff]  ;;  %5396 = vmatprep.subr.bf16.mxu1 %v5395_v15  ;;  %v5399_v29 = vpack.c.bf16 %v610_v20, %v602_v19  ;;  %v573_v32 = vld [vmem:[%s13623_s2 + $0xa0] sm:$0xff]  ;;  %v5401_v39 = vpack.c.bf16 %v609_v30, %v601_v25  ;;  %s5224_s18 = sshll.u32 %s7744_s0, 3  ;;  %s5226_s23 = sshll.u32 %s7746_s10, 3 }
  0x1a   :  { %v582_v28 = vld [vmem:[%s13623_s2 + $0xe8] sm:$0xff]  ;;  %v581_v33 = vld [vmem:[%s13623_s2 + $0xe0] sm:$0xff]  ;;  %5518 = vmatpush1.bf16.msra.mxu0 %v5517_v26  ;;  %s55_s26 = scalar_lea.vmem %s13622_s1, %s5216_s25  ;;  %s62_s12 = scalar_lea.vmem %s13622_s1, %s5218_s21 }
  0x1b   :  { %v5519_v31 = vpack.c.bf16 %v582_v28, %v574_v27  ;;  %v618_v34 = vld [vmem:[%s13623_s2 + $0x208] sm:$0xff]  ;;  %v5521_v36 = vpack.c.bf16 %v581_v33, %v573_v32  ;;  %v617_v40 = vld [vmem:[%s13623_s2 + $0x200] sm:$0xff]  ;;  %s69_s8 = scalar_lea.vmem %s13622_s1, %s5220_s13  ;;  %s7848_s28 = scalar_lea.vmem %s13622_s1, %s5222_s14 }
  0x1c   :  { %v626_v35 = vld [vmem:[%s13623_s2 + $0x248] sm:$0xff]  ;;  %5398 = vmatpush1.bf16.msra.mxu1 %v5397_v24  ;;  %v589_v42 = vld [vmem:[%s13623_s2 + $0x120] sm:$0xff]  ;;  %s83_s25 = scalar_lea.vmem %s13622_s1, %s5224_s18  ;;  %s90_s30 = scalar_lea.vmem %s13622_s1, %s5226_s23 }
  0x1d   :  { %v590_v37 = vld [vmem:[%s13623_s2 + $0x128] sm:$0xff]  ;;  %5520 = vmatprep.subr.bf16.mxu0 %v5519_v31  ;;  %v597_v43 = vld [vmem:[%s13623_s2 + $0x160] sm:$0xff]  ;;  %5400 = vmatprep.subr.bf16.mxu1 %v5399_v29  ;;  %v5403_v44 = vpack.c.bf16 %v626_v35, %v618_v34  ;;  %s5227_s0 = sld [smem:[#allocation5 + $0x8]]  ;;  %s5229_s10 = sld [smem:[#allocation5 + $0x9]] }
  0x1e   :  { %v598_v38 = vld [vmem:[%s13623_s2 + $0x168] sm:$0xff]  ;;  %v625_v45 = vld [vmem:[%s13623_s2 + $0x240] sm:$0xff]  ;;  %5522 = vmatpush1.bf16.msra.mxu0 %v5521_v36  ;;  %v5525_v50 = vpack.c.bf16 %v597_v43, %v589_v42  ;;  %s8085_s22 = sld [smem:[#allocation5 + $0xf]]  ;;  %s5238_s19 = sshll.u32 %s8075_s29, 3 }
  0x1f   :  { %v5523_v41 = vpack.c.bf16 %v598_v38, %v590_v37  ;;  %v606_v46 = vld [vmem:[%s13623_s2 + $0x1a8] sm:$0xff]  ;;  %v605_v52 = vld [vmem:[%s13623_s2 + $0x1a0] sm:$0xff]  ;;  %v5405_v54 = vpack.c.bf16 %v625_v45, %v617_v40  ;;  %s5247_s9 = sld [smem:[#allocation5 + $0x12]]  ;;  %s9597_s14 = sld [smem:[#allocation5 + $0x1e]] }
  0x20   :  { %v614_v47 = vld [vmem:[%s13623_s2 + $0x1e8] sm:$0xff]  ;;  %v613_v53 = vld [vmem:[%s13623_s2 + $0x1e0] sm:$0xff]  ;;  %5402 = vmatpush1.bf16.msra.mxu1 %v5401_v39 }
  0x21   :  { %v634_v48 = vld [vmem:[%s13623_s2 + $0x288] sm:$0xff]  ;;  %5524 = vmatprep.subr.bf16.mxu0 %v5523_v41  ;;  %v5527_v51 = vpack.c.bf16 %v614_v47, %v606_v46  ;;  %5404 = vmatprep.subr.bf16.mxu1 %v5403_v44  ;;  %v633_v58 = vld [vmem:[%s13623_s2 + $0x280] sm:$0xff]  ;;  %v5529_v62 = vpack.c.bf16 %v613_v53, %v605_v52 }
  0x22   :  { %v642_v49 = vld [vmem:[%s13623_s2 + $0x2c8] sm:$0xff]  ;;  %v641_v59 = vld [vmem:[%s13623_s2 + $0x2c0] sm:$0xff]  ;;  %5526 = vmatpush1.bf16.msra.mxu0 %v5525_v50 }
  0x23   :  { %v622_v55 = vld [vmem:[%s13623_s2 + $0x228] sm:$0xff]  ;;  %v5407_v57 = vpack.c.bf16 %v642_v49, %v634_v48  ;;  %5528 = vmatprep.subr.bf16.mxu0 %v5527_v51  ;;  %v621_v0 = vld [vmem:[%s13623_s2 + $0x220] sm:$0xff]  ;;  %v5409_v2 = vpack.c.bf16 %v641_v59, %v633_v58 }
  0x24   :  { %v630_v56 = vld [vmem:[%s13623_s2 + $0x268] sm:$0xff]  ;;  %v629_v1 = vld [vmem:[%s13623_s2 + $0x260] sm:$0xff]  ;;  %5406 = vmatpush1.bf16.msra.mxu1 %v5405_v54  ;;  %s5242_s29 = sshll.u32 %s8085_s22, 3  ;;  %s5265_s22 = sld [smem:[#allocation5 + $0x1b]] }
  0x25   :  { %v650_v60 = vld [vmem:[%s13623_s2 + $0x308] sm:$0xff]  ;;  %v5531_v63 = vpack.c.bf16 %v630_v56, %v622_v55  ;;  %5408 = vmatprep.subr.bf16.mxu1 %v5407_v57  ;;  %v649_v6 = vld [vmem:[%s13623_s2 + $0x300] sm:$0xff]  ;;  %v5533_v10 = vpack.c.bf16 %v629_v1, %v621_v0 }
  0x26   :  { %v658_v61 = vld [vmem:[%s13623_s2 + $0x348] sm:$0xff]  ;;  %v657_v7 = vld [vmem:[%s13623_s2 + $0x340] sm:$0xff]  ;;  %5530 = vmatpush1.bf16.msra.mxu0 %v5529_v62 }
  0x27   :  { %v638_v3 = vld [vmem:[%s13623_s2 + $0x2a8] sm:$0xff]  ;;  %v5411_v5 = vpack.c.bf16 %v658_v61, %v650_v60  ;;  %5532 = vmatprep.subr.bf16.mxu0 %v5531_v63  ;;  %v637_v12 = vld [vmem:[%s13623_s2 + $0x2a0] sm:$0xff]  ;;  %v5413_v14 = vpack.c.bf16 %v657_v7, %v649_v6 }
  0x28   :  { %v646_v4 = vld [vmem:[%s13623_s2 + $0x2e8] sm:$0xff]  ;;  %v645_v13 = vld [vmem:[%s13623_s2 + $0x2e0] sm:$0xff]  ;;  %5410 = vmatpush1.bf16.msra.mxu1 %v5409_v2 }
  0x29   :  { %v666_v8 = vld [vmem:[%s13623_s2 + $0x388] sm:$0xff]  ;;  %v5535_v11 = vpack.c.bf16 %v646_v4, %v638_v3  ;;  %5412 = vmatprep.subr.bf16.mxu1 %v5411_v5  ;;  %v665_v18 = vld [vmem:[%s13623_s2 + $0x380] sm:$0xff]  ;;  %v5537_v22 = vpack.c.bf16 %v645_v13, %v637_v12 }
  0x2a   :  { %v674_v9 = vld [vmem:[%s13623_s2 + $0x3c8] sm:$0xff]  ;;  %v673_v19 = vld [vmem:[%s13623_s2 + $0x3c0] sm:$0xff]  ;;  %5534 = vmatpush1.bf16.msra.mxu0 %v5533_v10 }
  0x2b   :  { %v654_v15 = vld [vmem:[%s13623_s2 + $0x328] sm:$0xff]  ;;  %v5415_v17 = vpack.c.bf16 %v674_v9, %v666_v8  ;;  %5536 = vmatprep.subr.bf16.mxu0 %v5535_v11  ;;  %v653_v24 = vld [vmem:[%s13623_s2 + $0x320] sm:$0xff]  ;;  %v5417_v26 = vpack.c.bf16 %v673_v19, %v665_v18 }
  0x2c   :  { %v662_v16 = vld [vmem:[%s13623_s2 + $0x368] sm:$0xff]  ;;  %v661_v25 = vld [vmem:[%s13623_s2 + $0x360] sm:$0xff]  ;;  %5414 = vmatpush1.bf16.msra.mxu1 %v5413_v14 }
  0x2d   :  { %v682_v20 = vld [vmem:[%s13623_s2 + $0x408] sm:$0xff]  ;;  %v5539_v23 = vpack.c.bf16 %v662_v16, %v654_v15  ;;  %5416 = vmatprep.subr.bf16.mxu1 %v5415_v17  ;;  %v681_v30 = vld [vmem:[%s13623_s2 + $0x400] sm:$0xff]  ;;  %v5541_v34 = vpack.c.bf16 %v661_v25, %v653_v24 }
  0x2e   :  { %v690_v21 = vld [vmem:[%s13623_s2 + $0x448] sm:$0xff]  ;;  %v689_v31 = vld [vmem:[%s13623_s2 + $0x440] sm:$0xff]  ;;  %5538 = vmatpush1.bf16.msra.mxu0 %v5537_v22 }
  0x2f   :  { %v670_v27 = vld [vmem:[%s13623_s2 + $0x3a8] sm:$0xff]  ;;  %v5419_v29 = vpack.c.bf16 %v690_v21, %v682_v20  ;;  %5540 = vmatprep.subr.bf16.mxu0 %v5539_v23  ;;  %v669_v36 = vld [vmem:[%s13623_s2 + $0x3a0] sm:$0xff]  ;;  %v5421_v38 = vpack.c.bf16 %v689_v31, %v681_v30 }
  0x30   :  { %v678_v28 = vld [vmem:[%s13623_s2 + $0x3e8] sm:$0xff]  ;;  %v677_v37 = vld [vmem:[%s13623_s2 + $0x3e0] sm:$0xff]  ;;  %5418 = vmatpush1.bf16.msra.mxu1 %v5417_v26 }
  0x31   :  { %v698_v32 = vld [vmem:[%s13623_s2 + $0x488] sm:$0xff]  ;;  %v5543_v35 = vpack.c.bf16 %v678_v28, %v670_v27  ;;  %5420 = vmatprep.subr.bf16.mxu1 %v5419_v29  ;;  %v697_v42 = vld [vmem:[%s13623_s2 + $0x480] sm:$0xff]  ;;  %v5545_v46 = vpack.c.bf16 %v677_v37, %v669_v36 }
  0x32   :  { %v706_v33 = vld [vmem:[%s13623_s2 + $0x4c8] sm:$0xff]  ;;  %v705_v43 = vld [vmem:[%s13623_s2 + $0x4c0] sm:$0xff]  ;;  %5542 = vmatpush1.bf16.msra.mxu0 %v5541_v34 }
  0x33   :  { %v686_v39 = vld [vmem:[%s13623_s2 + $0x428] sm:$0xff]  ;;  %v5423_v41 = vpack.c.bf16 %v706_v33, %v698_v32  ;;  %v7829_v47 = vld [vmem:[%s13623_s2 + $0x500] sm:$0xff]  ;;  %5544 = vmatprep.subr.bf16.mxu0 %v5543_v35  ;;  %v5425_v52 = vpack.c.bf16 %v705_v43, %v697_v42 }
  0x34   :  { %v694_v40 = vld [vmem:[%s13623_s2 + $0x468] sm:$0xff]  ;;  %v7834_v48 = vld [vmem:[%s13623_s2 + $0x540] sm:$0xff]  ;;  %5422 = vmatpush1.bf16.msra.mxu1 %v5421_v38 }
  0x35   :  { %v714_v44 = vld [vmem:[%s13623_s2 + $0x508] sm:$0xff]  ;;  %v5547_v49 = vpack.c.bf16 %v694_v40, %v686_v39  ;;  %v685_v50 = vld [vmem:[%s13623_s2 + $0x420] sm:$0xff]  ;;  %5424 = vmatprep.subr.bf16.mxu1 %v5423_v41  ;;  %v5429_v6 = vpack.c.bf16 %v7834_v48, %v7829_v47 }
  0x36   :  { %v722_v45 = vld [vmem:[%s13623_s2 + $0x548] sm:$0xff]  ;;  %v693_v51 = vld [vmem:[%s13623_s2 + $0x460] sm:$0xff]  ;;  %5546 = vmatpush1.bf16.msra.mxu0 %v5545_v46 }
  0x37   :  { %v730_v53 = vld [vmem:[%s13623_s2 + $0x588] sm:$0xff]  ;;  %v5427_v57 = vpack.c.bf16 %v722_v45, %v714_v44  ;;  %v701_v58 = vld [vmem:[%s13623_s2 + $0x4a0] sm:$0xff]  ;;  %v5549_v62 = vpack.c.bf16 %v693_v51, %v685_v50  ;;  %5548 = vmatprep.subr.bf16.mxu0 %v5547_v49 }
  0x38   :  { %v738_v54 = vld [vmem:[%s13623_s2 + $0x5c8] sm:$0xff]  ;;  %v709_v59 = vld [vmem:[%s13623_s2 + $0x4e0] sm:$0xff]  ;;  %5426 = vmatpush1.bf16.msra.mxu1 %v5425_v52 }
  0x39   :  { %v702_v55 = vld [vmem:[%s13623_s2 + $0x4a8] sm:$0xff]  ;;  %v43_v60 = vld [vmem:[%s7783_s17] sm:$0xff]  ;;  %5428 = vmatprep.subr.bf16.mxu1 %v5427_v57  ;;  %v5431_v9 = vpack.c.bf16 %v738_v54, %v730_v53  ;;  %v5553_v14 = vpack.c.bf16 %v709_v59, %v701_v58  ;;  %s8791_s17 = sld [smem:[#allocation5 + $0x16]] }
  0x3a   :  { %v710_v56 = vld [vmem:[%s13623_s2 + $0x4e8] sm:$0xff]  ;;  %v49_v61 = vld [vmem:[%s7788_s24] sm:$0xff]  ;;  %44 = vst [vmem:[#allocation2] ss:$8 sm:$0xf] %v43_v60  ;;  %5550 = vmatpush1.bf16.msra.mxu0 %v5549_v62  ;;  %s132_s24 = scalar_lea.vmem %s13622_s1, %s5238_s19  ;;  %s9595_s19 = sld [smem:[#allocation5 + $0x1d]] }
  0x3b   :  { %45 = vst [vmem:[#allocation2] ss:$8 sm:$0xf0] %v43_v60  ;;  %51 = vst [vmem:[#allocation2 + $0x1] ss:$8 sm:$0xf] %v49_v61  ;;  %v5551_v2 = vpack.c.bf16 %v710_v56, %v702_v55 }
  0x3c   :  { %52 = vst [vmem:[#allocation2 + $0x1] ss:$8 sm:$0xf0] %v49_v61  ;;  %v56_v63 = vld [vmem:[%s55_s26] sm:$0xff]  ;;  %v718_v7 = vld [vmem:[%s13623_s2 + $0x528] sm:$0xff]  ;;  %5430 = vmatpush1.bf16.msra.mxu1 %v5429_v6  ;;  %s5228_s26 = sshll.u32 %s5227_s0, 3 }
  0x3d   :  { %v63_v0 = vld [vmem:[%s62_s12] sm:$0xff]  ;;  %58 = vst [vmem:[#allocation2 + $0x2] ss:$8 sm:$0xf] %v56_v63  ;;  %v726_v8 = vld [vmem:[%s13623_s2 + $0x568] sm:$0xff]  ;;  %5552 = vmatprep.subr.bf16.mxu0 %v5551_v2  ;;  %5432 = vmatprep.subr.bf16.mxu1 %v5431_v9  ;;  %s5230_s12 = sshll.u32 %s5229_s10, 3  ;;  %s97_s21 = scalar_lea.vmem %s13622_s1, %s5228_s26 }
  0x3e   :  { %v70_v1 = vld [vmem:[%s69_s8] sm:$0xff]  ;;  %59 = vst [vmem:[#allocation2 + $0x2] ss:$8 sm:$0xf0] %v56_v63  ;;  %v746_v12 = vld [vmem:[%s13623_s2 + $0x608] sm:$0xff]  ;;  %v5555_v15 = vpack.c.bf16 %v726_v8, %v718_v7  ;;  %5554 = vmatpush1.bf16.msra.mxu0 %v5553_v14  ;;  %s104_s27 = scalar_lea.vmem %s13622_s1, %s5230_s12  ;;  %s5232_s0 = sshll.u32 %s8060_s15, 3 }
  0x3f   :  { %65 = vst [vmem:[#allocation2 + $0x3] ss:$8 sm:$0xf] %v63_v0  ;;  %66 = vst [vmem:[#allocation2 + $0x3] ss:$8 sm:$0xf0] %v63_v0  ;;  %s111_s26 = scalar_lea.vmem %s13622_s1, %s5232_s0 }
  0x40   :  { %72 = vst [vmem:[#allocation2 + $0x4] ss:$8 sm:$0xf] %v70_v1  ;;  %73 = vst [vmem:[#allocation2 + $0x4] ss:$8 sm:$0xf0] %v70_v1  ;;  %5556 = vmatprep.subr.bf16.mxu0 %v5555_v15 }
  0x41   :  { %v77_v3 = vld [vmem:[%s7848_s28] sm:$0xff]  ;;  %v754_v13 = vld [vmem:[%s13623_s2 + $0x648] sm:$0xff]  ;;  %s5234_s10 = sshll.u32 %s8062_s16, 3  ;;  %s146_s28 = scalar_lea.vmem %s13622_s1, %s5242_s29 }
  0x42   :  { %v84_v4 = vld [vmem:[%s83_s25] sm:$0xff]  ;;  %79 = vst [vmem:[#allocation2 + $0x5] ss:$8 sm:$0xf] %v77_v3  ;;  %v734_v19 = vld [vmem:[%s13623_s2 + $0x5a8] sm:$0xff]  ;;  %v5435_v21 = vpack.c.bf16 %v754_v13, %v746_v12  ;;  %s8073_s25 = sld [smem:[#allocation5 + $0xc]]  ;;  %s118_s15 = scalar_lea.vmem %s13622_s1, %s5234_s10 }
  0x43   :  { %v91_v5 = vld [vmem:[%s90_s30] sm:$0xff]  ;;  %80 = vst [vmem:[#allocation2 + $0x5] ss:$8 sm:$0xf0] %v77_v3  ;;  %v742_v20 = vld [vmem:[%s13623_s2 + $0x5e8] sm:$0xff]  ;;  %s5245_s30 = sld [smem:[#allocation5 + $0x11]] }
  0x44   :  { %86 = vst [vmem:[#allocation2 + $0x6] ss:$8 sm:$0xf] %v84_v4  ;;  %87 = vst [vmem:[#allocation2 + $0x6] ss:$8 sm:$0xf0] %v84_v4  ;;  %v5559_v29 = vpack.c.bf16 %v742_v20, %v734_v19 }
  0x45   :  { %93 = vst [vmem:[#allocation2 + $0x7] ss:$8 sm:$0xf] %v91_v5  ;;  %94 = vst [vmem:[#allocation2 + $0x7] ss:$8 sm:$0xf0] %v91_v5 }
  0x46   :  { %v729_v10 = vld [vmem:[%s13623_s2 + $0x580] sm:$0xff]  ;;  %v762_v24 = vld [vmem:[%s13623_s2 + $0x688] sm:$0xff]  ;;  %s5253_s10 = sld [smem:[#allocation5 + $0x15]]  ;;  %s5248_s16 = sshll.u32 %s5247_s9, 3 }
  0x47   :  { %v737_v11 = vld [vmem:[%s13623_s2 + $0x5c0] sm:$0xff]  ;;  %v770_v25 = vld [vmem:[%s13623_s2 + $0x6c8] sm:$0xff]  ;;  %s10421_s9 = sld [smem:[#allocation5 + $0x26]] }
  0x48   :  { %v717_v16 = vld [vmem:[%s13623_s2 + $0x520] sm:$0xff]  ;;  %v5433_v18 = vpack.c.bf16 %v737_v11, %v729_v10  ;;  %v750_v32 = vld [vmem:[%s13623_s2 + $0x628] sm:$0xff]  ;;  %v5439_v38 = vpack.c.bf16 %v770_v25, %v762_v24  ;;  %v556_v10 = vld [vmem:[%s13623_s2 + $0x18] sm:$0xff]  ;;  %s5236_s13 = sshll.u32 %s8073_s25, 3  ;;  %s5240_s25 = sshll.u32 %s8083_s11, 3 }
  0x49   :  { %v725_v17 = vld [vmem:[%s13623_s2 + $0x560] sm:$0xff]  ;;  %v758_v36 = vld [vmem:[%s13623_s2 + $0x668] sm:$0xff]  ;;  %v564_v11 = vld [vmem:[%s13623_s2 + $0x58] sm:$0xff]  ;;  %s125_s0 = scalar_lea.vmem %s13622_s1, %s5236_s13  ;;  %s139_s8 = scalar_lea.vmem %s13622_s1, %s5240_s25 }
  0x4a   :  { %v745_v22 = vld [vmem:[%s13623_s2 + $0x600] sm:$0xff]  ;;  %v5557_v26 = vpack.c.bf16 %v725_v17, %v717_v16  ;;  %5434 = vmatpush1.bf16.msra.mxu1 %v5433_v18  ;;  %v778_v42 = vld [vmem:[%s13623_s2 + $0x708] sm:$0xff]  ;;  %v5563_v47 = vpack.c.bf16 %v758_v36, %v750_v32  ;;  %s5246_s29 = sshll.u32 %s5245_s30, 3  ;;  %s167_s13 = scalar_lea.vmem %s13622_s1, %s5248_s16 }
  0x4b   :  { %v753_v23 = vld [vmem:[%s13623_s2 + $0x640] sm:$0xff]  ;;  %5436 = vmatprep.subr.bf16.mxu1 %v5435_v21  ;;  %v786_v43 = vld [vmem:[%s13623_s2 + $0x748] sm:$0xff]  ;;  %s5263_s11 = sld [smem:[#allocation5 + $0x1a]]  ;;  %s13122_s16 = sld [smem:[#allocation5 + $0x3c]] }
  0x4c   :  { %v733_v27 = vld [vmem:[%s13623_s2 + $0x5a0] sm:$0xff]  ;;  %v488_v30 = vld [vmem:[#allocation2 + $0x8] sm:$0xff]  ;;  %v490_v31 = vld [vmem:[#allocation2 + $0x18] sm:$0xff]  ;;  %v5437_v33 = vpack.c.bf16 %v753_v23, %v745_v22  ;;  %5558 = vmatpush1.bf16.msra.mxu0 %v5557_v26  ;;  %v5443_v53 = vpack.c.bf16 %v786_v43, %v778_v42  ;;  %v8005_v22 = vpack.c.bf16 %v564_v11, %v556_v10  ;;  %s5254_s30 = sshll.u32 %s5253_s10, 3 }
  0x4d   :  { %v741_v28 = vld [vmem:[%s13623_s2 + $0x5e0] sm:$0xff]  ;;  %v5340_v34 = vmul.f32 -1.442695, %v488_v30  ;;  %v5342_v35 = vmul.f32 -1.442695, %v490_v31  ;;  %v489_v41 = vld [vmem:[#allocation2 + $0x10] sm:$0xff]  ;;  %5560 = vmatprep.subr.bf16.mxu0 %v5559_v29  ;;  %s188_s23 = scalar_lea.vmem %s13622_s1, %s5254_s30 }
  0x4e   :  { %v487_v37 = vld [vmem:[#allocation2] sm:$0xff]  ;;  %v5561_v44 = vpack.c.bf16 %v741_v28, %v733_v27  ;;  %v5341_v46 = vmul.f32 -1.442695, %v489_v41  ;;  %5438 = vmatpush1.bf16.msra.mxu1 %v5437_v33  ;;  %v766_v51 = vld [vmem:[%s13623_s2 + $0x6a8] sm:$0xff]  ;;  %v494_v56 = vld [vmem:[#allocation2 + $0x38] sm:$0xff] }
  0x4f   :  { %v761_v39 = vld [vmem:[%s13623_s2 + $0x680] sm:$0xff]  ;;  %7244 = vpow2.f32 %v5340_v34  ;;  %v5339_v45 = vmul.f32 -1.442695, %v487_v37  ;;  %v774_v52 = vld [vmem:[%s13623_s2 + $0x6e8] sm:$0xff]  ;;  %5440 = vmatprep.subr.bf16.mxu1 %v5439_v38  ;;  %v493_v60 = vld [vmem:[#allocation2 + $0x30] sm:$0xff] }
  0x50   :  { %v769_v40 = vld [vmem:[%s13623_s2 + $0x6c0] sm:$0xff]  ;;  %7246 = vpow2.f32 %v5342_v35  ;;  %v794_v57 = vld [vmem:[%s13623_s2 + $0x788] sm:$0xff]  ;;  %5562 = vmatpush1.bf16.msra.mxu0 %v5561_v44  ;;  %v5567_v61 = vpack.c.bf16 %v774_v52, %v766_v51  ;;  %v5344_v2 = vmul.f32 -1.442695, %v494_v56  ;;  %v5343_v9 = vmul.f32 -1.442695, %v493_v60 }
  0x51   :  { %v749_v48 = vld [vmem:[%s13623_s2 + $0x620] sm:$0xff]  ;;  %v5441_v50 = vpack.c.bf16 %v769_v40, %v761_v39  ;;  %7248 = vpow2.f32 %v5339_v45  ;;  %v802_v58 = vld [vmem:[%s13623_s2 + $0x7c8] sm:$0xff]  ;;  %5564 = vmatprep.subr.bf16.mxu0 %v5563_v47  ;;  %v555_v51 = vld [vmem:[%s13623_s2 + $0x10] sm:$0xff] }
  0x52   :  { %v757_v49 = vld [vmem:[%s13623_s2 + $0x660] sm:$0xff]  ;;  %7250 = vpow2.f32 %v5341_v46  ;;  %v492_v1 = vld [vmem:[#allocation2 + $0x28] sm:$0xff]  ;;  %v5447_v5 = vpack.c.bf16 %v802_v58, %v794_v57  ;;  %v563_v52 = vld [vmem:[%s13623_s2 + $0x50] sm:$0xff] }
  0x53   :  { %v777_v54 = vld [vmem:[%s13623_s2 + $0x700] sm:$0xff]  ;;  %v5565_v59 = vpack.c.bf16 %v757_v49, %v749_v48  ;;  %5442 = vmatpush1.bf16.msra.mxu1 %v5441_v50  ;;  %v782_v3 = vld [vmem:[%s13623_s2 + $0x728] sm:$0xff]  ;;  %7252 = vtanh.f32 %v492_v1  ;;  %v580_v56 = vld [vmem:[%s13623_s2 + $0xd8] sm:$0xff]  ;;  %v8035_v58 = vpack.c.bf16 %v563_v52, %v555_v51 }
  0x54   :  { %v785_v55 = vld [vmem:[%s13623_s2 + $0x740] sm:$0xff]  ;;  %v790_v4 = vld [vmem:[%s13623_s2 + $0x768] sm:$0xff]  ;;  %5444 = vmatprep.subr.bf16.mxu1 %v5443_v53  ;;  %7254 = vpow2.f32 %v5344_v2  ;;  %v611_v10 = vld [vmem:[%s13623_s2 + $0x1d0] sm:$0xff] }
  0x55   :  { %v765_v62 = vld [vmem:[%s13623_s2 + $0x6a0] sm:$0xff]  ;;  %v5445_v0 = vpack.c.bf16 %v785_v55, %v777_v54  ;;  %5566 = vmatpush1.bf16.msra.mxu0 %v5565_v59  ;;  %v5571_v13 = vpack.c.bf16 %v790_v4, %v782_v3  ;;  %v798_v18 = vld [vmem:[%s13623_s2 + $0x7a8] sm:$0xff]  ;;  %v572_v55 = vld [vmem:[%s13623_s2 + $0x98] sm:$0xff] }
  0x56   :  { %v773_v63 = vld [vmem:[%s13623_s2 + $0x6e0] sm:$0xff]  ;;  %5568 = vmatprep.subr.bf16.mxu0 %v5567_v61  ;;  %v806_v19 = vld [vmem:[%s13623_s2 + $0x7e8] sm:$0xff]  ;;  %v8040_v60 = vpack.c.bf16 %v580_v56, %v572_v55  ;;  %v571_v61 = vld [vmem:[%s13623_s2 + $0x90] sm:$0xff] }
  0x57   :  { %v793_v6 = vld [vmem:[%s13623_s2 + $0x780] sm:$0xff]  ;;  %v5569_v12 = vpack.c.bf16 %v773_v63, %v765_v62  ;;  %5446 = vmatpush1.bf16.msra.mxu1 %v5445_v0  ;;  %v5575_v26 = vpack.c.bf16 %v806_v19, %v798_v18  ;;  %v579_v62 = vld [vmem:[%s13623_s2 + $0xd0] sm:$0xff]  ;;  %v588_v63 = vld [vmem:[%s13623_s2 + $0x118] sm:$0xff] }
  0x58   :  { %v801_v7 = vld [vmem:[%s13623_s2 + $0x7c0] sm:$0xff]  ;;  %5448 = vmatprep.subr.bf16.mxu1 %v5447_v5  ;;  %v596_v0 = vld [vmem:[%s13623_s2 + $0x158] sm:$0xff]  ;;  %v8057_v1 = vpack.c.bf16 %v579_v62, %v571_v61  ;;  %v587_v3 = vld [vmem:[%s13623_s2 + $0x110] sm:$0xff] }
  0x59   :  { %v491_v8 = vld [vmem:[#allocation2 + $0x20] sm:$0xff]  ;;  %v7245_v16 = vpop.eup %7244  ;;  %v5449_v17 = vpack.c.bf16 %v801_v7, %v793_v6  ;;  %5570 = vmatpush1.bf16.msra.mxu0 %v5569_v12  ;;  %v8065_v2 = vpack.c.bf16 %v596_v0, %v588_v63  ;;  %v595_v4 = vld [vmem:[%s13623_s2 + $0x150] sm:$0xff]  ;;  %v604_v5 = vld [vmem:[%s13623_s2 + $0x198] sm:$0xff] }
  0x5a   :  { %v781_v14 = vld [vmem:[%s13623_s2 + $0x720] sm:$0xff]  ;;  %v7247_v20 = vpop.eup %7246  ;;  %v502_v21 = vadd.f32 1.0, %v7245_v16  ;;  %7256 = vtanh.f32 %v491_v8  ;;  %5572 = vmatprep.subr.bf16.mxu0 %v5571_v13  ;;  %v612_v6 = vld [vmem:[%s13623_s2 + $0x1d8] sm:$0xff]  ;;  %v8088_v7 = vpack.c.bf16 %v595_v4, %v587_v3  ;;  %v619_v16 = vld [vmem:[%s13623_s2 + $0x210] sm:$0xff] }
  0x5b   :  { %v789_v15 = vld [vmem:[%s13623_s2 + $0x760] sm:$0xff]  ;;  %v514_v23 = vadd.f32 1.0, %v7247_v20  ;;  %7258 = vpow2.f32 %v5343_v9  ;;  %v7249_v25 = vpop.eup %7248  ;;  %5450 = vmatpush1.bf16.msra.mxu1 %v5449_v17  ;;  %v8091_v8 = vpack.c.bf16 %v612_v6, %v604_v5  ;;  %v603_v9 = vld [vmem:[%s13623_s2 + $0x190] sm:$0xff]  ;;  %v620_v11 = vld [vmem:[%s13623_s2 + $0x218] sm:$0xff] }
  0x5c   :  { %v5573_v24 = vpack.c.bf16 %v789_v15, %v781_v14  ;;  %7260 = vrcp.f32 %v502_v21  ;;  %v797_v27 = vld [vmem:[%s13623_s2 + $0x7a0] sm:$0xff]  ;;  %v7251_v29 = vpop.eup %7250  ;;  %v501_v30 = vadd.f32 1.0, %v7249_v25  ;;  %5452 = vmatprep.subr.bf16.mxu1 %v8005_v22  ;;  %v628_v12 = vld [vmem:[%s13623_s2 + $0x258] sm:$0xff]  ;;  %v8114_v15 = vpack.c.bf16 %v611_v10, %v603_v9  ;;  %v627_v18 = vld [vmem:[%s13623_s2 + $0x250] sm:$0xff] }
  0x5d   :  { %v805_v28 = vld [vmem:[%s13623_s2 + $0x7e0] sm:$0xff]  ;;  %7262 = vrcp.f32 %v514_v23  ;;  %v513_v31 = vadd.f32 1.0, %v7251_v29  ;;  %v7253_v33 = vpop.eup %7252  ;;  %v8126_v17 = vpack.c.bf16 %v628_v12, %v620_v11  ;;  %v636_v21 = vld [vmem:[%s13623_s2 + $0x298] sm:$0xff]  ;;  %v643_v29 = vld [vmem:[%s13623_s2 + $0x2d0] sm:$0xff] }
  0x5e   :  { %7264 = vrcp.f32 %v501_v30  ;;  %5574 = vmatpush1.bf16.msra.mxu0 %v5573_v24  ;;  %v5577_v32 = vpack.c.bf16 %v805_v28, %v797_v27  ;;  %v7255_v34 = vpop.eup %7254  ;;  %v98_v13 = vld [vmem:[%s97_s21] sm:$0xff]  ;;  %v644_v23 = vld [vmem:[%s13623_s2 + $0x2d8] sm:$0xff]  ;;  %v635_v27 = vld [vmem:[%s13623_s2 + $0x290] sm:$0xff]  ;;  %s5243_s21 = sld [smem:[#allocation5 + $0x10]] }
  0x5f   :  { %7266 = vrcp.f32 %v513_v31  ;;  %5576 = vmatprep.subr.bf16.mxu0 %v5575_v26  ;;  %v528_v38 = vadd.f32 1.0, %v7255_v34  ;;  %v105_v14 = vld [vmem:[%s104_s27] sm:$0xff]  ;;  %100 = vst [vmem:[#allocation2 + $0x40] ss:$8 sm:$0xf] %v98_v13  ;;  %v8148_v26 = vpack.c.bf16 %v627_v18, %v619_v16  ;;  %v8160_v28 = vpack.c.bf16 %v644_v23, %v636_v21  ;;  %v691_v51 = vld [vmem:[%s13623_s2 + $0x450] sm:$0xff] }
  0x60   :  { %107 = vst [vmem:[#allocation2 + $0x41] ss:$8 sm:$0xf] %v105_v14  ;;  %101 = vst [vmem:[#allocation2 + $0x40] ss:$8 sm:$0xf0] %v98_v13  ;;  %v8172_v34 = vpack.c.bf16 %v643_v29, %v635_v27 }
  0x61   :  { %7268 = vrcp.f32 %v528_v38  ;;  %108 = vst [vmem:[#allocation2 + $0x41] ss:$8 sm:$0xf0] %v105_v14  ;;  %v112_v19 = vld [vmem:[%s111_s26] sm:$0xff]  ;;  %v668_v38 = vld [vmem:[%s13623_s2 + $0x398] sm:$0xff]  ;;  %v707_v61 = vld [vmem:[%s13623_s2 + $0x4d0] sm:$0xff] }
  0x62   :  { %5578 = vmatpush1.bf16.msra.mxu0 %v5577_v32  ;;  %v119_v20 = vld [vmem:[%s118_s15] sm:$0xff]  ;;  %114 = vst [vmem:[#allocation2 + $0x42] ss:$8 sm:$0xf] %v112_v19  ;;  %v652_v32 = vld [vmem:[%s13623_s2 + $0x318] sm:$0xff]  ;;  %v715_v4 = vld [vmem:[%s13623_s2 + $0x510] sm:$0xff]  ;;  %s160_s15 = scalar_lea.vmem %s13622_s1, %s5246_s29 }
  0x63   :  { %121 = vst [vmem:[#allocation2 + $0x43] ss:$8 sm:$0xf] %v119_v20  ;;  %115 = vst [vmem:[#allocation2 + $0x42] ss:$8 sm:$0xf0] %v112_v19 }
  0x64   :  { %v7257_v35 = vpop.eup %7256  ;;  %122 = vst [vmem:[#allocation2 + $0x43] ss:$8 sm:$0xf0] %v119_v20  ;;  %v126_v24 = vld [vmem:[%s125_s0] sm:$0xff]  ;;  %v700_v52 = vld [vmem:[%s13623_s2 + $0x498] sm:$0xff]  ;;  %v723_v5 = vld [vmem:[%s13623_s2 + $0x550] sm:$0xff] }
  0x65   :  { %v7259_v36 = vpop.eup %7258  ;;  %v133_v25 = vld [vmem:[%s132_s24] sm:$0xff]  ;;  %128 = vst [vmem:[#allocation2 + $0x44] ss:$8 sm:$0xf] %v126_v24  ;;  %v716_v62 = vld [vmem:[%s13623_s2 + $0x518] sm:$0xff]  ;;  %v8262_v10 = vpack.c.bf16 %v723_v5, %v715_v4  ;;  %v731_v12 = vld [vmem:[%s13623_s2 + $0x590] sm:$0xff] }
  0x66   :  { %v7261_v37 = vpop.eup %7260  ;;  %v527_v43 = vadd.f32 1.0, %v7259_v36  ;;  %135 = vst [vmem:[#allocation2 + $0x45] ss:$8 sm:$0xf] %v133_v25  ;;  %v140_v30 = vld [vmem:[%s139_s8] sm:$0xff]  ;;  %v651_v36 = vld [vmem:[%s13623_s2 + $0x310] sm:$0xff] }
  0x67   :  { %v7263_v39 = vpop.eup %7262  ;;  %v536_v40 = vmul.f32 %v7261_v37, %v7253_v33  ;;  %129 = vst [vmem:[#allocation2 + $0x44] ss:$8 sm:$0xf0] %v126_v24  ;;  %136 = vst [vmem:[#allocation2 + $0x45] ss:$8 sm:$0xf0] %v133_v25 }
  0x68   :  { %v534_v41 = vmul.f32 0.0, %v7263_v39  ;;  %v7265_v42 = vpop.eup %7264  ;;  %v147_v31 = vld [vmem:[%s146_s28] sm:$0xff]  ;;  %v660_v33 = vld [vmem:[%s13623_s2 + $0x358] sm:$0xff]  ;;  %142 = vst [vmem:[#allocation2 + $0x46] ss:$8 sm:$0xf] %v140_v30 }
  0x69   :  { %v7267_v44 = vpop.eup %7266  ;;  %v535_v46 = vmul.f32 %v7265_v42, %v7257_v35  ;;  %149 = vst [vmem:[#allocation2 + $0x47] ss:$8 sm:$0xf] %v147_v31  ;;  %143 = vst [vmem:[#allocation2 + $0x46] ss:$8 sm:$0xf0] %v140_v30  ;;  %v8175_v35 = vpack.c.bf16 %v660_v33, %v652_v32 }
  0x6a   :  { %v8014_v45 = vadd.f32 %v536_v40, %v534_v41  ;;  %v533_v47 = vmul.f32 0.0, %v7267_v44  ;;  %150 = vst [vmem:[#allocation2 + $0x47] ss:$8 sm:$0xf0] %v147_v31  ;;  %v659_v37 = vld [vmem:[%s13623_s2 + $0x350] sm:$0xff]  ;;  %v676_v39 = vld [vmem:[%s13623_s2 + $0x3d8] sm:$0xff] }
  0x6b   :  { %v7269_v49 = vpop.eup %7268  ;;  %v8190_v40 = vpack.c.bf16 %v659_v37, %v651_v36  ;;  %v8193_v41 = vpack.c.bf16 %v676_v39, %v668_v38  ;;  %v667_v42 = vld [vmem:[%s13623_s2 + $0x390] sm:$0xff]  ;;  %v684_v44 = vld [vmem:[%s13623_s2 + $0x418] sm:$0xff]  ;;  %s5249_s27 = sld [smem:[#allocation5 + $0x13]]  ;;  %s5251_s0 = sld [smem:[#allocation5 + $0x14]] }
  0x6c   :  { %7270 = vtanh.f32 %v8014_v45  ;;  %v8017_v48 = vadd.f32 %v535_v46, %v533_v47  ;;  %v692_v46 = vld [vmem:[%s13623_s2 + $0x458] sm:$0xff]  ;;  %v739_v13 = vld [vmem:[%s13623_s2 + $0x5d0] sm:$0xff]  ;;  %s8793_s24 = sld [smem:[#allocation5 + $0x17]]  ;;  %s5244_s25 = sshll.u32 %s5243_s21, 3 }
  0x6d   :  { %7272 = vrcp.f32 %v527_v43  ;;  %v675_v43 = vld [vmem:[%s13623_s2 + $0x3d0] sm:$0xff]  ;;  %v724_v63 = vld [vmem:[%s13623_s2 + $0x558] sm:$0xff]  ;;  %v8280_v18 = vpack.c.bf16 %v739_v13, %v731_v12  ;;  %s153_s26 = scalar_lea.vmem %s13622_s1, %s5244_s25 }
  0x6e   :  { %7274 = vtanh.f32 %v8017_v48  ;;  %v8208_v47 = vpack.c.bf16 %v675_v43, %v667_v42  ;;  %v8247_v3 = vpack.c.bf16 %v724_v63, %v716_v62  ;;  %v732_v6 = vld [vmem:[%s13623_s2 + $0x598] sm:$0xff]  ;;  %v747_v20 = vld [vmem:[%s13623_s2 + $0x610] sm:$0xff] }
  0x6f   :  { %v740_v9 = vld [vmem:[%s13623_s2 + $0x5d8] sm:$0xff]  ;;  %v755_v21 = vld [vmem:[%s13623_s2 + $0x650] sm:$0xff] }
  0x70   :  { %v8265_v11 = vpack.c.bf16 %v740_v9, %v732_v6  ;;  %v748_v14 = vld [vmem:[%s13623_s2 + $0x618] sm:$0xff]  ;;  %v8298_v25 = vpack.c.bf16 %v755_v21, %v747_v20  ;;  %v763_v29 = vld [vmem:[%s13623_s2 + $0x690] sm:$0xff] }
  0x71   :  { %v756_v16 = vld [vmem:[%s13623_s2 + $0x658] sm:$0xff]  ;;  %v771_v30 = vld [vmem:[%s13623_s2 + $0x6d0] sm:$0xff]  ;;  %s5250_s28 = sshll.u32 %s5249_s27, 3  ;;  %s5252_s21 = sshll.u32 %s5251_s0, 3 }
  0x72   :  { %v8283_v19 = vpack.c.bf16 %v756_v16, %v748_v14  ;;  %v764_v23 = vld [vmem:[%s13623_s2 + $0x698] sm:$0xff]  ;;  %v8316_v33 = vpack.c.bf16 %v771_v30, %v763_v29  ;;  %v779_v37 = vld [vmem:[%s13623_s2 + $0x710] sm:$0xff]  ;;  %s174_s20 = scalar_lea.vmem %s13622_s1, %s5250_s28  ;;  %s181_s25 = scalar_lea.vmem %s13622_s1, %s5252_s21 }
  0x73   :  { %v772_v24 = vld [vmem:[%s13623_s2 + $0x6d8] sm:$0xff]  ;;  %v787_v38 = vld [vmem:[%s13623_s2 + $0x750] sm:$0xff]  ;;  %s5258_s12 = sshll.u32 %s8793_s24, 3  ;;  %s5261_s24 = sld [smem:[#allocation5 + $0x19]] }
  0x74   :  { %v8301_v27 = vpack.c.bf16 %v772_v24, %v764_v23  ;;  %v780_v31 = vld [vmem:[%s13623_s2 + $0x718] sm:$0xff]  ;;  %v8334_v43 = vpack.c.bf16 %v787_v38, %v779_v37  ;;  %v567_v62 = vld [vmem:[%s13623_s2 + $0x70] sm:$0xff]  ;;  %s202_s28 = scalar_lea.vmem %s13622_s1, %s5258_s12  ;;  %s5266_s12 = sshll.u32 %s5265_s22, 3 }
  0x75   :  { %v788_v32 = vld [vmem:[%s13623_s2 + $0x758] sm:$0xff]  ;;  %v575_v9 = vld [vmem:[%s13623_s2 + $0xb0] sm:$0xff]  ;;  %s5281_s22 = sld [smem:[#allocation5 + $0x23]]  ;;  %s5332_s0 = sshll.u32 %s13122_s16, 3 }
  0x76   :  { %v7271_v50 = vpop.eup %7270  ;;  %v8319_v36 = vpack.c.bf16 %v788_v32, %v780_v31  ;;  %v796_v39 = vld [vmem:[%s13623_s2 + $0x798] sm:$0xff]  ;;  %v583_v12 = vld [vmem:[%s13623_s2 + $0xf0] sm:$0xff] }
  0x77   :  { %v7273_v53 = vpop.eup %7272  ;;  %v8026_v54 = vmul.f32 %v7271_v50, %v7269_v49  ;;  %v8211_v49 = vpack.c.bf16 %v692_v46, %v684_v44  ;;  %v683_v50 = vld [vmem:[%s13623_s2 + $0x410] sm:$0xff]  ;;  %v804_v42 = vld [vmem:[%s13623_s2 + $0x7d8] sm:$0xff]  ;;  %v5585_v16 = vpack.c.bf16 %v583_v12, %v575_v9 }
  0x78   :  { %v7275_v57 = vpop.eup %7274  ;;  %v8226_v55 = vpack.c.bf16 %v691_v51, %v683_v50  ;;  %v8337_v44 = vpack.c.bf16 %v804_v42, %v796_v39  ;;  %v795_v46 = vld [vmem:[%s13623_s2 + $0x790] sm:$0xff]  ;;  %v560_v51 = vld [vmem:[%s13623_s2 + $0x38] sm:$0xff] }
  0x79   :  { %873 = vmatprep.mubr.f32.mxu1 %v8026_v54  ;;  %1015 = vmatprep.mubr.f32.mxu0 %v8026_v54  ;;  %v8038_v59 = vmul.f32 %v7275_v57, %v7273_v53  ;;  %v708_v53 = vld [vmem:[%s13623_s2 + $0x4d8] sm:$0xff]  ;;  %v699_v57 = vld [vmem:[%s13623_s2 + $0x490] sm:$0xff]  ;;  %s5262_s30 = sshll.u32 %s5261_s24, 3  ;;  %s5270_s24 = sshll.u32 %s9595_s19, 3 }
  0x7a   :  { %v8229_v56 = vpack.c.bf16 %v708_v53, %v700_v52  ;;  %v8244_v0 = vpack.c.bf16 %v707_v61, %v699_v57  ;;  %v803_v50 = vld [vmem:[%s13623_s2 + $0x7d0] sm:$0xff]  ;;  %v568_v52 = vld [vmem:[%s13623_s2 + $0x78] sm:$0xff]  ;;  %s244_s27 = scalar_lea.vmem %s13622_s1, %s5270_s24  ;;  %s5277_s24 = sld [smem:[#allocation5 + $0x21]] }
  0x7b   :  { %874 = vmatmul.mubr.f32.vlgmr.msra.gmra.mrb[0].mxu1 %v8038_v59  ;;  %1016 = vmatmul.mubr.f32.vlgmr.msra.gmra.mrb[0].mxu0 %v8038_v59  ;;  %v8352_v53 = vpack.c.bf16 %v803_v50, %v795_v46  ;;  %v8355_v57 = vpack.c.bf16 %v568_v52, %v560_v51  ;;  %v559_v61 = vld [vmem:[%s13623_s2 + $0x30] sm:$0xff]  ;;  %v576_v63 = vld [vmem:[%s13623_s2 + $0xb8] sm:$0xff] }
  0x7c   :  { %5454 = vmatpush1.bf16.msra.mxu1 %v8035_v58  ;;  %944 = vmatprep.mubr.f32.mxu1 %v8026_v54  ;;  %v584_v4 = vld [vmem:[%s13623_s2 + $0xf8] sm:$0xff]  ;;  %v8370_v5 = vpack.c.bf16 %v567_v62, %v559_v61  ;;  %v591_v21 = vld [vmem:[%s13623_s2 + $0x130] sm:$0xff] }
  0x7d   :  { %5456 = vmatprep.subr.bf16.mxu1 %v8040_v60  ;;  %v8373_v6 = vpack.c.bf16 %v584_v4, %v576_v63  ;;  %v592_v13 = vld [vmem:[%s13623_s2 + $0x138] sm:$0xff]  ;;  %v599_v23 = vld [vmem:[%s13623_s2 + $0x170] sm:$0xff] }
  0x7e   :  { %v600_v14 = vld [vmem:[%s13623_s2 + $0x178] sm:$0xff]  ;;  %v5589_v30 = vpack.c.bf16 %v599_v23, %v591_v21  ;;  %v607_v32 = vld [vmem:[%s13623_s2 + $0x1b0] sm:$0xff] }
  0x7f   :  { %v5587_v20 = vpack.c.bf16 %v600_v14, %v592_v13  ;;  %v608_v24 = vld [vmem:[%s13623_s2 + $0x1b8] sm:$0xff]  ;;  %v615_v37 = vld [vmem:[%s13623_s2 + $0x1f0] sm:$0xff] }
  0x80   :  { %5458 = vmatpush1.bf16.msra.mxu1 %v8057_v1  ;;  %v616_v29 = vld [vmem:[%s13623_s2 + $0x1f8] sm:$0xff]  ;;  %v5593_v42 = vpack.c.bf16 %v615_v37, %v607_v32  ;;  %v623_v50 = vld [vmem:[%s13623_s2 + $0x230] sm:$0xff] }
  0x81   :  { %5460 = vmatprep.subr.bf16.mxu1 %v8065_v2  ;;  %v5591_v31 = vpack.c.bf16 %v616_v29, %v608_v24  ;;  %v624_v38 = vld [vmem:[%s13623_s2 + $0x238] sm:$0xff]  ;;  %v631_v51 = vld [vmem:[%s13623_s2 + $0x270] sm:$0xff] }
  0x82   :  { %v632_v39 = vld [vmem:[%s13623_s2 + $0x278] sm:$0xff]  ;;  %v5597_v62 = vpack.c.bf16 %v631_v51, %v623_v50  ;;  %v639_v4 = vld [vmem:[%s13623_s2 + $0x2b0] sm:$0xff] }
  0x83   :  { %v5595_v46 = vpack.c.bf16 %v632_v39, %v624_v38  ;;  %v640_v52 = vld [vmem:[%s13623_s2 + $0x2b8] sm:$0xff]  ;;  %v647_v9 = vld [vmem:[%s13623_s2 + $0x2f0] sm:$0xff] }
  0x84   :  { %5462 = vmatpush1.bf16.msra.mxu1 %v8088_v7  ;;  %v648_v61 = vld [vmem:[%s13623_s2 + $0x2f8] sm:$0xff]  ;;  %v5601_v14 = vpack.c.bf16 %v647_v9, %v639_v4  ;;  %v663_v21 = vld [vmem:[%s13623_s2 + $0x370] sm:$0xff] }
  0x85   :  { %5464 = vmatprep.subr.bf16.mxu1 %v8091_v8  ;;  %v5599_v63 = vpack.c.bf16 %v648_v61, %v640_v52  ;;  %v656_v12 = vld [vmem:[%s13623_s2 + $0x338] sm:$0xff]  ;;  %v679_v32 = vld [vmem:[%s13623_s2 + $0x3f0] sm:$0xff] }
  0x86   :  { %v664_v13 = vld [vmem:[%s13623_s2 + $0x378] sm:$0xff]  ;;  %v695_v50 = vld [vmem:[%s13623_s2 + $0x470] sm:$0xff] }
  0x87   :  { %v672_v23 = vld [vmem:[%s13623_s2 + $0x3b8] sm:$0xff]  ;;  %v711_v4 = vld [vmem:[%s13623_s2 + $0x4f0] sm:$0xff] }
  0x88   :  { %5466 = vmatpush1.bf16.msra.mxu1 %v8114_v15  ;;  %v680_v24 = vld [vmem:[%s13623_s2 + $0x3f8] sm:$0xff] }
  0x89   :  { %5468 = vmatprep.subr.bf16.mxu1 %v8126_v17  ;;  %v688_v37 = vld [vmem:[%s13623_s2 + $0x438] sm:$0xff] }
  0x8a   :  { %v696_v38 = vld [vmem:[%s13623_s2 + $0x478] sm:$0xff] }
  0x8b   :  { %v704_v51 = vld [vmem:[%s13623_s2 + $0x4b8] sm:$0xff] }
  0x8c   :  { %5470 = vmatpush1.bf16.msra.mxu1 %v8148_v26  ;;  %v712_v52 = vld [vmem:[%s13623_s2 + $0x4f8] sm:$0xff] }
  0x8d   :  { %5472 = vmatprep.subr.bf16.mxu1 %v8160_v28  ;;  %v720_v9 = vld [vmem:[%s13623_s2 + $0x538] sm:$0xff] }
  0x90   :  { %5474 = vmatpush1.bf16.msra.mxu1 %v8172_v34 }
  0x91   :  { %5476 = vmatprep.subr.bf16.mxu1 %v8175_v35 }
  0x94   :  { %5478 = vmatpush1.bf16.msra.mxu1 %v8190_v40 }
  0x95   :  { %5480 = vmatprep.subr.bf16.mxu1 %v8193_v41 }
  0x98   :  { %5482 = vmatpush1.bf16.msra.mxu1 %v8208_v47 }
  0x99   :  { %5484 = vmatprep.subr.bf16.mxu1 %v8211_v49 }
  0x9c   :  { %5486 = vmatpush1.bf16.msra.mxu1 %v8226_v55 }
  0x9d   :  { %5488 = vmatprep.subr.bf16.mxu1 %v8229_v56 }
  0xa0   :  { %5490 = vmatpush1.bf16.msra.mxu1 %v8244_v0 }
  0xa1   :  { %5492 = vmatprep.subr.bf16.mxu1 %v8247_v3 }
  0xa4   :  { %5494 = vmatpush1.bf16.msra.mxu1 %v8262_v10 }
  0xa5   :  { %5496 = vmatprep.subr.bf16.mxu1 %v8265_v11 }
  0xa8   :  { %5498 = vmatpush1.bf16.msra.mxu1 %v8280_v18 }
  0xa9   :  { %5500 = vmatprep.subr.bf16.mxu1 %v8283_v19 }
  0xac   :  { %5502 = vmatpush1.bf16.msra.mxu1 %v8298_v25 }
  0xad   :  { %5504 = vmatprep.subr.bf16.mxu1 %v8301_v27 }
  0xb0   :  { %5506 = vmatpush1.bf16.msra.mxu1 %v8316_v33 }
  0xb1   :  { %5508 = vmatprep.subr.bf16.mxu1 %v8319_v36 }
  0xb4   :  { %5510 = vmatpush1.bf16.msra.mxu1 %v8334_v43 }
  0xb5   :  { %5512 = vmatprep.subr.bf16.mxu1 %v8337_v44 }
  0xb8   :  { %5514 = vmatpush1.bf16.msra.mxu1 %v8352_v53 }
  0xb9   :  { %5580 = vmatprep.subr.bf16.mxu1 %v8355_v57 }
  0xbb   :  { %945 = vmatmul.mubr.f32.vlgmr.msra.gmra.mrb[2].mxu1 %v8038_v59 }
  0xbc   :  { %5582 = vmatpush1.bf16.msra.mxu1 %v8370_v5  ;;  %1086 = vmatprep.mubr.f32.mxu1 %v8026_v54 }
  0xbd   :  { %5584 = vmatprep.subr.bf16.mxu1 %v8373_v6 }
  0xc0   :  { %5586 = vmatpush1.bf16.msra.mxu1 %v5585_v16  ;;  %v5603_v16 = vpack.c.bf16 %v664_v13, %v656_v12  ;;  %v728_v12 = vld [vmem:[%s13623_s2 + $0x578] sm:$0xff] }
  0xc1   :  { %5588 = vmatprep.subr.bf16.mxu1 %v5587_v20  ;;  %v655_v20 = vld [vmem:[%s13623_s2 + $0x330] sm:$0xff] }
  0xc2   :  { %v5605_v29 = vpack.c.bf16 %v663_v21, %v655_v20  ;;  %v727_v20 = vld [vmem:[%s13623_s2 + $0x570] sm:$0xff]  ;;  %v736_v21 = vld [vmem:[%s13623_s2 + $0x5b8] sm:$0xff] }
  0xc4   :  { %5590 = vmatpush1.bf16.msra.mxu1 %v5589_v30  ;;  %v5607_v30 = vpack.c.bf16 %v680_v24, %v672_v23  ;;  %v744_v23 = vld [vmem:[%s13623_s2 + $0x5f8] sm:$0xff] }
  0xc5   :  { %5592 = vmatprep.subr.bf16.mxu1 %v5591_v31  ;;  %v671_v31 = vld [vmem:[%s13623_s2 + $0x3b0] sm:$0xff] }
  0xc6   :  { %v5609_v39 = vpack.c.bf16 %v679_v32, %v671_v31  ;;  %v743_v31 = vld [vmem:[%s13623_s2 + $0x5f0] sm:$0xff]  ;;  %v752_v32 = vld [vmem:[%s13623_s2 + $0x638] sm:$0xff] }
  0xc8   :  { %5594 = vmatpush1.bf16.msra.mxu1 %v5593_v42  ;;  %v5611_v42 = vpack.c.bf16 %v696_v38, %v688_v37  ;;  %v760_v37 = vld [vmem:[%s13623_s2 + $0x678] sm:$0xff] }
  0xc9   :  { %5596 = vmatprep.subr.bf16.mxu1 %v5595_v46  ;;  %v687_v46 = vld [vmem:[%s13623_s2 + $0x430] sm:$0xff] }
  0xca   :  { %v5613_v61 = vpack.c.bf16 %v695_v50, %v687_v46  ;;  %v759_v46 = vld [vmem:[%s13623_s2 + $0x670] sm:$0xff]  ;;  %v768_v50 = vld [vmem:[%s13623_s2 + $0x6b8] sm:$0xff] }
  0xcc   :  { %5598 = vmatpush1.bf16.msra.mxu1 %v5597_v62  ;;  %v5615_v62 = vpack.c.bf16 %v712_v52, %v704_v51  ;;  %v776_v51 = vld [vmem:[%s13623_s2 + $0x6f8] sm:$0xff] }
  0xcd   :  { %5600 = vmatprep.subr.bf16.mxu1 %v5599_v63  ;;  %v703_v63 = vld [vmem:[%s13623_s2 + $0x4b0] sm:$0xff] }
  0xce   :  { %v5617_v13 = vpack.c.bf16 %v711_v4, %v703_v63  ;;  %v775_v63 = vld [vmem:[%s13623_s2 + $0x6f0] sm:$0xff]  ;;  %v784_v4 = vld [vmem:[%s13623_s2 + $0x738] sm:$0xff] }
  0xd0   :  { %5602 = vmatpush1.bf16.msra.mxu1 %v5601_v14  ;;  %v5619_v14 = vpack.c.bf16 %v728_v12, %v720_v9  ;;  %v792_v9 = vld [vmem:[%s13623_s2 + $0x778] sm:$0xff] }
  0xd1   :  { %5604 = vmatprep.subr.bf16.mxu1 %v5603_v16  ;;  %v719_v16 = vld [vmem:[%s13623_s2 + $0x530] sm:$0xff] }
  0xd2   :  { %v5621_v24 = vpack.c.bf16 %v727_v20, %v719_v16  ;;  %v791_v16 = vld [vmem:[%s13623_s2 + $0x770] sm:$0xff]  ;;  %v800_v20 = vld [vmem:[%s13623_s2 + $0x7b8] sm:$0xff] }
  0xd4   :  { %5606 = vmatpush1.bf16.msra.mxu1 %v5605_v29  ;;  %v5623_v29 = vpack.c.bf16 %v744_v23, %v736_v21  ;;  %v808_v21 = vld [vmem:[%s13623_s2 + $0x7f8] sm:$0xff] }
  0xd5   :  { %5608 = vmatprep.subr.bf16.mxu1 %v5607_v30  ;;  %v735_v30 = vld [vmem:[%s13623_s2 + $0x5b0] sm:$0xff] }
  0xd6   :  { %v5625_v38 = vpack.c.bf16 %v743_v31, %v735_v30  ;;  %v807_v30 = vld [vmem:[%s13623_s2 + $0x7f0] sm:$0xff] }
  0xd8   :  { %5610 = vmatpush1.bf16.msra.mxu1 %v5609_v39  ;;  %v5627_v39 = vpack.c.bf16 %v760_v37, %v752_v32 }
  0xd9   :  { %5612 = vmatprep.subr.bf16.mxu1 %v5611_v42  ;;  %v751_v42 = vld [vmem:[%s13623_s2 + $0x630] sm:$0xff] }
  0xda   :  { %v5629_v52 = vpack.c.bf16 %v759_v46, %v751_v42 }
  0xdc   :  { %5614 = vmatpush1.bf16.msra.mxu1 %v5613_v61  ;;  %v5631_v61 = vpack.c.bf16 %v776_v51, %v768_v50  ;;  %v1255_v50 = vld [vmem:[%s13623_s2 + $0x300] sm:$0xff] }
  0xdd   :  { %5616 = vmatprep.subr.bf16.mxu1 %v5615_v62  ;;  %v767_v62 = vld [vmem:[%s13623_s2 + $0x6b0] sm:$0xff]  ;;  %v1263_v51 = vld [vmem:[%s13623_s2 + $0x340] sm:$0xff] }
  0xde   :  { %v5633_v12 = vpack.c.bf16 %v775_v63, %v767_v62  ;;  %v5669_v62 = vpack.c.bf16 %v1263_v51, %v1255_v50  ;;  %v1376_v50 = vld [vmem:[%s13623_s2 + $0x6c8] sm:$0xff] }
  0xe0   :  { %5618 = vmatpush1.bf16.msra.mxu1 %v5617_v13  ;;  %v5635_v13 = vpack.c.bf16 %v792_v9, %v784_v4  ;;  %v1271_v4 = vld [vmem:[%s13623_s2 + $0x380] sm:$0xff] }
  0xe1   :  { %5620 = vmatprep.subr.bf16.mxu1 %v5619_v14  ;;  %v783_v14 = vld [vmem:[%s13623_s2 + $0x730] sm:$0xff]  ;;  %v1279_v9 = vld [vmem:[%s13623_s2 + $0x3c0] sm:$0xff] }
  0xe2   :  { %v5637_v23 = vpack.c.bf16 %v791_v16, %v783_v14  ;;  %v1296_v14 = vld [vmem:[%s13623_s2 + $0x448] sm:$0xff]  ;;  %v545_v16 = vld [vmem:[#allocation2 + $0x40] sm:$0xff] }
  0xe4   :  { %5622 = vmatpush1.bf16.msra.mxu1 %v5621_v24  ;;  %v5639_v24 = vpack.c.bf16 %v808_v21, %v800_v20  ;;  %v1287_v21 = vld [vmem:[%s13623_s2 + $0x400] sm:$0xff] }
  0xe5   :  { %5624 = vmatprep.subr.bf16.mxu1 %v5623_v29  ;;  %v799_v29 = vld [vmem:[%s13623_s2 + $0x7b0] sm:$0xff] }
  0xe6   :  { %v5641_v31 = vpack.c.bf16 %v807_v30, %v799_v29 }
  0xe8   :  { %5626 = vmatpush1.bf16.msra.mxu1 %v5625_v38  ;;  %v1239_v38 = vld [vmem:[%s13623_s2 + $0x280] sm:$0xff] }
  0xe9   :  { %5628 = vmatprep.subr.bf16.mxu1 %v5627_v39  ;;  %v1256_v39 = vld [vmem:[%s13623_s2 + $0x308] sm:$0xff] }
  0xec   :  { %5630 = vmatpush1.bf16.msra.mxu1 %v5629_v52  ;;  %v1272_v52 = vld [vmem:[%s13623_s2 + $0x388] sm:$0xff] }
  0xed   :  { %5632 = vmatprep.subr.bf16.mxu1 %v5631_v61  ;;  %v1280_v61 = vld [vmem:[%s13623_s2 + $0x3c8] sm:$0xff] }
  0xee   :  { %v5671_v63 = vpack.c.bf16 %v1280_v61, %v1272_v52  ;;  %v1367_v52 = vld [vmem:[%s13623_s2 + $0x680] sm:$0xff] }
  0xef   :  { %v1375_v61 = vld [vmem:[%s13623_s2 + $0x6c0] sm:$0xff] }
  0xf0   :  { %5634 = vmatpush1.bf16.msra.mxu1 %v5633_v12  ;;  %v5673_v12 = vpack.c.bf16 %v1279_v9, %v1271_v4  ;;  %v1392_v4 = vld [vmem:[%s13623_s2 + $0x748] sm:$0xff]  ;;  %v1383_v9 = vld [vmem:[%s13623_s2 + $0x700] sm:$0xff] }
  0xf1   :  { %5636 = vmatprep.subr.bf16.mxu1 %v5635_v13  ;;  %v1288_v13 = vld [vmem:[%s13623_s2 + $0x408] sm:$0xff] }
  0xf2   :  { %v5675_v20 = vpack.c.bf16 %v1296_v14, %v1288_v13  ;;  %v1391_v13 = vld [vmem:[%s13623_s2 + $0x740] sm:$0xff]  ;;  %v1400_v14 = vld [vmem:[%s13623_s2 + $0x788] sm:$0xff] }
  0xf4   :  { %5638 = vmatpush1.bf16.msra.mxu1 %v5637_v23  ;;  %v1295_v23 = vld [vmem:[%s13623_s2 + $0x440] sm:$0xff] }
  0xf5   :  { %5640 = vmatprep.subr.bf16.mxu1 %v5639_v24  ;;  %v546_v24 = vld [vmem:[#allocation2 + $0x48] sm:$0xff]  ;;  %v5677_v29 = vpack.c.bf16 %v1295_v23, %v1287_v21  ;;  %v1399_v23 = vld [vmem:[%s13623_s2 + $0x780] sm:$0xff] }
  0xf8   :  { %5642 = vmatpush1.bf16.msra.mxu1 %v5641_v31 }
  0xf9   :  { %5708 = vmatprep.subr.bf16.mxu1 %v8005_v22  ;;  %v1160_v22 = vld [vmem:[%s13623_s2 + $0x8] sm:$0xff] }
  0xfb   :  { %1087 = vmatmul.mubr.f32.vlgmr.msra.gmra.mrb[4].mxu1 %v8038_v59 }
  0xfc   :  { %5710 = vmatpush1.bf16.msra.mxu1 %v8035_v58  ;;  %v1168_v58 = vld [vmem:[%s13623_s2 + $0x48] sm:$0xff] }
  0xfd   :  { %5712 = vmatprep.subr.bf16.mxu1 %v8040_v60  ;;  %v5643_v60 = vpack.c.bf16 %v1168_v58, %v1160_v22 }
  0xff   :  { %5644 = vmatprep.subr.bf16.mxu0 %v5643_v60 }
 0x100   :  { %5714 = vmatpush1.bf16.msra.mxu1 %v8057_v1  ;;  %v1159_v1 = vld [vmem:[%s13623_s2] sm:$0xff] }
 0x101   :  { %5716 = vmatprep.subr.bf16.mxu1 %v8065_v2  ;;  %v1167_v2 = vld [vmem:[%s13623_s2 + $0x40] sm:$0xff] }
 0x104   :  { %5718 = vmatpush1.bf16.msra.mxu1 %v8088_v7  ;;  %v5645_v7 = vpack.c.bf16 %v1167_v2, %v1159_v1  ;;  %v1304_v1 = vld [vmem:[%s13623_s2 + $0x488] sm:$0xff] }
 0x105   :  { %5720 = vmatprep.subr.bf16.mxu1 %v8091_v8  ;;  %v1176_v8 = vld [vmem:[%s13623_s2 + $0x88] sm:$0xff] }
 0x106   :  { %5646 = vmatpush1.bf16.msra.mxu0 %v5645_v7  ;;  %v1312_v2 = vld [vmem:[%s13623_s2 + $0x4c8] sm:$0xff] }
 0x108   :  { %5722 = vmatpush1.bf16.msra.mxu1 %v8114_v15  ;;  %v1184_v15 = vld [vmem:[%s13623_s2 + $0xc8] sm:$0xff] }
 0x109   :  { %5724 = vmatprep.subr.bf16.mxu1 %v8126_v17  ;;  %v5647_v17 = vpack.c.bf16 %v1184_v15, %v1176_v8  ;;  %v5679_v8 = vpack.c.bf16 %v1312_v2, %v1304_v1  ;;  %v1303_v15 = vld [vmem:[%s13623_s2 + $0x480] sm:$0xff]  ;;  %v1164_v1 = vld [vmem:[%s13623_s2 + $0x28] sm:$0xff] }
 0x10a   :  { %v1172_v2 = vld [vmem:[%s13623_s2 + $0x68] sm:$0xff] }
 0x10b   :  { %5648 = vmatprep.subr.bf16.mxu0 %v5647_v17  ;;  %v1311_v17 = vld [vmem:[%s13623_s2 + $0x4c0] sm:$0xff] }
 0x10c   :  { %5726 = vmatpush1.bf16.msra.mxu1 %v8148_v26  ;;  %v1175_v26 = vld [vmem:[%s13623_s2 + $0x80] sm:$0xff] }
 0x10d   :  { %5728 = vmatprep.subr.bf16.mxu1 %v8160_v28  ;;  %v1183_v28 = vld [vmem:[%s13623_s2 + $0xc0] sm:$0xff] }
 0x110   :  { %5730 = vmatpush1.bf16.msra.mxu1 %v8172_v34  ;;  %v1192_v34 = vld [vmem:[%s13623_s2 + $0x108] sm:$0xff] }
 0x111   :  { %5732 = vmatprep.subr.bf16.mxu1 %v8175_v35  ;;  %v5649_v35 = vpack.c.bf16 %v1183_v28, %v1175_v26  ;;  %v5681_v28 = vpack.c.bf16 %v1311_v17, %v1303_v15  ;;  %v547_v15 = vld [vmem:[#allocation2 + $0x50] sm:$0xff]  ;;  %v548_v17 = vld [vmem:[#allocation2 + $0x58] sm:$0xff] }
 0x113   :  { %5650 = vmatpush1.bf16.msra.mxu0 %v5649_v35  ;;  %v1320_v35 = vld [vmem:[%s13623_s2 + $0x508] sm:$0xff] }
 0x114   :  { %5734 = vmatpush1.bf16.msra.mxu1 %v8190_v40  ;;  %v1200_v40 = vld [vmem:[%s13623_s2 + $0x148] sm:$0xff] }
 0x115   :  { %5736 = vmatprep.subr.bf16.mxu1 %v8193_v41  ;;  %v1191_v41 = vld [vmem:[%s13623_s2 + $0x100] sm:$0xff] }
 0x118   :  { %5738 = vmatpush1.bf16.msra.mxu1 %v8208_v47  ;;  %v1199_v47 = vld [vmem:[%s13623_s2 + $0x140] sm:$0xff] }
 0x119   :  { %5740 = vmatprep.subr.bf16.mxu1 %v8211_v49  ;;  %v5651_v49 = vpack.c.bf16 %v1200_v40, %v1192_v34  ;;  %v1328_v40 = vld [vmem:[%s13623_s2 + $0x548] sm:$0xff] }
 0x11b   :  { %5652 = vmatprep.subr.bf16.mxu0 %v5651_v49  ;;  %v1327_v49 = vld [vmem:[%s13623_s2 + $0x540] sm:$0xff] }
 0x11c   :  { %5742 = vmatpush1.bf16.msra.mxu1 %v8226_v55  ;;  %v1208_v55 = vld [vmem:[%s13623_s2 + $0x188] sm:$0xff] }
 0x11d   :  { %5744 = vmatprep.subr.bf16.mxu1 %v8229_v56  ;;  %v1216_v56 = vld [vmem:[%s13623_s2 + $0x1c8] sm:$0xff] }
 0x120   :  { %5746 = vmatpush1.bf16.msra.mxu1 %v8244_v0  ;;  %v5653_v0 = vpack.c.bf16 %v1199_v47, %v1191_v41  ;;  %v5683_v41 = vpack.c.bf16 %v1328_v40, %v1320_v35  ;;  %v1319_v47 = vld [vmem:[%s13623_s2 + $0x500] sm:$0xff] }
 0x121   :  { %5748 = vmatprep.subr.bf16.mxu1 %v8247_v3  ;;  %v5655_v3 = vpack.c.bf16 %v1216_v56, %v1208_v55  ;;  %v5685_v55 = vpack.c.bf16 %v1327_v49, %v1319_v47  ;;  %v549_v56 = vld [vmem:[#allocation2 + $0x60] sm:$0xff] }
 0x122   :  { %5654 = vmatpush1.bf16.msra.mxu0 %v5653_v0  ;;  %v1336_v0 = vld [vmem:[%s13623_s2 + $0x588] sm:$0xff] }
 0x123   :  { %5656 = vmatprep.subr.bf16.mxu0 %v5655_v3  ;;  %v1344_v3 = vld [vmem:[%s13623_s2 + $0x5c8] sm:$0xff] }
 0x124   :  { %5750 = vmatpush1.bf16.msra.mxu1 %v8262_v10  ;;  %v1207_v10 = vld [vmem:[%s13623_s2 + $0x180] sm:$0xff] }
 0x125   :  { %5752 = vmatprep.subr.bf16.mxu1 %v8265_v11  ;;  %v1215_v11 = vld [vmem:[%s13623_s2 + $0x1c0] sm:$0xff] }
 0x128   :  { %5754 = vmatpush1.bf16.msra.mxu1 %v8280_v18  ;;  %v1224_v18 = vld [vmem:[%s13623_s2 + $0x208] sm:$0xff] }
 0x129   :  { %5756 = vmatprep.subr.bf16.mxu1 %v8283_v19  ;;  %v1232_v19 = vld [vmem:[%s13623_s2 + $0x248] sm:$0xff] }
 0x12c   :  { %5758 = vmatpush1.bf16.msra.mxu1 %v8298_v25  ;;  %v5657_v25 = vpack.c.bf16 %v1215_v11, %v1207_v10  ;;  %v550_v10 = vld [vmem:[#allocation2 + $0x68] sm:$0xff]  ;;  %v5687_v11 = vpack.c.bf16 %v1344_v3, %v1336_v0 }
 0x12d   :  { %5760 = vmatprep.subr.bf16.mxu1 %v8301_v27  ;;  %v5659_v27 = vpack.c.bf16 %v1232_v19, %v1224_v18  ;;  %v1335_v18 = vld [vmem:[%s13623_s2 + $0x580] sm:$0xff] }
 0x12e   :  { %5658 = vmatpush1.bf16.msra.mxu0 %v5657_v25  ;;  %v1343_v19 = vld [vmem:[%s13623_s2 + $0x5c0] sm:$0xff] }
 0x12f   :  { %5660 = vmatprep.subr.bf16.mxu0 %v5659_v27  ;;  %v5689_v25 = vpack.c.bf16 %v1343_v19, %v1335_v18 }
 0x130   :  { %5762 = vmatpush1.bf16.msra.mxu1 %v8316_v33  ;;  %v1223_v33 = vld [vmem:[%s13623_s2 + $0x200] sm:$0xff] }
 0x131   :  { %5764 = vmatprep.subr.bf16.mxu1 %v8319_v36  ;;  %v1231_v36 = vld [vmem:[%s13623_s2 + $0x240] sm:$0xff] }
 0x132   :  { %v5661_v32 = vpack.c.bf16 %v1231_v36, %v1223_v33  ;;  %v1352_v36 = vld [vmem:[%s13623_s2 + $0x608] sm:$0xff] }
 0x134   :  { %5766 = vmatpush1.bf16.msra.mxu1 %v8334_v43  ;;  %v1240_v43 = vld [vmem:[%s13623_s2 + $0x288] sm:$0xff]  ;;  %5662 = vmatpush1.bf16.msra.mxu0 %v5661_v32  ;;  %v1351_v32 = vld [vmem:[%s13623_s2 + $0x600] sm:$0xff] }
 0x135   :  { %5768 = vmatprep.subr.bf16.mxu1 %v8337_v44  ;;  %v1248_v44 = vld [vmem:[%s13623_s2 + $0x2c8] sm:$0xff] }
 0x136   :  { %v5663_v37 = vpack.c.bf16 %v1248_v44, %v1240_v43  ;;  %v1360_v43 = vld [vmem:[%s13623_s2 + $0x648] sm:$0xff] }
 0x137   :  { %v5691_v44 = vpack.c.bf16 %v1360_v43, %v1352_v36  ;;  %v189_v36 = vld [vmem:[%s188_s23] sm:$0xff]  ;;  %s216_s23 = scalar_lea.vmem %s13622_s1, %s5262_s30  ;;  %s10419_s30 = sld [smem:[#allocation5 + $0x25]] }
 0x138   :  { %5770 = vmatpush1.bf16.msra.mxu1 %v8352_v53  ;;  %v1247_v53 = vld [vmem:[%s13623_s2 + $0x2c0] sm:$0xff]  ;;  %5664 = vmatprep.subr.bf16.mxu0 %v5663_v37  ;;  %191 = vst [vmem:[#allocation2 + $0x85] ss:$8 sm:$0xf] %v189_v36 }
 0x139   :  { %5836 = vmatprep.subr.bf16.mxu1 %v8355_v57  ;;  %v1264_v57 = vld [vmem:[%s13623_s2 + $0x348] sm:$0xff]  ;;  %v5665_v42 = vpack.c.bf16 %v1247_v53, %v1239_v38  ;;  %v1359_v37 = vld [vmem:[%s13623_s2 + $0x640] sm:$0xff]  ;;  %192 = vst [vmem:[#allocation2 + $0x85] ss:$8 sm:$0xf0] %v189_v36 }
 0x13a   :  { %v5667_v46 = vpack.c.bf16 %v1264_v57, %v1256_v39  ;;  %v5693_v53 = vpack.c.bf16 %v1359_v37, %v1351_v32  ;;  %v551_v32 = vld [vmem:[#allocation2 + $0x70] sm:$0xff]  ;;  %v552_v37 = vld [vmem:[#allocation2 + $0x78] sm:$0xff] }
 0x13b   :  { %5666 = vmatpush1.bf16.msra.mxu0 %v5665_v42 }
 0x13c   :  { %5668 = vmatprep.subr.bf16.mxu0 %v5667_v46  ;;  %v1368_v46 = vld [vmem:[%s13623_s2 + $0x688] sm:$0xff] }
 0x13d   :  { %v5695_v51 = vpack.c.bf16 %v1376_v50, %v1368_v46 }
 0x13f   :  { %5670 = vmatpush1.bf16.msra.mxu0 %v5669_v62  ;;  %v5697_v62 = vpack.c.bf16 %v1375_v61, %v1367_v52 }
 0x140   :  { %5672 = vmatprep.subr.bf16.mxu0 %v5671_v63  ;;  %v1384_v63 = vld [vmem:[%s13623_s2 + $0x708] sm:$0xff] }
 0x143   :  { %5674 = vmatpush1.bf16.msra.mxu0 %v5673_v12  ;;  %v5699_v12 = vpack.c.bf16 %v1392_v4, %v1384_v63  ;;  %v1163_v63 = vld [vmem:[%s13623_s2 + $0x20] sm:$0xff] }
 0x144   :  { %5676 = vmatprep.subr.bf16.mxu0 %v5675_v20  ;;  %v5701_v20 = vpack.c.bf16 %v1391_v13, %v1383_v9  ;;  %v1171_v4 = vld [vmem:[%s13623_s2 + $0x60] sm:$0xff]  ;;  %v1180_v13 = vld [vmem:[%s13623_s2 + $0xa8] sm:$0xff] }
 0x147   :  { %5678 = vmatpush1.bf16.msra.mxu0 %v5677_v29 }
 0x148   :  { %5680 = vmatprep.subr.bf16.mxu0 %v5679_v8  ;;  %v5771_v8 = vpack.c.bf16 %v1172_v2, %v1164_v1  ;;  %v1198_v1 = vld [vmem:[%s13623_s2 + $0x138] sm:$0xff] }
 0x149   :  { %v1206_v2 = vld [vmem:[%s13623_s2 + $0x178] sm:$0xff] }
 0x14b   :  { %5682 = vmatpush1.bf16.msra.mxu0 %v5681_v28 }
 0x14c   :  { %5684 = vmatprep.subr.bf16.mxu0 %v5683_v41 }
 0x14e   :  { %v875_v30 = vpop.f32.mrb[0].mxu1  ;;  %v1017_v31 = vpop.f32.mrb[0].mxu0 }
 0x14f   :  { %v1093_v22 = vadd.f32 %v875_v30, %v545_v16  ;;  %v877_v58 = vpop.f32.mrb[1].mxu1  ;;  %v1019_v60 = vpop.f32.mrb[1].mxu0  ;;  %5686 = vmatpush1.bf16.msra.mxu0 %v5685_v55  ;;  %v1097_v27 = vadd.f32 %v1017_v31, %v549_v56  ;;  %v1408_v16 = vld [vmem:[%s13623_s2 + $0x7c8] sm:$0xff] }
 0x150   :  { %v1094_v7 = vadd.f32 %v877_v58, %v546_v24  ;;  %5688 = vmatprep.subr.bf16.mxu0 %v5687_v11  ;;  %v1098_v33 = vadd.f32 %v1019_v60, %v550_v10  ;;  %v5703_v21 = vpack.c.bf16 %v1408_v16, %v1400_v14  ;;  %v1407_v24 = vld [vmem:[%s13623_s2 + $0x7c0] sm:$0xff]  ;;  %v1188_v14 = vld [vmem:[%s13623_s2 + $0xe8] sm:$0xff] }
 0x151   :  { %v5345_v26 = vmul.f32 -1.442695, %v1093_v22  ;;  %v5705_v29 = vpack.c.bf16 %v1407_v24, %v1399_v23  ;;  %v1179_v23 = vld [vmem:[%s13623_s2 + $0xa0] sm:$0xff] }
 0x152   :  { %v5346_v34 = vmul.f32 -1.442695, %v1094_v7  ;;  %v1187_v24 = vld [vmem:[%s13623_s2 + $0xe0] sm:$0xff] }
 0x153   :  { %7276 = vpow2.f32 %v5345_v26  ;;  %5690 = vmatpush1.bf16.msra.mxu0 %v5689_v25  ;;  %v168_v25 = vld [vmem:[%s167_s13] sm:$0xff]  ;;  %s9593_s13 = sld [smem:[#allocation5 + $0x1c]] }
 0x154   :  { %7278 = vpow2.f32 %v5346_v34  ;;  %5692 = vmatprep.subr.bf16.mxu0 %v5691_v44  ;;  %170 = vst [vmem:[#allocation2 + $0x82] ss:$8 sm:$0xf] %v168_v25  ;;  %171 = vst [vmem:[#allocation2 + $0x82] ss:$8 sm:$0xf0] %v168_v25 }
 0x155   :  { %7280 = vtanh.f32 %v1097_v27  ;;  %v175_v27 = vld [vmem:[%s174_s20] sm:$0xff]  ;;  %v1230_v25 = vld [vmem:[%s13623_s2 + $0x238] sm:$0xff]  ;;  %s9599_s20 = sld [smem:[#allocation5 + $0x1f]] }
 0x156   :  { %7282 = vtanh.f32 %v1098_v33  ;;  %177 = vst [vmem:[#allocation2 + $0x83] ss:$8 sm:$0xf] %v175_v27  ;;  %178 = vst [vmem:[#allocation2 + $0x83] ss:$8 sm:$0xf0] %v175_v27 }
 0x157   :  { %5694 = vmatpush1.bf16.msra.mxu0 %v5693_v53  ;;  %v182_v33 = vld [vmem:[%s181_s25] sm:$0xff]  ;;  %v1238_v27 = vld [vmem:[%s13623_s2 + $0x278] sm:$0xff] }
 0x158   :  { %5696 = vmatprep.subr.bf16.mxu0 %v5695_v51  ;;  %184 = vst [vmem:[#allocation2 + $0x84] ss:$8 sm:$0xf] %v182_v33  ;;  %185 = vst [vmem:[#allocation2 + $0x84] ss:$8 sm:$0xf0] %v182_v33 }
 0x159   :  { %v203_v44 = vld [vmem:[%s202_s28] sm:$0xff]  ;;  %s230_s28 = scalar_lea.vmem %s13622_s1, %s5266_s12 }
 0x15a   :  { %205 = vst [vmem:[#allocation2 + $0x87] ss:$8 sm:$0xf] %v203_v44  ;;  %206 = vst [vmem:[#allocation2 + $0x87] ss:$8 sm:$0xf0] %v203_v44 }
 0x15b   :  { %5698 = vmatpush1.bf16.msra.mxu0 %v5697_v62  ;;  %v1235_v44 = vld [vmem:[%s13623_s2 + $0x260] sm:$0xff]  ;;  %s5274_s29 = sshll.u32 %s9599_s20, 3  ;;  %s5282_s20 = sshll.u32 %s5281_s22, 3 }
 0x15c   :  { %5700 = vmatprep.subr.bf16.mxu0 %v5699_v12  ;;  %s258_s12 = scalar_lea.vmem %s13622_s1, %s5274_s29  ;;  %s5278_s29 = sshll.u32 %s5277_s24, 3 }
 0x15d   :  { %v7277_v38 = vpop.eup %7276  ;;  %s5286_s24 = sshll.u32 %s10419_s30, 3  ;;  %s5297_s22 = sld [smem:[#allocation5 + $0x2b]] }
 0x15e   :  { %v7279_v39 = vpop.eup %7278  ;;  %v1107_v57 = vadd.f32 1.0, %v7277_v38  ;;  %s300_s19 = scalar_lea.vmem %s13622_s1, %s5286_s24  ;;  %s5293_s24 = sld [smem:[#allocation5 + $0x29]] }
 0x15f   :  { %v1108_v42 = vadd.f32 1.0, %v7279_v39  ;;  %5702 = vmatpush1.bf16.msra.mxu0 %v5701_v20  ;;  %v7281_v30 = vpop.eup %7280 }
 0x160   :  { %7284 = vrcp.f32 %v1107_v57  ;;  %5704 = vmatprep.subr.bf16.mxu0 %v5703_v21  ;;  %v7283_v31 = vpop.eup %7282  ;;  %v5773_v21 = vpack.c.bf16 %v1171_v4, %v1163_v63  ;;  %v1245_v4 = vld [vmem:[%s13623_s2 + $0x2b0] sm:$0xff] }
 0x161   :  { %7286 = vrcp.f32 %v1108_v42 }
 0x163   :  { %5706 = vmatpush1.bf16.msra.mxu0 %v5705_v29 }
 0x164   :  { %5772 = vmatprep.subr.bf16.mxu0 %v5771_v8 }
 0x16a   :  { %v7285_v22 = vpop.eup %7284 }
 0x16b   :  { %v7287_v58 = vpop.eup %7286  ;;  %v1141_v60 = vmul.f32 %v7285_v22, %v7281_v30  ;;  %v1181_v30 = vld [vmem:[%s13623_s2 + $0xb0] sm:$0xff]  ;;  %v1196_v22 = vld [vmem:[%s13623_s2 + $0x128] sm:$0xff] }
 0x16c   :  { %v1142_v7 = vmul.f32 %v7287_v58, %v7283_v31  ;;  %v1189_v31 = vld [vmem:[%s13623_s2 + $0xf0] sm:$0xff]  ;;  %v5775_v58 = vpack.c.bf16 %v1188_v14, %v1180_v13  ;;  %v1268_v13 = vld [vmem:[%s13623_s2 + $0x368] sm:$0xff]  ;;  %v1262_v14 = vld [vmem:[%s13623_s2 + $0x338] sm:$0xff] }
 0x16d   :  { %v5841_v8 = vpack.c.bf16 %v1189_v31, %v1181_v30  ;;  %v1267_v30 = vld [vmem:[%s13623_s2 + $0x360] sm:$0xff] }
 0x18e   :  { %v946_v26 = vpop.f32.mrb[2].mxu1 }
 0x18f   :  { %v1095_v28 = vadd.f32 %v946_v26, %v547_v15  ;;  %v948_v34 = vpop.f32.mrb[3].mxu1  ;;  %v1195_v15 = vld [vmem:[%s13623_s2 + $0x120] sm:$0xff] }
 0x190   :  { %v1096_v35 = vadd.f32 %v948_v34, %v548_v17  ;;  %v1203_v17 = vld [vmem:[%s13623_s2 + $0x160] sm:$0xff]  ;;  %v1205_v34 = vld [vmem:[%s13623_s2 + $0x170] sm:$0xff] }
 0x191   :  { %v5347_v40 = vmul.f32 -1.442695, %v1095_v28  ;;  %v5843_v28 = vpack.c.bf16 %v1206_v2, %v1198_v1  ;;  %v1276_v1 = vld [vmem:[%s13623_s2 + $0x3a8] sm:$0xff] }
 0x192   :  { %v5348_v41 = vmul.f32 -1.442695, %v1096_v35  ;;  %v1212_v35 = vld [vmem:[%s13623_s2 + $0x1a8] sm:$0xff] }
 0x193   :  { %7288 = vpow2.f32 %v5347_v40  ;;  %v1220_v40 = vld [vmem:[%s13623_s2 + $0x1e8] sm:$0xff] }
 0x194   :  { %7290 = vpow2.f32 %v5348_v41  ;;  %v1214_v41 = vld [vmem:[%s13623_s2 + $0x1b8] sm:$0xff]  ;;  %v1284_v2 = vld [vmem:[%s13623_s2 + $0x3e8] sm:$0xff] }
 0x19d   :  { %v7289_v47 = vpop.eup %7288 }
 0x19e   :  { %v7291_v49 = vpop.eup %7290  ;;  %v1119_v55 = vadd.f32 1.0, %v7289_v47  ;;  %v1222_v47 = vld [vmem:[%s13623_s2 + $0x1f8] sm:$0xff] }
 0x19f   :  { %v1120_v56 = vadd.f32 1.0, %v7291_v49  ;;  %v5781_v49 = vpack.c.bf16 %v1203_v17, %v1195_v15 }
 0x1a0   :  { %7292 = vrcp.f32 %v1119_v55 }
 0x1a1   :  { %7294 = vrcp.f32 %v1120_v56  ;;  %v1219_v56 = vld [vmem:[%s13623_s2 + $0x1e0] sm:$0xff] }
 0x1aa   :  { %v7293_v0 = vpop.eup %7292 }
 0x1ab   :  { %v7295_v3 = vpop.eup %7294  ;;  %v1139_v10 = vmul.f32 %v7293_v0, %v8017_v48  ;;  %v161_v48 = vld [vmem:[%s160_s15] sm:$0xff]  ;;  %v5783_v0 = vpack.c.bf16 %v1220_v40, %v1212_v35  ;;  %v1277_v35 = vld [vmem:[%s13623_s2 + $0x3b0] sm:$0xff] }
 0x1ac   :  { %v1140_v11 = vmul.f32 %v7295_v3, %v8014_v45  ;;  %v154_v45 = vld [vmem:[%s153_s26] sm:$0xff]  ;;  %163 = vst [vmem:[#allocation2 + $0x81] ss:$8 sm:$0xf] %v161_v48  ;;  %s5256_s26 = sshll.u32 %s8791_s17, 3  ;;  %v5847_v3 = vpack.c.bf16 %v1222_v47, %v1214_v41  ;;  %v1285_v40 = vld [vmem:[%s13623_s2 + $0x3f0] sm:$0xff] }
 0x1ad   :  { %v8787_v18 = vadd.f32 %v1141_v60, %v1139_v10  ;;  %156 = vst [vmem:[#allocation2 + $0x80] ss:$8 sm:$0xf] %v154_v45  ;;  %157 = vst [vmem:[#allocation2 + $0x80] ss:$8 sm:$0xf0] %v154_v45  ;;  %s195_s8 = scalar_lea.vmem %s13622_s1, %s5256_s26 }
 0x1ae   :  { %v8789_v19 = vadd.f32 %v1142_v7, %v1140_v11  ;;  %164 = vst [vmem:[#allocation2 + $0x81] ss:$8 sm:$0xf0] %v161_v48  ;;  %v196_v43 = vld [vmem:[%s195_s8] sm:$0xff]  ;;  %v1204_v60 = vld [vmem:[%s13623_s2 + $0x168] sm:$0xff]  ;;  %v5777_v7 = vpack.c.bf16 %v1187_v24, %v1179_v23  ;;  %v1213_v10 = vld [vmem:[%s13623_s2 + $0x1b0] sm:$0xff] }
 0x1af   :  { %198 = vst [vmem:[#allocation2 + $0x86] ss:$8 sm:$0xf] %v196_v43  ;;  %199 = vst [vmem:[#allocation2 + $0x86] ss:$8 sm:$0xf0] %v196_v43  ;;  %v5779_v26 = vpack.c.bf16 %v1204_v60, %v1196_v22 }
 0x1b0   :  { %v1221_v11 = vld [vmem:[%s13623_s2 + $0x1f0] sm:$0xff]  ;;  %v1228_v45 = vld [vmem:[%s13623_s2 + $0x228] sm:$0xff]  ;;  %v1227_v43 = vld [vmem:[%s13623_s2 + $0x220] sm:$0xff]  ;;  %s5259_s17 = sld [smem:[#allocation5 + $0x18]]  ;;  %s5264_s26 = sshll.u32 %s5263_s11, 3 }
 0x1b1   :  { %v1236_v48 = vld [vmem:[%s13623_s2 + $0x268] sm:$0xff]  ;;  %v5849_v36 = vpack.c.bf16 %v1221_v11, %v1213_v10  ;;  %v1259_v24 = vld [vmem:[%s13623_s2 + $0x320] sm:$0xff]  ;;  %v1269_v60 = vld [vmem:[%s13623_s2 + $0x370] sm:$0xff]  ;;  %s223_s8 = scalar_lea.vmem %s13622_s1, %s5264_s26  ;;  %s5279_s11 = sld [smem:[#allocation5 + $0x22]] }
 0x1b2   :  { %v5797_v15 = vpack.c.bf16 %v1267_v30, %v1259_v24  ;;  %v1292_v41 = vld [vmem:[%s13623_s2 + $0x428] sm:$0xff] }
 0x1b3   :  { %v1300_v47 = vld [vmem:[%s13623_s2 + $0x468] sm:$0xff] }
 0x1b4   :  { %v5803_v10 = vpack.c.bf16 %v1300_v47, %v1292_v41  ;;  %v1357_v41 = vld [vmem:[%s13623_s2 + $0x630] sm:$0xff] }
 0x1b5   :  { %v1365_v47 = vld [vmem:[%s13623_s2 + $0x670] sm:$0xff] }
 0x1b6   :  { %s5260_s21 = sshll.u32 %s5259_s17, 3  ;;  %s5268_s17 = sshll.u32 %s9593_s13, 3 }
 0x1b7   :  { %s209_s25 = scalar_lea.vmem %s13622_s1, %s5260_s21  ;;  %s237_s21 = scalar_lea.vmem %s13622_s1, %s5268_s17 }
 0x1b8   :  { %s5275_s17 = sld [smem:[#allocation5 + $0x20]]  ;;  %s11245_s13 = sld [smem:[#allocation5 + $0x2e]] }
 0x1ce   :  { %v1088_v38 = vpop.f32.mrb[4].mxu1 }
 0x1cf   :  { %v1099_v53 = vadd.f32 %v1088_v38, %v551_v32  ;;  %v1090_v39 = vpop.f32.mrb[5].mxu1  ;;  %v5787_v32 = vpack.c.bf16 %v1236_v48, %v1228_v45  ;;  %v1229_v38 = vld [vmem:[%s13623_s2 + $0x230] sm:$0xff] }
 0x1d0   :  { %v1100_v57 = vadd.f32 %v1090_v39, %v552_v37  ;;  %v5851_v37 = vpack.c.bf16 %v1238_v27, %v1230_v25  ;;  %v1244_v39 = vld [vmem:[%s13623_s2 + $0x2a8] sm:$0xff]  ;;  %v1293_v45 = vld [vmem:[%s13623_s2 + $0x430] sm:$0xff] }
 0x1d1   :  { %v5349_v42 = vmul.f32 -1.442695, %v1099_v53  ;;  %v1237_v53 = vld [vmem:[%s13623_s2 + $0x270] sm:$0xff]  ;;  %v1308_v25 = vld [vmem:[%s13623_s2 + $0x4a8] sm:$0xff] }
 0x1d2   :  { %v5350_v46 = vmul.f32 -1.442695, %v1100_v57  ;;  %v1252_v57 = vld [vmem:[%s13623_s2 + $0x2e8] sm:$0xff]  ;;  %v1301_v48 = vld [vmem:[%s13623_s2 + $0x470] sm:$0xff] }
 0x1d3   :  { %7296 = vpow2.f32 %v5349_v42  ;;  %v1246_v42 = vld [vmem:[%s13623_s2 + $0x2b8] sm:$0xff]  ;;  %v1316_v27 = vld [vmem:[%s13623_s2 + $0x4e8] sm:$0xff] }
 0x1d4   :  { %7298 = vpow2.f32 %v5350_v46  ;;  %v1254_v46 = vld [vmem:[%s13623_s2 + $0x2f8] sm:$0xff] }
 0x1d5   :  { %7300 = vtanh.f32 %v8789_v19  ;;  %v5855_v63 = vpack.c.bf16 %v1254_v46, %v1246_v42  ;;  %v1324_v42 = vld [vmem:[%s13623_s2 + $0x528] sm:$0xff] }
 0x1d6   :  { %v1332_v46 = vld [vmem:[%s13623_s2 + $0x568] sm:$0xff] }
 0x1dd   :  { %v7297_v50 = vpop.eup %7296 }
 0x1de   :  { %v7299_v51 = vpop.eup %7298  ;;  %v1133_v52 = vadd.f32 1.0, %v7297_v50  ;;  %v5789_v50 = vpack.c.bf16 %v1235_v44, %v1227_v43  ;;  %v5869_v44 = vpack.c.bf16 %v1301_v48, %v1293_v45 }
 0x1df   :  { %v1134_v61 = vadd.f32 1.0, %v7299_v51  ;;  %v7301_v62 = vpop.eup %7300  ;;  %v5853_v51 = vpack.c.bf16 %v1237_v53, %v1229_v38  ;;  %v5807_v38 = vpack.c.bf16 %v1316_v27, %v1308_v25  ;;  %v1373_v25 = vld [vmem:[%s13623_s2 + $0x6b0] sm:$0xff] }
 0x1e0   :  { %7302 = vrcp.f32 %v1133_v52  ;;  %v1243_v52 = vld [vmem:[%s13623_s2 + $0x2a0] sm:$0xff]  ;;  %v1381_v27 = vld [vmem:[%s13623_s2 + $0x6f0] sm:$0xff] }
 0x1e1   :  { %7304 = vrcp.f32 %v1134_v61  ;;  %v1251_v61 = vld [vmem:[%s13623_s2 + $0x2e0] sm:$0xff] }
 0x1e2   :  { %7306 = vtanh.f32 %v8787_v18 }
 0x1ea   :  { %v7303_v9 = vpop.eup %7302 }
 0x1eb   :  { %v7305_v12 = vpop.eup %7304 }
 0x1ec   :  { %v7307_v16 = vpop.eup %7306  ;;  %v8835_v20 = vmul.f32 %v7305_v12, %v7301_v62  ;;  %v5791_v62 = vpack.c.bf16 %v1252_v57, %v1244_v39  ;;  %v1260_v12 = vld [vmem:[%s13623_s2 + $0x328] sm:$0xff]  ;;  %v1309_v39 = vld [vmem:[%s13623_s2 + $0x4b0] sm:$0xff] }
 0x1ed   :  { %v8843_v29 = vmul.f32 %v7307_v16, %v7303_v9  ;;  %v1253_v9 = vld [vmem:[%s13623_s2 + $0x2f0] sm:$0xff]  ;;  %v1270_v16 = vld [vmem:[%s13623_s2 + $0x378] sm:$0xff]  ;;  %v5795_v31 = vpack.c.bf16 %v1268_v13, %v1260_v12 }
 0x1ee   :  { %1479 = vmatprep.mubr.f32.mxu0 %v8835_v20  ;;  %1550 = vmatprep.mubr.f32.mxu1 %v8835_v20  ;;  %v5857_v23 = vpack.c.bf16 %v1253_v9, %v1245_v4  ;;  %v5859_v22 = vpack.c.bf16 %v1270_v16, %v1262_v14  ;;  %v1317_v57 = vld [vmem:[%s13623_s2 + $0x4f0] sm:$0xff]  ;;  %v5811_v4 = vpack.c.bf16 %v1332_v46, %v1324_v42  ;;  %v1340_v14 = vld [vmem:[%s13623_s2 + $0x5a8] sm:$0xff] }
 0x1ef   :  { %1480 = vmatmul.mubr.f32.vlgmr.msra.gmra.mrb[2].mxu0 %v8843_v29  ;;  %1551 = vmatmul.mubr.f32.vlgmr.msra.gmra.mrb[6].mxu1 %v8843_v29  ;;  %v1325_v12 = vld [vmem:[%s13623_s2 + $0x530] sm:$0xff]  ;;  %v1348_v16 = vld [vmem:[%s13623_s2 + $0x5e8] sm:$0xff] }
 0x1f0   :  { %5774 = vmatpush1.bf16.msra.mxu0 %v5773_v21  ;;  %5838 = vmatpush1.bf16.msra.mxu1 %v8370_v5  ;;  %v1197_v5 = vld [vmem:[%s13623_s2 + $0x130] sm:$0xff]  ;;  %v5793_v21 = vpack.c.bf16 %v1251_v61, %v1243_v52  ;;  %v5873_v61 = vpack.c.bf16 %v1317_v57, %v1309_v39 }
 0x1f1   :  { %1621 = vmatprep.mubr.f32.mxu0 %v8835_v20  ;;  %1692 = vmatprep.mubr.f32.mxu1 %v8835_v20  ;;  %v5845_v55 = vpack.c.bf16 %v1205_v34, %v1197_v5  ;;  %v5799_v5 = vpack.c.bf16 %v1284_v2, %v1276_v1  ;;  %v1333_v13 = vld [vmem:[%s13623_s2 + $0x570] sm:$0xff] }
 0x1f2   :  { %5776 = vmatprep.subr.bf16.mxu0 %v5775_v58  ;;  %5840 = vmatprep.subr.bf16.mxu1 %v8373_v6  ;;  %v1211_v6 = vld [vmem:[%s13623_s2 + $0x1a0] sm:$0xff]  ;;  %v1261_v58 = vld [vmem:[%s13623_s2 + $0x330] sm:$0xff]  ;;  %v5877_v30 = vpack.c.bf16 %v1333_v13, %v1325_v12 }
 0x1f3   :  { %v5785_v33 = vpack.c.bf16 %v1219_v56, %v1211_v6  ;;  %v5861_v17 = vpack.c.bf16 %v1269_v60, %v1261_v58  ;;  %v5865_v56 = vpack.c.bf16 %v1285_v40, %v1277_v35  ;;  %v5815_v58 = vpack.c.bf16 %v1348_v16, %v1340_v14  ;;  %v1341_v1 = vld [vmem:[%s13623_s2 + $0x5b0] sm:$0xff]  ;;  %v1411_v13 = vld [vmem:[%s13623_s2 + $0x7e0] sm:$0xff] }
 0x1f4   :  { %5778 = vmatpush1.bf16.msra.mxu0 %v5777_v7  ;;  %5842 = vmatpush1.bf16.msra.mxu1 %v5841_v8  ;;  %v1278_v7 = vld [vmem:[%s13623_s2 + $0x3b8] sm:$0xff]  ;;  %v1349_v2 = vld [vmem:[%s13623_s2 + $0x5f0] sm:$0xff] }
 0x1f5   :  { %5780 = vmatprep.subr.bf16.mxu0 %v5779_v26  ;;  %5844 = vmatprep.subr.bf16.mxu1 %v5843_v28  ;;  %v1286_v8 = vld [vmem:[%s13623_s2 + $0x3f8] sm:$0xff]  ;;  %v1275_v26 = vld [vmem:[%s13623_s2 + $0x3a0] sm:$0xff]  ;;  %v1389_v42 = vld [vmem:[%s13623_s2 + $0x730] sm:$0xff] }
 0x1f6   :  { %v1283_v28 = vld [vmem:[%s13623_s2 + $0x3e0] sm:$0xff]  ;;  %v5863_v34 = vpack.c.bf16 %v1286_v8, %v1278_v7  ;;  %v1356_v7 = vld [vmem:[%s13623_s2 + $0x628] sm:$0xff]  ;;  %v1397_v46 = vld [vmem:[%s13623_s2 + $0x770] sm:$0xff] }
 0x1f7   :  { %v5801_v6 = vpack.c.bf16 %v1283_v28, %v1275_v26  ;;  %v1364_v8 = vld [vmem:[%s13623_s2 + $0x668] sm:$0xff]  ;;  %v5881_v28 = vpack.c.bf16 %v1349_v2, %v1341_v1  ;;  %v1405_v14 = vld [vmem:[%s13623_s2 + $0x7b0] sm:$0xff]  ;;  %v1773_v1 = vld [vmem:[%s13623_s2 + $0x40] sm:$0xff] }
 0x1f8   :  { %5782 = vmatpush1.bf16.msra.mxu0 %v5781_v49  ;;  %5846 = vmatpush1.bf16.msra.mxu1 %v5845_v55  ;;  %v1294_v49 = vld [vmem:[%s13623_s2 + $0x438] sm:$0xff]  ;;  %v5819_v35 = vpack.c.bf16 %v1364_v8, %v1356_v7  ;;  %v1413_v16 = vld [vmem:[%s13623_s2 + $0x7f0] sm:$0xff] }
 0x1f9   :  { %5784 = vmatprep.subr.bf16.mxu0 %v5783_v0  ;;  %5848 = vmatprep.subr.bf16.mxu1 %v5847_v3  ;;  %v1302_v55 = vld [vmem:[%s13623_s2 + $0x478] sm:$0xff]  ;;  %v1291_v0 = vld [vmem:[%s13623_s2 + $0x420] sm:$0xff]  ;;  %v1767_v8 = vld [vmem:[%s13623_s2 + $0x10] sm:$0xff] }
 0x1fa   :  { %v1299_v3 = vld [vmem:[%s13623_s2 + $0x460] sm:$0xff]  ;;  %v5867_v11 = vpack.c.bf16 %v1302_v55, %v1294_v49  ;;  %v1372_v49 = vld [vmem:[%s13623_s2 + $0x6a8] sm:$0xff] }
 0x1fb   :  { %v5805_v43 = vpack.c.bf16 %v1299_v3, %v1291_v0  ;;  %v1380_v55 = vld [vmem:[%s13623_s2 + $0x6e8] sm:$0xff]  ;;  %v5885_v3 = vpack.c.bf16 %v1365_v47, %v1357_v41  ;;  %v1781_v41 = vld [vmem:[%s13623_s2 + $0x80] sm:$0xff] }
 0x1fc   :  { %5786 = vmatpush1.bf16.msra.mxu0 %v5785_v33  ;;  %5850 = vmatpush1.bf16.msra.mxu1 %v5849_v36  ;;  %v1310_v33 = vld [vmem:[%s13623_s2 + $0x4b8] sm:$0xff]  ;;  %v5823_v45 = vpack.c.bf16 %v1380_v55, %v1372_v49  ;;  %v1789_v47 = vld [vmem:[%s13623_s2 + $0xc0] sm:$0xff]  ;;  %v1783_v49 = vld [vmem:[%s13623_s2 + $0x90] sm:$0xff] }
 0x1fd   :  { %5788 = vmatprep.subr.bf16.mxu0 %v5787_v32  ;;  %5852 = vmatprep.subr.bf16.mxu1 %v5851_v37  ;;  %v1318_v36 = vld [vmem:[%s13623_s2 + $0x4f8] sm:$0xff]  ;;  %v1307_v32 = vld [vmem:[%s13623_s2 + $0x4a0] sm:$0xff]  ;;  %v5905_v55 = vpack.c.bf16 %v1789_v47, %v1781_v41 }
 0x1fe   :  { %v1315_v37 = vld [vmem:[%s13623_s2 + $0x4e0] sm:$0xff]  ;;  %v5871_v53 = vpack.c.bf16 %v1318_v36, %v1310_v33  ;;  %v1388_v33 = vld [vmem:[%s13623_s2 + $0x728] sm:$0xff] }
 0x1ff   :  { %v5809_v52 = vpack.c.bf16 %v1315_v37, %v1307_v32  ;;  %v1396_v36 = vld [vmem:[%s13623_s2 + $0x768] sm:$0xff]  ;;  %v5889_v37 = vpack.c.bf16 %v1381_v27, %v1373_v25  ;;  %v1805_v27 = vld [vmem:[%s13623_s2 + $0x140] sm:$0xff] }
 0x200   :  { %5790 = vmatpush1.bf16.msra.mxu0 %v5789_v50  ;;  %5854 = vmatpush1.bf16.msra.mxu1 %v5853_v51  ;;  %v1326_v50 = vld [vmem:[%s13623_s2 + $0x538] sm:$0xff]  ;;  %v5827_v39 = vpack.c.bf16 %v1396_v36, %v1388_v33  ;;  %v1799_v33 = vld [vmem:[%s13623_s2 + $0x110] sm:$0xff]  ;;  %v1861_v47 = vld [vmem:[%s13623_s2 + $0x300] sm:$0xff] }
 0x201   :  { %5792 = vmatprep.subr.bf16.mxu0 %v5791_v62  ;;  %5856 = vmatprep.subr.bf16.mxu1 %v5855_v63  ;;  %v1334_v51 = vld [vmem:[%s13623_s2 + $0x578] sm:$0xff]  ;;  %v1323_v62 = vld [vmem:[%s13623_s2 + $0x520] sm:$0xff]  ;;  %v1807_v36 = vld [vmem:[%s13623_s2 + $0x150] sm:$0xff] }
 0x202   :  { %v1331_v63 = vld [vmem:[%s13623_s2 + $0x560] sm:$0xff]  ;;  %v5875_v9 = vpack.c.bf16 %v1334_v51, %v1326_v50  ;;  %v1404_v50 = vld [vmem:[%s13623_s2 + $0x7a8] sm:$0xff] }
 0x203   :  { %v5813_v24 = vpack.c.bf16 %v1331_v63, %v1323_v62  ;;  %v1412_v51 = vld [vmem:[%s13623_s2 + $0x7e8] sm:$0xff]  ;;  %v5893_v63 = vpack.c.bf16 %v1397_v46, %v1389_v42  ;;  %v1821_v42 = vld [vmem:[%s13623_s2 + $0x1c0] sm:$0xff] }
 0x204   :  { %5794 = vmatpush1.bf16.msra.mxu0 %v5793_v21  ;;  %5858 = vmatpush1.bf16.msra.mxu1 %v5857_v23  ;;  %v1342_v21 = vld [vmem:[%s13623_s2 + $0x5b8] sm:$0xff] }
 0x205   :  { %5796 = vmatprep.subr.bf16.mxu0 %v5795_v31  ;;  %5860 = vmatprep.subr.bf16.mxu1 %v5859_v22  ;;  %v1350_v23 = vld [vmem:[%s13623_s2 + $0x5f8] sm:$0xff]  ;;  %v1339_v31 = vld [vmem:[%s13623_s2 + $0x5a0] sm:$0xff] }
 0x206   :  { %v1347_v22 = vld [vmem:[%s13623_s2 + $0x5e0] sm:$0xff]  ;;  %v5879_v60 = vpack.c.bf16 %v1350_v23, %v1342_v21  ;;  %v5897_v23 = vpack.c.bf16 %v1413_v16, %v1405_v14  ;;  %v1831_v16 = vld [vmem:[%s13623_s2 + $0x210] sm:$0xff] }
 0x207   :  { %v5817_v26 = vpack.c.bf16 %v1347_v22, %v1339_v31  ;;  %v1768_v31 = vld [vmem:[%s13623_s2 + $0x18] sm:$0xff]  ;;  %v1837_v14 = vld [vmem:[%s13623_s2 + $0x240] sm:$0xff] }
 0x208   :  { %5798 = vmatpush1.bf16.msra.mxu0 %v5797_v15  ;;  %5862 = vmatpush1.bf16.msra.mxu1 %v5861_v17  ;;  %v1358_v15 = vld [vmem:[%s13623_s2 + $0x638] sm:$0xff] }
 0x209   :  { %5800 = vmatprep.subr.bf16.mxu0 %v5799_v5  ;;  %5864 = vmatprep.subr.bf16.mxu1 %v5863_v34  ;;  %v1366_v17 = vld [vmem:[%s13623_s2 + $0x678] sm:$0xff]  ;;  %v1355_v5 = vld [vmem:[%s13623_s2 + $0x620] sm:$0xff] }
 0x20a   :  { %v1363_v34 = vld [vmem:[%s13623_s2 + $0x660] sm:$0xff]  ;;  %v5883_v40 = vpack.c.bf16 %v1366_v17, %v1358_v15  ;;  %v1775_v15 = vld [vmem:[%s13623_s2 + $0x50] sm:$0xff]  ;;  %v1782_v17 = vld [vmem:[%s13623_s2 + $0x88] sm:$0xff] }
 0x20b   :  { %v5821_v0 = vpack.c.bf16 %v1363_v34, %v1355_v5  ;;  %v1784_v5 = vld [vmem:[%s13623_s2 + $0x98] sm:$0xff] }
 0x20c   :  { %5802 = vmatpush1.bf16.msra.mxu0 %v5801_v6  ;;  %5866 = vmatpush1.bf16.msra.mxu1 %v5865_v56  ;;  %v1374_v6 = vld [vmem:[%s13623_s2 + $0x6b8] sm:$0xff] }
 0x20d   :  { %5804 = vmatprep.subr.bf16.mxu0 %v5803_v10  ;;  %5868 = vmatprep.subr.bf16.mxu1 %v5867_v11  ;;  %v1382_v56 = vld [vmem:[%s13623_s2 + $0x6f8] sm:$0xff]  ;;  %v1371_v10 = vld [vmem:[%s13623_s2 + $0x6a0] sm:$0xff] }
 0x20e   :  { %v1379_v11 = vld [vmem:[%s13623_s2 + $0x6e0] sm:$0xff]  ;;  %v5887_v48 = vpack.c.bf16 %v1382_v56, %v1374_v6  ;;  %v1792_v34 = vld [vmem:[%s13623_s2 + $0xd8] sm:$0xff]  ;;  %v1791_v6 = vld [vmem:[%s13623_s2 + $0xd0] sm:$0xff] }
 0x20f   :  { %v5825_v32 = vpack.c.bf16 %v1379_v11, %v1371_v10  ;;  %v1798_v56 = vld [vmem:[%s13623_s2 + $0x108] sm:$0xff]  ;;  %v1800_v11 = vld [vmem:[%s13623_s2 + $0x118] sm:$0xff] }
 0x210   :  { %5806 = vmatpush1.bf16.msra.mxu0 %v5805_v43  ;;  %5870 = vmatpush1.bf16.msra.mxu1 %v5869_v44  ;;  %v1390_v43 = vld [vmem:[%s13623_s2 + $0x738] sm:$0xff] }
 0x211   :  { %5808 = vmatprep.subr.bf16.mxu0 %v5807_v38  ;;  %5872 = vmatprep.subr.bf16.mxu1 %v5871_v53  ;;  %v1398_v44 = vld [vmem:[%s13623_s2 + $0x778] sm:$0xff]  ;;  %v1387_v38 = vld [vmem:[%s13623_s2 + $0x720] sm:$0xff] }
 0x212   :  { %v1395_v53 = vld [vmem:[%s13623_s2 + $0x760] sm:$0xff]  ;;  %v5891_v57 = vpack.c.bf16 %v1398_v44, %v1390_v43  ;;  %v1814_v44 = vld [vmem:[%s13623_s2 + $0x188] sm:$0xff] }
 0x213   :  { %v5829_v62 = vpack.c.bf16 %v1395_v53, %v1387_v38  ;;  %v5973_v38 = vpack.c.bf16 %v1807_v36, %v1799_v33  ;;  %v1885_v33 = vld [vmem:[%s13623_s2 + $0x3c0] sm:$0xff] }
 0x214   :  { %5810 = vmatpush1.bf16.msra.mxu0 %v5809_v52  ;;  %5874 = vmatpush1.bf16.msra.mxu1 %v5873_v61  ;;  %v1406_v52 = vld [vmem:[%s13623_s2 + $0x7b8] sm:$0xff] }
 0x215   :  { %5812 = vmatprep.subr.bf16.mxu0 %v5811_v4  ;;  %5876 = vmatprep.subr.bf16.mxu1 %v5875_v9  ;;  %v1414_v61 = vld [vmem:[%s13623_s2 + $0x7f8] sm:$0xff]  ;;  %v1403_v4 = vld [vmem:[%s13623_s2 + $0x7a0] sm:$0xff]  ;;  %v5831_v9 = vpack.c.bf16 %v1412_v51, %v1404_v50  ;;  %v1815_v50 = vld [vmem:[%s13623_s2 + $0x190] sm:$0xff] }
 0x216   :  { %v5895_v12 = vpack.c.bf16 %v1414_v61, %v1406_v52  ;;  %v5833_v21 = vpack.c.bf16 %v1411_v13, %v1403_v4  ;;  %v1823_v51 = vld [vmem:[%s13623_s2 + $0x1d0] sm:$0xff]  ;;  %v1830_v52 = vld [vmem:[%s13623_s2 + $0x208] sm:$0xff]  ;;  %v1829_v13 = vld [vmem:[%s13623_s2 + $0x200] sm:$0xff] }
 0x217   :  { %v1838_v61 = vld [vmem:[%s13623_s2 + $0x248] sm:$0xff] }
 0x218   :  { %5814 = vmatpush1.bf16.msra.mxu0 %v5813_v24  ;;  %5878 = vmatpush1.bf16.msra.mxu1 %v5877_v30  ;;  %v1766_v24 = vld [vmem:[%s13623_s2 + $0x8] sm:$0xff] }
 0x219   :  { %5816 = vmatprep.subr.bf16.mxu0 %v5815_v58  ;;  %5880 = vmatprep.subr.bf16.mxu1 %v5879_v60  ;;  %v1774_v30 = vld [vmem:[%s13623_s2 + $0x48] sm:$0xff]  ;;  %v1776_v58 = vld [vmem:[%s13623_s2 + $0x58] sm:$0xff]  ;;  %v1765_v60 = vld [vmem:[%s13623_s2] sm:$0xff] }
 0x21a   :  { %v5899_v22 = vpack.c.bf16 %v1774_v30, %v1766_v24  ;;  %v5963_v2 = vpack.c.bf16 %v1776_v58, %v1768_v31  ;;  %v5901_v7 = vpack.c.bf16 %v1773_v1, %v1765_v60  ;;  %v1846_v24 = vld [vmem:[%s13623_s2 + $0x288] sm:$0xff]  ;;  %v1848_v31 = vld [vmem:[%s13623_s2 + $0x298] sm:$0xff]  ;;  %v5917_v58 = vpack.c.bf16 %v1837_v14, %v1829_v13 }
 0x21b   :  { %v1854_v30 = vld [vmem:[%s13623_s2 + $0x2c8] sm:$0xff]  ;;  %v1920_v14 = vld [vmem:[%s13623_s2 + $0x4d8] sm:$0xff] }
 0x21c   :  { %5818 = vmatpush1.bf16.msra.mxu0 %v5817_v26  ;;  %5882 = vmatpush1.bf16.msra.mxu1 %v5881_v28  ;;  %v5965_v26 = vpack.c.bf16 %v1775_v15, %v1767_v8  ;;  %v1790_v28 = vld [vmem:[%s13623_s2 + $0xc8] sm:$0xff]  ;;  %v5919_v1 = vpack.c.bf16 %v1854_v30, %v1846_v24  ;;  %v1847_v8 = vld [vmem:[%s13623_s2 + $0x290] sm:$0xff] }
 0x21d   :  { %5820 = vmatprep.subr.bf16.mxu0 %v5819_v35  ;;  %5884 = vmatprep.subr.bf16.mxu1 %v5883_v40  ;;  %v5903_v35 = vpack.c.bf16 %v1790_v28, %v1782_v17  ;;  %v5967_v40 = vpack.c.bf16 %v1792_v34, %v1784_v5  ;;  %v1855_v17 = vld [vmem:[%s13623_s2 + $0x2d0] sm:$0xff]  ;;  %v1870_v28 = vld [vmem:[%s13623_s2 + $0x348] sm:$0xff]  ;;  %v1864_v5 = vld [vmem:[%s13623_s2 + $0x318] sm:$0xff] }
 0x21e   :  { %v1872_v34 = vld [vmem:[%s13623_s2 + $0x358] sm:$0xff]  ;;  %v1911_v30 = vld [vmem:[%s13623_s2 + $0x490] sm:$0xff] }
 0x220   :  { %5822 = vmatpush1.bf16.msra.mxu0 %v5821_v0  ;;  %5886 = vmatpush1.bf16.msra.mxu1 %v5885_v3  ;;  %v1806_v0 = vld [vmem:[%s13623_s2 + $0x148] sm:$0xff]  ;;  %v5969_v3 = vpack.c.bf16 %v1791_v6, %v1783_v49  ;;  %v1869_v49 = vld [vmem:[%s13623_s2 + $0x340] sm:$0xff]  ;;  %v5987_v6 = vpack.c.bf16 %v1872_v34, %v1864_v5  ;;  %v1935_v5 = vld [vmem:[%s13623_s2 + $0x550] sm:$0xff] }
 0x221   :  { %5824 = vmatprep.subr.bf16.mxu0 %v5823_v45  ;;  %5888 = vmatprep.subr.bf16.mxu1 %v5887_v48  ;;  %v5907_v10 = vpack.c.bf16 %v1806_v0, %v1798_v56  ;;  %v1808_v45 = vld [vmem:[%s13623_s2 + $0x158] sm:$0xff]  ;;  %v1797_v48 = vld [vmem:[%s13623_s2 + $0x100] sm:$0xff]  ;;  %v1871_v56 = vld [vmem:[%s13623_s2 + $0x350] sm:$0xff] }
 0x222   :  { %v5971_v25 = vpack.c.bf16 %v1808_v45, %v1800_v11  ;;  %v5909_v43 = vpack.c.bf16 %v1805_v27, %v1797_v48  ;;  %v1878_v0 = vld [vmem:[%s13623_s2 + $0x388] sm:$0xff]  ;;  %v1888_v11 = vld [vmem:[%s13623_s2 + $0x3d8] sm:$0xff]  ;;  %v5925_v45 = vpack.c.bf16 %v1869_v49, %v1861_v47  ;;  %v1877_v27 = vld [vmem:[%s13623_s2 + $0x380] sm:$0xff] }
 0x223   :  { %v1952_v49 = vld [vmem:[%s13623_s2 + $0x5d8] sm:$0xff] }
 0x224   :  { %5826 = vmatpush1.bf16.msra.mxu0 %v5825_v32  ;;  %5890 = vmatpush1.bf16.msra.mxu1 %v5889_v37  ;;  %v1822_v32 = vld [vmem:[%s13623_s2 + $0x1c8] sm:$0xff]  ;;  %v1816_v37 = vld [vmem:[%s13623_s2 + $0x198] sm:$0xff] }
 0x225   :  { %5828 = vmatprep.subr.bf16.mxu0 %v5827_v39  ;;  %5892 = vmatprep.subr.bf16.mxu1 %v5891_v57  ;;  %v5911_v53 = vpack.c.bf16 %v1822_v32, %v1814_v44  ;;  %v1824_v39 = vld [vmem:[%s13623_s2 + $0x1d8] sm:$0xff]  ;;  %v1813_v57 = vld [vmem:[%s13623_s2 + $0x180] sm:$0xff]  ;;  %v1887_v44 = vld [vmem:[%s13623_s2 + $0x3d0] sm:$0xff]  ;;  %v5929_v32 = vpack.c.bf16 %v1885_v33, %v1877_v27 }
 0x226   :  { %v5975_v46 = vpack.c.bf16 %v1824_v39, %v1816_v37  ;;  %v5913_v4 = vpack.c.bf16 %v1821_v42, %v1813_v57  ;;  %v1896_v39 = vld [vmem:[%s13623_s2 + $0x418] sm:$0xff] }
 0x227   :  { %v1904_v42 = vld [vmem:[%s13623_s2 + $0x458] sm:$0xff] }
 0x228   :  { %5830 = vmatpush1.bf16.msra.mxu0 %v5829_v62  ;;  %5894 = vmatpush1.bf16.msra.mxu1 %v5893_v63  ;;  %v1832_v62 = vld [vmem:[%s13623_s2 + $0x218] sm:$0xff] }
 0x229   :  { %5832 = vmatprep.subr.bf16.mxu0 %v5831_v9  ;;  %5896 = vmatprep.subr.bf16.mxu1 %v5895_v12  ;;  %v1840_v63 = vld [vmem:[%s13623_s2 + $0x258] sm:$0xff]  ;;  %v5977_v9 = vpack.c.bf16 %v1823_v51, %v1815_v50  ;;  %v5915_v12 = vpack.c.bf16 %v1838_v61, %v1830_v52  ;;  %v1893_v50 = vld [vmem:[%s13623_s2 + $0x400] sm:$0xff]  ;;  %v1895_v52 = vld [vmem:[%s13623_s2 + $0x410] sm:$0xff] }
 0x22a   :  { %v1901_v51 = vld [vmem:[%s13623_s2 + $0x440] sm:$0xff]  ;;  %v1968_v33 = vld [vmem:[%s13623_s2 + $0x658] sm:$0xff] }
 0x22b   :  { %v5933_v61 = vpack.c.bf16 %v1901_v51, %v1893_v50  ;;  %v1984_v50 = vld [vmem:[%s13623_s2 + $0x6d8] sm:$0xff]  ;;  %v1973_v51 = vld [vmem:[%s13623_s2 + $0x680] sm:$0xff] }
 0x22c   :  { %5834 = vmatpush1.bf16.msra.mxu0 %v5833_v21  ;;  %5898 = vmatpush1.bf16.msra.mxu1 %v5897_v23  ;;  %v5979_v21 = vpack.c.bf16 %v1840_v63, %v1832_v62  ;;  %v1839_v23 = vld [vmem:[%s13623_s2 + $0x250] sm:$0xff] }
 0x22d   :  { %5900 = vmatprep.subr.bf16.mxu0 %v5899_v22  ;;  %5964 = vmatprep.subr.bf16.mxu1 %v5963_v2  ;;  %v1856_v22 = vld [vmem:[%s13623_s2 + $0x2d8] sm:$0xff]  ;;  %v5981_v60 = vpack.c.bf16 %v1839_v23, %v1831_v16  ;;  %v1845_v2 = vld [vmem:[%s13623_s2 + $0x280] sm:$0xff]  ;;  %v1903_v62 = vld [vmem:[%s13623_s2 + $0x450] sm:$0xff] }
 0x22e   :  { %v5983_v15 = vpack.c.bf16 %v1856_v22, %v1848_v31  ;;  %v5997_v63 = vpack.c.bf16 %v1903_v62, %v1895_v52  ;;  %v1909_v16 = vld [vmem:[%s13623_s2 + $0x480] sm:$0xff]  ;;  %v1919_v31 = vld [vmem:[%s13623_s2 + $0x4d0] sm:$0xff] }
 0x22f   :  { %1622 = vmatmul.mubr.f32.vlgmr.msra.gmra.mrb[4].mxu0 %v8843_v29  ;;  %1693 = vmatmul.mubr.f32.vlgmr.msra.gmra.mrb[8].mxu1 %v8843_v29  ;;  %v6001_v22 = vpack.c.bf16 %v1919_v31, %v1911_v30  ;;  %v1981_v52 = vld [vmem:[%s13623_s2 + $0x6c0] sm:$0xff]  ;;  %v1991_v31 = vld [vmem:[%s13623_s2 + $0x710] sm:$0xff] }
 0x230   :  { %5902 = vmatpush1.bf16.msra.mxu0 %v5901_v7  ;;  %5966 = vmatpush1.bf16.msra.mxu1 %v5965_v26  ;;  %v1853_v7 = vld [vmem:[%s13623_s2 + $0x2c0] sm:$0xff]  ;;  %v1862_v26 = vld [vmem:[%s13623_s2 + $0x308] sm:$0xff]  ;;  %v5953_v62 = vpack.c.bf16 %v1981_v52, %v1973_v51 }
 0x231   :  { %5904 = vmatprep.subr.bf16.mxu0 %v5903_v35  ;;  %5968 = vmatprep.subr.bf16.mxu1 %v5967_v40  ;;  %v5921_v35 = vpack.c.bf16 %v1853_v7, %v1845_v2  ;;  %v5985_v40 = vpack.c.bf16 %v1855_v17, %v1847_v8  ;;  %v5923_v41 = vpack.c.bf16 %v1870_v28, %v1862_v26  ;;  %v1936_v7 = vld [vmem:[%s13623_s2 + $0x558] sm:$0xff]  ;;  %v1925_v8 = vld [vmem:[%s13623_s2 + $0x500] sm:$0xff]  ;;  %v1927_v28 = vld [vmem:[%s13623_s2 + $0x510] sm:$0xff] }
 0x232   :  { %v6005_v34 = vpack.c.bf16 %v1935_v5, %v1927_v28  ;;  %v1997_v30 = vld [vmem:[%s13623_s2 + $0x740] sm:$0xff]  ;;  %v2007_v5 = vld [vmem:[%s13623_s2 + $0x790] sm:$0xff] }
 0x233   :  { %v2013_v28 = vld [vmem:[%s13623_s2 + $0x7c0] sm:$0xff] }
 0x234   :  { %5906 = vmatpush1.bf16.msra.mxu0 %v5905_v55  ;;  %5970 = vmatpush1.bf16.msra.mxu1 %v5969_v3  ;;  %v1863_v55 = vld [vmem:[%s13623_s2 + $0x310] sm:$0xff]  ;;  %v1886_v3 = vld [vmem:[%s13623_s2 + $0x3c8] sm:$0xff]  ;;  %v245_v51 = vld [vmem:[%s244_s27] sm:$0xff]  ;;  %s10423_s27 = sld [smem:[#allocation5 + $0x27]] }
 0x235   :  { %5908 = vmatprep.subr.bf16.mxu0 %v5907_v10  ;;  %5972 = vmatprep.subr.bf16.mxu1 %v5971_v25  ;;  %v1880_v10 = vld [vmem:[%s13623_s2 + $0x398] sm:$0xff]  ;;  %v5989_v48 = vpack.c.bf16 %v1871_v56, %v1863_v55  ;;  %v5927_v25 = vpack.c.bf16 %v1886_v3, %v1878_v0  ;;  %v1941_v55 = vld [vmem:[%s13623_s2 + $0x580] sm:$0xff]  ;;  %v1943_v3 = vld [vmem:[%s13623_s2 + $0x590] sm:$0xff]  ;;  %247 = vst [vmem:[#allocation2 + $0xc5] ss:$8 sm:$0xf] %v245_v51 }
 0x236   :  { %v5991_v36 = vpack.c.bf16 %v1888_v11, %v1880_v10  ;;  %v1951_v10 = vld [vmem:[%s13623_s2 + $0x5d0] sm:$0xff]  ;;  %248 = vst [vmem:[#allocation2 + $0xc5] ss:$8 sm:$0xf0] %v245_v51 }
 0x237   :  { %v6009_v11 = vpack.c.bf16 %v1951_v10, %v1943_v3  ;;  %v1795_v51 = vld [vmem:[%s13623_s2 + $0xf0] sm:$0xff] }
 0x238   :  { %5910 = vmatpush1.bf16.msra.mxu0 %v5909_v43  ;;  %5974 = vmatpush1.bf16.msra.mxu1 %v5973_v38  ;;  %v1879_v43 = vld [vmem:[%s13623_s2 + $0x390] sm:$0xff]  ;;  %v1894_v38 = vld [vmem:[%s13623_s2 + $0x408] sm:$0xff] }
 0x239   :  { %5912 = vmatprep.subr.bf16.mxu0 %v5911_v53  ;;  %5976 = vmatprep.subr.bf16.mxu1 %v5975_v46  ;;  %v5993_v37 = vpack.c.bf16 %v1887_v44, %v1879_v43  ;;  %v1902_v53 = vld [vmem:[%s13623_s2 + $0x448] sm:$0xff]  ;;  %v5995_v46 = vpack.c.bf16 %v1904_v42, %v1896_v39  ;;  %v1965_v43 = vld [vmem:[%s13623_s2 + $0x640] sm:$0xff]  ;;  %v1976_v42 = vld [vmem:[%s13623_s2 + $0x698] sm:$0xff] }
 0x23a   :  { %v5931_v57 = vpack.c.bf16 %v1902_v53, %v1894_v38  ;;  %v1967_v38 = vld [vmem:[%s13623_s2 + $0x650] sm:$0xff]  ;;  %v1974_v39 = vld [vmem:[%s13623_s2 + $0x688] sm:$0xff] }
 0x23c   :  { %5914 = vmatpush1.bf16.msra.mxu0 %v5913_v4  ;;  %5978 = vmatpush1.bf16.msra.mxu1 %v5977_v9  ;;  %v1910_v4 = vld [vmem:[%s13623_s2 + $0x488] sm:$0xff] }
 0x23d   :  { %5916 = vmatprep.subr.bf16.mxu0 %v5915_v12  ;;  %5980 = vmatprep.subr.bf16.mxu1 %v5979_v21  ;;  %v1918_v9 = vld [vmem:[%s13623_s2 + $0x4c8] sm:$0xff]  ;;  %v1912_v12 = vld [vmem:[%s13623_s2 + $0x498] sm:$0xff]  ;;  %v1917_v21 = vld [vmem:[%s13623_s2 + $0x4c0] sm:$0xff] }
 0x23e   :  { %v5935_v13 = vpack.c.bf16 %v1918_v9, %v1910_v4  ;;  %v5999_v23 = vpack.c.bf16 %v1920_v14, %v1912_v12  ;;  %v5937_v24 = vpack.c.bf16 %v1917_v21, %v1909_v16  ;;  %v1983_v4 = vld [vmem:[%s13623_s2 + $0x6d0] sm:$0xff]  ;;  %v1990_v9 = vld [vmem:[%s13623_s2 + $0x708] sm:$0xff]  ;;  %v1992_v14 = vld [vmem:[%s13623_s2 + $0x718] sm:$0xff] }
 0x23f   :  { %v2000_v16 = vld [vmem:[%s13623_s2 + $0x758] sm:$0xff] }
 0x240   :  { %5918 = vmatpush1.bf16.msra.mxu0 %v5917_v58  ;;  %5982 = vmatpush1.bf16.msra.mxu1 %v5981_v60  ;;  %v1926_v58 = vld [vmem:[%s13623_s2 + $0x508] sm:$0xff] }
 0x241   :  { %5920 = vmatprep.subr.bf16.mxu0 %v5919_v1  ;;  %5984 = vmatprep.subr.bf16.mxu1 %v5983_v15  ;;  %v1934_v60 = vld [vmem:[%s13623_s2 + $0x548] sm:$0xff]  ;;  %v1928_v1 = vld [vmem:[%s13623_s2 + $0x518] sm:$0xff]  ;;  %v1933_v15 = vld [vmem:[%s13623_s2 + $0x540] sm:$0xff] }
 0x242   :  { %v5939_v2 = vpack.c.bf16 %v1934_v60, %v1926_v58  ;;  %v6003_v17 = vpack.c.bf16 %v1936_v7, %v1928_v1  ;;  %v5941_v26 = vpack.c.bf16 %v1933_v15, %v1925_v8  ;;  %v1999_v58 = vld [vmem:[%s13623_s2 + $0x750] sm:$0xff]  ;;  %v2006_v60 = vld [vmem:[%s13623_s2 + $0x788] sm:$0xff]  ;;  %v2008_v8 = vld [vmem:[%s13623_s2 + $0x798] sm:$0xff] }
 0x243   :  { %v2014_v1 = vld [vmem:[%s13623_s2 + $0x7c8] sm:$0xff]  ;;  %v2016_v15 = vld [vmem:[%s13623_s2 + $0x7d8] sm:$0xff] }
 0x244   :  { %5922 = vmatpush1.bf16.msra.mxu0 %v5921_v35  ;;  %5986 = vmatpush1.bf16.msra.mxu1 %v5985_v40  ;;  %v1942_v35 = vld [vmem:[%s13623_s2 + $0x588] sm:$0xff]  ;;  %v5959_v7 = vpack.c.bf16 %v2014_v1, %v2006_v60 }
 0x245   :  { %5924 = vmatprep.subr.bf16.mxu0 %v5923_v41  ;;  %5988 = vmatprep.subr.bf16.mxu1 %v5987_v6  ;;  %v1950_v40 = vld [vmem:[%s13623_s2 + $0x5c8] sm:$0xff]  ;;  %v1944_v41 = vld [vmem:[%s13623_s2 + $0x598] sm:$0xff]  ;;  %v1949_v6 = vld [vmem:[%s13623_s2 + $0x5c0] sm:$0xff] }
 0x246   :  { %v5943_v47 = vpack.c.bf16 %v1950_v40, %v1942_v35  ;;  %v6007_v56 = vpack.c.bf16 %v1952_v49, %v1944_v41  ;;  %v5945_v0 = vpack.c.bf16 %v1949_v6, %v1941_v55  ;;  %v1770_v41 = vld [vmem:[%s13623_s2 + $0x28] sm:$0xff]  ;;  %v1772_v49 = vld [vmem:[%s13623_s2 + $0x38] sm:$0xff] }
 0x247   :  { %v1780_v6 = vld [vmem:[%s13623_s2 + $0x78] sm:$0xff] }
 0x248   :  { %5926 = vmatpush1.bf16.msra.mxu0 %v5925_v45  ;;  %5990 = vmatpush1.bf16.msra.mxu1 %v5989_v48  ;;  %v1958_v45 = vld [vmem:[%s13623_s2 + $0x608] sm:$0xff] }
 0x249   :  { %5928 = vmatprep.subr.bf16.mxu0 %v5927_v25  ;;  %5992 = vmatprep.subr.bf16.mxu1 %v5991_v36  ;;  %v1966_v48 = vld [vmem:[%s13623_s2 + $0x648] sm:$0xff]  ;;  %v1960_v25 = vld [vmem:[%s13623_s2 + $0x618] sm:$0xff]  ;;  %v1957_v36 = vld [vmem:[%s13623_s2 + $0x600] sm:$0xff] }
 0x24a   :  { %v5947_v27 = vpack.c.bf16 %v1966_v48, %v1958_v45  ;;  %v6011_v44 = vpack.c.bf16 %v1968_v33, %v1960_v25  ;;  %v1151_v45 = vld [vmem:[#allocation2 + $0x80] sm:$0xff]  ;;  %v1153_v48 = vld [vmem:[#allocation2 + $0x90] sm:$0xff]  ;;  %v1152_v25 = vld [vmem:[#allocation2 + $0x88] sm:$0xff] }
 0x24b   :  { %v1154_v33 = vld [vmem:[#allocation2 + $0x98] sm:$0xff] }
 0x24c   :  { %5930 = vmatpush1.bf16.msra.mxu0 %v5929_v32  ;;  %5994 = vmatpush1.bf16.msra.mxu1 %v5993_v37  ;;  %v5949_v32 = vpack.c.bf16 %v1965_v43, %v1957_v36  ;;  %v1959_v37 = vld [vmem:[%s13623_s2 + $0x610] sm:$0xff] }
 0x24d   :  { %5932 = vmatprep.subr.bf16.mxu0 %v5931_v57  ;;  %5996 = vmatprep.subr.bf16.mxu1 %v5995_v46  ;;  %v6013_v53 = vpack.c.bf16 %v1967_v38, %v1959_v37  ;;  %v1982_v57 = vld [vmem:[%s13623_s2 + $0x6c8] sm:$0xff]  ;;  %v210_v38 = vld [vmem:[%s209_s25] sm:$0xff]  ;;  %s5272_s25 = sshll.u32 %s9597_s14, 3  ;;  %s5280_s14 = sshll.u32 %s5279_s11, 3 }
 0x24e   :  { %v5951_v46 = vpack.c.bf16 %v1982_v57, %v1974_v39  ;;  %212 = vst [vmem:[#allocation2 + $0xc0] ss:$8 sm:$0xf] %v210_v38  ;;  %213 = vst [vmem:[#allocation2 + $0xc0] ss:$8 sm:$0xf0] %v210_v38  ;;  %s251_s18 = scalar_lea.vmem %s13622_s1, %s5272_s25 }
 0x24f   :  { %v252_v52 = vld [vmem:[%s251_s18] sm:$0xff]  ;;  %s5276_s25 = sshll.u32 %s5275_s17, 3  ;;  %s5295_s11 = sld [smem:[#allocation5 + $0x2a]] }
 0x250   :  { %5934 = vmatpush1.bf16.msra.mxu0 %v5933_v61  ;;  %5998 = vmatpush1.bf16.msra.mxu1 %v5997_v63  ;;  %v6015_v61 = vpack.c.bf16 %v1984_v50, %v1976_v42  ;;  %v1975_v63 = vld [vmem:[%s13623_s2 + $0x690] sm:$0xff]  ;;  %v224_v42 = vld [vmem:[%s223_s8] sm:$0xff]  ;;  %254 = vst [vmem:[#allocation2 + $0xc6] ss:$8 sm:$0xf] %v252_v52  ;;  %s265_s18 = scalar_lea.vmem %s13622_s1, %s5276_s25  ;;  %s279_s8 = scalar_lea.vmem %s13622_s1, %s5280_s14 }
 0x251   :  { %5936 = vmatprep.subr.bf16.mxu0 %v5935_v13  ;;  %6000 = vmatprep.subr.bf16.mxu1 %v5999_v23  ;;  %v6017_v12 = vpack.c.bf16 %v1983_v4, %v1975_v63  ;;  %v1998_v13 = vld [vmem:[%s13623_s2 + $0x748] sm:$0xff]  ;;  %v6019_v23 = vpack.c.bf16 %v2000_v16, %v1992_v14  ;;  %226 = vst [vmem:[#allocation2 + $0xc2] ss:$8 sm:$0xf] %v224_v42  ;;  %v238_v50 = vld [vmem:[%s237_s21] sm:$0xff]  ;;  %s10417_s21 = sld [smem:[#allocation5 + $0x24]] }
 0x252   :  { %v5955_v21 = vpack.c.bf16 %v1998_v13, %v1990_v9  ;;  %227 = vst [vmem:[#allocation2 + $0xc2] ss:$8 sm:$0xf0] %v224_v42  ;;  %240 = vst [vmem:[#allocation2 + $0xc4] ss:$8 sm:$0xf] %v238_v50 }
 0x253   :  { %241 = vst [vmem:[#allocation2 + $0xc4] ss:$8 sm:$0xf0] %v238_v50  ;;  %255 = vst [vmem:[#allocation2 + $0xc6] ss:$8 sm:$0xf0] %v252_v52 }
 0x254   :  { %5938 = vmatpush1.bf16.msra.mxu0 %v5937_v24  ;;  %6002 = vmatpush1.bf16.msra.mxu1 %v6001_v22  ;;  %v1989_v24 = vld [vmem:[%s13623_s2 + $0x700] sm:$0xff]  ;;  %v1787_v50 = vld [vmem:[%s13623_s2 + $0xb0] sm:$0xff]  ;;  %v1802_v52 = vld [vmem:[%s13623_s2 + $0x128] sm:$0xff] }
 0x255   :  { %5940 = vmatprep.subr.bf16.mxu0 %v5939_v2  ;;  %6004 = vmatprep.subr.bf16.mxu1 %v6003_v17  ;;  %v5957_v22 = vpack.c.bf16 %v1997_v30, %v1989_v24  ;;  %v6021_v2 = vpack.c.bf16 %v1999_v58, %v1991_v31  ;;  %v2005_v17 = vld [vmem:[%s13623_s2 + $0x780] sm:$0xff]  ;;  %v1156_v24 = vld [vmem:[#allocation2 + $0xa8] sm:$0xff]  ;;  %v1158_v30 = vld [vmem:[#allocation2 + $0xb8] sm:$0xff] }
 0x256   :  { %v5961_v35 = vpack.c.bf16 %v2013_v28, %v2005_v17  ;;  %v1793_v42 = vld [vmem:[%s13623_s2 + $0xe0] sm:$0xff] }
 0x257   :  { %s5284_s17 = sshll.u32 %s10417_s21, 3  ;;  %s12069_s21 = sld [smem:[#allocation5 + $0x36]] }
 0x258   :  { %5942 = vmatpush1.bf16.msra.mxu0 %v5941_v26  ;;  %6006 = vmatpush1.bf16.msra.mxu1 %v6005_v34  ;;  %v6023_v26 = vpack.c.bf16 %v2016_v15, %v2008_v8  ;;  %v2015_v34 = vld [vmem:[%s13623_s2 + $0x7d0] sm:$0xff]  ;;  %s293_s25 = scalar_lea.vmem %s13622_s1, %s5284_s17  ;;  %s5291_s17 = sld [smem:[#allocation5 + $0x28]] }
 0x259   :  { %5944 = vmatprep.subr.bf16.mxu0 %v5943_v47  ;;  %6008 = vmatprep.subr.bf16.mxu1 %v6007_v56  ;;  %v6025_v40 = vpack.c.bf16 %v2015_v34, %v2007_v5  ;;  %v1778_v47 = vld [vmem:[%s13623_s2 + $0x68] sm:$0xff]  ;;  %v6091_v56 = vpack.c.bf16 %v1780_v6, %v1772_v49 }
 0x25a   :  { %v6027_v55 = vpack.c.bf16 %v1778_v47, %v1770_v41 }
 0x25c   :  { %5946 = vmatpush1.bf16.msra.mxu0 %v5945_v0  ;;  %6010 = vmatpush1.bf16.msra.mxu1 %v6009_v11 }
 0x25d   :  { %5948 = vmatprep.subr.bf16.mxu0 %v5947_v27  ;;  %6012 = vmatprep.subr.bf16.mxu1 %v6011_v44 }
 0x260   :  { %5950 = vmatpush1.bf16.msra.mxu0 %v5949_v32  ;;  %6014 = vmatpush1.bf16.msra.mxu1 %v6013_v53  ;;  %v217_v53 = vld [vmem:[%s216_s23] sm:$0xff]  ;;  %s5290_s23 = sshll.u32 %s10423_s27, 3  ;;  %s5298_s27 = sshll.u32 %s5297_s22, 3 }
 0x261   :  { %5952 = vmatprep.subr.bf16.mxu0 %v5951_v46  ;;  %6016 = vmatprep.subr.bf16.mxu1 %v6015_v61  ;;  %219 = vst [vmem:[#allocation2 + $0xc1] ss:$8 sm:$0xf] %v217_v53  ;;  %220 = vst [vmem:[#allocation2 + $0xc1] ss:$8 sm:$0xf0] %v217_v53 }
 0x262   :  { %v231_v46 = vld [vmem:[%s230_s28] sm:$0xff]  ;;  %s286_s28 = scalar_lea.vmem %s13622_s1, %s5282_s20  ;;  %s314_s20 = scalar_lea.vmem %s13622_s1, %s5290_s23 }
 0x263   :  { %233 = vst [vmem:[#allocation2 + $0xc3] ss:$8 sm:$0xf] %v231_v46  ;;  %234 = vst [vmem:[#allocation2 + $0xc3] ss:$8 sm:$0xf0] %v231_v46 }
 0x264   :  { %5954 = vmatpush1.bf16.msra.mxu0 %v5953_v62  ;;  %6018 = vmatpush1.bf16.msra.mxu1 %v6017_v12  ;;  %v259_v61 = vld [vmem:[%s258_s12] sm:$0xff]  ;;  %s272_s12 = scalar_lea.vmem %s13622_s1, %s5278_s29  ;;  %s11243_s29 = sld [smem:[#allocation5 + $0x2d]] }
 0x265   :  { %5956 = vmatprep.subr.bf16.mxu0 %v5955_v21  ;;  %6020 = vmatprep.subr.bf16.mxu1 %v6019_v23  ;;  %261 = vst [vmem:[#allocation2 + $0xc7] ss:$8 sm:$0xf] %v259_v61  ;;  %262 = vst [vmem:[#allocation2 + $0xc7] ss:$8 sm:$0xf0] %v259_v61 }
 0x266   :  { %v1155_v21 = vld [vmem:[#allocation2 + $0xa0] sm:$0xff]  ;;  %v1157_v23 = vld [vmem:[#allocation2 + $0xb0] sm:$0xff]  ;;  %s5294_s23 = sshll.u32 %s5293_s24, 3  ;;  %s5313_s22 = sld [smem:[#allocation5 + $0x33]] }
 0x268   :  { %5958 = vmatpush1.bf16.msra.mxu0 %v5957_v22  ;;  %6022 = vmatpush1.bf16.msra.mxu1 %v6021_v2 }
 0x269   :  { %5960 = vmatprep.subr.bf16.mxu0 %v5959_v7  ;;  %6024 = vmatprep.subr.bf16.mxu1 %v6023_v26 }
 0x26a   :  { %s5302_s24 = sshll.u32 %s11243_s29, 3 }
 0x26b   :  { %s356_s30 = scalar_lea.vmem %s13622_s1, %s5302_s24  ;;  %s5309_s24 = sld [smem:[#allocation5 + $0x31]] }
 0x26c   :  { %5962 = vmatpush1.bf16.msra.mxu0 %v5961_v35  ;;  %6026 = vmatpush1.bf16.msra.mxu1 %v6025_v40 }
 0x26d   :  { %6028 = vmatprep.subr.bf16.mxu0 %v6027_v55  ;;  %6092 = vmatprep.subr.bf16.mxu1 %v6091_v56 }
 0x2c2   :  { %v1481_v0 = vpop.f32.mrb[2].mxu0  ;;  %v1552_v3 = vpop.f32.mrb[6].mxu1 }
 0x2c3   :  { %v1483_v10 = vpop.f32.mrb[3].mxu0  ;;  %v1554_v11 = vpop.f32.mrb[7].mxu1  ;;  %v1699_v27 = vadd.f32 %v1481_v0, %v1151_v45  ;;  %v1701_v36 = vadd.f32 %v1552_v3, %v1153_v48  ;;  %v1777_v48 = vld [vmem:[%s13623_s2 + $0x60] sm:$0xff] }
 0x2c4   :  { %v1700_v43 = vadd.f32 %v1483_v10, %v1152_v25  ;;  %v1702_v44 = vadd.f32 %v1554_v11, %v1154_v33  ;;  %v1771_v25 = vld [vmem:[%s13623_s2 + $0x30] sm:$0xff] }
 0x2c5   :  { %v5351_v32 = vmul.f32 -1.442695, %v1699_v27  ;;  %v5353_v37 = vmul.f32 -1.442695, %v1701_v36  ;;  %v1779_v27 = vld [vmem:[%s13623_s2 + $0x70] sm:$0xff]  ;;  %v1786_v36 = vld [vmem:[%s13623_s2 + $0xa8] sm:$0xff] }
 0x2c6   :  { %v5352_v39 = vmul.f32 -1.442695, %v1700_v43  ;;  %v5354_v57 = vmul.f32 -1.442695, %v1702_v44  ;;  %v1794_v44 = vld [vmem:[%s13623_s2 + $0xe8] sm:$0xff] }
 0x2c7   :  { %7308 = vpow2.f32 %v5351_v32  ;;  %v1788_v32 = vld [vmem:[%s13623_s2 + $0xb8] sm:$0xff]  ;;  %v6031_v61 = vpack.c.bf16 %v1794_v44, %v1786_v36  ;;  %v1857_v36 = vld [vmem:[%s13623_s2 + $0x2e0] sm:$0xff] }
 0x2c8   :  { %7310 = vpow2.f32 %v5353_v37  ;;  %v1796_v37 = vld [vmem:[%s13623_s2 + $0xf8] sm:$0xff] }
 0x2c9   :  { %7312 = vpow2.f32 %v5352_v39  ;;  %v6093_v39 = vpack.c.bf16 %v1779_v27, %v1771_v25 }
 0x2ca   :  { %7314 = vpow2.f32 %v5354_v57  ;;  %v1785_v57 = vld [vmem:[%s13623_s2 + $0xa0] sm:$0xff] }
 0x2d1   :  { %v7309_v62 = vpop.eup %7308 }
 0x2d2   :  { %v7311_v63 = vpop.eup %7310  ;;  %v1713_v12 = vadd.f32 1.0, %v7309_v62  ;;  %v6095_v62 = vpack.c.bf16 %v1796_v37, %v1788_v32  ;;  %v1851_v32 = vld [vmem:[%s13623_s2 + $0x2b0] sm:$0xff] }
 0x2d3   :  { %v7313_v4 = vpop.eup %7312  ;;  %v1725_v13 = vadd.f32 1.0, %v7311_v63  ;;  %v1810_v63 = vld [vmem:[%s13623_s2 + $0x168] sm:$0xff]  ;;  %v1859_v37 = vld [vmem:[%s13623_s2 + $0x2f0] sm:$0xff] }
 0x2d4   :  { %v7315_v9 = vpop.eup %7314  ;;  %v1714_v14 = vadd.f32 1.0, %v7313_v4  ;;  %7316 = vrcp.f32 %v1713_v12  ;;  %v1804_v4 = vld [vmem:[%s13623_s2 + $0x138] sm:$0xff]  ;;  %v6033_v12 = vpack.c.bf16 %v1793_v42, %v1785_v57 }
 0x2d5   :  { %v1726_v16 = vadd.f32 1.0, %v7315_v9  ;;  %7318 = vrcp.f32 %v1725_v13  ;;  %v1812_v9 = vld [vmem:[%s13623_s2 + $0x178] sm:$0xff]  ;;  %v6097_v13 = vpack.c.bf16 %v1795_v51, %v1787_v50  ;;  %v6113_v51 = vpack.c.bf16 %v1859_v37, %v1851_v32  ;;  %v1929_v32 = vld [vmem:[%s13623_s2 + $0x520] sm:$0xff] }
 0x2d6   :  { %7320 = vrcp.f32 %v1714_v14  ;;  %v1801_v14 = vld [vmem:[%s13623_s2 + $0x120] sm:$0xff]  ;;  %v1868_v57 = vld [vmem:[%s13623_s2 + $0x338] sm:$0xff] }
 0x2d7   :  { %7322 = vrcp.f32 %v1726_v16  ;;  %v1809_v16 = vld [vmem:[%s13623_s2 + $0x160] sm:$0xff]  ;;  %v1876_v42 = vld [vmem:[%s13623_s2 + $0x378] sm:$0xff] }
 0x2d8   :  { %v1937_v37 = vld [vmem:[%s13623_s2 + $0x560] sm:$0xff] }
 0x2de   :  { %v7317_v26 = vpop.eup %7316 }
 0x2df   :  { %v7319_v28 = vpop.eup %7318 }
 0x2e0   :  { %v7321_v5 = vpop.eup %7320  ;;  %v1745_v41 = vmul.f32 %v7319_v28, %v8787_v18  ;;  %v1769_v18 = vld [vmem:[%s13623_s2 + $0x20] sm:$0xff]  ;;  %v1827_v28 = vld [vmem:[%s13623_s2 + $0x1f0] sm:$0xff] }
 0x2e1   :  { %v7323_v34 = vpop.eup %7322  ;;  %v6029_v53 = vpack.c.bf16 %v1777_v48, %v1769_v18  ;;  %v1858_v18 = vld [vmem:[%s13623_s2 + $0x2e8] sm:$0xff]  ;;  %v1860_v48 = vld [vmem:[%s13623_s2 + $0x2f8] sm:$0xff] }
 0x2e2   :  { %v1746_v55 = vmul.f32 %v7323_v34, %v8789_v19  ;;  %v1842_v34 = vld [vmem:[%s13623_s2 + $0x268] sm:$0xff] }
 0x302   :  { %v1623_v31 = vpop.f32.mrb[4].mxu0  ;;  %v1694_v22 = vpop.f32.mrb[8].mxu1 }
 0x303   :  { %v1703_v58 = vadd.f32 %v1623_v31, %v1155_v21  ;;  %v1705_v60 = vadd.f32 %v1694_v22, %v1157_v23  ;;  %v1625_v1 = vpop.f32.mrb[5].mxu0  ;;  %v1696_v2 = vpop.f32.mrb[9].mxu1  ;;  %v6035_v21 = vpack.c.bf16 %v1810_v63, %v1802_v52  ;;  %v6099_v23 = vpack.c.bf16 %v1812_v9, %v1804_v4  ;;  %v1818_v31 = vld [vmem:[%s13623_s2 + $0x1a8] sm:$0xff]  ;;  %v1865_v52 = vld [vmem:[%s13623_s2 + $0x320] sm:$0xff]  ;;  %v1867_v4 = vld [vmem:[%s13623_s2 + $0x330] sm:$0xff] }
 0x304   :  { %v1704_v7 = vadd.f32 %v1625_v1, %v1156_v24  ;;  %v1706_v8 = vadd.f32 %v1696_v2, %v1158_v30  ;;  %v1803_v24 = vld [vmem:[%s13623_s2 + $0x130] sm:$0xff]  ;;  %v1826_v22 = vld [vmem:[%s13623_s2 + $0x1e8] sm:$0xff]  ;;  %v6037_v1 = vpack.c.bf16 %v1809_v16, %v1801_v14  ;;  %v6115_v63 = vpack.c.bf16 %v1876_v42, %v1868_v57  ;;  %v1884_v14 = vld [vmem:[%s13623_s2 + $0x3b8] sm:$0xff] }
 0x305   :  { %7324 = vtanh.f32 %v1703_v58  ;;  %v5355_v15 = vmul.f32 -1.442695, %v1705_v60  ;;  %v1811_v30 = vld [vmem:[%s13623_s2 + $0x170] sm:$0xff]  ;;  %v1820_v58 = vld [vmem:[%s13623_s2 + $0x1b8] sm:$0xff] }
 0x306   :  { %7326 = vtanh.f32 %v1704_v7  ;;  %v5356_v17 = vmul.f32 -1.442695, %v1706_v8  ;;  %v1828_v60 = vld [vmem:[%s13623_s2 + $0x1f8] sm:$0xff]  ;;  %v6101_v2 = vpack.c.bf16 %v1811_v30, %v1803_v24  ;;  %v1817_v7 = vld [vmem:[%s13623_s2 + $0x1a0] sm:$0xff]  ;;  %v1875_v9 = vld [vmem:[%s13623_s2 + $0x370] sm:$0xff] }
 0x307   :  { %7328 = vpow2.f32 %v5355_v15  ;;  %v1825_v8 = vld [vmem:[%s13623_s2 + $0x1e0] sm:$0xff]  ;;  %v6039_v15 = vpack.c.bf16 %v1826_v22, %v1818_v31  ;;  %v1892_v16 = vld [vmem:[%s13623_s2 + $0x3f8] sm:$0xff]  ;;  %v1931_v57 = vld [vmem:[%s13623_s2 + $0x530] sm:$0xff] }
 0x308   :  { %7330 = vpow2.f32 %v5356_v17  ;;  %v6103_v17 = vpack.c.bf16 %v1828_v60, %v1820_v58  ;;  %v1881_v24 = vld [vmem:[%s13623_s2 + $0x3a0] sm:$0xff]  ;;  %v6119_v22 = vpack.c.bf16 %v1892_v16, %v1884_v14  ;;  %v1883_v58 = vld [vmem:[%s13623_s2 + $0x3b0] sm:$0xff] }
 0x309   :  { %v1889_v30 = vld [vmem:[%s13623_s2 + $0x3e0] sm:$0xff]  ;;  %v1891_v60 = vld [vmem:[%s13623_s2 + $0x3f0] sm:$0xff] }
 0x30a   :  { %v1939_v42 = vld [vmem:[%s13623_s2 + $0x570] sm:$0xff] }
 0x30b   :  { %v1947_v14 = vld [vmem:[%s13623_s2 + $0x5b0] sm:$0xff] }
 0x30c   :  { %v1955_v16 = vld [vmem:[%s13623_s2 + $0x5f0] sm:$0xff] }
 0x30f   :  { %v7325_v35 = vpop.eup %7324 }
 0x310   :  { %v7327_v40 = vpop.eup %7326  ;;  %v1747_v47 = vmul.f32 %v7325_v35, %v7317_v26  ;;  %v1819_v26 = vld [vmem:[%s13623_s2 + $0x1b0] sm:$0xff]  ;;  %v1836_v35 = vld [vmem:[%s13623_s2 + $0x238] sm:$0xff] }
 0x311   :  { %v7329_v49 = vpop.eup %7328  ;;  %v1748_v6 = vmul.f32 %v7327_v40, %v7321_v5  ;;  %v1834_v5 = vld [vmem:[%s13623_s2 + $0x228] sm:$0xff]  ;;  %v1844_v40 = vld [vmem:[%s13623_s2 + $0x278] sm:$0xff] }
 0x312   :  { %v7331_v56 = vpop.eup %7330  ;;  %v9631_v0 = vadd.f32 %v1747_v47, %v1745_v41  ;;  %v1739_v3 = vadd.f32 1.0, %v7329_v49  ;;  %v6041_v41 = vpack.c.bf16 %v1825_v8, %v1817_v7  ;;  %v6105_v47 = vpack.c.bf16 %v1827_v28, %v1819_v26  ;;  %v1833_v49 = vld [vmem:[%s13623_s2 + $0x220] sm:$0xff]  ;;  %v1900_v7 = vld [vmem:[%s13623_s2 + $0x438] sm:$0xff] }
 0x313   :  { %v9633_v10 = vadd.f32 %v1748_v6, %v1746_v55  ;;  %v1740_v11 = vadd.f32 1.0, %v7331_v56  ;;  %v1841_v55 = vld [vmem:[%s13623_s2 + $0x260] sm:$0xff]  ;;  %v6043_v6 = vpack.c.bf16 %v1842_v34, %v1834_v5  ;;  %v6107_v56 = vpack.c.bf16 %v1844_v40, %v1836_v35  ;;  %v1908_v8 = vld [vmem:[%s13623_s2 + $0x478] sm:$0xff]  ;;  %v1899_v35 = vld [vmem:[%s13623_s2 + $0x430] sm:$0xff] }
 0x314   :  { %7332 = vtanh.f32 %v9631_v0  ;;  %v6045_v25 = vpack.c.bf16 %v1841_v55, %v1833_v49  ;;  %v1897_v26 = vld [vmem:[%s13623_s2 + $0x420] sm:$0xff]  ;;  %v6123_v34 = vpack.c.bf16 %v1908_v8, %v1900_v7  ;;  %v1907_v40 = vld [vmem:[%s13623_s2 + $0x470] sm:$0xff]  ;;  %v1916_v49 = vld [vmem:[%s13623_s2 + $0x4b8] sm:$0xff] }
 0x315   :  { %7334 = vrcp.f32 %v1739_v3  ;;  %v1835_v3 = vld [vmem:[%s13623_s2 + $0x230] sm:$0xff]  ;;  %v1905_v28 = vld [vmem:[%s13623_s2 + $0x460] sm:$0xff]  ;;  %v1924_v55 = vld [vmem:[%s13623_s2 + $0x4f8] sm:$0xff] }
 0x316   :  { %7336 = vtanh.f32 %v9633_v10  ;;  %v1963_v7 = vld [vmem:[%s13623_s2 + $0x630] sm:$0xff] }
 0x317   :  { %7338 = vrcp.f32 %v1740_v11  ;;  %v1843_v11 = vld [vmem:[%s13623_s2 + $0x270] sm:$0xff] }
 0x318   :  { %v6109_v27 = vpack.c.bf16 %v1843_v11, %v1835_v3  ;;  %v1913_v3 = vld [vmem:[%s13623_s2 + $0x4a0] sm:$0xff]  ;;  %v1971_v8 = vld [vmem:[%s13623_s2 + $0x670] sm:$0xff] }
 0x319   :  { %v1921_v11 = vld [vmem:[%s13623_s2 + $0x4e0] sm:$0xff] }
 0x31e   :  { %v7333_v45 = vpop.eup %7332 }
 0x31f   :  { %v7335_v19 = vpop.eup %7334 }
 0x320   :  { %v7337_v33 = vpop.eup %7336  ;;  %v9669_v46 = vmul.f32 %v7335_v19, %v7333_v45  ;;  %v1850_v45 = vld [vmem:[%s13623_s2 + $0x2a8] sm:$0xff]  ;;  %v1852_v19 = vld [vmem:[%s13623_s2 + $0x2b8] sm:$0xff] }
 0x321   :  { %v7339_v43 = vpop.eup %7338  ;;  %v6111_v44 = vpack.c.bf16 %v1860_v48, %v1852_v19  ;;  %v1915_v19 = vld [vmem:[%s13623_s2 + $0x4b0] sm:$0xff] }
 0x322   :  { %v9661_v38 = vmul.f32 %v7339_v43, %v7337_v33  ;;  %v1849_v33 = vld [vmem:[%s13623_s2 + $0x2a0] sm:$0xff]  ;;  %v6047_v43 = vpack.c.bf16 %v1858_v18, %v1850_v45  ;;  %v6127_v18 = vpack.c.bf16 %v1924_v55, %v1916_v49  ;;  %v1923_v48 = vld [vmem:[%s13623_s2 + $0x4f0] sm:$0xff] }
 0x323   :  { %v6049_v50 = vpack.c.bf16 %v1857_v36, %v1849_v33  ;;  %v1932_v33 = vld [vmem:[%s13623_s2 + $0x538] sm:$0xff]  ;;  %v1979_v49 = vld [vmem:[%s13623_s2 + $0x6b0] sm:$0xff] }
 0x324   :  { %2085 = vmatprep.mubr.f32.mxu0 %v9661_v38  ;;  %2156 = vmatprep.mubr.f32.mxu1 %v9661_v38  ;;  %v1940_v36 = vld [vmem:[%s13623_s2 + $0x578] sm:$0xff]  ;;  %v1987_v55 = vld [vmem:[%s13623_s2 + $0x6f0] sm:$0xff] }
 0x325   :  { %2086 = vmatmul.mubr.f32.vlgmr.msra.gmra.mrb[6].mxu0 %v9669_v46  ;;  %2157 = vmatmul.mubr.f32.vlgmr.msra.gmra.mrb[10].mxu1 %v9669_v46 }
 0x326   :  { %6030 = vmatpush1.bf16.msra.mxu0 %v6029_v53  ;;  %6094 = vmatpush1.bf16.msra.mxu1 %v6093_v39  ;;  %v1866_v53 = vld [vmem:[%s13623_s2 + $0x328] sm:$0xff] }
 0x327   :  { %2227 = vmatprep.mubr.f32.mxu0 %v9661_v38  ;;  %2298 = vmatprep.mubr.f32.mxu1 %v9661_v38  ;;  %v1874_v39 = vld [vmem:[%s13623_s2 + $0x368] sm:$0xff] }
 0x328   :  { %6032 = vmatprep.subr.bf16.mxu0 %v6031_v61  ;;  %6096 = vmatprep.subr.bf16.mxu1 %v6095_v62  ;;  %v1873_v61 = vld [vmem:[%s13623_s2 + $0x360] sm:$0xff]  ;;  %v6051_v62 = vpack.c.bf16 %v1874_v39, %v1866_v53  ;;  %v6131_v39 = vpack.c.bf16 %v1940_v36, %v1932_v33  ;;  %v1995_v33 = vld [vmem:[%s13623_s2 + $0x730] sm:$0xff] }
 0x329   :  { %v2003_v36 = vld [vmem:[%s13623_s2 + $0x770] sm:$0xff] }
 0x32a   :  { %6034 = vmatpush1.bf16.msra.mxu0 %v6033_v12  ;;  %6098 = vmatpush1.bf16.msra.mxu1 %v6097_v13  ;;  %v1882_v12 = vld [vmem:[%s13623_s2 + $0x3a8] sm:$0xff] }
 0x32b   :  { %6036 = vmatprep.subr.bf16.mxu0 %v6035_v21  ;;  %6100 = vmatprep.subr.bf16.mxu1 %v6099_v23  ;;  %v1890_v13 = vld [vmem:[%s13623_s2 + $0x3e8] sm:$0xff]  ;;  %v6053_v21 = vpack.c.bf16 %v1873_v61, %v1865_v52  ;;  %v6117_v23 = vpack.c.bf16 %v1875_v9, %v1867_v4  ;;  %v1948_v52 = vld [vmem:[%s13623_s2 + $0x5b8] sm:$0xff]  ;;  %v1945_v4 = vld [vmem:[%s13623_s2 + $0x5a0] sm:$0xff] }
 0x32c   :  { %v6055_v31 = vpack.c.bf16 %v1890_v13, %v1882_v12  ;;  %v1956_v61 = vld [vmem:[%s13623_s2 + $0x5f8] sm:$0xff]  ;;  %v1953_v9 = vld [vmem:[%s13623_s2 + $0x5e0] sm:$0xff] }
 0x32d   :  { %v6135_v13 = vpack.c.bf16 %v1956_v61, %v1948_v52  ;;  %v2011_v52 = vld [vmem:[%s13623_s2 + $0x7b0] sm:$0xff] }
 0x32e   :  { %6038 = vmatpush1.bf16.msra.mxu0 %v6037_v1  ;;  %6102 = vmatpush1.bf16.msra.mxu1 %v6101_v2  ;;  %v1898_v1 = vld [vmem:[%s13623_s2 + $0x428] sm:$0xff]  ;;  %v2019_v61 = vld [vmem:[%s13623_s2 + $0x7f0] sm:$0xff] }
 0x32f   :  { %6040 = vmatprep.subr.bf16.mxu0 %v6039_v15  ;;  %6104 = vmatprep.subr.bf16.mxu1 %v6103_v17  ;;  %v1906_v2 = vld [vmem:[%s13623_s2 + $0x468] sm:$0xff]  ;;  %v6057_v15 = vpack.c.bf16 %v1889_v30, %v1881_v24  ;;  %v6121_v17 = vpack.c.bf16 %v1891_v60, %v1883_v58  ;;  %v1964_v24 = vld [vmem:[%s13623_s2 + $0x638] sm:$0xff]  ;;  %v1961_v58 = vld [vmem:[%s13623_s2 + $0x620] sm:$0xff] }
 0x330   :  { %v6059_v5 = vpack.c.bf16 %v1906_v2, %v1898_v1  ;;  %v1972_v30 = vld [vmem:[%s13623_s2 + $0x678] sm:$0xff]  ;;  %v1969_v60 = vld [vmem:[%s13623_s2 + $0x660] sm:$0xff] }
 0x331   :  { %v6139_v2 = vpack.c.bf16 %v1972_v30, %v1964_v24  ;;  %v2373_v30 = vld [vmem:[%s13623_s2 + $0x10] sm:$0xff] }
 0x332   :  { %6042 = vmatpush1.bf16.msra.mxu0 %v6041_v41  ;;  %6106 = vmatpush1.bf16.msra.mxu1 %v6105_v47  ;;  %v1914_v41 = vld [vmem:[%s13623_s2 + $0x4a8] sm:$0xff] }
 0x333   :  { %6044 = vmatprep.subr.bf16.mxu0 %v6043_v6  ;;  %6108 = vmatprep.subr.bf16.mxu1 %v6107_v56  ;;  %v1922_v47 = vld [vmem:[%s13623_s2 + $0x4e8] sm:$0xff]  ;;  %v6061_v6 = vpack.c.bf16 %v1905_v28, %v1897_v26  ;;  %v6125_v56 = vpack.c.bf16 %v1907_v40, %v1899_v35  ;;  %v1980_v26 = vld [vmem:[%s13623_s2 + $0x6b8] sm:$0xff]  ;;  %v1977_v35 = vld [vmem:[%s13623_s2 + $0x6a0] sm:$0xff] }
 0x334   :  { %v6063_v45 = vpack.c.bf16 %v1922_v47, %v1914_v41  ;;  %v1988_v28 = vld [vmem:[%s13623_s2 + $0x6f8] sm:$0xff]  ;;  %v1985_v40 = vld [vmem:[%s13623_s2 + $0x6e0] sm:$0xff] }
 0x335   :  { %v6143_v47 = vpack.c.bf16 %v1988_v28, %v1980_v26  ;;  %v2389_v26 = vld [vmem:[%s13623_s2 + $0x90] sm:$0xff] }
 0x336   :  { %6046 = vmatpush1.bf16.msra.mxu0 %v6045_v25  ;;  %6110 = vmatpush1.bf16.msra.mxu1 %v6109_v27  ;;  %v1930_v25 = vld [vmem:[%s13623_s2 + $0x528] sm:$0xff] }
 0x337   :  { %6048 = vmatprep.subr.bf16.mxu0 %v6047_v43  ;;  %6112 = vmatprep.subr.bf16.mxu1 %v6111_v44  ;;  %v1938_v27 = vld [vmem:[%s13623_s2 + $0x568] sm:$0xff]  ;;  %v6065_v43 = vpack.c.bf16 %v1921_v11, %v1913_v3  ;;  %v6129_v44 = vpack.c.bf16 %v1923_v48, %v1915_v19  ;;  %v1996_v3 = vld [vmem:[%s13623_s2 + $0x738] sm:$0xff]  ;;  %v1993_v19 = vld [vmem:[%s13623_s2 + $0x720] sm:$0xff] }
 0x338   :  { %v6067_v53 = vpack.c.bf16 %v1938_v27, %v1930_v25  ;;  %v2004_v11 = vld [vmem:[%s13623_s2 + $0x778] sm:$0xff]  ;;  %v2001_v48 = vld [vmem:[%s13623_s2 + $0x760] sm:$0xff] }
 0x339   :  { %v6147_v27 = vpack.c.bf16 %v2004_v11, %v1996_v3  ;;  %v2405_v3 = vld [vmem:[%s13623_s2 + $0x110] sm:$0xff] }
 0x33a   :  { %6050 = vmatpush1.bf16.msra.mxu0 %v6049_v50  ;;  %6114 = vmatpush1.bf16.msra.mxu1 %v6113_v51  ;;  %v1946_v50 = vld [vmem:[%s13623_s2 + $0x5a8] sm:$0xff]  ;;  %v2413_v11 = vld [vmem:[%s13623_s2 + $0x150] sm:$0xff] }
 0x33b   :  { %6052 = vmatprep.subr.bf16.mxu0 %v6051_v62  ;;  %6116 = vmatprep.subr.bf16.mxu1 %v6115_v63  ;;  %v1954_v51 = vld [vmem:[%s13623_s2 + $0x5e8] sm:$0xff]  ;;  %v6069_v62 = vpack.c.bf16 %v1937_v37, %v1929_v32  ;;  %v6133_v63 = vpack.c.bf16 %v1939_v42, %v1931_v57  ;;  %v2012_v32 = vld [vmem:[%s13623_s2 + $0x7b8] sm:$0xff]  ;;  %v2009_v57 = vld [vmem:[%s13623_s2 + $0x7a0] sm:$0xff] }
 0x33c   :  { %v6071_v12 = vpack.c.bf16 %v1954_v51, %v1946_v50  ;;  %v2020_v37 = vld [vmem:[%s13623_s2 + $0x7f8] sm:$0xff]  ;;  %v2017_v51 = vld [vmem:[%s13623_s2 + $0x7e0] sm:$0xff] }
 0x33d   :  { %v6151_v50 = vpack.c.bf16 %v2020_v37, %v2012_v32  ;;  %v2421_v32 = vld [vmem:[%s13623_s2 + $0x190] sm:$0xff] }
 0x33e   :  { %6054 = vmatpush1.bf16.msra.mxu0 %v6053_v21  ;;  %6118 = vmatpush1.bf16.msra.mxu1 %v6117_v23  ;;  %v1962_v21 = vld [vmem:[%s13623_s2 + $0x628] sm:$0xff]  ;;  %v2429_v37 = vld [vmem:[%s13623_s2 + $0x1d0] sm:$0xff] }
 0x33f   :  { %6056 = vmatprep.subr.bf16.mxu0 %v6055_v31  ;;  %6120 = vmatprep.subr.bf16.mxu1 %v6119_v22  ;;  %v1970_v23 = vld [vmem:[%s13623_s2 + $0x668] sm:$0xff]  ;;  %v6073_v31 = vpack.c.bf16 %v1953_v9, %v1945_v4  ;;  %v6137_v22 = vpack.c.bf16 %v1955_v16, %v1947_v14  ;;  %v2382_v14 = vld [vmem:[%s13623_s2 + $0x58] sm:$0xff]  ;;  %v2371_v16 = vld [vmem:[%s13623_s2] sm:$0xff] }
 0x340   :  { %v6075_v1 = vpack.c.bf16 %v1970_v23, %v1962_v21  ;;  %v2372_v4 = vld [vmem:[%s13623_s2 + $0x8] sm:$0xff]  ;;  %v2379_v21 = vld [vmem:[%s13623_s2 + $0x40] sm:$0xff] }
 0x341   :  { %v2380_v9 = vld [vmem:[%s13623_s2 + $0x48] sm:$0xff]  ;;  %v6157_v24 = vpack.c.bf16 %v2379_v21, %v2371_v16  ;;  %v2462_v16 = vld [vmem:[%s13623_s2 + $0x2d8] sm:$0xff] }
 0x342   :  { %6058 = vmatpush1.bf16.msra.mxu0 %v6057_v15  ;;  %6122 = vmatpush1.bf16.msra.mxu1 %v6121_v17  ;;  %v1978_v15 = vld [vmem:[%s13623_s2 + $0x6a8] sm:$0xff] }
 0x343   :  { %6060 = vmatprep.subr.bf16.mxu0 %v6059_v5  ;;  %6124 = vmatprep.subr.bf16.mxu1 %v6123_v34  ;;  %v1986_v17 = vld [vmem:[%s13623_s2 + $0x6e8] sm:$0xff]  ;;  %v6077_v5 = vpack.c.bf16 %v1969_v60, %v1961_v58  ;;  %v6141_v34 = vpack.c.bf16 %v1971_v8, %v1963_v7 }
 0x344   :  { %v6079_v41 = vpack.c.bf16 %v1986_v17, %v1978_v15  ;;  %v2396_v60 = vld [vmem:[%s13623_s2 + $0xc8] sm:$0xff]  ;;  %v2387_v15 = vld [vmem:[%s13623_s2 + $0x80] sm:$0xff] }
 0x345   :  { %v2395_v17 = vld [vmem:[%s13623_s2 + $0xc0] sm:$0xff] }
 0x346   :  { %6062 = vmatpush1.bf16.msra.mxu0 %v6061_v6  ;;  %6126 = vmatpush1.bf16.msra.mxu1 %v6125_v56  ;;  %v1994_v6 = vld [vmem:[%s13623_s2 + $0x728] sm:$0xff]  ;;  %v6161_v28 = vpack.c.bf16 %v2395_v17, %v2387_v15 }
 0x347   :  { %6064 = vmatprep.subr.bf16.mxu0 %v6063_v45  ;;  %6128 = vmatprep.subr.bf16.mxu1 %v6127_v18  ;;  %v2002_v56 = vld [vmem:[%s13623_s2 + $0x768] sm:$0xff]  ;;  %v6081_v45 = vpack.c.bf16 %v1985_v40, %v1977_v35  ;;  %v6145_v18 = vpack.c.bf16 %v1987_v55, %v1979_v49  ;;  %v2414_v49 = vld [vmem:[%s13623_s2 + $0x158] sm:$0xff]  ;;  %v2403_v55 = vld [vmem:[%s13623_s2 + $0x100] sm:$0xff] }
 0x348   :  { %v6083_v25 = vpack.c.bf16 %v2002_v56, %v1994_v6  ;;  %v2412_v35 = vld [vmem:[%s13623_s2 + $0x148] sm:$0xff]  ;;  %v2411_v56 = vld [vmem:[%s13623_s2 + $0x140] sm:$0xff] }
 0x34a   :  { %6066 = vmatpush1.bf16.msra.mxu0 %v6065_v43  ;;  %6130 = vmatpush1.bf16.msra.mxu1 %v6129_v44  ;;  %v2010_v43 = vld [vmem:[%s13623_s2 + $0x7a8] sm:$0xff] }
 0x34b   :  { %6068 = vmatprep.subr.bf16.mxu0 %v6067_v53  ;;  %6132 = vmatprep.subr.bf16.mxu1 %v6131_v39  ;;  %v2018_v44 = vld [vmem:[%s13623_s2 + $0x7e8] sm:$0xff]  ;;  %v6085_v53 = vpack.c.bf16 %v2001_v48, %v1993_v19  ;;  %v6149_v39 = vpack.c.bf16 %v2003_v36, %v1995_v33  ;;  %v2422_v48 = vld [vmem:[%s13623_s2 + $0x198] sm:$0xff]  ;;  %v2419_v36 = vld [vmem:[%s13623_s2 + $0x180] sm:$0xff] }
 0x34c   :  { %v6087_v42 = vpack.c.bf16 %v2018_v44, %v2010_v43  ;;  %v2428_v19 = vld [vmem:[%s13623_s2 + $0x1c8] sm:$0xff]  ;;  %v2430_v33 = vld [vmem:[%s13623_s2 + $0x1d8] sm:$0xff]  ;;  %v2427_v43 = vld [vmem:[%s13623_s2 + $0x1c0] sm:$0xff] }
 0x34d   :  { %v6231_v44 = vpack.c.bf16 %v2430_v33, %v2422_v48  ;;  %v2493_v48 = vld [vmem:[%s13623_s2 + $0x3d0] sm:$0xff]  ;;  %v2500_v33 = vld [vmem:[%s13623_s2 + $0x408] sm:$0xff] }
 0x34e   :  { %6070 = vmatpush1.bf16.msra.mxu0 %v6069_v62  ;;  %6134 = vmatpush1.bf16.msra.mxu1 %v6133_v63  ;;  %v6089_v62 = vpack.c.bf16 %v2017_v51, %v2009_v57  ;;  %v6153_v63 = vpack.c.bf16 %v2019_v61, %v2011_v52  ;;  %v2438_v57 = vld [vmem:[%s13623_s2 + $0x218] sm:$0xff]  ;;  %v6233_v51 = vpack.c.bf16 %v2429_v37, %v2421_v32  ;;  %v2435_v61 = vld [vmem:[%s13623_s2 + $0x200] sm:$0xff] }
 0x34f   :  { %6072 = vmatprep.subr.bf16.mxu0 %v6071_v12  ;;  %6136 = vmatprep.subr.bf16.mxu1 %v6135_v13  ;;  %v2374_v12 = vld [vmem:[%s13623_s2 + $0x18] sm:$0xff]  ;;  %v6155_v13 = vpack.c.bf16 %v2380_v9, %v2372_v4  ;;  %v2445_v9 = vld [vmem:[%s13623_s2 + $0x250] sm:$0xff] }
 0x350   :  { %v6219_v23 = vpack.c.bf16 %v2382_v14, %v2374_v12  ;;  %v2452_v12 = vld [vmem:[%s13623_s2 + $0x288] sm:$0xff]  ;;  %v2454_v14 = vld [vmem:[%s13623_s2 + $0x298] sm:$0xff] }
 0x351   :  { %v2510_v32 = vld [vmem:[%s13623_s2 + $0x458] sm:$0xff] }
 0x352   :  { %6074 = vmatpush1.bf16.msra.mxu0 %v6073_v31  ;;  %6138 = vmatpush1.bf16.msra.mxu1 %v6137_v22  ;;  %v2381_v31 = vld [vmem:[%s13623_s2 + $0x50] sm:$0xff]  ;;  %v2388_v22 = vld [vmem:[%s13623_s2 + $0x88] sm:$0xff] }
 0x353   :  { %6076 = vmatprep.subr.bf16.mxu0 %v6075_v1  ;;  %6140 = vmatprep.subr.bf16.mxu1 %v6139_v2  ;;  %v6221_v58 = vpack.c.bf16 %v2381_v31, %v2373_v30  ;;  %v2390_v1 = vld [vmem:[%s13623_s2 + $0x98] sm:$0xff]  ;;  %v6159_v7 = vpack.c.bf16 %v2396_v60, %v2388_v22  ;;  %v2451_v30 = vld [vmem:[%s13623_s2 + $0x280] sm:$0xff]  ;;  %v2453_v22 = vld [vmem:[%s13623_s2 + $0x290] sm:$0xff] }
 0x354   :  { %v2398_v2 = vld [vmem:[%s13623_s2 + $0xd8] sm:$0xff]  ;;  %v2459_v31 = vld [vmem:[%s13623_s2 + $0x2c0] sm:$0xff]  ;;  %v2461_v60 = vld [vmem:[%s13623_s2 + $0x2d0] sm:$0xff] }
 0x355   :  { %v6223_v8 = vpack.c.bf16 %v2398_v2, %v2390_v1  ;;  %v2468_v1 = vld [vmem:[%s13623_s2 + $0x308] sm:$0xff]  ;;  %v6177_v15 = vpack.c.bf16 %v2459_v31, %v2451_v30  ;;  %v6241_v17 = vpack.c.bf16 %v2461_v60, %v2453_v22  ;;  %v2534_v31 = vld [vmem:[%s13623_s2 + $0x518] sm:$0xff]  ;;  %v2531_v60 = vld [vmem:[%s13623_s2 + $0x500] sm:$0xff] }
 0x356   :  { %6078 = vmatpush1.bf16.msra.mxu0 %v6077_v5  ;;  %6142 = vmatpush1.bf16.msra.mxu1 %v6141_v34  ;;  %v2397_v5 = vld [vmem:[%s13623_s2 + $0xd0] sm:$0xff]  ;;  %v2404_v34 = vld [vmem:[%s13623_s2 + $0x108] sm:$0xff] }
 0x357   :  { %6080 = vmatprep.subr.bf16.mxu0 %v6079_v41  ;;  %6144 = vmatprep.subr.bf16.mxu1 %v6143_v47  ;;  %v6225_v40 = vpack.c.bf16 %v2397_v5, %v2389_v26  ;;  %v6163_v41 = vpack.c.bf16 %v2412_v35, %v2404_v34  ;;  %v2406_v47 = vld [vmem:[%s13623_s2 + $0x118] sm:$0xff]  ;;  %v2476_v2 = vld [vmem:[%s13623_s2 + $0x348] sm:$0xff]  ;;  %v2475_v5 = vld [vmem:[%s13623_s2 + $0x340] sm:$0xff] }
 0x358   :  { %v6227_v6 = vpack.c.bf16 %v2414_v49, %v2406_v47  ;;  %v6179_v26 = vpack.c.bf16 %v2476_v2, %v2468_v1  ;;  %v2469_v34 = vld [vmem:[%s13623_s2 + $0x310] sm:$0xff]  ;;  %v2492_v47 = vld [vmem:[%s13623_s2 + $0x3c8] sm:$0xff]  ;;  %v2486_v49 = vld [vmem:[%s13623_s2 + $0x398] sm:$0xff] }
 0x359   :  { %v2540_v30 = vld [vmem:[%s13623_s2 + $0x548] sm:$0xff]  ;;  %v2539_v1 = vld [vmem:[%s13623_s2 + $0x540] sm:$0xff] }
 0x35a   :  { %6082 = vmatpush1.bf16.msra.mxu0 %v6081_v45  ;;  %6146 = vmatpush1.bf16.msra.mxu1 %v6145_v18  ;;  %v6165_v45 = vpack.c.bf16 %v2411_v56, %v2403_v55  ;;  %v2420_v18 = vld [vmem:[%s13623_s2 + $0x188] sm:$0xff]  ;;  %v2494_v55 = vld [vmem:[%s13623_s2 + $0x3d8] sm:$0xff] }
 0x35b   :  { %6084 = vmatprep.subr.bf16.mxu0 %v6083_v25  ;;  %6148 = vmatprep.subr.bf16.mxu1 %v6147_v27  ;;  %v6229_v25 = vpack.c.bf16 %v2413_v11, %v2405_v3  ;;  %v6167_v27 = vpack.c.bf16 %v2428_v19, %v2420_v18  ;;  %v2483_v11 = vld [vmem:[%s13623_s2 + $0x380] sm:$0xff]  ;;  %v6247_v18 = vpack.c.bf16 %v2494_v55, %v2486_v49  ;;  %v2485_v19 = vld [vmem:[%s13623_s2 + $0x390] sm:$0xff] }
 0x35c   :  { %v2549_v55 = vld [vmem:[%s13623_s2 + $0x590] sm:$0xff] }
 0x35e   :  { %6086 = vmatpush1.bf16.msra.mxu0 %v6085_v53  ;;  %6150 = vmatpush1.bf16.msra.mxu1 %v6149_v39  ;;  %v2436_v53 = vld [vmem:[%s13623_s2 + $0x208] sm:$0xff] }
 0x35f   :  { %6088 = vmatprep.subr.bf16.mxu0 %v6087_v42  ;;  %6152 = vmatprep.subr.bf16.mxu1 %v6151_v50  ;;  %v2444_v39 = vld [vmem:[%s13623_s2 + $0x248] sm:$0xff]  ;;  %v2446_v42 = vld [vmem:[%s13623_s2 + $0x258] sm:$0xff]  ;;  %v6169_v50 = vpack.c.bf16 %v2427_v43, %v2419_v36 }
 0x360   :  { %v6171_v52 = vpack.c.bf16 %v2444_v39, %v2436_v53  ;;  %v6235_v4 = vpack.c.bf16 %v2446_v42, %v2438_v57  ;;  %v2508_v36 = vld [vmem:[%s13623_s2 + $0x448] sm:$0xff]  ;;  %v2502_v43 = vld [vmem:[%s13623_s2 + $0x418] sm:$0xff]  ;;  %v2499_v53 = vld [vmem:[%s13623_s2 + $0x400] sm:$0xff] }
 0x361   :  { %v6251_v37 = vpack.c.bf16 %v2510_v32, %v2502_v43  ;;  %v2507_v39 = vld [vmem:[%s13623_s2 + $0x440] sm:$0xff]  ;;  %v2501_v57 = vld [vmem:[%s13623_s2 + $0x410] sm:$0xff]  ;;  %v2580_v32 = vld [vmem:[%s13623_s2 + $0x688] sm:$0xff] }
 0x362   :  { %6090 = vmatpush1.bf16.msra.mxu0 %v6089_v62  ;;  %6154 = vmatpush1.bf16.msra.mxu1 %v6153_v63  ;;  %v2443_v62 = vld [vmem:[%s13623_s2 + $0x240] sm:$0xff]  ;;  %v2437_v63 = vld [vmem:[%s13623_s2 + $0x210] sm:$0xff]  ;;  %v6189_v42 = vpack.c.bf16 %v2507_v39, %v2499_v53  ;;  %v2582_v53 = vld [vmem:[%s13623_s2 + $0x698] sm:$0xff] }
 0x363   :  { %6156 = vmatprep.subr.bf16.mxu0 %v6155_v13  ;;  %6220 = vmatprep.subr.bf16.mxu1 %v6219_v23  ;;  %v2460_v13 = vld [vmem:[%s13623_s2 + $0x2c8] sm:$0xff]  ;;  %v6173_v21 = vpack.c.bf16 %v2443_v62, %v2435_v61  ;;  %v6237_v23 = vpack.c.bf16 %v2445_v9, %v2437_v63  ;;  %v2518_v62 = vld [vmem:[%s13623_s2 + $0x498] sm:$0xff]  ;;  %v2515_v9 = vld [vmem:[%s13623_s2 + $0x480] sm:$0xff] }
 0x364   :  { %v2524_v61 = vld [vmem:[%s13623_s2 + $0x4c8] sm:$0xff]  ;;  %v2573_v43 = vld [vmem:[%s13623_s2 + $0x650] sm:$0xff] }
 0x365   :  { %2228 = vmatmul.mubr.f32.vlgmr.msra.gmra.mrb[8].mxu0 %v9669_v46  ;;  %2299 = vmatmul.mubr.f32.vlgmr.msra.gmra.mrb[12].mxu1 %v9669_v46 }
 0x366   :  { %6158 = vmatpush1.bf16.msra.mxu0 %v6157_v24  ;;  %6222 = vmatpush1.bf16.msra.mxu1 %v6221_v58  ;;  %v6175_v24 = vpack.c.bf16 %v2460_v13, %v2452_v12  ;;  %v6239_v58 = vpack.c.bf16 %v2462_v16, %v2454_v14  ;;  %v2523_v12 = vld [vmem:[%s13623_s2 + $0x4c0] sm:$0xff]  ;;  %v2517_v16 = vld [vmem:[%s13623_s2 + $0x490] sm:$0xff] }
 0x367   :  { %6160 = vmatprep.subr.bf16.mxu0 %v6159_v7  ;;  %6224 = vmatprep.subr.bf16.mxu1 %v6223_v8  ;;  %v2470_v7 = vld [vmem:[%s13623_s2 + $0x318] sm:$0xff]  ;;  %v6193_v14 = vpack.c.bf16 %v2523_v12, %v2515_v9  ;;  %v2604_v9 = vld [vmem:[%s13623_s2 + $0x748] sm:$0xff] }
 0x368   :  { %v2478_v8 = vld [vmem:[%s13623_s2 + $0x358] sm:$0xff] }
 0x369   :  { %v6243_v35 = vpack.c.bf16 %v2478_v8, %v2470_v7  ;;  %v6197_v7 = vpack.c.bf16 %v2539_v1, %v2531_v60  ;;  %v2533_v8 = vld [vmem:[%s13623_s2 + $0x510] sm:$0xff]  ;;  %v2598_v12 = vld [vmem:[%s13623_s2 + $0x718] sm:$0xff] }
 0x36a   :  { %6162 = vmatpush1.bf16.msra.mxu0 %v6161_v28  ;;  %6226 = vmatpush1.bf16.msra.mxu1 %v6225_v40  ;;  %v2467_v28 = vld [vmem:[%s13623_s2 + $0x300] sm:$0xff]  ;;  %v2477_v40 = vld [vmem:[%s13623_s2 + $0x350] sm:$0xff] }
 0x36b   :  { %6164 = vmatprep.subr.bf16.mxu0 %v6163_v41  ;;  %6228 = vmatprep.subr.bf16.mxu1 %v6227_v6  ;;  %v2484_v41 = vld [vmem:[%s13623_s2 + $0x388] sm:$0xff]  ;;  %v6181_v6 = vpack.c.bf16 %v2475_v5, %v2467_v28  ;;  %v6245_v56 = vpack.c.bf16 %v2477_v40, %v2469_v34  ;;  %v2550_v5 = vld [vmem:[%s13623_s2 + $0x598] sm:$0xff]  ;;  %v2547_v40 = vld [vmem:[%s13623_s2 + $0x580] sm:$0xff] }
 0x36c   :  { %v6183_v3 = vpack.c.bf16 %v2492_v47, %v2484_v41  ;;  %v2556_v28 = vld [vmem:[%s13623_s2 + $0x5c8] sm:$0xff]  ;;  %v2555_v41 = vld [vmem:[%s13623_s2 + $0x5c0] sm:$0xff] }
 0x36d   :  { %v6201_v49 = vpack.c.bf16 %v2555_v41, %v2547_v40  ;;  %v2384_v40 = vld [vmem:[%s13623_s2 + $0x68] sm:$0xff]  ;;  %v2378_v41 = vld [vmem:[%s13623_s2 + $0x38] sm:$0xff] }
 0x36e   :  { %6166 = vmatpush1.bf16.msra.mxu0 %v6165_v45  ;;  %6230 = vmatpush1.bf16.msra.mxu1 %v6229_v25  ;;  %v2491_v45 = vld [vmem:[%s13623_s2 + $0x3c0] sm:$0xff] }
 0x36f   :  { %6168 = vmatprep.subr.bf16.mxu0 %v6167_v27  ;;  %6232 = vmatprep.subr.bf16.mxu1 %v6231_v44  ;;  %v6185_v25 = vpack.c.bf16 %v2491_v45, %v2483_v11  ;;  %v6249_v27 = vpack.c.bf16 %v2493_v48, %v2485_v19  ;;  %v6187_v44 = vpack.c.bf16 %v2508_v36, %v2500_v33  ;;  %v2572_v11 = vld [vmem:[%s13623_s2 + $0x648] sm:$0xff]  ;;  %v2566_v45 = vld [vmem:[%s13623_s2 + $0x618] sm:$0xff]  ;;  %v2563_v48 = vld [vmem:[%s13623_s2 + $0x600] sm:$0xff] }
 0x370   :  { %v2574_v19 = vld [vmem:[%s13623_s2 + $0x658] sm:$0xff]  ;;  %v2565_v36 = vld [vmem:[%s13623_s2 + $0x610] sm:$0xff] }
 0x372   :  { %6170 = vmatpush1.bf16.msra.mxu0 %v6169_v50  ;;  %6234 = vmatpush1.bf16.msra.mxu1 %v6233_v51  ;;  %v2509_v50 = vld [vmem:[%s13623_s2 + $0x450] sm:$0xff] }
 0x373   :  { %6172 = vmatprep.subr.bf16.mxu0 %v6171_v52  ;;  %6236 = vmatprep.subr.bf16.mxu1 %v6235_v4  ;;  %v6253_v51 = vpack.c.bf16 %v2509_v50, %v2501_v57  ;;  %v2516_v52 = vld [vmem:[%s13623_s2 + $0x488] sm:$0xff]  ;;  %v2526_v4 = vld [vmem:[%s13623_s2 + $0x4d8] sm:$0xff]  ;;  %v2587_v50 = vld [vmem:[%s13623_s2 + $0x6c0] sm:$0xff] }
 0x374   :  { %v6191_v63 = vpack.c.bf16 %v2524_v61, %v2516_v52  ;;  %v6255_v13 = vpack.c.bf16 %v2526_v4, %v2518_v62  ;;  %v2590_v57 = vld [vmem:[%s13623_s2 + $0x6d8] sm:$0xff]  ;;  %v2581_v61 = vld [vmem:[%s13623_s2 + $0x690] sm:$0xff] }
 0x375   :  { %v2589_v62 = vld [vmem:[%s13623_s2 + $0x6d0] sm:$0xff] }
 0x376   :  { %6174 = vmatpush1.bf16.msra.mxu0 %v6173_v21  ;;  %6238 = vmatpush1.bf16.msra.mxu1 %v6237_v23  ;;  %v2525_v21 = vld [vmem:[%s13623_s2 + $0x4d0] sm:$0xff]  ;;  %v6273_v4 = vpack.c.bf16 %v2589_v62, %v2581_v61  ;;  %v315_v61 = vld [vmem:[%s314_s20] sm:$0xff]  ;;  %s328_s20 = scalar_lea.vmem %s13622_s1, %s5294_s23  ;;  %s12067_s23 = sld [smem:[#allocation5 + $0x35]] }
 0x377   :  { %6176 = vmatprep.subr.bf16.mxu0 %v6175_v24  ;;  %6240 = vmatprep.subr.bf16.mxu1 %v6239_v58  ;;  %v6257_v23 = vpack.c.bf16 %v2525_v21, %v2517_v16  ;;  %v2532_v24 = vld [vmem:[%s13623_s2 + $0x508] sm:$0xff]  ;;  %v2542_v58 = vld [vmem:[%s13623_s2 + $0x558] sm:$0xff]  ;;  %v2595_v21 = vld [vmem:[%s13623_s2 + $0x700] sm:$0xff]  ;;  %317 = vst [vmem:[#allocation2 + $0x107] ss:$8 sm:$0xf] %v315_v61 }
 0x378   :  { %v6195_v22 = vpack.c.bf16 %v2540_v30, %v2532_v24  ;;  %v6259_v2 = vpack.c.bf16 %v2542_v58, %v2534_v31  ;;  %v2597_v24 = vld [vmem:[%s13623_s2 + $0x710] sm:$0xff]  ;;  %v2620_v58 = vld [vmem:[%s13623_s2 + $0x7c8] sm:$0xff]  ;;  %318 = vst [vmem:[#allocation2 + $0x107] ss:$8 sm:$0xf0] %v315_v61 }
 0x379   :  { %v2605_v31 = vld [vmem:[%s13623_s2 + $0x750] sm:$0xff] }
 0x37a   :  { %6178 = vmatpush1.bf16.msra.mxu0 %v6177_v15  ;;  %6242 = vmatpush1.bf16.msra.mxu1 %v6241_v17  ;;  %v2541_v15 = vld [vmem:[%s13623_s2 + $0x550] sm:$0xff]  ;;  %v6277_v60 = vpack.c.bf16 %v2605_v31, %v2597_v24  ;;  %v1762_v24 = vld [vmem:[#allocation2 + $0xe8] sm:$0xff] }
 0x37b   :  { %6180 = vmatprep.subr.bf16.mxu0 %v6179_v26  ;;  %6244 = vmatprep.subr.bf16.mxu1 %v6243_v35  ;;  %v6261_v17 = vpack.c.bf16 %v2541_v15, %v2533_v8  ;;  %v2548_v26 = vld [vmem:[%s13623_s2 + $0x588] sm:$0xff]  ;;  %v2558_v35 = vld [vmem:[%s13623_s2 + $0x5d8] sm:$0xff]  ;;  %v2611_v8 = vld [vmem:[%s13623_s2 + $0x780] sm:$0xff] }
 0x37c   :  { %v6199_v34 = vpack.c.bf16 %v2556_v28, %v2548_v26  ;;  %v6263_v47 = vpack.c.bf16 %v2558_v35, %v2550_v5  ;;  %v2613_v26 = vld [vmem:[%s13623_s2 + $0x790] sm:$0xff]  ;;  %v2376_v35 = vld [vmem:[%s13623_s2 + $0x28] sm:$0xff] }
 0x37d   :  { %v2621_v28 = vld [vmem:[%s13623_s2 + $0x7d0] sm:$0xff] }
 0x37e   :  { %6182 = vmatpush1.bf16.msra.mxu0 %v6181_v6  ;;  %6246 = vmatpush1.bf16.msra.mxu1 %v6245_v56  ;;  %v2557_v6 = vld [vmem:[%s13623_s2 + $0x5d0] sm:$0xff] }
 0x37f   :  { %6184 = vmatprep.subr.bf16.mxu0 %v6183_v3  ;;  %6248 = vmatprep.subr.bf16.mxu1 %v6247_v18  ;;  %v6265_v56 = vpack.c.bf16 %v2557_v6, %v2549_v55  ;;  %v2564_v3 = vld [vmem:[%s13623_s2 + $0x608] sm:$0xff]  ;;  %v2401_v61 = vld [vmem:[%s13623_s2 + $0xf0] sm:$0xff] }
 0x380   :  { %v6203_v18 = vpack.c.bf16 %v2572_v11, %v2564_v3 }
 0x382   :  { %6186 = vmatpush1.bf16.msra.mxu0 %v6185_v25  ;;  %6250 = vmatpush1.bf16.msra.mxu1 %v6249_v27  ;;  %v2571_v25 = vld [vmem:[%s13623_s2 + $0x640] sm:$0xff]  ;;  %v6267_v27 = vpack.c.bf16 %v2574_v19, %v2566_v45  ;;  %v1758_v19 = vld [vmem:[#allocation2 + $0xc8] sm:$0xff] }
 0x383   :  { %6188 = vmatprep.subr.bf16.mxu0 %v6187_v44  ;;  %6252 = vmatprep.subr.bf16.mxu1 %v6251_v37  ;;  %v6205_v33 = vpack.c.bf16 %v2571_v25, %v2563_v48  ;;  %v6269_v44 = vpack.c.bf16 %v2573_v43, %v2565_v36  ;;  %v2588_v37 = vld [vmem:[%s13623_s2 + $0x6c8] sm:$0xff]  ;;  %v1757_v45 = vld [vmem:[#allocation2 + $0xc0] sm:$0xff]  ;;  %v1760_v25 = vld [vmem:[#allocation2 + $0xd8] sm:$0xff] }
 0x384   :  { %v6207_v39 = vpack.c.bf16 %v2588_v37, %v2580_v32  ;;  %v266_v32 = vld [vmem:[%s265_s18] sm:$0xff]  ;;  %s5288_s18 = sshll.u32 %s10421_s9, 3  ;;  %s5296_s9 = sshll.u32 %s5295_s11, 3 }
 0x385   :  { %v273_v37 = vld [vmem:[%s272_s12] sm:$0xff]  ;;  %268 = vst [vmem:[#allocation2 + $0x100] ss:$8 sm:$0xf] %v266_v32  ;;  %s307_s26 = scalar_lea.vmem %s13622_s1, %s5288_s18  ;;  %s5292_s18 = sshll.u32 %s5291_s17, 3 }
 0x386   :  { %6190 = vmatpush1.bf16.msra.mxu0 %v6189_v42  ;;  %6254 = vmatpush1.bf16.msra.mxu1 %v6253_v51  ;;  %v2579_v42 = vld [vmem:[%s13623_s2 + $0x680] sm:$0xff]  ;;  %v6271_v51 = vpack.c.bf16 %v2590_v57, %v2582_v53  ;;  %275 = vst [vmem:[#allocation2 + $0x101] ss:$8 sm:$0xf] %v273_v37  ;;  %s5311_s11 = sld [smem:[#allocation5 + $0x32]] }
 0x387   :  { %6192 = vmatprep.subr.bf16.mxu0 %v6191_v63  ;;  %6256 = vmatprep.subr.bf16.mxu1 %v6255_v13  ;;  %v6209_v52 = vpack.c.bf16 %v2587_v50, %v2579_v42  ;;  %v2596_v63 = vld [vmem:[%s13623_s2 + $0x708] sm:$0xff]  ;;  %v2606_v13 = vld [vmem:[%s13623_s2 + $0x758] sm:$0xff]  ;;  %269 = vst [vmem:[#allocation2 + $0x100] ss:$8 sm:$0xf0] %v266_v32  ;;  %v280_v57 = vld [vmem:[%s279_s8] sm:$0xff]  ;;  %s335_s8 = scalar_lea.vmem %s13622_s1, %s5296_s9 }
 0x388   :  { %v6275_v16 = vpack.c.bf16 %v2606_v13, %v2598_v12  ;;  %276 = vst [vmem:[#allocation2 + $0x101] ss:$8 sm:$0xf0] %v273_v37  ;;  %v287_v42 = vld [vmem:[%s286_s28] sm:$0xff]  ;;  %v2394_v32 = vld [vmem:[%s13623_s2 + $0xb8] sm:$0xff]  ;;  %s342_s28 = scalar_lea.vmem %s13622_s1, %s5298_s27 }
 0x389   :  { %282 = vst [vmem:[#allocation2 + $0x102] ss:$8 sm:$0xf] %v280_v57  ;;  %289 = vst [vmem:[#allocation2 + $0x103] ss:$8 sm:$0xf] %v287_v42 }
 0x38a   :  { %6194 = vmatpush1.bf16.msra.mxu0 %v6193_v14  ;;  %6258 = vmatpush1.bf16.msra.mxu1 %v6257_v23  ;;  %v6211_v14 = vpack.c.bf16 %v2604_v9, %v2596_v63  ;;  %v2603_v23 = vld [vmem:[%s13623_s2 + $0x740] sm:$0xff]  ;;  %283 = vst [vmem:[#allocation2 + $0x102] ss:$8 sm:$0xf0] %v280_v57  ;;  %v2402_v37 = vld [vmem:[%s13623_s2 + $0xf8] sm:$0xff] }
 0x38b   :  { %6196 = vmatprep.subr.bf16.mxu0 %v6195_v22  ;;  %6260 = vmatprep.subr.bf16.mxu1 %v6259_v2  ;;  %v6213_v30 = vpack.c.bf16 %v2603_v23, %v2595_v21  ;;  %v2612_v22 = vld [vmem:[%s13623_s2 + $0x788] sm:$0xff]  ;;  %v2614_v2 = vld [vmem:[%s13623_s2 + $0x798] sm:$0xff]  ;;  %290 = vst [vmem:[#allocation2 + $0x103] ss:$8 sm:$0xf0] %v287_v42  ;;  %v294_v50 = vld [vmem:[%s293_s25] sm:$0xff] }
 0x38c   :  { %v6215_v1 = vpack.c.bf16 %v2620_v58, %v2612_v22  ;;  %296 = vst [vmem:[#allocation2 + $0x104] ss:$8 sm:$0xf] %v294_v50  ;;  %297 = vst [vmem:[#allocation2 + $0x104] ss:$8 sm:$0xf0] %v294_v50 }
 0x38d   :  { %v1761_v21 = vld [vmem:[#allocation2 + $0xe0] sm:$0xff]  ;;  %v1763_v23 = vld [vmem:[#allocation2 + $0xf0] sm:$0xff]  ;;  %s11241_s25 = sld [smem:[#allocation5 + $0x2c]] }
 0x38e   :  { %6198 = vmatpush1.bf16.msra.mxu0 %v6197_v7  ;;  %6262 = vmatpush1.bf16.msra.mxu1 %v6261_v17  ;;  %v2622_v7 = vld [vmem:[%s13623_s2 + $0x7d8] sm:$0xff]  ;;  %v2619_v17 = vld [vmem:[%s13623_s2 + $0x7c0] sm:$0xff] }
 0x38f   :  { %6200 = vmatprep.subr.bf16.mxu0 %v6199_v34  ;;  %6264 = vmatprep.subr.bf16.mxu1 %v6263_v47  ;;  %v6279_v15 = vpack.c.bf16 %v2622_v7, %v2614_v2  ;;  %v6217_v5 = vpack.c.bf16 %v2619_v17, %v2611_v8  ;;  %v6281_v34 = vpack.c.bf16 %v2621_v28, %v2613_v26  ;;  %v2391_v42 = vld [vmem:[%s13623_s2 + $0xa0] sm:$0xff] }
 0x390   :  { %v6283_v47 = vpack.c.bf16 %v2384_v40, %v2376_v35  ;;  %v2399_v50 = vld [vmem:[%s13623_s2 + $0xe0] sm:$0xff] }
 0x392   :  { %6202 = vmatpush1.bf16.msra.mxu0 %v6201_v49  ;;  %6266 = vmatpush1.bf16.msra.mxu1 %v6265_v56  ;;  %v2386_v49 = vld [vmem:[%s13623_s2 + $0x78] sm:$0xff] }
 0x393   :  { %6204 = vmatprep.subr.bf16.mxu0 %v6203_v18  ;;  %6268 = vmatprep.subr.bf16.mxu1 %v6267_v27  ;;  %v6347_v55 = vpack.c.bf16 %v2386_v49, %v2378_v41  ;;  %v1759_v18 = vld [vmem:[#allocation2 + $0xd0] sm:$0xff]  ;;  %s5300_s17 = sshll.u32 %s11241_s25, 3  ;;  %s13135_s25 = sld [smem:[#allocation5 + $0x3e]] }
 0x396   :  { %6206 = vmatpush1.bf16.msra.mxu0 %v6205_v33  ;;  %6270 = vmatpush1.bf16.msra.mxu1 %v6269_v44 }
 0x397   :  { %6208 = vmatprep.subr.bf16.mxu0 %v6207_v39  ;;  %6272 = vmatprep.subr.bf16.mxu1 %v6271_v51  ;;  %v301_v51 = vld [vmem:[%s300_s19] sm:$0xff]  ;;  %s11247_s19 = sld [smem:[#allocation5 + $0x2f]] }
 0x398   :  { %303 = vst [vmem:[#allocation2 + $0x105] ss:$8 sm:$0xf] %v301_v51  ;;  %304 = vst [vmem:[#allocation2 + $0x105] ss:$8 sm:$0xf0] %v301_v51 }
 0x39a   :  { %6210 = vmatpush1.bf16.msra.mxu0 %v6209_v52  ;;  %6274 = vmatpush1.bf16.msra.mxu1 %v6273_v4  ;;  %v308_v52 = vld [vmem:[%s307_s26] sm:$0xff]  ;;  %s321_s26 = scalar_lea.vmem %s13622_s1, %s5292_s18  ;;  %s349_s18 = scalar_lea.vmem %s13622_s1, %s5300_s17 }
 0x39b   :  { %6212 = vmatprep.subr.bf16.mxu0 %v6211_v14  ;;  %6276 = vmatprep.subr.bf16.mxu1 %v6275_v16  ;;  %310 = vst [vmem:[#allocation2 + $0x106] ss:$8 sm:$0xf] %v308_v52  ;;  %311 = vst [vmem:[#allocation2 + $0x106] ss:$8 sm:$0xf0] %v308_v52 }
 0x39c   :  { %v2393_v52 = vld [vmem:[%s13623_s2 + $0xb0] sm:$0xff]  ;;  %s5307_s17 = sld [smem:[#allocation5 + $0x30]] }
 0x39d   :  { %s5306_s12 = sshll.u32 %s11247_s19, 3  ;;  %s5314_s19 = sshll.u32 %s5313_s22, 3 }
 0x39e   :  { %6214 = vmatpush1.bf16.msra.mxu0 %v6213_v30  ;;  %6278 = vmatpush1.bf16.msra.mxu1 %v6277_v60  ;;  %v1764_v30 = vld [vmem:[#allocation2 + $0xf8] sm:$0xff]  ;;  %s370_s27 = scalar_lea.vmem %s13622_s1, %s5306_s12  ;;  %s5310_s12 = sshll.u32 %s5309_s24, 3 }
 0x39f   :  { %6216 = vmatprep.subr.bf16.mxu0 %v6215_v1  ;;  %6280 = vmatprep.subr.bf16.mxu1 %v6279_v15  ;;  %s5318_s24 = sshll.u32 %s12067_s23, 3  ;;  %s13104_s23 = sld [smem:[#allocation5 + $0x39]] }
 0x3a0   :  { %s412_s29 = scalar_lea.vmem %s13622_s1, %s5318_s24 }
 0x3a2   :  { %6218 = vmatpush1.bf16.msra.mxu0 %v6217_v5  ;;  %6282 = vmatpush1.bf16.msra.mxu1 %v6281_v34 }
 0x3a3   :  { %6284 = vmatprep.subr.bf16.mxu0 %v6283_v47  ;;  %6348 = vmatprep.subr.bf16.mxu1 %v6347_v55 }
 0x3a5   :  { %s5326_s24 = sshll.u32 %s13104_s23, 3 }
 0x3f8   :  { %v2087_v6 = vpop.f32.mrb[6].mxu0  ;;  %v2158_v56 = vpop.f32.mrb[10].mxu1 }
 0x3f9   :  { %v2089_v3 = vpop.f32.mrb[7].mxu0  ;;  %v2160_v11 = vpop.f32.mrb[11].mxu1  ;;  %v2305_v48 = vadd.f32 %v2087_v6, %v1757_v45  ;;  %v2307_v27 = vadd.f32 %v2158_v56, %v1759_v18 }
 0x3fa   :  { %v2306_v33 = vadd.f32 %v2089_v3, %v1758_v19  ;;  %v2308_v36 = vadd.f32 %v2160_v11, %v1760_v25  ;;  %v2377_v25 = vld [vmem:[%s13623_s2 + $0x30] sm:$0xff] }
 0x3fb   :  { %v5357_v43 = vmul.f32 -1.442695, %v2305_v48  ;;  %v5359_v44 = vmul.f32 -1.442695, %v2307_v27  ;;  %v2383_v48 = vld [vmem:[%s13623_s2 + $0x60] sm:$0xff]  ;;  %v2385_v27 = vld [vmem:[%s13623_s2 + $0x70] sm:$0xff] }
 0x3fc   :  { %v5358_v53 = vmul.f32 -1.442695, %v2306_v33  ;;  %v5360_v39 = vmul.f32 -1.442695, %v2308_v36  ;;  %v2392_v36 = vld [vmem:[%s13623_s2 + $0xa8] sm:$0xff]  ;;  %v6349_v57 = vpack.c.bf16 %v2385_v27, %v2377_v25  ;;  %v2458_v25 = vld [vmem:[%s13623_s2 + $0x2b8] sm:$0xff] }
 0x3fd   :  { %7340 = vpow2.f32 %v5357_v43  ;;  %v2466_v27 = vld [vmem:[%s13623_s2 + $0x2f8] sm:$0xff] }
 0x3fe   :  { %7342 = vpow2.f32 %v5359_v44  ;;  %v2400_v44 = vld [vmem:[%s13623_s2 + $0xe8] sm:$0xff] }
 0x3ff   :  { %7344 = vpow2.f32 %v5358_v53 }
 0x400   :  { %7346 = vpow2.f32 %v5360_v39 }
 0x407   :  { %v7341_v62 = vpop.eup %7340 }
 0x408   :  { %v7343_v63 = vpop.eup %7342  ;;  %v2319_v12 = vadd.f32 1.0, %v7341_v62  ;;  %v2408_v62 = vld [vmem:[%s13623_s2 + $0x128] sm:$0xff] }
 0x409   :  { %v7345_v4 = vpop.eup %7344  ;;  %v2331_v13 = vadd.f32 1.0, %v7343_v63  ;;  %v6287_v63 = vpack.c.bf16 %v2400_v44, %v2392_v36  ;;  %v2463_v44 = vld [vmem:[%s13623_s2 + $0x2e0] sm:$0xff] }
 0x40a   :  { %v7347_v9 = vpop.eup %7346  ;;  %v2320_v14 = vadd.f32 1.0, %v7345_v4  ;;  %7348 = vrcp.f32 %v2319_v12  ;;  %v6351_v4 = vpack.c.bf16 %v2402_v37, %v2394_v32  ;;  %v2410_v12 = vld [vmem:[%s13623_s2 + $0x138] sm:$0xff]  ;;  %v6367_v37 = vpack.c.bf16 %v2466_v27, %v2458_v25 }
 0x40b   :  { %v2332_v16 = vadd.f32 1.0, %v7347_v9  ;;  %7350 = vrcp.f32 %v2331_v13  ;;  %v2416_v9 = vld [vmem:[%s13623_s2 + $0x168] sm:$0xff]  ;;  %v2418_v13 = vld [vmem:[%s13623_s2 + $0x178] sm:$0xff] }
 0x40c   :  { %7352 = vrcp.f32 %v2320_v14  ;;  %v6289_v14 = vpack.c.bf16 %v2399_v50, %v2391_v42  ;;  %v2472_v42 = vld [vmem:[%s13623_s2 + $0x328] sm:$0xff] }
 0x40d   :  { %7354 = vrcp.f32 %v2332_v16  ;;  %v6353_v16 = vpack.c.bf16 %v2401_v61, %v2393_v52  ;;  %v2480_v50 = vld [vmem:[%s13623_s2 + $0x368] sm:$0xff]  ;;  %v2474_v52 = vld [vmem:[%s13623_s2 + $0x338] sm:$0xff] }
 0x40e   :  { %v2482_v61 = vld [vmem:[%s13623_s2 + $0x378] sm:$0xff] }
 0x414   :  { %v7349_v26 = vpop.eup %7348 }
 0x415   :  { %v7351_v28 = vpop.eup %7350 }
 0x416   :  { %v7353_v5 = vpop.eup %7352  ;;  %v2351_v41 = vmul.f32 %v7351_v28, %v9631_v0  ;;  %v2375_v0 = vld [vmem:[%s13623_s2 + $0x20] sm:$0xff] }
 0x417   :  { %v7355_v34 = vpop.eup %7354  ;;  %v6285_v39 = vpack.c.bf16 %v2383_v48, %v2375_v0  ;;  %v2449_v0 = vld [vmem:[%s13623_s2 + $0x270] sm:$0xff]  ;;  %v2464_v48 = vld [vmem:[%s13623_s2 + $0x2e8] sm:$0xff] }
 0x418   :  { %v2352_v55 = vmul.f32 %v7355_v34, %v9633_v10  ;;  %v2433_v34 = vld [vmem:[%s13623_s2 + $0x1f0] sm:$0xff] }
 0x438   :  { %v2229_v31 = vpop.f32.mrb[8].mxu0  ;;  %v2300_v22 = vpop.f32.mrb[12].mxu1 }
 0x439   :  { %v2309_v58 = vadd.f32 %v2229_v31, %v1761_v21  ;;  %v2311_v60 = vadd.f32 %v2300_v22, %v1763_v23  ;;  %v2231_v1 = vpop.f32.mrb[9].mxu0  ;;  %v2302_v2 = vpop.f32.mrb[13].mxu1  ;;  %v2407_v21 = vld [vmem:[%s13623_s2 + $0x120] sm:$0xff]  ;;  %v2409_v31 = vld [vmem:[%s13623_s2 + $0x130] sm:$0xff] }
 0x43a   :  { %v2310_v7 = vadd.f32 %v2231_v1, %v1762_v24  ;;  %v2312_v8 = vadd.f32 %v2302_v2, %v1764_v30  ;;  %v2415_v23 = vld [vmem:[%s13623_s2 + $0x160] sm:$0xff]  ;;  %v6291_v24 = vpack.c.bf16 %v2416_v9, %v2408_v62  ;;  %v6355_v30 = vpack.c.bf16 %v2418_v13, %v2410_v12  ;;  %v2417_v22 = vld [vmem:[%s13623_s2 + $0x170] sm:$0xff]  ;;  %v2426_v1 = vld [vmem:[%s13623_s2 + $0x1b8] sm:$0xff] }
 0x43b   :  { %7356 = vtanh.f32 %v2309_v58  ;;  %v5361_v15 = vmul.f32 -1.442695, %v2311_v60  ;;  %v2424_v58 = vld [vmem:[%s13623_s2 + $0x1a8] sm:$0xff]  ;;  %v2434_v2 = vld [vmem:[%s13623_s2 + $0x1f8] sm:$0xff]  ;;  %v2479_v9 = vld [vmem:[%s13623_s2 + $0x360] sm:$0xff]  ;;  %v6307_v12 = vpack.c.bf16 %v2480_v50, %v2472_v42  ;;  %v6371_v13 = vpack.c.bf16 %v2482_v61, %v2474_v52 }
 0x43c   :  { %7358 = vtanh.f32 %v2310_v7  ;;  %v5362_v17 = vmul.f32 -1.442695, %v2312_v8  ;;  %v2432_v60 = vld [vmem:[%s13623_s2 + $0x1e8] sm:$0xff]  ;;  %v6293_v7 = vpack.c.bf16 %v2415_v23, %v2407_v21  ;;  %v6357_v8 = vpack.c.bf16 %v2417_v22, %v2409_v31  ;;  %v2535_v42 = vld [vmem:[%s13623_s2 + $0x520] sm:$0xff] }
 0x43d   :  { %7360 = vpow2.f32 %v5361_v15  ;;  %v2423_v15 = vld [vmem:[%s13623_s2 + $0x1a0] sm:$0xff]  ;;  %v6359_v28 = vpack.c.bf16 %v2434_v2, %v2426_v1  ;;  %v2488_v21 = vld [vmem:[%s13623_s2 + $0x3a8] sm:$0xff] }
 0x43e   :  { %7362 = vpow2.f32 %v5362_v17  ;;  %v2431_v17 = vld [vmem:[%s13623_s2 + $0x1e0] sm:$0xff]  ;;  %v2496_v23 = vld [vmem:[%s13623_s2 + $0x3e8] sm:$0xff] }
 0x43f   :  { %v6311_v1 = vpack.c.bf16 %v2496_v23, %v2488_v21  ;;  %v2543_v50 = vld [vmem:[%s13623_s2 + $0x560] sm:$0xff] }
 0x440   :  { %v2551_v21 = vld [vmem:[%s13623_s2 + $0x5a0] sm:$0xff] }
 0x441   :  { %v2559_v23 = vld [vmem:[%s13623_s2 + $0x5e0] sm:$0xff] }
 0x445   :  { %v7357_v35 = vpop.eup %7356 }
 0x446   :  { %v7359_v40 = vpop.eup %7358  ;;  %v2353_v47 = vmul.f32 %v7357_v35, %v7349_v26  ;;  %v6295_v26 = vpack.c.bf16 %v2432_v60, %v2424_v58  ;;  %v2440_v35 = vld [vmem:[%s13623_s2 + $0x228] sm:$0xff]  ;;  %v2487_v58 = vld [vmem:[%s13623_s2 + $0x3a0] sm:$0xff] }
 0x447   :  { %v7361_v49 = vpop.eup %7360  ;;  %v2354_v6 = vmul.f32 %v7359_v40, %v7353_v5  ;;  %v2425_v5 = vld [vmem:[%s13623_s2 + $0x1b0] sm:$0xff]  ;;  %v2448_v40 = vld [vmem:[%s13623_s2 + $0x268] sm:$0xff]  ;;  %v2495_v60 = vld [vmem:[%s13623_s2 + $0x3e0] sm:$0xff] }
 0x448   :  { %v7363_v56 = vpop.eup %7362  ;;  %v10455_v3 = vadd.f32 %v2353_v47, %v2351_v41  ;;  %v2345_v11 = vadd.f32 1.0, %v7361_v49  ;;  %v2442_v41 = vld [vmem:[%s13623_s2 + $0x238] sm:$0xff]  ;;  %v6297_v49 = vpack.c.bf16 %v2431_v17, %v2423_v15  ;;  %v2504_v15 = vld [vmem:[%s13623_s2 + $0x428] sm:$0xff] }
 0x449   :  { %v10457_v45 = vadd.f32 %v2354_v6, %v2352_v55  ;;  %v2346_v18 = vadd.f32 1.0, %v7363_v56  ;;  %v2450_v47 = vld [vmem:[%s13623_s2 + $0x278] sm:$0xff]  ;;  %v6361_v55 = vpack.c.bf16 %v2433_v34, %v2425_v5  ;;  %v2439_v6 = vld [vmem:[%s13623_s2 + $0x220] sm:$0xff]  ;;  %v2512_v17 = vld [vmem:[%s13623_s2 + $0x468] sm:$0xff]  ;;  %v6313_v5 = vpack.c.bf16 %v2495_v60, %v2487_v58 }
 0x44a   :  { %7364 = vtanh.f32 %v10455_v3  ;;  %v2447_v56 = vld [vmem:[%s13623_s2 + $0x260] sm:$0xff]  ;;  %v2568_v58 = vld [vmem:[%s13623_s2 + $0x628] sm:$0xff] }
 0x44b   :  { %7366 = vrcp.f32 %v2345_v11  ;;  %v6299_v11 = vpack.c.bf16 %v2448_v40, %v2440_v35  ;;  %v2503_v35 = vld [vmem:[%s13623_s2 + $0x420] sm:$0xff]  ;;  %v2576_v60 = vld [vmem:[%s13623_s2 + $0x668] sm:$0xff] }
 0x44c   :  { %7368 = vtanh.f32 %v10457_v45  ;;  %v2511_v40 = vld [vmem:[%s13623_s2 + $0x460] sm:$0xff] }
 0x44d   :  { %7370 = vrcp.f32 %v2346_v18  ;;  %v6363_v18 = vpack.c.bf16 %v2450_v47, %v2442_v41  ;;  %v6315_v41 = vpack.c.bf16 %v2512_v17, %v2504_v15  ;;  %v2567_v15 = vld [vmem:[%s13623_s2 + $0x620] sm:$0xff] }
 0x44e   :  { %v2575_v17 = vld [vmem:[%s13623_s2 + $0x660] sm:$0xff] }
 0x454   :  { %v7365_v19 = vpop.eup %7364 }
 0x455   :  { %v7367_v10 = vpop.eup %7366 }
 0x456   :  { %v7369_v33 = vpop.eup %7368  ;;  %v10493_v51 = vmul.f32 %v7367_v10, %v7365_v19  ;;  %v2441_v19 = vld [vmem:[%s13623_s2 + $0x230] sm:$0xff]  ;;  %v2456_v10 = vld [vmem:[%s13623_s2 + $0x2a8] sm:$0xff] }
 0x457   :  { %v7371_v43 = vpop.eup %7370  ;;  %v6365_v36 = vpack.c.bf16 %v2449_v0, %v2441_v19  ;;  %v6303_v32 = vpack.c.bf16 %v2464_v48, %v2456_v10  ;;  %v6317_v19 = vpack.c.bf16 %v2511_v40, %v2503_v35  ;;  %v2519_v10 = vld [vmem:[%s13623_s2 + $0x4a0] sm:$0xff]  ;;  %v2584_v35 = vld [vmem:[%s13623_s2 + $0x6a8] sm:$0xff] }
 0x458   :  { %v10485_v53 = vmul.f32 %v7371_v43, %v7369_v33  ;;  %v6301_v33 = vpack.c.bf16 %v2447_v56, %v2439_v6  ;;  %v2455_v43 = vld [vmem:[%s13623_s2 + $0x2a0] sm:$0xff]  ;;  %v2520_v6 = vld [vmem:[%s13623_s2 + $0x4a8] sm:$0xff] }
 0x459   :  { %v6305_v62 = vpack.c.bf16 %v2463_v44, %v2455_v43  ;;  %v2528_v56 = vld [vmem:[%s13623_s2 + $0x4e8] sm:$0xff]  ;;  %v2527_v48 = vld [vmem:[%s13623_s2 + $0x4e0] sm:$0xff] }
 0x45a   :  { %2691 = vmatprep.mubr.f32.mxu0 %v10485_v53  ;;  %2762 = vmatprep.mubr.f32.mxu1 %v10485_v53  ;;  %v6319_v25 = vpack.c.bf16 %v2528_v56, %v2520_v6  ;;  %v2536_v43 = vld [vmem:[%s13623_s2 + $0x528] sm:$0xff]  ;;  %v2583_v6 = vld [vmem:[%s13623_s2 + $0x6a0] sm:$0xff] }
 0x45b   :  { %2692 = vmatmul.mubr.f32.vlgmr.msra.gmra.mrb[10].mxu0 %v10493_v51  ;;  %2763 = vmatmul.mubr.f32.vlgmr.msra.gmra.mrb[14].mxu1 %v10493_v51  ;;  %v2544_v44 = vld [vmem:[%s13623_s2 + $0x568] sm:$0xff]  ;;  %v2591_v56 = vld [vmem:[%s13623_s2 + $0x6e0] sm:$0xff] }
 0x45c   :  { %6286 = vmatpush1.bf16.msra.mxu0 %v6285_v39  ;;  %6350 = vmatpush1.bf16.msra.mxu1 %v6349_v57  ;;  %v2457_v39 = vld [vmem:[%s13623_s2 + $0x2b0] sm:$0xff]  ;;  %v6323_v52 = vpack.c.bf16 %v2544_v44, %v2536_v43  ;;  %v2592_v40 = vld [vmem:[%s13623_s2 + $0x6e8] sm:$0xff]  ;;  %v2599_v43 = vld [vmem:[%s13623_s2 + $0x720] sm:$0xff] }
 0x45d   :  { %2833 = vmatprep.mubr.f32.mxu0 %v10485_v53  ;;  %2904 = vmatprep.mubr.f32.mxu1 %v10485_v53  ;;  %v2465_v57 = vld [vmem:[%s13623_s2 + $0x2f0] sm:$0xff]  ;;  %v2607_v44 = vld [vmem:[%s13623_s2 + $0x760] sm:$0xff] }
 0x45e   :  { %6288 = vmatprep.subr.bf16.mxu0 %v6287_v63  ;;  %6352 = vmatprep.subr.bf16.mxu1 %v6351_v4  ;;  %v6369_v63 = vpack.c.bf16 %v2465_v57, %v2457_v39  ;;  %v2471_v4 = vld [vmem:[%s13623_s2 + $0x320] sm:$0xff]  ;;  %v6321_v39 = vpack.c.bf16 %v2527_v48, %v2519_v10  ;;  %v2600_v10 = vld [vmem:[%s13623_s2 + $0x728] sm:$0xff] }
 0x45f   :  { %v6309_v31 = vpack.c.bf16 %v2479_v9, %v2471_v4  ;;  %v2552_v4 = vld [vmem:[%s13623_s2 + $0x5a8] sm:$0xff] }
 0x460   :  { %6290 = vmatpush1.bf16.msra.mxu0 %v6289_v14  ;;  %6354 = vmatpush1.bf16.msra.mxu1 %v6353_v16  ;;  %v2473_v14 = vld [vmem:[%s13623_s2 + $0x330] sm:$0xff]  ;;  %v2560_v9 = vld [vmem:[%s13623_s2 + $0x5e8] sm:$0xff] }
 0x461   :  { %6292 = vmatprep.subr.bf16.mxu0 %v6291_v24  ;;  %6356 = vmatprep.subr.bf16.mxu1 %v6355_v30  ;;  %v2481_v16 = vld [vmem:[%s13623_s2 + $0x370] sm:$0xff]  ;;  %v2490_v24 = vld [vmem:[%s13623_s2 + $0x3b8] sm:$0xff]  ;;  %v2608_v48 = vld [vmem:[%s13623_s2 + $0x768] sm:$0xff] }
 0x462   :  { %v2498_v30 = vld [vmem:[%s13623_s2 + $0x3f8] sm:$0xff]  ;;  %v6373_v22 = vpack.c.bf16 %v2481_v16, %v2473_v14  ;;  %v6325_v14 = vpack.c.bf16 %v2543_v50, %v2535_v42  ;;  %v2616_v42 = vld [vmem:[%s13623_s2 + $0x7a8] sm:$0xff] }
 0x463   :  { %v6375_v2 = vpack.c.bf16 %v2498_v30, %v2490_v24  ;;  %v6327_v24 = vpack.c.bf16 %v2560_v9, %v2552_v4  ;;  %v2624_v50 = vld [vmem:[%s13623_s2 + $0x7e8] sm:$0xff]  ;;  %v2615_v4 = vld [vmem:[%s13623_s2 + $0x7a0] sm:$0xff] }
 0x464   :  { %6294 = vmatpush1.bf16.msra.mxu0 %v6293_v7  ;;  %6358 = vmatpush1.bf16.msra.mxu1 %v6357_v8  ;;  %v2489_v7 = vld [vmem:[%s13623_s2 + $0x3b0] sm:$0xff]  ;;  %v6343_v9 = vpack.c.bf16 %v2624_v50, %v2616_v42  ;;  %v3036_v42 = vld [vmem:[%s13623_s2 + $0x1d8] sm:$0xff]  ;;  %v3025_v50 = vld [vmem:[%s13623_s2 + $0x180] sm:$0xff] }
 0x465   :  { %6296 = vmatprep.subr.bf16.mxu0 %v6295_v26  ;;  %6360 = vmatprep.subr.bf16.mxu1 %v6359_v28  ;;  %v2497_v8 = vld [vmem:[%s13623_s2 + $0x3f0] sm:$0xff]  ;;  %v2506_v26 = vld [vmem:[%s13623_s2 + $0x438] sm:$0xff] }
 0x466   :  { %v2514_v28 = vld [vmem:[%s13623_s2 + $0x478] sm:$0xff]  ;;  %v6377_v34 = vpack.c.bf16 %v2497_v8, %v2489_v7  ;;  %v6329_v7 = vpack.c.bf16 %v2559_v23, %v2551_v21 }
 0x467   :  { %v6379_v47 = vpack.c.bf16 %v2514_v28, %v2506_v26  ;;  %v6331_v26 = vpack.c.bf16 %v2576_v60, %v2568_v58  ;;  %v2988_v58 = vld [vmem:[%s13623_s2 + $0x58] sm:$0xff]  ;;  %v2977_v60 = vld [vmem:[%s13623_s2] sm:$0xff] }
 0x468   :  { %6298 = vmatpush1.bf16.msra.mxu0 %v6297_v49  ;;  %6362 = vmatpush1.bf16.msra.mxu1 %v6361_v55  ;;  %v2505_v49 = vld [vmem:[%s13623_s2 + $0x430] sm:$0xff] }
 0x469   :  { %6300 = vmatprep.subr.bf16.mxu0 %v6299_v11  ;;  %6364 = vmatprep.subr.bf16.mxu1 %v6363_v18  ;;  %v2513_v55 = vld [vmem:[%s13623_s2 + $0x470] sm:$0xff]  ;;  %v2522_v11 = vld [vmem:[%s13623_s2 + $0x4b8] sm:$0xff] }
 0x46a   :  { %v2530_v18 = vld [vmem:[%s13623_s2 + $0x4f8] sm:$0xff]  ;;  %v6381_v0 = vpack.c.bf16 %v2513_v55, %v2505_v49  ;;  %v6333_v49 = vpack.c.bf16 %v2575_v17, %v2567_v15  ;;  %v2987_v15 = vld [vmem:[%s13623_s2 + $0x50] sm:$0xff]  ;;  %v2994_v17 = vld [vmem:[%s13623_s2 + $0x88] sm:$0xff] }
 0x46b   :  { %v6383_v27 = vpack.c.bf16 %v2530_v18, %v2522_v11  ;;  %v6335_v11 = vpack.c.bf16 %v2592_v40, %v2584_v35 }
 0x46c   :  { %6302 = vmatpush1.bf16.msra.mxu0 %v6301_v33  ;;  %6366 = vmatpush1.bf16.msra.mxu1 %v6365_v36  ;;  %v2521_v33 = vld [vmem:[%s13623_s2 + $0x4b0] sm:$0xff] }
 0x46d   :  { %6304 = vmatprep.subr.bf16.mxu0 %v6303_v32  ;;  %6368 = vmatprep.subr.bf16.mxu1 %v6367_v37  ;;  %v2529_v36 = vld [vmem:[%s13623_s2 + $0x4f0] sm:$0xff]  ;;  %v2538_v32 = vld [vmem:[%s13623_s2 + $0x538] sm:$0xff] }
 0x46e   :  { %v2546_v37 = vld [vmem:[%s13623_s2 + $0x578] sm:$0xff]  ;;  %v6385_v57 = vpack.c.bf16 %v2529_v36, %v2521_v33  ;;  %v6337_v33 = vpack.c.bf16 %v2591_v56, %v2583_v6  ;;  %v3003_v6 = vld [vmem:[%s13623_s2 + $0xd0] sm:$0xff]  ;;  %v3010_v56 = vld [vmem:[%s13623_s2 + $0x108] sm:$0xff] }
 0x46f   :  { %v6387_v61 = vpack.c.bf16 %v2546_v37, %v2538_v32  ;;  %v6339_v32 = vpack.c.bf16 %v2608_v48, %v2600_v10  ;;  %v3020_v10 = vld [vmem:[%s13623_s2 + $0x158] sm:$0xff]  ;;  %v3009_v48 = vld [vmem:[%s13623_s2 + $0x100] sm:$0xff] }
 0x470   :  { %6306 = vmatpush1.bf16.msra.mxu0 %v6305_v62  ;;  %6370 = vmatpush1.bf16.msra.mxu1 %v6369_v63  ;;  %v2537_v62 = vld [vmem:[%s13623_s2 + $0x530] sm:$0xff] }
 0x471   :  { %6308 = vmatprep.subr.bf16.mxu0 %v6307_v12  ;;  %6372 = vmatprep.subr.bf16.mxu1 %v6371_v13  ;;  %v2545_v63 = vld [vmem:[%s13623_s2 + $0x570] sm:$0xff]  ;;  %v2554_v12 = vld [vmem:[%s13623_s2 + $0x5b8] sm:$0xff] }
 0x472   :  { %v2562_v13 = vld [vmem:[%s13623_s2 + $0x5f8] sm:$0xff]  ;;  %v6389_v16 = vpack.c.bf16 %v2545_v63, %v2537_v62  ;;  %v6341_v62 = vpack.c.bf16 %v2607_v44, %v2599_v43  ;;  %v3026_v44 = vld [vmem:[%s13623_s2 + $0x188] sm:$0xff] }
 0x473   :  { %v6391_v30 = vpack.c.bf16 %v2562_v13, %v2554_v12  ;;  %v2623_v13 = vld [vmem:[%s13623_s2 + $0x7e0] sm:$0xff] }
 0x474   :  { %6310 = vmatpush1.bf16.msra.mxu0 %v6309_v31  ;;  %6374 = vmatpush1.bf16.msra.mxu1 %v6373_v22  ;;  %v2553_v31 = vld [vmem:[%s13623_s2 + $0x5b0] sm:$0xff]  ;;  %v6345_v21 = vpack.c.bf16 %v2623_v13, %v2615_v4  ;;  %v3042_v4 = vld [vmem:[%s13623_s2 + $0x208] sm:$0xff]  ;;  %v3052_v13 = vld [vmem:[%s13623_s2 + $0x258] sm:$0xff] }
 0x475   :  { %6312 = vmatprep.subr.bf16.mxu0 %v6311_v1  ;;  %6376 = vmatprep.subr.bf16.mxu1 %v6375_v2  ;;  %v2561_v22 = vld [vmem:[%s13623_s2 + $0x5f0] sm:$0xff]  ;;  %v2570_v1 = vld [vmem:[%s13623_s2 + $0x638] sm:$0xff] }
 0x476   :  { %v2578_v2 = vld [vmem:[%s13623_s2 + $0x678] sm:$0xff]  ;;  %v6393_v8 = vpack.c.bf16 %v2561_v22, %v2553_v31 }
 0x477   :  { %v6395_v28 = vpack.c.bf16 %v2578_v2, %v2570_v1  ;;  %v2980_v31 = vld [vmem:[%s13623_s2 + $0x18] sm:$0xff]  ;;  %v2985_v1 = vld [vmem:[%s13623_s2 + $0x40] sm:$0xff] }
 0x478   :  { %6314 = vmatpush1.bf16.msra.mxu0 %v6313_v5  ;;  %6378 = vmatpush1.bf16.msra.mxu1 %v6377_v34  ;;  %v2569_v5 = vld [vmem:[%s13623_s2 + $0x630] sm:$0xff]  ;;  %v6475_v2 = vpack.c.bf16 %v2988_v58, %v2980_v31  ;;  %v3058_v58 = vld [vmem:[%s13623_s2 + $0x288] sm:$0xff] }
 0x479   :  { %6316 = vmatprep.subr.bf16.mxu0 %v6315_v41  ;;  %6380 = vmatprep.subr.bf16.mxu1 %v6379_v47  ;;  %v2577_v34 = vld [vmem:[%s13623_s2 + $0x670] sm:$0xff]  ;;  %v2586_v41 = vld [vmem:[%s13623_s2 + $0x6b8] sm:$0xff] }
 0x47a   :  { %v2594_v47 = vld [vmem:[%s13623_s2 + $0x6f8] sm:$0xff]  ;;  %v6397_v55 = vpack.c.bf16 %v2577_v34, %v2569_v5 }
 0x47b   :  { %v6399_v18 = vpack.c.bf16 %v2594_v47, %v2586_v41  ;;  %v2996_v5 = vld [vmem:[%s13623_s2 + $0x98] sm:$0xff]  ;;  %v2993_v41 = vld [vmem:[%s13623_s2 + $0x80] sm:$0xff] }
 0x47c   :  { %6318 = vmatpush1.bf16.msra.mxu0 %v6317_v19  ;;  %6382 = vmatpush1.bf16.msra.mxu1 %v6381_v0  ;;  %v2585_v19 = vld [vmem:[%s13623_s2 + $0x6b0] sm:$0xff]  ;;  %v3004_v34 = vld [vmem:[%s13623_s2 + $0xd8] sm:$0xff]  ;;  %v3001_v47 = vld [vmem:[%s13623_s2 + $0xc0] sm:$0xff] }
 0x47d   :  { %6320 = vmatprep.subr.bf16.mxu0 %v6319_v25  ;;  %6384 = vmatprep.subr.bf16.mxu1 %v6383_v27  ;;  %v2593_v0 = vld [vmem:[%s13623_s2 + $0x6f0] sm:$0xff]  ;;  %v2602_v25 = vld [vmem:[%s13623_s2 + $0x738] sm:$0xff]  ;;  %v6479_v40 = vpack.c.bf16 %v3004_v34, %v2996_v5 }
 0x47e   :  { %v2610_v27 = vld [vmem:[%s13623_s2 + $0x778] sm:$0xff]  ;;  %v6401_v36 = vpack.c.bf16 %v2593_v0, %v2585_v19  ;;  %v3067_v34 = vld [vmem:[%s13623_s2 + $0x2d0] sm:$0xff] }
 0x47f   :  { %v6403_v37 = vpack.c.bf16 %v2610_v27, %v2602_v25  ;;  %v3012_v0 = vld [vmem:[%s13623_s2 + $0x118] sm:$0xff]  ;;  %v3017_v27 = vld [vmem:[%s13623_s2 + $0x140] sm:$0xff] }
 0x480   :  { %6322 = vmatpush1.bf16.msra.mxu0 %v6321_v39  ;;  %6386 = vmatpush1.bf16.msra.mxu1 %v6385_v57  ;;  %v2601_v39 = vld [vmem:[%s13623_s2 + $0x730] sm:$0xff]  ;;  %v6483_v25 = vpack.c.bf16 %v3020_v10, %v3012_v0  ;;  %v6421_v43 = vpack.c.bf16 %v3017_v27, %v3009_v48  ;;  %v3090_v10 = vld [vmem:[%s13623_s2 + $0x388] sm:$0xff]  ;;  %v3100_v27 = vld [vmem:[%s13623_s2 + $0x3d8] sm:$0xff] }
 0x481   :  { %6324 = vmatprep.subr.bf16.mxu0 %v6323_v52  ;;  %6388 = vmatprep.subr.bf16.mxu1 %v6387_v61  ;;  %v2609_v57 = vld [vmem:[%s13623_s2 + $0x770] sm:$0xff]  ;;  %v2618_v52 = vld [vmem:[%s13623_s2 + $0x7b8] sm:$0xff]  ;;  %v3098_v48 = vld [vmem:[%s13623_s2 + $0x3c8] sm:$0xff] }
 0x482   :  { %v2626_v61 = vld [vmem:[%s13623_s2 + $0x7f8] sm:$0xff]  ;;  %v6405_v63 = vpack.c.bf16 %v2609_v57, %v2601_v39  ;;  %v3083_v0 = vld [vmem:[%s13623_s2 + $0x350] sm:$0xff] }
 0x483   :  { %v6407_v12 = vpack.c.bf16 %v2626_v61, %v2618_v52  ;;  %v3033_v52 = vld [vmem:[%s13623_s2 + $0x1c0] sm:$0xff] }
 0x484   :  { %6326 = vmatpush1.bf16.msra.mxu0 %v6325_v14  ;;  %6390 = vmatpush1.bf16.msra.mxu1 %v6389_v16  ;;  %v2617_v14 = vld [vmem:[%s13623_s2 + $0x7b0] sm:$0xff] }
 0x485   :  { %6328 = vmatprep.subr.bf16.mxu0 %v6327_v24  ;;  %6392 = vmatprep.subr.bf16.mxu1 %v6391_v30  ;;  %v2625_v16 = vld [vmem:[%s13623_s2 + $0x7f0] sm:$0xff]  ;;  %v2978_v24 = vld [vmem:[%s13623_s2 + $0x8] sm:$0xff] }
 0x486   :  { %v6409_v23 = vpack.c.bf16 %v2625_v16, %v2617_v14  ;;  %v2986_v30 = vld [vmem:[%s13623_s2 + $0x48] sm:$0xff]  ;;  %v6425_v14 = vpack.c.bf16 %v3033_v52, %v3025_v50 }
 0x487   :  { %v6411_v22 = vpack.c.bf16 %v2986_v30, %v2978_v24  ;;  %v3049_v24 = vld [vmem:[%s13623_s2 + $0x240] sm:$0xff]  ;;  %v3043_v30 = vld [vmem:[%s13623_s2 + $0x210] sm:$0xff]  ;;  %v3106_v52 = vld [vmem:[%s13623_s2 + $0x408] sm:$0xff] }
 0x488   :  { %6330 = vmatpush1.bf16.msra.mxu0 %v6329_v7  ;;  %6394 = vmatpush1.bf16.msra.mxu1 %v6393_v8  ;;  %v6413_v7 = vpack.c.bf16 %v2985_v1, %v2977_v60  ;;  %v2979_v8 = vld [vmem:[%s13623_s2 + $0x10] sm:$0xff]  ;;  %v3066_v60 = vld [vmem:[%s13623_s2 + $0x2c8] sm:$0xff]  ;;  %v3060_v1 = vld [vmem:[%s13623_s2 + $0x298] sm:$0xff] }
 0x489   :  { %6332 = vmatprep.subr.bf16.mxu0 %v6331_v26  ;;  %6396 = vmatprep.subr.bf16.mxu1 %v6395_v28  ;;  %v6477_v26 = vpack.c.bf16 %v2987_v15, %v2979_v8  ;;  %v3002_v28 = vld [vmem:[%s13623_s2 + $0xc8] sm:$0xff]  ;;  %v6431_v15 = vpack.c.bf16 %v3066_v60, %v3058_v58  ;;  %v3132_v58 = vld [vmem:[%s13623_s2 + $0x4d8] sm:$0xff]  ;;  %v3121_v60 = vld [vmem:[%s13623_s2 + $0x480] sm:$0xff] }
 0x48a   :  { %v6415_v35 = vpack.c.bf16 %v3002_v28, %v2994_v17  ;;  %v3057_v17 = vld [vmem:[%s13623_s2 + $0x280] sm:$0xff]  ;;  %v3059_v28 = vld [vmem:[%s13623_s2 + $0x290] sm:$0xff] }
 0x48c   :  { %6334 = vmatpush1.bf16.msra.mxu0 %v6333_v49  ;;  %6398 = vmatpush1.bf16.msra.mxu1 %v6397_v55  ;;  %v2995_v49 = vld [vmem:[%s13623_s2 + $0x90] sm:$0xff]  ;;  %v6417_v55 = vpack.c.bf16 %v3001_v47, %v2993_v41  ;;  %v3076_v41 = vld [vmem:[%s13623_s2 + $0x318] sm:$0xff] }
 0x48d   :  { %6336 = vmatprep.subr.bf16.mxu0 %v6335_v11  ;;  %6400 = vmatprep.subr.bf16.mxu1 %v6399_v18  ;;  %v3018_v11 = vld [vmem:[%s13623_s2 + $0x148] sm:$0xff]  ;;  %v6481_v18 = vpack.c.bf16 %v3003_v6, %v2995_v49  ;;  %v3084_v47 = vld [vmem:[%s13623_s2 + $0x358] sm:$0xff] }
 0x48e   :  { %v6419_v19 = vpack.c.bf16 %v3018_v11, %v3010_v56  ;;  %v3073_v56 = vld [vmem:[%s13623_s2 + $0x300] sm:$0xff] }
 0x48f   :  { %v3081_v11 = vld [vmem:[%s13623_s2 + $0x340] sm:$0xff] }
 0x490   :  { %6338 = vmatpush1.bf16.msra.mxu0 %v6337_v33  ;;  %6402 = vmatpush1.bf16.msra.mxu1 %v6401_v36  ;;  %v3011_v33 = vld [vmem:[%s13623_s2 + $0x110] sm:$0xff] }
 0x491   :  { %6340 = vmatprep.subr.bf16.mxu0 %v6339_v32  ;;  %6404 = vmatprep.subr.bf16.mxu1 %v6403_v37  ;;  %v3019_v36 = vld [vmem:[%s13623_s2 + $0x150] sm:$0xff]  ;;  %v3034_v32 = vld [vmem:[%s13623_s2 + $0x1c8] sm:$0xff]  ;;  %v3028_v37 = vld [vmem:[%s13623_s2 + $0x198] sm:$0xff] }
 0x492   :  { %v6485_v39 = vpack.c.bf16 %v3019_v36, %v3011_v33  ;;  %v6423_v57 = vpack.c.bf16 %v3034_v32, %v3026_v44  ;;  %v6487_v61 = vpack.c.bf16 %v3036_v42, %v3028_v37  ;;  %v6437_v33 = vpack.c.bf16 %v3081_v11, %v3073_v56  ;;  %v3089_v44 = vld [vmem:[%s13623_s2 + $0x380] sm:$0xff]  ;;  %v3154_v11 = vld [vmem:[%s13623_s2 + $0x588] sm:$0xff] }
 0x493   :  { %v3097_v32 = vld [vmem:[%s13623_s2 + $0x3c0] sm:$0xff] }
 0x494   :  { %6342 = vmatpush1.bf16.msra.mxu0 %v6341_v62  ;;  %6406 = vmatpush1.bf16.msra.mxu1 %v6405_v63  ;;  %v3027_v62 = vld [vmem:[%s13623_s2 + $0x190] sm:$0xff]  ;;  %v6441_v42 = vpack.c.bf16 %v3097_v32, %v3089_v44  ;;  %v3170_v32 = vld [vmem:[%s13623_s2 + $0x608] sm:$0xff] }
 0x495   :  { %6344 = vmatprep.subr.bf16.mxu0 %v6343_v9  ;;  %6408 = vmatprep.subr.bf16.mxu1 %v6407_v12  ;;  %v3035_v63 = vld [vmem:[%s13623_s2 + $0x1d0] sm:$0xff]  ;;  %v3050_v9 = vld [vmem:[%s13623_s2 + $0x248] sm:$0xff]  ;;  %v3044_v12 = vld [vmem:[%s13623_s2 + $0x218] sm:$0xff] }
 0x496   :  { %v6489_v16 = vpack.c.bf16 %v3035_v63, %v3027_v62  ;;  %v6491_v31 = vpack.c.bf16 %v3052_v13, %v3044_v12  ;;  %v3108_v62 = vld [vmem:[%s13623_s2 + $0x418] sm:$0xff]  ;;  %v3105_v12 = vld [vmem:[%s13623_s2 + $0x400] sm:$0xff] }
 0x497   :  { %v3113_v13 = vld [vmem:[%s13623_s2 + $0x440] sm:$0xff] }
 0x498   :  { %6346 = vmatpush1.bf16.msra.mxu0 %v6345_v21  ;;  %6410 = vmatpush1.bf16.msra.mxu1 %v6409_v23  ;;  %v6427_v21 = vpack.c.bf16 %v3050_v9, %v3042_v4  ;;  %v3041_v23 = vld [vmem:[%s13623_s2 + $0x200] sm:$0xff]  ;;  %v3116_v4 = vld [vmem:[%s13623_s2 + $0x458] sm:$0xff] }
 0x499   :  { %6412 = vmatprep.subr.bf16.mxu0 %v6411_v22  ;;  %6476 = vmatprep.subr.bf16.mxu1 %v6475_v2  ;;  %v3051_v22 = vld [vmem:[%s13623_s2 + $0x250] sm:$0xff]  ;;  %v3068_v2 = vld [vmem:[%s13623_s2 + $0x2d8] sm:$0xff]  ;;  %v6507_v9 = vpack.c.bf16 %v3116_v4, %v3108_v62 }
 0x49a   :  { %v6493_v8 = vpack.c.bf16 %v3051_v22, %v3043_v30  ;;  %v6495_v5 = vpack.c.bf16 %v3068_v2, %v3060_v1  ;;  %v3130_v30 = vld [vmem:[%s13623_s2 + $0x4c8] sm:$0xff]  ;;  %v3129_v1 = vld [vmem:[%s13623_s2 + $0x4c0] sm:$0xff]  ;;  %v3179_v4 = vld [vmem:[%s13623_s2 + $0x650] sm:$0xff] }
 0x49b   :  { %2834 = vmatmul.mubr.f32.vlgmr.msra.gmra.mrb[12].mxu0 %v10493_v51  ;;  %2905 = vmatmul.mubr.f32.vlgmr.msra.gmra.mrb[16].mxu1 %v10493_v51 }
 0x49c   :  { %6414 = vmatpush1.bf16.msra.mxu0 %v6413_v7  ;;  %6478 = vmatpush1.bf16.msra.mxu1 %v6477_v26  ;;  %v6429_v7 = vpack.c.bf16 %v3049_v24, %v3041_v23  ;;  %v3065_v26 = vld [vmem:[%s13623_s2 + $0x2c0] sm:$0xff]  ;;  %v3122_v24 = vld [vmem:[%s13623_s2 + $0x488] sm:$0xff] }
 0x49d   :  { %6416 = vmatprep.subr.bf16.mxu0 %v6415_v35  ;;  %6480 = vmatprep.subr.bf16.mxu1 %v6479_v40  ;;  %v3074_v35 = vld [vmem:[%s13623_s2 + $0x308] sm:$0xff]  ;;  %v6433_v49 = vpack.c.bf16 %v3065_v26, %v3057_v17  ;;  %v6447_v22 = vpack.c.bf16 %v3130_v30, %v3122_v24  ;;  %v3193_v24 = vld [vmem:[%s13623_s2 + $0x6c0] sm:$0xff] }
 0x49e   :  { %v3082_v40 = vld [vmem:[%s13623_s2 + $0x348] sm:$0xff] }
 0x49f   :  { %v6435_v6 = vpack.c.bf16 %v3082_v40, %v3074_v35  ;;  %v3138_v26 = vld [vmem:[%s13623_s2 + $0x508] sm:$0xff]  ;;  %v3148_v35 = vld [vmem:[%s13623_s2 + $0x558] sm:$0xff]  ;;  %v3137_v40 = vld [vmem:[%s13623_s2 + $0x500] sm:$0xff] }
 0x4a0   :  { %6418 = vmatpush1.bf16.msra.mxu0 %v6417_v55  ;;  %6482 = vmatpush1.bf16.msra.mxu1 %v6481_v18  ;;  %v6497_v55 = vpack.c.bf16 %v3067_v34, %v3059_v28  ;;  %v3075_v18 = vld [vmem:[%s13623_s2 + $0x310] sm:$0xff]  ;;  %v3146_v28 = vld [vmem:[%s13623_s2 + $0x548] sm:$0xff] }
 0x4a1   :  { %6420 = vmatprep.subr.bf16.mxu0 %v6419_v19  ;;  %6484 = vmatprep.subr.bf16.mxu1 %v6483_v25  ;;  %v6499_v19 = vpack.c.bf16 %v3084_v47, %v3076_v41  ;;  %v3092_v25 = vld [vmem:[%s13623_s2 + $0x398] sm:$0xff]  ;;  %v6501_v36 = vpack.c.bf16 %v3083_v0, %v3075_v18  ;;  %v6451_v34 = vpack.c.bf16 %v3146_v28, %v3138_v26  ;;  %v3145_v41 = vld [vmem:[%s13623_s2 + $0x540] sm:$0xff]  ;;  %v3162_v18 = vld [vmem:[%s13623_s2 + $0x5c8] sm:$0xff] }
 0x4a2   :  { %v6503_v37 = vpack.c.bf16 %v3100_v27, %v3092_v25  ;;  %v6455_v0 = vpack.c.bf16 %v3162_v18, %v3154_v11  ;;  %v3161_v25 = vld [vmem:[%s13623_s2 + $0x5c0] sm:$0xff] }
 0x4a3   :  { %v3201_v26 = vld [vmem:[%s13623_s2 + $0x700] sm:$0xff] }
 0x4a4   :  { %6422 = vmatpush1.bf16.msra.mxu0 %v6421_v43  ;;  %6486 = vmatpush1.bf16.msra.mxu1 %v6485_v39  ;;  %v6439_v43 = vpack.c.bf16 %v3098_v48, %v3090_v10  ;;  %v3091_v39 = vld [vmem:[%s13623_s2 + $0x390] sm:$0xff]  ;;  %v3164_v10 = vld [vmem:[%s13623_s2 + $0x5d8] sm:$0xff]  ;;  %v3153_v48 = vld [vmem:[%s13623_s2 + $0x580] sm:$0xff] }
 0x4a5   :  { %6424 = vmatprep.subr.bf16.mxu0 %v6423_v57  ;;  %6488 = vmatprep.subr.bf16.mxu1 %v6487_v61  ;;  %v3099_v57 = vld [vmem:[%s13623_s2 + $0x3d0] sm:$0xff]  ;;  %v3114_v61 = vld [vmem:[%s13623_s2 + $0x448] sm:$0xff]  ;;  %v3209_v28 = vld [vmem:[%s13623_s2 + $0x740] sm:$0xff] }
 0x4a6   :  { %v6505_v50 = vpack.c.bf16 %v3099_v57, %v3091_v39  ;;  %v6443_v63 = vpack.c.bf16 %v3114_v61, %v3106_v52  ;;  %v3172_v39 = vld [vmem:[%s13623_s2 + $0x618] sm:$0xff]  ;;  %v3177_v52 = vld [vmem:[%s13623_s2 + $0x640] sm:$0xff] }
 0x4a7   :  { %v3225_v18 = vld [vmem:[%s13623_s2 + $0x7c0] sm:$0xff] }
 0x4a8   :  { %6426 = vmatpush1.bf16.msra.mxu0 %v6425_v14  ;;  %6490 = vmatpush1.bf16.msra.mxu1 %v6489_v16  ;;  %v3107_v14 = vld [vmem:[%s13623_s2 + $0x410] sm:$0xff]  ;;  %v6445_v16 = vpack.c.bf16 %v3113_v13, %v3105_v12  ;;  %v3186_v12 = vld [vmem:[%s13623_s2 + $0x688] sm:$0xff] }
 0x4a9   :  { %6428 = vmatprep.subr.bf16.mxu0 %v6427_v21  ;;  %6492 = vmatprep.subr.bf16.mxu1 %v6491_v31  ;;  %v3115_v21 = vld [vmem:[%s13623_s2 + $0x450] sm:$0xff]  ;;  %v3124_v31 = vld [vmem:[%s13623_s2 + $0x498] sm:$0xff]  ;;  %v3194_v13 = vld [vmem:[%s13623_s2 + $0x6c8] sm:$0xff] }
 0x4aa   :  { %v6509_v23 = vpack.c.bf16 %v3115_v21, %v3107_v14  ;;  %v6511_v2 = vpack.c.bf16 %v3132_v58, %v3124_v31  ;;  %v3188_v14 = vld [vmem:[%s13623_s2 + $0x698] sm:$0xff]  ;;  %v3195_v58 = vld [vmem:[%s13623_s2 + $0x6d0] sm:$0xff] }
 0x4ab   :  { %v3196_v21 = vld [vmem:[%s13623_s2 + $0x6d8] sm:$0xff] }
 0x4ac   :  { %6430 = vmatpush1.bf16.msra.mxu0 %v6429_v7  ;;  %6494 = vmatpush1.bf16.msra.mxu1 %v6493_v8  ;;  %v6449_v7 = vpack.c.bf16 %v3129_v1, %v3121_v60  ;;  %v3123_v8 = vld [vmem:[%s13623_s2 + $0x490] sm:$0xff]  ;;  %v6527_v30 = vpack.c.bf16 %v3196_v21, %v3188_v14  ;;  %v3202_v60 = vld [vmem:[%s13623_s2 + $0x708] sm:$0xff]  ;;  %v322_v14 = vld [vmem:[%s321_s26] sm:$0xff]  ;;  %s5304_s26 = sshll.u32 %s11245_s13, 3  ;;  %s5312_s13 = sshll.u32 %s5311_s11, 3 }
 0x4ad   :  { %6432 = vmatprep.subr.bf16.mxu0 %v6431_v15  ;;  %6496 = vmatprep.subr.bf16.mxu1 %v6495_v5  ;;  %v3131_v15 = vld [vmem:[%s13623_s2 + $0x4d0] sm:$0xff]  ;;  %v3140_v5 = vld [vmem:[%s13623_s2 + $0x518] sm:$0xff]  ;;  %324 = vst [vmem:[#allocation2 + $0x140] ss:$8 sm:$0xf] %v322_v14  ;;  %s363_s14 = scalar_lea.vmem %s13622_s1, %s5304_s26  ;;  %s5308_s26 = sshll.u32 %s5307_s17, 3 }
 0x4ae   :  { %v6513_v17 = vpack.c.bf16 %v3131_v15, %v3123_v8  ;;  %v6515_v47 = vpack.c.bf16 %v3148_v35, %v3140_v5  ;;  %v3212_v8 = vld [vmem:[%s13623_s2 + $0x758] sm:$0xff]  ;;  %v3203_v5 = vld [vmem:[%s13623_s2 + $0x710] sm:$0xff]  ;;  %325 = vst [vmem:[#allocation2 + $0x140] ss:$8 sm:$0xf0] %v322_v14 }
 0x4af   :  { %v3211_v35 = vld [vmem:[%s13623_s2 + $0x750] sm:$0xff] }
 0x4b0   :  { %6434 = vmatpush1.bf16.msra.mxu0 %v6433_v49  ;;  %6498 = vmatpush1.bf16.msra.mxu1 %v6497_v55  ;;  %v6453_v49 = vpack.c.bf16 %v3145_v41, %v3137_v40  ;;  %v3139_v55 = vld [vmem:[%s13623_s2 + $0x510] sm:$0xff]  ;;  %v3218_v40 = vld [vmem:[%s13623_s2 + $0x788] sm:$0xff] }
 0x4b1   :  { %6436 = vmatprep.subr.bf16.mxu0 %v6435_v6  ;;  %6500 = vmatprep.subr.bf16.mxu1 %v6499_v19  ;;  %v3147_v6 = vld [vmem:[%s13623_s2 + $0x550] sm:$0xff]  ;;  %v3156_v19 = vld [vmem:[%s13623_s2 + $0x598] sm:$0xff]  ;;  %v3226_v41 = vld [vmem:[%s13623_s2 + $0x7c8] sm:$0xff] }
 0x4b2   :  { %v6517_v56 = vpack.c.bf16 %v3147_v6, %v3139_v55  ;;  %v6519_v27 = vpack.c.bf16 %v3164_v10, %v3156_v19  ;;  %v3220_v55 = vld [vmem:[%s13623_s2 + $0x798] sm:$0xff]  ;;  %v3219_v19 = vld [vmem:[%s13623_s2 + $0x790] sm:$0xff] }
 0x4b3   :  { %v3228_v6 = vld [vmem:[%s13623_s2 + $0x7d8] sm:$0xff] }
 0x4b4   :  { %6438 = vmatpush1.bf16.msra.mxu0 %v6437_v33  ;;  %6502 = vmatpush1.bf16.msra.mxu1 %v6501_v36  ;;  %v6457_v33 = vpack.c.bf16 %v3161_v25, %v3153_v48  ;;  %v3155_v36 = vld [vmem:[%s13623_s2 + $0x590] sm:$0xff]  ;;  %v6535_v11 = vpack.c.bf16 %v3228_v6, %v3220_v55  ;;  %v2982_v25 = vld [vmem:[%s13623_s2 + $0x28] sm:$0xff] }
 0x4b5   :  { %6440 = vmatprep.subr.bf16.mxu0 %v6439_v43  ;;  %6504 = vmatprep.subr.bf16.mxu1 %v6503_v37  ;;  %v3163_v43 = vld [vmem:[%s13623_s2 + $0x5d0] sm:$0xff]  ;;  %v3178_v37 = vld [vmem:[%s13623_s2 + $0x648] sm:$0xff] }
 0x4b6   :  { %v6521_v44 = vpack.c.bf16 %v3163_v43, %v3155_v36  ;;  %v6459_v57 = vpack.c.bf16 %v3178_v37, %v3170_v32  ;;  %v2992_v43 = vld [vmem:[%s13623_s2 + $0x78] sm:$0xff] }
 0x4b8   :  { %6442 = vmatpush1.bf16.msra.mxu0 %v6441_v42  ;;  %6506 = vmatpush1.bf16.msra.mxu1 %v6505_v50  ;;  %v3180_v42 = vld [vmem:[%s13623_s2 + $0x658] sm:$0xff]  ;;  %v3169_v50 = vld [vmem:[%s13623_s2 + $0x600] sm:$0xff] }
 0x4b9   :  { %6444 = vmatprep.subr.bf16.mxu0 %v6443_v63  ;;  %6508 = vmatprep.subr.bf16.mxu1 %v6507_v9  ;;  %v6523_v61 = vpack.c.bf16 %v3180_v42, %v3172_v39  ;;  %v6461_v62 = vpack.c.bf16 %v3177_v52, %v3169_v50  ;;  %v3171_v63 = vld [vmem:[%s13623_s2 + $0x610] sm:$0xff]  ;;  %v2363_v42 = vld [vmem:[#allocation2 + $0x100] sm:$0xff]  ;;  %v2364_v52 = vld [vmem:[#allocation2 + $0x108] sm:$0xff] }
 0x4ba   :  { %v6525_v9 = vpack.c.bf16 %v3179_v4, %v3171_v63  ;;  %v2365_v50 = vld [vmem:[#allocation2 + $0x110] sm:$0xff] }
 0x4bc   :  { %6446 = vmatpush1.bf16.msra.mxu0 %v6445_v16  ;;  %6510 = vmatpush1.bf16.msra.mxu1 %v6509_v23  ;;  %v6463_v16 = vpack.c.bf16 %v3194_v13, %v3186_v12  ;;  %v3185_v23 = vld [vmem:[%s13623_s2 + $0x680] sm:$0xff] }
 0x4bd   :  { %6448 = vmatprep.subr.bf16.mxu0 %v6447_v22  ;;  %6512 = vmatprep.subr.bf16.mxu1 %v6511_v2  ;;  %v6465_v31 = vpack.c.bf16 %v3193_v24, %v3185_v23  ;;  %v3187_v22 = vld [vmem:[%s13623_s2 + $0x690] sm:$0xff]  ;;  %v3210_v2 = vld [vmem:[%s13623_s2 + $0x748] sm:$0xff]  ;;  %v336_v24 = vld [vmem:[%s335_s8] sm:$0xff]  ;;  %s391_s8 = scalar_lea.vmem %s13622_s1, %s5312_s13 }
 0x4be   :  { %v6529_v1 = vpack.c.bf16 %v3195_v58, %v3187_v22  ;;  %v6467_v15 = vpack.c.bf16 %v3210_v2, %v3202_v60  ;;  %338 = vst [vmem:[#allocation2 + $0x142] ss:$8 sm:$0xf] %v336_v24  ;;  %339 = vst [vmem:[#allocation2 + $0x142] ss:$8 sm:$0xf0] %v336_v24 }
 0x4bf   :  { %v357_v22 = vld [vmem:[%s356_s30] sm:$0xff]  ;;  %s12071_s30 = sld [smem:[#allocation5 + $0x37]] }
 0x4c0   :  { %6450 = vmatpush1.bf16.msra.mxu0 %v6449_v7  ;;  %6514 = vmatpush1.bf16.msra.mxu1 %v6513_v17  ;;  %v3204_v7 = vld [vmem:[%s13623_s2 + $0x718] sm:$0xff]  ;;  %359 = vst [vmem:[#allocation2 + $0x145] ss:$8 sm:$0xf] %v357_v22  ;;  %v364_v58 = vld [vmem:[%s363_s14] sm:$0xff]  ;;  %s377_s14 = scalar_lea.vmem %s13622_s1, %s5308_s26 }
 0x4c1   :  { %6452 = vmatprep.subr.bf16.mxu0 %v6451_v34  ;;  %6516 = vmatprep.subr.bf16.mxu1 %v6515_v47  ;;  %v6531_v17 = vpack.c.bf16 %v3212_v8, %v3204_v7  ;;  %v6469_v34 = vpack.c.bf16 %v3209_v28, %v3201_v26  ;;  %v6533_v47 = vpack.c.bf16 %v3211_v35, %v3203_v5  ;;  %v371_v60 = vld [vmem:[%s370_s27] sm:$0xff]  ;;  %v2368_v35 = vld [vmem:[#allocation2 + $0x128] sm:$0xff]  ;;  %s384_s27 = scalar_lea.vmem %s13622_s1, %s5310_s12 }
 0x4c2   :  { %360 = vst [vmem:[#allocation2 + $0x145] ss:$8 sm:$0xf0] %v357_v22  ;;  %366 = vst [vmem:[#allocation2 + $0x146] ss:$8 sm:$0xf] %v364_v58 }
 0x4c3   :  { %373 = vst [vmem:[#allocation2 + $0x147] ss:$8 sm:$0xf] %v371_v60  ;;  %367 = vst [vmem:[#allocation2 + $0x146] ss:$8 sm:$0xf0] %v364_v58 }
 0x4c4   :  { %6454 = vmatpush1.bf16.msra.mxu0 %v6453_v49  ;;  %6518 = vmatpush1.bf16.msra.mxu1 %v6517_v56  ;;  %v6471_v49 = vpack.c.bf16 %v3226_v41, %v3218_v40  ;;  %v3217_v56 = vld [vmem:[%s13623_s2 + $0x780] sm:$0xff]  ;;  %374 = vst [vmem:[#allocation2 + $0x147] ss:$8 sm:$0xf0] %v371_v60  ;;  %v2370_v40 = vld [vmem:[#allocation2 + $0x138] sm:$0xff] }
 0x4c5   :  { %6456 = vmatprep.subr.bf16.mxu0 %v6455_v0  ;;  %6520 = vmatprep.subr.bf16.mxu1 %v6519_v27  ;;  %v3227_v0 = vld [vmem:[%s13623_s2 + $0x7d0] sm:$0xff]  ;;  %v6473_v10 = vpack.c.bf16 %v3225_v18, %v3217_v56  ;;  %v2990_v27 = vld [vmem:[%s13623_s2 + $0x68] sm:$0xff]  ;;  %v2367_v5 = vld [vmem:[#allocation2 + $0x120] sm:$0xff] }
 0x4c6   :  { %v6537_v48 = vpack.c.bf16 %v3227_v0, %v3219_v19  ;;  %v6539_v36 = vpack.c.bf16 %v2990_v27, %v2982_v25  ;;  %v2997_v22 = vld [vmem:[%s13623_s2 + $0xa0] sm:$0xff] }
 0x4c7   :  { %v3005_v58 = vld [vmem:[%s13623_s2 + $0xe0] sm:$0xff] }
 0x4c8   :  { %6458 = vmatpush1.bf16.msra.mxu0 %v6457_v33  ;;  %6522 = vmatpush1.bf16.msra.mxu1 %v6521_v44  ;;  %v2984_v33 = vld [vmem:[%s13623_s2 + $0x38] sm:$0xff] }
 0x4c9   :  { %6460 = vmatprep.subr.bf16.mxu0 %v6459_v57  ;;  %6524 = vmatprep.subr.bf16.mxu1 %v6523_v61  ;;  %v6603_v44 = vpack.c.bf16 %v2992_v43, %v2984_v33 }
 0x4cc   :  { %6462 = vmatpush1.bf16.msra.mxu0 %v6461_v62  ;;  %6526 = vmatpush1.bf16.msra.mxu1 %v6525_v9  ;;  %v2366_v62 = vld [vmem:[#allocation2 + $0x118] sm:$0xff] }
 0x4cd   :  { %6464 = vmatprep.subr.bf16.mxu0 %v6463_v16  ;;  %6528 = vmatprep.subr.bf16.mxu1 %v6527_v30  ;;  %v329_v16 = vld [vmem:[%s328_s20] sm:$0xff]  ;;  %s5322_s20 = sshll.u32 %s12071_s30, 3  ;;  %s13114_s30 = sld [smem:[#allocation5 + $0x3b]] }
 0x4ce   :  { %331 = vst [vmem:[#allocation2 + $0x141] ss:$8 sm:$0xf] %v329_v16  ;;  %332 = vst [vmem:[#allocation2 + $0x141] ss:$8 sm:$0xf0] %v329_v16 }
 0x4cf   :  { %v343_v30 = vld [vmem:[%s342_s28] sm:$0xff]  ;;  %v3006_v16 = vld [vmem:[%s13623_s2 + $0xe8] sm:$0xff]  ;;  %s398_s28 = scalar_lea.vmem %s13622_s1, %s5314_s19  ;;  %s426_s19 = scalar_lea.vmem %s13622_s1, %s5322_s20 }
 0x4d0   :  { %6466 = vmatpush1.bf16.msra.mxu0 %v6465_v31  ;;  %6530 = vmatpush1.bf16.msra.mxu1 %v6529_v1  ;;  %345 = vst [vmem:[#allocation2 + $0x143] ss:$8 sm:$0xf] %v343_v30  ;;  %346 = vst [vmem:[#allocation2 + $0x143] ss:$8 sm:$0xf0] %v343_v30 }
 0x4d1   :  { %6468 = vmatprep.subr.bf16.mxu0 %v6467_v15  ;;  %6532 = vmatprep.subr.bf16.mxu1 %v6531_v17  ;;  %v350_v31 = vld [vmem:[%s349_s18] sm:$0xff]  ;;  %s12065_s18 = sld [smem:[#allocation5 + $0x34]] }
 0x4d2   :  { %352 = vst [vmem:[#allocation2 + $0x144] ss:$8 sm:$0xf] %v350_v31  ;;  %353 = vst [vmem:[#allocation2 + $0x144] ss:$8 sm:$0xf0] %v350_v31 }
 0x4d3   :  { %s5330_s15 = sshll.u32 %s13114_s30, 3 }
 0x4d4   :  { %6470 = vmatpush1.bf16.msra.mxu0 %v6469_v34  ;;  %6534 = vmatpush1.bf16.msra.mxu1 %v6533_v47  ;;  %v2369_v34 = vld [vmem:[#allocation2 + $0x130] sm:$0xff] }
 0x4d5   :  { %6472 = vmatprep.subr.bf16.mxu0 %v6471_v49  ;;  %6536 = vmatprep.subr.bf16.mxu1 %v6535_v11 }
 0x4d7   :  { %s5316_s17 = sshll.u32 %s12065_s18, 3  ;;  %s13102_s18 = sld [smem:[#allocation5 + $0x38]] }
 0x4d8   :  { %6474 = vmatpush1.bf16.msra.mxu0 %v6473_v10  ;;  %6538 = vmatpush1.bf16.msra.mxu1 %v6537_v48  ;;  %s405_s26 = scalar_lea.vmem %s13622_s1, %s5316_s17 }
 0x4d9   :  { %6540 = vmatprep.subr.bf16.mxu0 %v6539_v36  ;;  %6604 = vmatprep.subr.bf16.mxu1 %v6603_v44 }
 0x4dd   :  { %s5324_s17 = sshll.u32 %s13102_s18, 3  ;;  %s440_s18 = scalar_lea.vmem %s13622_s1, %s5326_s24 }
 0x4de   :  { %s433_s13 = scalar_lea.vmem %s13622_s1, %s5324_s17  ;;  %s461_s24 = scalar_lea.vmem %s13622_s1, %s5332_s0 }
 0x52e   :  { %v2693_v32 = vpop.f32.mrb[10].mxu0  ;;  %v2764_v37 = vpop.f32.mrb[14].mxu1 }
 0x52f   :  { %v2695_v39 = vpop.f32.mrb[11].mxu0  ;;  %v2766_v57 = vpop.f32.mrb[15].mxu1  ;;  %v2911_v61 = vadd.f32 %v2693_v32, %v2363_v42  ;;  %v2913_v63 = vadd.f32 %v2764_v37, %v2365_v50 }
 0x530   :  { %v2912_v4 = vadd.f32 %v2695_v39, %v2364_v52  ;;  %v2914_v9 = vadd.f32 %v2766_v57, %v2366_v62 }
 0x531   :  { %v5363_v12 = vmul.f32 -1.442695, %v2911_v61  ;;  %v5365_v13 = vmul.f32 -1.442695, %v2913_v63  ;;  %v2989_v63 = vld [vmem:[%s13623_s2 + $0x60] sm:$0xff] }
 0x532   :  { %v5364_v21 = vmul.f32 -1.442695, %v2912_v4  ;;  %v5366_v23 = vmul.f32 -1.442695, %v2914_v9  ;;  %v2983_v4 = vld [vmem:[%s13623_s2 + $0x30] sm:$0xff] }
 0x533   :  { %7372 = vpow2.f32 %v5363_v12  ;;  %v2991_v9 = vld [vmem:[%s13623_s2 + $0x70] sm:$0xff] }
 0x534   :  { %7374 = vpow2.f32 %v5365_v13  ;;  %v2998_v13 = vld [vmem:[%s13623_s2 + $0xa8] sm:$0xff]  ;;  %v6605_v31 = vpack.c.bf16 %v2991_v9, %v2983_v4 }
 0x535   :  { %7376 = vpow2.f32 %v5364_v21  ;;  %v3000_v21 = vld [vmem:[%s13623_s2 + $0xb8] sm:$0xff]  ;;  %v3062_v4 = vld [vmem:[%s13623_s2 + $0x2a8] sm:$0xff] }
 0x536   :  { %7378 = vpow2.f32 %v5366_v23  ;;  %v3008_v23 = vld [vmem:[%s13623_s2 + $0xf8] sm:$0xff]  ;;  %v3070_v9 = vld [vmem:[%s13623_s2 + $0x2e8] sm:$0xff] }
 0x53d   :  { %v7373_v1 = vpop.eup %7372 }
 0x53e   :  { %v7375_v2 = vpop.eup %7374  ;;  %v2925_v15 = vadd.f32 1.0, %v7373_v1  ;;  %v2999_v1 = vld [vmem:[%s13623_s2 + $0xb0] sm:$0xff] }
 0x53f   :  { %v7377_v7 = vpop.eup %7376  ;;  %v2937_v17 = vadd.f32 1.0, %v7375_v2  ;;  %v3007_v2 = vld [vmem:[%s13623_s2 + $0xf0] sm:$0xff] }
 0x540   :  { %v7379_v8 = vpop.eup %7378  ;;  %v2926_v26 = vadd.f32 1.0, %v7377_v7  ;;  %7380 = vrcp.f32 %v2925_v15  ;;  %v3014_v7 = vld [vmem:[%s13623_s2 + $0x128] sm:$0xff]  ;;  %v6607_v15 = vpack.c.bf16 %v3008_v23, %v3000_v21  ;;  %v3061_v21 = vld [vmem:[%s13623_s2 + $0x2a0] sm:$0xff] }
 0x541   :  { %v2938_v28 = vadd.f32 1.0, %v7379_v8  ;;  %7382 = vrcp.f32 %v2937_v17  ;;  %v6543_v8 = vpack.c.bf16 %v3006_v16, %v2998_v13  ;;  %v3022_v17 = vld [vmem:[%s13623_s2 + $0x168] sm:$0xff]  ;;  %v3072_v13 = vld [vmem:[%s13623_s2 + $0x2f8] sm:$0xff]  ;;  %v3069_v23 = vld [vmem:[%s13623_s2 + $0x2e0] sm:$0xff] }
 0x542   :  { %7384 = vrcp.f32 %v2926_v26  ;;  %v3016_v26 = vld [vmem:[%s13623_s2 + $0x138] sm:$0xff] }
 0x543   :  { %7386 = vrcp.f32 %v2938_v28  ;;  %v3024_v28 = vld [vmem:[%s13623_s2 + $0x178] sm:$0xff] }
 0x54a   :  { %v7381_v10 = vpop.eup %7380 }
 0x54b   :  { %v7383_v48 = vpop.eup %7382 }
 0x54c   :  { %v7385_v25 = vpop.eup %7384  ;;  %v2957_v43 = vmul.f32 %v7383_v48, %v10455_v3  ;;  %v2981_v3 = vld [vmem:[%s13623_s2 + $0x20] sm:$0xff] }
 0x54d   :  { %v7387_v27 = vpop.eup %7386  ;;  %v6541_v30 = vpack.c.bf16 %v2989_v63, %v2981_v3  ;;  %v3037_v48 = vld [vmem:[%s13623_s2 + $0x1e0] sm:$0xff]  ;;  %v3055_v63 = vld [vmem:[%s13623_s2 + $0x270] sm:$0xff] }
 0x54e   :  { %v2958_v37 = vmul.f32 %v7387_v27, %v10457_v45 }
 0x56e   :  { %v2835_v41 = vpop.f32.mrb[12].mxu0  ;;  %v2906_v47 = vpop.f32.mrb[16].mxu1 }
 0x56f   :  { %v2915_v49 = vadd.f32 %v2835_v41, %v2367_v5  ;;  %v2917_v55 = vadd.f32 %v2906_v47, %v2369_v34  ;;  %v2837_v6 = vpop.f32.mrb[13].mxu0  ;;  %v2908_v56 = vpop.f32.mrb[17].mxu1  ;;  %v6545_v5 = vpack.c.bf16 %v3005_v58, %v2997_v22  ;;  %v6609_v34 = vpack.c.bf16 %v3007_v2, %v2999_v1  ;;  %v3063_v22 = vld [vmem:[%s13623_s2 + $0x2b0] sm:$0xff]  ;;  %v3078_v1 = vld [vmem:[%s13623_s2 + $0x328] sm:$0xff] }
 0x570   :  { %v2916_v11 = vadd.f32 %v2837_v6, %v2368_v35  ;;  %v2918_v18 = vadd.f32 %v2908_v56, %v2370_v40  ;;  %v3013_v35 = vld [vmem:[%s13623_s2 + $0x120] sm:$0xff]  ;;  %v6547_v41 = vpack.c.bf16 %v3022_v17, %v3014_v7  ;;  %v6611_v47 = vpack.c.bf16 %v3024_v28, %v3016_v26  ;;  %v3030_v6 = vld [vmem:[%s13623_s2 + $0x1a8] sm:$0xff]  ;;  %v3071_v58 = vld [vmem:[%s13623_s2 + $0x2f0] sm:$0xff] }
 0x571   :  { %7388 = vtanh.f32 %v2915_v49  ;;  %v5367_v19 = vmul.f32 -1.442695, %v2917_v55  ;;  %v3021_v40 = vld [vmem:[%s13623_s2 + $0x160] sm:$0xff]  ;;  %v3015_v49 = vld [vmem:[%s13623_s2 + $0x130] sm:$0xff]  ;;  %v3038_v56 = vld [vmem:[%s13623_s2 + $0x1e8] sm:$0xff]  ;;  %v6625_v17 = vpack.c.bf16 %v3071_v58, %v3063_v22 }
 0x572   :  { %7390 = vtanh.f32 %v2916_v11  ;;  %v5368_v0 = vmul.f32 -1.442695, %v2918_v18  ;;  %v3023_v55 = vld [vmem:[%s13623_s2 + $0x170] sm:$0xff]  ;;  %v3032_v11 = vld [vmem:[%s13623_s2 + $0x1b8] sm:$0xff]  ;;  %v3086_v2 = vld [vmem:[%s13623_s2 + $0x368] sm:$0xff] }
 0x573   :  { %7392 = vpow2.f32 %v5367_v19  ;;  %v3040_v18 = vld [vmem:[%s13623_s2 + $0x1f8] sm:$0xff]  ;;  %v6549_v19 = vpack.c.bf16 %v3021_v40, %v3013_v35  ;;  %v3077_v26 = vld [vmem:[%s13623_s2 + $0x320] sm:$0xff]  ;;  %v3079_v35 = vld [vmem:[%s13623_s2 + $0x330] sm:$0xff] }
 0x574   :  { %7394 = vpow2.f32 %v5368_v0  ;;  %v6613_v0 = vpack.c.bf16 %v3023_v55, %v3015_v49  ;;  %v6615_v27 = vpack.c.bf16 %v3040_v18, %v3032_v11  ;;  %v3080_v7 = vld [vmem:[%s13623_s2 + $0x338] sm:$0xff]  ;;  %v3085_v28 = vld [vmem:[%s13623_s2 + $0x360] sm:$0xff]  ;;  %v3087_v40 = vld [vmem:[%s13623_s2 + $0x370] sm:$0xff] }
 0x575   :  { %v3096_v49 = vld [vmem:[%s13623_s2 + $0x3b8] sm:$0xff]  ;;  %v3093_v11 = vld [vmem:[%s13623_s2 + $0x3a0] sm:$0xff] }
 0x576   :  { %v3104_v55 = vld [vmem:[%s13623_s2 + $0x3f8] sm:$0xff]  ;;  %v3101_v18 = vld [vmem:[%s13623_s2 + $0x3e0] sm:$0xff] }
 0x577   :  { %v3144_v22 = vld [vmem:[%s13623_s2 + $0x538] sm:$0xff] }
 0x578   :  { %v3152_v58 = vld [vmem:[%s13623_s2 + $0x578] sm:$0xff] }
 0x57b   :  { %v7389_v33 = vpop.eup %7388 }
 0x57c   :  { %v7391_v36 = vpop.eup %7390  ;;  %v2959_v44 = vmul.f32 %v7389_v33, %v7381_v10  ;;  %v3029_v10 = vld [vmem:[%s13623_s2 + $0x1a0] sm:$0xff]  ;;  %v3031_v33 = vld [vmem:[%s13623_s2 + $0x1b0] sm:$0xff] }
 0x57d   :  { %v7393_v32 = vpop.eup %7392  ;;  %v2960_v39 = vmul.f32 %v7391_v36, %v7385_v25  ;;  %v6551_v25 = vpack.c.bf16 %v3038_v56, %v3030_v6  ;;  %v3039_v36 = vld [vmem:[%s13623_s2 + $0x1f0] sm:$0xff]  ;;  %v6565_v6 = vpack.c.bf16 %v3085_v28, %v3077_v26  ;;  %v6629_v56 = vpack.c.bf16 %v3087_v40, %v3079_v35  ;;  %v3160_v35 = vld [vmem:[%s13623_s2 + $0x5b8] sm:$0xff] }
 0x57e   :  { %v7395_v57 = vpop.eup %7394  ;;  %v11279_v42 = vadd.f32 %v2959_v44, %v2957_v43  ;;  %v2951_v50 = vadd.f32 1.0, %v7393_v32  ;;  %v3046_v43 = vld [vmem:[%s13623_s2 + $0x228] sm:$0xff]  ;;  %v3048_v32 = vld [vmem:[%s13623_s2 + $0x238] sm:$0xff]  ;;  %v3143_v26 = vld [vmem:[%s13623_s2 + $0x530] sm:$0xff] }
 0x57f   :  { %v11281_v52 = vadd.f32 %v2960_v39, %v2958_v37  ;;  %v2952_v61 = vadd.f32 1.0, %v7395_v57  ;;  %v3054_v44 = vld [vmem:[%s13623_s2 + $0x268] sm:$0xff]  ;;  %v3056_v37 = vld [vmem:[%s13623_s2 + $0x278] sm:$0xff]  ;;  %v6553_v39 = vpack.c.bf16 %v3037_v48, %v3029_v10  ;;  %v6617_v57 = vpack.c.bf16 %v3039_v36, %v3031_v33  ;;  %v3095_v10 = vld [vmem:[%s13623_s2 + $0x3b0] sm:$0xff] }
 0x580   :  { %7396 = vtanh.f32 %v11279_v42  ;;  %v6619_v3 = vpack.c.bf16 %v3056_v37, %v3048_v32  ;;  %v3103_v48 = vld [vmem:[%s13623_s2 + $0x3f0] sm:$0xff]  ;;  %v3112_v33 = vld [vmem:[%s13623_s2 + $0x438] sm:$0xff]  ;;  %v3109_v32 = vld [vmem:[%s13623_s2 + $0x420] sm:$0xff] }
 0x581   :  { %7398 = vrcp.f32 %v2951_v50  ;;  %v3045_v50 = vld [vmem:[%s13623_s2 + $0x220] sm:$0xff]  ;;  %v3120_v36 = vld [vmem:[%s13623_s2 + $0x478] sm:$0xff]  ;;  %v3151_v28 = vld [vmem:[%s13623_s2 + $0x570] sm:$0xff] }
 0x582   :  { %7400 = vtanh.f32 %v11281_v52  ;;  %v3117_v37 = vld [vmem:[%s13623_s2 + $0x460] sm:$0xff]  ;;  %v3168_v40 = vld [vmem:[%s13623_s2 + $0x5f8] sm:$0xff] }
 0x583   :  { %7402 = vrcp.f32 %v2952_v61  ;;  %v3053_v61 = vld [vmem:[%s13623_s2 + $0x260] sm:$0xff] }
 0x58a   :  { %v7397_v62 = vpop.eup %7396 }
 0x58b   :  { %v7399_v45 = vpop.eup %7398 }
 0x58c   :  { %v7401_v12 = vpop.eup %7400  ;;  %v11317_v60 = vmul.f32 %v7399_v45, %v7397_v62  ;;  %v6555_v62 = vpack.c.bf16 %v3054_v44, %v3046_v43  ;;  %v3047_v45 = vld [vmem:[%s13623_s2 + $0x230] sm:$0xff]  ;;  %v6569_v43 = vpack.c.bf16 %v3101_v18, %v3093_v11  ;;  %v6633_v44 = vpack.c.bf16 %v3103_v48, %v3095_v10  ;;  %v3176_v10 = vld [vmem:[%s13623_s2 + $0x638] sm:$0xff] }
 0x58d   :  { %v7403_v14 = vpop.eup %7402  ;;  %v6621_v16 = vpack.c.bf16 %v3055_v63, %v3047_v45  ;;  %v3128_v45 = vld [vmem:[%s13623_s2 + $0x4b8] sm:$0xff]  ;;  %v3159_v11 = vld [vmem:[%s13623_s2 + $0x5b0] sm:$0xff] }
 0x58e   :  { %v11309_v24 = vmul.f32 %v7403_v14, %v7401_v12  ;;  %v3064_v12 = vld [vmem:[%s13623_s2 + $0x2b8] sm:$0xff]  ;;  %v6557_v14 = vpack.c.bf16 %v3053_v61, %v3045_v50  ;;  %v3111_v50 = vld [vmem:[%s13623_s2 + $0x430] sm:$0xff] }
 0x58f   :  { %v3119_v61 = vld [vmem:[%s13623_s2 + $0x470] sm:$0xff]  ;;  %v3136_v63 = vld [vmem:[%s13623_s2 + $0x4f8] sm:$0xff] }
 0x590   :  { %3297 = vmatprep.mubr.f32.mxu0 %v11309_v24  ;;  %3368 = vmatprep.mubr.f32.mxu1 %v11309_v24  ;;  %v3167_v18 = vld [vmem:[%s13623_s2 + $0x5f0] sm:$0xff]  ;;  %v3184_v48 = vld [vmem:[%s13623_s2 + $0x678] sm:$0xff] }
 0x591   :  { %3298 = vmatmul.mubr.f32.vlgmr.msra.gmra.mrb[14].mxu0 %v11317_v60  ;;  %3369 = vmatmul.mubr.f32.vlgmr.msra.gmra.mrb[18].mxu1 %v11317_v60 }
 0x592   :  { %6542 = vmatpush1.bf16.msra.mxu0 %v6541_v30  ;;  %6606 = vmatpush1.bf16.msra.mxu1 %v6605_v31  ;;  %v6559_v30 = vpack.c.bf16 %v3070_v9, %v3062_v4  ;;  %v6623_v31 = vpack.c.bf16 %v3072_v13, %v3064_v12  ;;  %v6573_v4 = vpack.c.bf16 %v3117_v37, %v3109_v32  ;;  %v3125_v12 = vld [vmem:[%s13623_s2 + $0x4a0] sm:$0xff]  ;;  %v3175_v32 = vld [vmem:[%s13623_s2 + $0x630] sm:$0xff] }
 0x593   :  { %3439 = vmatprep.mubr.f32.mxu0 %v11309_v24  ;;  %3510 = vmatprep.mubr.f32.mxu1 %v11309_v24  ;;  %v6637_v9 = vpack.c.bf16 %v3119_v61, %v3111_v50  ;;  %v3133_v13 = vld [vmem:[%s13623_s2 + $0x4e0] sm:$0xff]  ;;  %v3183_v37 = vld [vmem:[%s13623_s2 + $0x670] sm:$0xff]  ;;  %v3192_v50 = vld [vmem:[%s13623_s2 + $0x6b8] sm:$0xff] }
 0x594   :  { %6544 = vmatprep.subr.bf16.mxu0 %v6543_v8  ;;  %6608 = vmatprep.subr.bf16.mxu1 %v6607_v15  ;;  %v3088_v8 = vld [vmem:[%s13623_s2 + $0x378] sm:$0xff]  ;;  %v6561_v15 = vpack.c.bf16 %v3069_v23, %v3061_v21  ;;  %v3127_v21 = vld [vmem:[%s13623_s2 + $0x4b0] sm:$0xff] }
 0x595   :  { %v3135_v23 = vld [vmem:[%s13623_s2 + $0x4f0] sm:$0xff]  ;;  %v3200_v61 = vld [vmem:[%s13623_s2 + $0x6f8] sm:$0xff] }
 0x596   :  { %6546 = vmatpush1.bf16.msra.mxu0 %v6545_v5  ;;  %6610 = vmatpush1.bf16.msra.mxu1 %v6609_v34  ;;  %v6563_v5 = vpack.c.bf16 %v3086_v2, %v3078_v1  ;;  %v6627_v34 = vpack.c.bf16 %v3088_v8, %v3080_v7  ;;  %v6577_v1 = vpack.c.bf16 %v3133_v13, %v3125_v12  ;;  %v3141_v7 = vld [vmem:[%s13623_s2 + $0x520] sm:$0xff]  ;;  %v3191_v12 = vld [vmem:[%s13623_s2 + $0x6b0] sm:$0xff] }
 0x597   :  { %6548 = vmatprep.subr.bf16.mxu0 %v6547_v41  ;;  %6612 = vmatprep.subr.bf16.mxu1 %v6611_v47  ;;  %v3094_v41 = vld [vmem:[%s13623_s2 + $0x3a8] sm:$0xff]  ;;  %v6641_v2 = vpack.c.bf16 %v3135_v23, %v3127_v21  ;;  %v3149_v8 = vld [vmem:[%s13623_s2 + $0x560] sm:$0xff]  ;;  %v3199_v13 = vld [vmem:[%s13623_s2 + $0x6f0] sm:$0xff] }
 0x598   :  { %v3102_v47 = vld [vmem:[%s13623_s2 + $0x3e8] sm:$0xff]  ;;  %v3208_v21 = vld [vmem:[%s13623_s2 + $0x738] sm:$0xff] }
 0x599   :  { %v3216_v23 = vld [vmem:[%s13623_s2 + $0x778] sm:$0xff] }
 0x59a   :  { %6550 = vmatpush1.bf16.msra.mxu0 %v6549_v19  ;;  %6614 = vmatpush1.bf16.msra.mxu1 %v6613_v0  ;;  %v6567_v19 = vpack.c.bf16 %v3102_v47, %v3094_v41  ;;  %v6631_v0 = vpack.c.bf16 %v3104_v55, %v3096_v49  ;;  %v6581_v41 = vpack.c.bf16 %v3149_v8, %v3141_v7  ;;  %v3157_v49 = vld [vmem:[%s13623_s2 + $0x5a0] sm:$0xff]  ;;  %v3207_v7 = vld [vmem:[%s13623_s2 + $0x730] sm:$0xff] }
 0x59b   :  { %6552 = vmatprep.subr.bf16.mxu0 %v6551_v25  ;;  %6616 = vmatprep.subr.bf16.mxu1 %v6615_v27  ;;  %v3110_v25 = vld [vmem:[%s13623_s2 + $0x428] sm:$0xff]  ;;  %v6645_v47 = vpack.c.bf16 %v3151_v28, %v3143_v26  ;;  %v3165_v55 = vld [vmem:[%s13623_s2 + $0x5e0] sm:$0xff]  ;;  %v3215_v8 = vld [vmem:[%s13623_s2 + $0x770] sm:$0xff] }
 0x59c   :  { %v3118_v27 = vld [vmem:[%s13623_s2 + $0x468] sm:$0xff]  ;;  %v3224_v26 = vld [vmem:[%s13623_s2 + $0x7b8] sm:$0xff] }
 0x59d   :  { %v3232_v28 = vld [vmem:[%s13623_s2 + $0x7f8] sm:$0xff] }
 0x59e   :  { %6554 = vmatpush1.bf16.msra.mxu0 %v6553_v39  ;;  %6618 = vmatpush1.bf16.msra.mxu1 %v6617_v57  ;;  %v6571_v39 = vpack.c.bf16 %v3118_v27, %v3110_v25  ;;  %v6635_v57 = vpack.c.bf16 %v3120_v36, %v3112_v33  ;;  %v6585_v25 = vpack.c.bf16 %v3165_v55, %v3157_v49  ;;  %v3173_v33 = vld [vmem:[%s13623_s2 + $0x620] sm:$0xff]  ;;  %v3223_v49 = vld [vmem:[%s13623_s2 + $0x7b0] sm:$0xff] }
 0x59f   :  { %6556 = vmatprep.subr.bf16.mxu0 %v6555_v62  ;;  %6620 = vmatprep.subr.bf16.mxu1 %v6619_v3  ;;  %v3126_v62 = vld [vmem:[%s13623_s2 + $0x4a8] sm:$0xff]  ;;  %v6649_v27 = vpack.c.bf16 %v3167_v18, %v3159_v11  ;;  %v3181_v36 = vld [vmem:[%s13623_s2 + $0x660] sm:$0xff]  ;;  %v3231_v55 = vld [vmem:[%s13623_s2 + $0x7f0] sm:$0xff] }
 0x5a0   :  { %v3134_v3 = vld [vmem:[%s13623_s2 + $0x4e8] sm:$0xff] }
 0x5a1   :  { %v3584_v11 = vld [vmem:[%s13623_s2 + $0x8] sm:$0xff] }
 0x5a2   :  { %6558 = vmatpush1.bf16.msra.mxu0 %v6557_v14  ;;  %6622 = vmatpush1.bf16.msra.mxu1 %v6621_v16  ;;  %v6575_v14 = vpack.c.bf16 %v3134_v3, %v3126_v62  ;;  %v6639_v16 = vpack.c.bf16 %v3136_v63, %v3128_v45  ;;  %v6589_v62 = vpack.c.bf16 %v3181_v36, %v3173_v33  ;;  %v3189_v45 = vld [vmem:[%s13623_s2 + $0x6a0] sm:$0xff]  ;;  %v3592_v18 = vld [vmem:[%s13623_s2 + $0x48] sm:$0xff]  ;;  %v3585_v36 = vld [vmem:[%s13623_s2 + $0x10] sm:$0xff] }
 0x5a3   :  { %6560 = vmatprep.subr.bf16.mxu0 %v6559_v30  ;;  %6624 = vmatprep.subr.bf16.mxu1 %v6623_v31  ;;  %v3142_v30 = vld [vmem:[%s13623_s2 + $0x528] sm:$0xff]  ;;  %v6653_v3 = vpack.c.bf16 %v3183_v37, %v3175_v32  ;;  %v3197_v63 = vld [vmem:[%s13623_s2 + $0x6e0] sm:$0xff] }
 0x5a4   :  { %v3150_v31 = vld [vmem:[%s13623_s2 + $0x568] sm:$0xff] }
 0x5a5   :  { %v3608_v37 = vld [vmem:[%s13623_s2 + $0xc8] sm:$0xff] }
 0x5a6   :  { %6562 = vmatpush1.bf16.msra.mxu0 %v6561_v15  ;;  %6626 = vmatpush1.bf16.msra.mxu1 %v6625_v17  ;;  %v6579_v15 = vpack.c.bf16 %v3150_v31, %v3142_v30  ;;  %v6643_v17 = vpack.c.bf16 %v3152_v58, %v3144_v22  ;;  %v6593_v30 = vpack.c.bf16 %v3197_v63, %v3189_v45  ;;  %v3205_v22 = vld [vmem:[%s13623_s2 + $0x720] sm:$0xff]  ;;  %v3601_v45 = vld [vmem:[%s13623_s2 + $0x90] sm:$0xff] }
 0x5a7   :  { %6564 = vmatprep.subr.bf16.mxu0 %v6563_v5  ;;  %6628 = vmatprep.subr.bf16.mxu1 %v6627_v34  ;;  %v3158_v5 = vld [vmem:[%s13623_s2 + $0x5a8] sm:$0xff]  ;;  %v6657_v31 = vpack.c.bf16 %v3199_v13, %v3191_v12  ;;  %v3213_v58 = vld [vmem:[%s13623_s2 + $0x760] sm:$0xff] }
 0x5a8   :  { %v3166_v34 = vld [vmem:[%s13623_s2 + $0x5e8] sm:$0xff] }
 0x5a9   :  { %v3624_v12 = vld [vmem:[%s13623_s2 + $0x148] sm:$0xff] }
 0x5aa   :  { %6566 = vmatpush1.bf16.msra.mxu0 %v6565_v6  ;;  %6630 = vmatpush1.bf16.msra.mxu1 %v6629_v56  ;;  %v6583_v6 = vpack.c.bf16 %v3166_v34, %v3158_v5  ;;  %v6647_v56 = vpack.c.bf16 %v3168_v40, %v3160_v35  ;;  %v6597_v5 = vpack.c.bf16 %v3213_v58, %v3205_v22  ;;  %v3221_v35 = vld [vmem:[%s13623_s2 + $0x7a0] sm:$0xff]  ;;  %v3617_v22 = vld [vmem:[%s13623_s2 + $0x110] sm:$0xff] }
 0x5ab   :  { %6568 = vmatprep.subr.bf16.mxu0 %v6567_v19  ;;  %6632 = vmatprep.subr.bf16.mxu1 %v6631_v0  ;;  %v3174_v19 = vld [vmem:[%s13623_s2 + $0x628] sm:$0xff]  ;;  %v6661_v34 = vpack.c.bf16 %v3215_v8, %v3207_v7  ;;  %v3625_v58 = vld [vmem:[%s13623_s2 + $0x150] sm:$0xff]  ;;  %v3634_v8 = vld [vmem:[%s13623_s2 + $0x198] sm:$0xff] }
 0x5ac   :  { %v3182_v0 = vld [vmem:[%s13623_s2 + $0x668] sm:$0xff] }
 0x5ad   :  { %v3640_v7 = vld [vmem:[%s13623_s2 + $0x1c8] sm:$0xff] }
 0x5ae   :  { %6570 = vmatpush1.bf16.msra.mxu0 %v6569_v43  ;;  %6634 = vmatpush1.bf16.msra.mxu1 %v6633_v44  ;;  %v6587_v43 = vpack.c.bf16 %v3182_v0, %v3174_v19  ;;  %v6651_v44 = vpack.c.bf16 %v3184_v48, %v3176_v10  ;;  %v3586_v19 = vld [vmem:[%s13623_s2 + $0x18] sm:$0xff]  ;;  %v6667_v0 = vpack.c.bf16 %v3592_v18, %v3584_v11  ;;  %v3583_v48 = vld [vmem:[%s13623_s2] sm:$0xff] }
 0x5af   :  { %6572 = vmatprep.subr.bf16.mxu0 %v6571_v39  ;;  %6636 = vmatprep.subr.bf16.mxu1 %v6635_v57  ;;  %v3190_v39 = vld [vmem:[%s13623_s2 + $0x6a8] sm:$0xff]  ;;  %v3594_v10 = vld [vmem:[%s13623_s2 + $0x58] sm:$0xff]  ;;  %v3647_v18 = vld [vmem:[%s13623_s2 + $0x200] sm:$0xff] }
 0x5b0   :  { %v3198_v57 = vld [vmem:[%s13623_s2 + $0x6e8] sm:$0xff] }
 0x5b2   :  { %6574 = vmatpush1.bf16.msra.mxu0 %v6573_v4  ;;  %6638 = vmatpush1.bf16.msra.mxu1 %v6637_v9  ;;  %v6591_v4 = vpack.c.bf16 %v3198_v57, %v3190_v39  ;;  %v6655_v9 = vpack.c.bf16 %v3200_v61, %v3192_v50  ;;  %v3602_v39 = vld [vmem:[%s13623_s2 + $0x98] sm:$0xff] }
 0x5b3   :  { %6576 = vmatprep.subr.bf16.mxu0 %v6575_v14  ;;  %6640 = vmatprep.subr.bf16.mxu1 %v6639_v16  ;;  %v3206_v14 = vld [vmem:[%s13623_s2 + $0x728] sm:$0xff]  ;;  %v3610_v57 = vld [vmem:[%s13623_s2 + $0xd8] sm:$0xff] }
 0x5b4   :  { %v3214_v16 = vld [vmem:[%s13623_s2 + $0x768] sm:$0xff]  ;;  %v6735_v61 = vpack.c.bf16 %v3610_v57, %v3602_v39  ;;  %v3671_v39 = vld [vmem:[%s13623_s2 + $0x2c0] sm:$0xff]  ;;  %v3665_v57 = vld [vmem:[%s13623_s2 + $0x290] sm:$0xff] }
 0x5b6   :  { %6578 = vmatpush1.bf16.msra.mxu0 %v6577_v1  ;;  %6642 = vmatpush1.bf16.msra.mxu1 %v6641_v2  ;;  %v6595_v1 = vpack.c.bf16 %v3214_v16, %v3206_v14  ;;  %v6659_v2 = vpack.c.bf16 %v3216_v23, %v3208_v21  ;;  %v3618_v16 = vld [vmem:[%s13623_s2 + $0x118] sm:$0xff]  ;;  %v3615_v23 = vld [vmem:[%s13623_s2 + $0x100] sm:$0xff] }
 0x5b7   :  { %6580 = vmatprep.subr.bf16.mxu0 %v6579_v15  ;;  %6644 = vmatprep.subr.bf16.mxu1 %v6643_v17  ;;  %v3222_v15 = vld [vmem:[%s13623_s2 + $0x7a8] sm:$0xff]  ;;  %v3626_v21 = vld [vmem:[%s13623_s2 + $0x158] sm:$0xff] }
 0x5b8   :  { %v3230_v17 = vld [vmem:[%s13623_s2 + $0x7e8] sm:$0xff] }
 0x5b9   :  { %v6599_v40 = vpack.c.bf16 %v3230_v17, %v3222_v15  ;;  %v6741_v15 = vpack.c.bf16 %v3625_v58, %v3617_v22  ;;  %v3698_v22 = vld [vmem:[%s13623_s2 + $0x398] sm:$0xff] }
 0x5ba   :  { %6582 = vmatpush1.bf16.msra.mxu0 %v6581_v41  ;;  %6646 = vmatpush1.bf16.msra.mxu1 %v6645_v47  ;;  %v6663_v41 = vpack.c.bf16 %v3232_v28, %v3224_v26  ;;  %v3229_v47 = vld [vmem:[%s13623_s2 + $0x7e0] sm:$0xff]  ;;  %v3642_v26 = vld [vmem:[%s13623_s2 + $0x1d8] sm:$0xff] }
 0x5bb   :  { %6584 = vmatprep.subr.bf16.mxu0 %v6583_v6  ;;  %6648 = vmatprep.subr.bf16.mxu1 %v6647_v56  ;;  %v6601_v6 = vpack.c.bf16 %v3229_v47, %v3221_v35  ;;  %v6665_v56 = vpack.c.bf16 %v3231_v55, %v3223_v49  ;;  %v3631_v28 = vld [vmem:[%s13623_s2 + $0x180] sm:$0xff]  ;;  %v3633_v35 = vld [vmem:[%s13623_s2 + $0x190] sm:$0xff]  ;;  %v3656_v47 = vld [vmem:[%s13623_s2 + $0x248] sm:$0xff] }
 0x5bc   :  { %v3650_v49 = vld [vmem:[%s13623_s2 + $0x218] sm:$0xff] }
 0x5bd   :  { %v3658_v55 = vld [vmem:[%s13623_s2 + $0x258] sm:$0xff] }
 0x5be   :  { %6586 = vmatpush1.bf16.msra.mxu0 %v6585_v25  ;;  %6650 = vmatpush1.bf16.msra.mxu1 %v6649_v27  ;;  %v3591_v25 = vld [vmem:[%s13623_s2 + $0x40] sm:$0xff]  ;;  %v6731_v27 = vpack.c.bf16 %v3594_v10, %v3586_v19  ;;  %v6747_v10 = vpack.c.bf16 %v3658_v55, %v3650_v49  ;;  %v3706_v58 = vld [vmem:[%s13623_s2 + $0x3d8] sm:$0xff] }
 0x5bf   :  { %6588 = vmatprep.subr.bf16.mxu0 %v6587_v43  ;;  %6652 = vmatprep.subr.bf16.mxu1 %v6651_v44  ;;  %v6669_v33 = vpack.c.bf16 %v3591_v25, %v3583_v48  ;;  %v3593_v43 = vld [vmem:[%s13623_s2 + $0x50] sm:$0xff]  ;;  %v3600_v44 = vld [vmem:[%s13623_s2 + $0x88] sm:$0xff]  ;;  %v3655_v19 = vld [vmem:[%s13623_s2 + $0x240] sm:$0xff] }
 0x5c0   :  { %v6733_v32 = vpack.c.bf16 %v3593_v43, %v3585_v36  ;;  %v6671_v50 = vpack.c.bf16 %v3608_v37, %v3600_v44  ;;  %v3657_v48 = vld [vmem:[%s13623_s2 + $0x250] sm:$0xff]  ;;  %v3664_v25 = vld [vmem:[%s13623_s2 + $0x288] sm:$0xff]  ;;  %v3674_v36 = vld [vmem:[%s13623_s2 + $0x2d8] sm:$0xff]  ;;  %v6685_v43 = vpack.c.bf16 %v3655_v19, %v3647_v18 }
 0x5c1   :  { %v3663_v37 = vld [vmem:[%s13623_s2 + $0x280] sm:$0xff]  ;;  %v3722_v49 = vld [vmem:[%s13623_s2 + $0x458] sm:$0xff]  ;;  %v3721_v19 = vld [vmem:[%s13623_s2 + $0x450] sm:$0xff] }
 0x5c2   :  { %6590 = vmatpush1.bf16.msra.mxu0 %v6589_v62  ;;  %6654 = vmatpush1.bf16.msra.mxu1 %v6653_v3  ;;  %v3599_v62 = vld [vmem:[%s13623_s2 + $0x80] sm:$0xff] }
 0x5c3   :  { %6592 = vmatprep.subr.bf16.mxu0 %v6591_v4  ;;  %6656 = vmatprep.subr.bf16.mxu1 %v6655_v9  ;;  %v3607_v3 = vld [vmem:[%s13623_s2 + $0xc0] sm:$0xff]  ;;  %v3609_v4 = vld [vmem:[%s13623_s2 + $0xd0] sm:$0xff]  ;;  %v3616_v9 = vld [vmem:[%s13623_s2 + $0x108] sm:$0xff] }
 0x5c4   :  { %v6673_v63 = vpack.c.bf16 %v3607_v3, %v3599_v62  ;;  %v6737_v13 = vpack.c.bf16 %v3609_v4, %v3601_v45  ;;  %v6675_v14 = vpack.c.bf16 %v3624_v12, %v3616_v9  ;;  %v3680_v62 = vld [vmem:[%s13623_s2 + $0x308] sm:$0xff]  ;;  %v3682_v45 = vld [vmem:[%s13623_s2 + $0x318] sm:$0xff]  ;;  %v6689_v4 = vpack.c.bf16 %v3671_v39, %v3663_v37  ;;  %v3729_v37 = vld [vmem:[%s13623_s2 + $0x490] sm:$0xff] }
 0x5c5   :  { %v3688_v3 = vld [vmem:[%s13623_s2 + $0x348] sm:$0xff]  ;;  %v3737_v39 = vld [vmem:[%s13623_s2 + $0x4d0] sm:$0xff] }
 0x5c6   :  { %6594 = vmatpush1.bf16.msra.mxu0 %v6593_v30  ;;  %6658 = vmatpush1.bf16.msra.mxu1 %v6657_v31  ;;  %v6739_v30 = vpack.c.bf16 %v3626_v21, %v3618_v16  ;;  %v3623_v31 = vld [vmem:[%s13623_s2 + $0x140] sm:$0xff]  ;;  %v6691_v12 = vpack.c.bf16 %v3688_v3, %v3680_v62  ;;  %v3681_v16 = vld [vmem:[%s13623_s2 + $0x310] sm:$0xff]  ;;  %v3746_v62 = vld [vmem:[%s13623_s2 + $0x518] sm:$0xff] }
 0x5c7   :  { %6596 = vmatprep.subr.bf16.mxu0 %v6595_v1  ;;  %6660 = vmatprep.subr.bf16.mxu1 %v6659_v2  ;;  %v6677_v1 = vpack.c.bf16 %v3623_v31, %v3615_v23  ;;  %v3632_v2 = vld [vmem:[%s13623_s2 + $0x188] sm:$0xff]  ;;  %v3689_v23 = vld [vmem:[%s13623_s2 + $0x350] sm:$0xff] }
 0x5c8   :  { %v6679_v17 = vpack.c.bf16 %v3640_v7, %v3632_v2  ;;  %v3704_v31 = vld [vmem:[%s13623_s2 + $0x3c8] sm:$0xff]  ;;  %v6757_v2 = vpack.c.bf16 %v3689_v23, %v3681_v16 }
 0x5c9   :  { %v3768_v23 = vld [vmem:[%s13623_s2 + $0x5c8] sm:$0xff] }
 0x5ca   :  { %6598 = vmatpush1.bf16.msra.mxu0 %v6597_v5  ;;  %6662 = vmatpush1.bf16.msra.mxu1 %v6661_v34  ;;  %v3639_v5 = vld [vmem:[%s13623_s2 + $0x1c0] sm:$0xff]  ;;  %v6743_v34 = vpack.c.bf16 %v3642_v26, %v3634_v8  ;;  %v3697_v26 = vld [vmem:[%s13623_s2 + $0x390] sm:$0xff] }
 0x5cb   :  { %6600 = vmatprep.subr.bf16.mxu0 %v6599_v40  ;;  %6664 = vmatprep.subr.bf16.mxu1 %v6663_v41  ;;  %v3641_v40 = vld [vmem:[%s13623_s2 + $0x1d0] sm:$0xff]  ;;  %v3648_v41 = vld [vmem:[%s13623_s2 + $0x208] sm:$0xff]  ;;  %v3695_v8 = vld [vmem:[%s13623_s2 + $0x380] sm:$0xff] }
 0x5cc   :  { %v6683_v11 = vpack.c.bf16 %v3656_v47, %v3648_v41  ;;  %v3714_v41 = vld [vmem:[%s13623_s2 + $0x418] sm:$0xff] }
 0x5cd   :  { %v6763_v55 = vpack.c.bf16 %v3722_v49, %v3714_v41  ;;  %v3783_v41 = vld [vmem:[%s13623_s2 + $0x640] sm:$0xff] }
 0x5ce   :  { %6602 = vmatpush1.bf16.msra.mxu0 %v6601_v6  ;;  %6666 = vmatpush1.bf16.msra.mxu1 %v6665_v56  ;;  %v6681_v6 = vpack.c.bf16 %v3639_v5, %v3631_v28  ;;  %v6745_v56 = vpack.c.bf16 %v3641_v40, %v3633_v35  ;;  %v3705_v28 = vld [vmem:[%s13623_s2 + $0x3d0] sm:$0xff]  ;;  %v3712_v35 = vld [vmem:[%s13623_s2 + $0x408] sm:$0xff] }
 0x5cf   :  { %6668 = vmatprep.subr.bf16.mxu0 %v6667_v0  ;;  %6732 = vmatprep.subr.bf16.mxu1 %v6731_v27  ;;  %v3649_v0 = vld [vmem:[%s13623_s2 + $0x210] sm:$0xff]  ;;  %v3672_v27 = vld [vmem:[%s13623_s2 + $0x2c8] sm:$0xff] }
 0x5d0   :  { %v6749_v44 = vpack.c.bf16 %v3657_v48, %v3649_v0  ;;  %v3720_v40 = vld [vmem:[%s13623_s2 + $0x448] sm:$0xff] }
 0x5d1   :  { %3440 = vmatmul.mubr.f32.vlgmr.msra.gmra.mrb[16].mxu0 %v11317_v60  ;;  %3511 = vmatmul.mubr.f32.vlgmr.msra.gmra.mrb[20].mxu1 %v11317_v60  ;;  %v6699_v47 = vpack.c.bf16 %v3720_v40, %v3712_v35  ;;  %v3736_v48 = vld [vmem:[%s13623_s2 + $0x4c8] sm:$0xff]  ;;  %v3786_v35 = vld [vmem:[%s13623_s2 + $0x658] sm:$0xff]  ;;  %v3775_v40 = vld [vmem:[%s13623_s2 + $0x600] sm:$0xff] }
 0x5d2   :  { %6670 = vmatpush1.bf16.msra.mxu0 %v6669_v33  ;;  %6734 = vmatpush1.bf16.msra.mxu1 %v6733_v32  ;;  %v3666_v33 = vld [vmem:[%s13623_s2 + $0x298] sm:$0xff]  ;;  %v6687_v32 = vpack.c.bf16 %v3672_v27, %v3664_v25  ;;  %v6717_v49 = vpack.c.bf16 %v3783_v41, %v3775_v40  ;;  %v2969_v41 = vld [vmem:[#allocation2 + $0x140] sm:$0xff] }
 0x5d3   :  { %6672 = vmatprep.subr.bf16.mxu0 %v6671_v50  ;;  %6736 = vmatprep.subr.bf16.mxu1 %v6735_v61  ;;  %v6751_v50 = vpack.c.bf16 %v3674_v36, %v3666_v33  ;;  %v3673_v61 = vld [vmem:[%s13623_s2 + $0x2d0] sm:$0xff]  ;;  %v3730_v25 = vld [vmem:[%s13623_s2 + $0x498] sm:$0xff]  ;;  %v3727_v36 = vld [vmem:[%s13623_s2 + $0x480] sm:$0xff] }
 0x5d4   :  { %v6753_v9 = vpack.c.bf16 %v3673_v61, %v3665_v57  ;;  %v3738_v33 = vld [vmem:[%s13623_s2 + $0x4d8] sm:$0xff]  ;;  %v6769_v57 = vpack.c.bf16 %v3737_v39, %v3729_v37  ;;  %v3752_v61 = vld [vmem:[%s13623_s2 + $0x548] sm:$0xff] }
 0x5d5   :  { %v3816_v37 = vld [vmem:[%s13623_s2 + $0x748] sm:$0xff]  ;;  %v3810_v39 = vld [vmem:[%s13623_s2 + $0x718] sm:$0xff] }
 0x5d6   :  { %6674 = vmatpush1.bf16.msra.mxu0 %v6673_v63  ;;  %6738 = vmatpush1.bf16.msra.mxu1 %v6737_v13  ;;  %v3690_v63 = vld [vmem:[%s13623_s2 + $0x358] sm:$0xff]  ;;  %v3679_v13 = vld [vmem:[%s13623_s2 + $0x300] sm:$0xff] }
 0x5d7   :  { %6676 = vmatprep.subr.bf16.mxu0 %v6675_v14  ;;  %6740 = vmatprep.subr.bf16.mxu1 %v6739_v30  ;;  %v3687_v14 = vld [vmem:[%s13623_s2 + $0x340] sm:$0xff]  ;;  %v6755_v21 = vpack.c.bf16 %v3690_v63, %v3682_v45  ;;  %v3696_v30 = vld [vmem:[%s13623_s2 + $0x388] sm:$0xff]  ;;  %v3754_v45 = vld [vmem:[%s13623_s2 + $0x558] sm:$0xff] }
 0x5d8   :  { %v6695_v7 = vpack.c.bf16 %v3704_v31, %v3696_v30  ;;  %v3743_v63 = vld [vmem:[%s13623_s2 + $0x500] sm:$0xff]  ;;  %v3762_v30 = vld [vmem:[%s13623_s2 + $0x598] sm:$0xff] }
 0x5da   :  { %6678 = vmatpush1.bf16.msra.mxu0 %v6677_v1  ;;  %6742 = vmatpush1.bf16.msra.mxu1 %v6741_v15  ;;  %v6693_v1 = vpack.c.bf16 %v3687_v14, %v3679_v13  ;;  %v3703_v15 = vld [vmem:[%s13623_s2 + $0x3c0] sm:$0xff]  ;;  %v3745_v13 = vld [vmem:[%s13623_s2 + $0x510] sm:$0xff] }
 0x5db   :  { %6680 = vmatprep.subr.bf16.mxu0 %v6679_v17  ;;  %6744 = vmatprep.subr.bf16.mxu1 %v6743_v34  ;;  %v6759_v17 = vpack.c.bf16 %v3706_v58, %v3698_v22  ;;  %v6697_v5 = vpack.c.bf16 %v3703_v15, %v3695_v8  ;;  %v6761_v34 = vpack.c.bf16 %v3705_v28, %v3697_v26  ;;  %v3753_v14 = vld [vmem:[%s13623_s2 + $0x550] sm:$0xff]  ;;  %v3770_v22 = vld [vmem:[%s13623_s2 + $0x5d8] sm:$0xff]  ;;  %v3759_v58 = vld [vmem:[%s13623_s2 + $0x580] sm:$0xff] }
 0x5dc   :  { %v6773_v16 = vpack.c.bf16 %v3753_v14, %v3745_v13  ;;  %v3761_v8 = vld [vmem:[%s13623_s2 + $0x590] sm:$0xff]  ;;  %v3776_v26 = vld [vmem:[%s13623_s2 + $0x608] sm:$0xff] }
 0x5dd   :  { %v3769_v15 = vld [vmem:[%s13623_s2 + $0x5d0] sm:$0xff]  ;;  %v3784_v28 = vld [vmem:[%s13623_s2 + $0x648] sm:$0xff] }
 0x5de   :  { %6682 = vmatpush1.bf16.msra.mxu0 %v6681_v6  ;;  %6746 = vmatpush1.bf16.msra.mxu1 %v6745_v56  ;;  %v3711_v6 = vld [vmem:[%s13623_s2 + $0x400] sm:$0xff] }
 0x5df   :  { %6684 = vmatprep.subr.bf16.mxu0 %v6683_v11  ;;  %6748 = vmatprep.subr.bf16.mxu1 %v6747_v10  ;;  %v3719_v56 = vld [vmem:[%s13623_s2 + $0x440] sm:$0xff]  ;;  %v3713_v11 = vld [vmem:[%s13623_s2 + $0x410] sm:$0xff]  ;;  %v3728_v10 = vld [vmem:[%s13623_s2 + $0x488] sm:$0xff] }
 0x5e0   :  { %v6701_v18 = vpack.c.bf16 %v3719_v56, %v3711_v6  ;;  %v6765_v0 = vpack.c.bf16 %v3721_v19, %v3713_v11  ;;  %v6703_v27 = vpack.c.bf16 %v3736_v48, %v3728_v10  ;;  %v3785_v6 = vld [vmem:[%s13623_s2 + $0x650] sm:$0xff]  ;;  %v3792_v11 = vld [vmem:[%s13623_s2 + $0x688] sm:$0xff]  ;;  %v3794_v19 = vld [vmem:[%s13623_s2 + $0x698] sm:$0xff] }
 0x5e1   :  { %v3802_v10 = vld [vmem:[%s13623_s2 + $0x6d8] sm:$0xff]  ;;  %v3791_v48 = vld [vmem:[%s13623_s2 + $0x680] sm:$0xff] }
 0x5e2   :  { %6686 = vmatpush1.bf16.msra.mxu0 %v6685_v43  ;;  %6750 = vmatpush1.bf16.msra.mxu1 %v6749_v44  ;;  %v3735_v43 = vld [vmem:[%s13623_s2 + $0x4c0] sm:$0xff]  ;;  %v6767_v44 = vpack.c.bf16 %v3738_v33, %v3730_v25 }
 0x5e3   :  { %6688 = vmatprep.subr.bf16.mxu0 %v6687_v32  ;;  %6752 = vmatprep.subr.bf16.mxu1 %v6751_v50  ;;  %v6705_v32 = vpack.c.bf16 %v3735_v43, %v3727_v36  ;;  %v3744_v50 = vld [vmem:[%s13623_s2 + $0x508] sm:$0xff]  ;;  %v3799_v25 = vld [vmem:[%s13623_s2 + $0x6c0] sm:$0xff]  ;;  %v3793_v36 = vld [vmem:[%s13623_s2 + $0x690] sm:$0xff] }
 0x5e4   :  { %v6707_v3 = vpack.c.bf16 %v3752_v61, %v3744_v50  ;;  %v6721_v33 = vpack.c.bf16 %v3799_v25, %v3791_v48  ;;  %v3801_v43 = vld [vmem:[%s13623_s2 + $0x6d0] sm:$0xff]  ;;  %v385_v48 = vld [vmem:[%s384_s27] sm:$0xff]  ;;  %s454_s27 = scalar_lea.vmem %s13622_s1, %s5330_s15 }
 0x5e5   :  { %387 = vst [vmem:[#allocation2 + $0x181] ss:$8 sm:$0xf] %v385_v48  ;;  %388 = vst [vmem:[#allocation2 + $0x181] ss:$8 sm:$0xf0] %v385_v48 }
 0x5e6   :  { %6690 = vmatpush1.bf16.msra.mxu0 %v6689_v4  ;;  %6754 = vmatpush1.bf16.msra.mxu1 %v6753_v9  ;;  %v3751_v4 = vld [vmem:[%s13623_s2 + $0x540] sm:$0xff]  ;;  %v6771_v9 = vpack.c.bf16 %v3754_v45, %v3746_v62  ;;  %v3809_v45 = vld [vmem:[%s13623_s2 + $0x710] sm:$0xff]  ;;  %v3604_v48 = vld [vmem:[%s13623_s2 + $0xa8] sm:$0xff] }
 0x5e7   :  { %6692 = vmatprep.subr.bf16.mxu0 %v6691_v12  ;;  %6756 = vmatprep.subr.bf16.mxu1 %v6755_v21  ;;  %v6709_v12 = vpack.c.bf16 %v3751_v4, %v3743_v63  ;;  %v3760_v21 = vld [vmem:[%s13623_s2 + $0x588] sm:$0xff]  ;;  %v3807_v62 = vld [vmem:[%s13623_s2 + $0x700] sm:$0xff]  ;;  %v3817_v4 = vld [vmem:[%s13623_s2 + $0x750] sm:$0xff] }
 0x5e8   :  { %v6711_v31 = vpack.c.bf16 %v3768_v23, %v3760_v21  ;;  %v6789_v13 = vpack.c.bf16 %v3817_v4, %v3809_v45  ;;  %v3834_v21 = vld [vmem:[%s13623_s2 + $0x7d8] sm:$0xff]  ;;  %v3823_v23 = vld [vmem:[%s13623_s2 + $0x780] sm:$0xff] }
 0x5e9   :  { %v2973_v4 = vld [vmem:[#allocation2 + $0x160] sm:$0xff] }
 0x5ea   :  { %6694 = vmatpush1.bf16.msra.mxu0 %v6693_v1  ;;  %6758 = vmatpush1.bf16.msra.mxu1 %v6757_v2  ;;  %v3767_v1 = vld [vmem:[%s13623_s2 + $0x5c0] sm:$0xff]  ;;  %v6775_v2 = vpack.c.bf16 %v3770_v22, %v3762_v30  ;;  %v3825_v22 = vld [vmem:[%s13623_s2 + $0x790] sm:$0xff] }
 0x5eb   :  { %6696 = vmatprep.subr.bf16.mxu0 %v6695_v7  ;;  %6760 = vmatprep.subr.bf16.mxu1 %v6759_v17  ;;  %v6713_v7 = vpack.c.bf16 %v3767_v1, %v3759_v58  ;;  %v6777_v17 = vpack.c.bf16 %v3769_v15, %v3761_v8  ;;  %v3833_v58 = vld [vmem:[%s13623_s2 + $0x7d0] sm:$0xff]  ;;  %v3596_v8 = vld [vmem:[%s13623_s2 + $0x68] sm:$0xff]  ;;  %v3590_v15 = vld [vmem:[%s13623_s2 + $0x38] sm:$0xff] }
 0x5ee   :  { %6698 = vmatpush1.bf16.msra.mxu0 %v6697_v5  ;;  %6762 = vmatpush1.bf16.msra.mxu1 %v6761_v34  ;;  %v3778_v5 = vld [vmem:[%s13623_s2 + $0x618] sm:$0xff]  ;;  %v6715_v34 = vpack.c.bf16 %v3784_v28, %v3776_v26 }
 0x5ef   :  { %6700 = vmatprep.subr.bf16.mxu0 %v6699_v47  ;;  %6764 = vmatprep.subr.bf16.mxu1 %v6763_v55  ;;  %v6779_v47 = vpack.c.bf16 %v3786_v35, %v3778_v5  ;;  %v3777_v55 = vld [vmem:[%s13623_s2 + $0x610] sm:$0xff]  ;;  %v3598_v26 = vld [vmem:[%s13623_s2 + $0x78] sm:$0xff] }
 0x5f0   :  { %v6781_v56 = vpack.c.bf16 %v3785_v6, %v3777_v55  ;;  %v6859_v28 = vpack.c.bf16 %v3598_v26, %v3590_v15  ;;  %v2972_v6 = vld [vmem:[#allocation2 + $0x158] sm:$0xff] }
 0x5f2   :  { %6702 = vmatpush1.bf16.msra.mxu0 %v6701_v18  ;;  %6766 = vmatpush1.bf16.msra.mxu1 %v6765_v0  ;;  %v3800_v18 = vld [vmem:[%s13623_s2 + $0x6c8] sm:$0xff] }
 0x5f3   :  { %6704 = vmatprep.subr.bf16.mxu0 %v6703_v27  ;;  %6768 = vmatprep.subr.bf16.mxu1 %v6767_v44  ;;  %v6719_v0 = vpack.c.bf16 %v3800_v18, %v3792_v11  ;;  %v6783_v27 = vpack.c.bf16 %v3802_v10, %v3794_v19  ;;  %v3808_v44 = vld [vmem:[%s13623_s2 + $0x708] sm:$0xff]  ;;  %v378_v10 = vld [vmem:[%s377_s14] sm:$0xff]  ;;  %s5320_s14 = sshll.u32 %s12069_s21, 3  ;;  %s13112_s21 = sld [smem:[#allocation5 + $0x3a]] }
 0x5f4   :  { %v6723_v50 = vpack.c.bf16 %v3816_v37, %v3808_v44  ;;  %380 = vst [vmem:[#allocation2 + $0x180] ss:$8 sm:$0xf] %v378_v10  ;;  %381 = vst [vmem:[#allocation2 + $0x180] ss:$8 sm:$0xf0] %v378_v10  ;;  %s419_s9 = scalar_lea.vmem %s13622_s1, %s5320_s14 }
 0x5f5   :  { %v413_v44 = vld [vmem:[%s412_s29] sm:$0xff]  ;;  %s13137_s29 = sld [smem:[#allocation5 + $0x3f]] }
 0x5f6   :  { %6706 = vmatpush1.bf16.msra.mxu0 %v6705_v32  ;;  %6770 = vmatpush1.bf16.msra.mxu1 %v6769_v57  ;;  %v6785_v32 = vpack.c.bf16 %v3801_v43, %v3793_v36  ;;  %v3818_v57 = vld [vmem:[%s13623_s2 + $0x758] sm:$0xff]  ;;  %v399_v36 = vld [vmem:[%s398_s28] sm:$0xff]  ;;  %415 = vst [vmem:[#allocation2 + $0x185] ss:$8 sm:$0xf] %v413_v44  ;;  %s13124_s28 = sld [smem:[#allocation5 + $0x3d]] }
 0x5f7   :  { %6708 = vmatprep.subr.bf16.mxu0 %v6707_v3  ;;  %6772 = vmatprep.subr.bf16.mxu1 %v6771_v9  ;;  %v6787_v61 = vpack.c.bf16 %v3818_v57, %v3810_v39  ;;  %v3815_v3 = vld [vmem:[%s13623_s2 + $0x740] sm:$0xff]  ;;  %v3824_v9 = vld [vmem:[%s13623_s2 + $0x788] sm:$0xff]  ;;  %401 = vst [vmem:[#allocation2 + $0x183] ss:$8 sm:$0xf] %v399_v36 }
 0x5f8   :  { %v6725_v63 = vpack.c.bf16 %v3815_v3, %v3807_v62  ;;  %402 = vst [vmem:[#allocation2 + $0x183] ss:$8 sm:$0xf0] %v399_v36  ;;  %v406_v43 = vld [vmem:[%s405_s26] sm:$0xff]  ;;  %v3614_v36 = vld [vmem:[%s13623_s2 + $0xf8] sm:$0xff] }
 0x5f9   :  { %408 = vst [vmem:[#allocation2 + $0x184] ss:$8 sm:$0xf] %v406_v43  ;;  %409 = vst [vmem:[#allocation2 + $0x184] ss:$8 sm:$0xf0] %v406_v43 }
 0x5fa   :  { %6710 = vmatpush1.bf16.msra.mxu0 %v6709_v12  ;;  %6774 = vmatpush1.bf16.msra.mxu1 %v6773_v16  ;;  %v3832_v12 = vld [vmem:[%s13623_s2 + $0x7c8] sm:$0xff]  ;;  %v3826_v16 = vld [vmem:[%s13623_s2 + $0x798] sm:$0xff]  ;;  %416 = vst [vmem:[#allocation2 + $0x185] ss:$8 sm:$0xf0] %v413_v44  ;;  %v427_v37 = vld [vmem:[%s426_s19] sm:$0xff] }
 0x5fb   :  { %6712 = vmatprep.subr.bf16.mxu0 %v6711_v31  ;;  %6776 = vmatprep.subr.bf16.mxu1 %v6775_v2  ;;  %v6727_v14 = vpack.c.bf16 %v3832_v12, %v3824_v9  ;;  %v6791_v30 = vpack.c.bf16 %v3834_v21, %v3826_v16  ;;  %v3831_v31 = vld [vmem:[%s13623_s2 + $0x7c0] sm:$0xff]  ;;  %v6793_v2 = vpack.c.bf16 %v3833_v58, %v3825_v22  ;;  %v2975_v9 = vld [vmem:[#allocation2 + $0x170] sm:$0xff]  ;;  %v2974_v12 = vld [vmem:[#allocation2 + $0x168] sm:$0xff]  ;;  %s5338_s20 = sshll.u32 %s13137_s29, 3 }
 0x5fc   :  { %v6729_v1 = vpack.c.bf16 %v3831_v31, %v3823_v23  ;;  %429 = vst [vmem:[#allocation2 + $0x187] ss:$8 sm:$0xf] %v427_v37  ;;  %430 = vst [vmem:[#allocation2 + $0x187] ss:$8 sm:$0xf0] %v427_v37  ;;  %s482_s15 = scalar_lea.vmem %s13622_s1, %s5338_s20 }
 0x5fd   :  { %v3603_v37 = vld [vmem:[%s13623_s2 + $0xa0] sm:$0xff] }
 0x5fe   :  { %6714 = vmatpush1.bf16.msra.mxu0 %v6713_v7  ;;  %6778 = vmatpush1.bf16.msra.mxu1 %v6777_v17  ;;  %v3588_v7 = vld [vmem:[%s13623_s2 + $0x28] sm:$0xff] }
 0x5ff   :  { %6716 = vmatprep.subr.bf16.mxu0 %v6715_v34  ;;  %6780 = vmatprep.subr.bf16.mxu1 %v6779_v47  ;;  %v6795_v17 = vpack.c.bf16 %v3596_v8, %v3588_v7  ;;  %v2971_v47 = vld [vmem:[#allocation2 + $0x150] sm:$0xff] }
 0x602   :  { %6718 = vmatpush1.bf16.msra.mxu0 %v6717_v49  ;;  %6782 = vmatpush1.bf16.msra.mxu1 %v6781_v56  ;;  %v2970_v49 = vld [vmem:[#allocation2 + $0x148] sm:$0xff] }
 0x603   :  { %6720 = vmatprep.subr.bf16.mxu0 %v6719_v0  ;;  %6784 = vmatprep.subr.bf16.mxu1 %v6783_v27 }
 0x606   :  { %6722 = vmatpush1.bf16.msra.mxu0 %v6721_v33  ;;  %6786 = vmatpush1.bf16.msra.mxu1 %v6785_v32  ;;  %v392_v33 = vld [vmem:[%s391_s8] sm:$0xff]  ;;  %s5328_s8 = sshll.u32 %s13112_s21, 3 }
 0x607   :  { %6724 = vmatprep.subr.bf16.mxu0 %v6723_v50  ;;  %6788 = vmatprep.subr.bf16.mxu1 %v6787_v61  ;;  %394 = vst [vmem:[#allocation2 + $0x182] ss:$8 sm:$0xf] %v392_v33  ;;  %395 = vst [vmem:[#allocation2 + $0x182] ss:$8 sm:$0xf0] %v392_v33  ;;  %s447_s14 = scalar_lea.vmem %s13622_s1, %s5328_s8 }
 0x608   :  { %v420_v32 = vld [vmem:[%s419_s9] sm:$0xff]  ;;  %v3606_v33 = vld [vmem:[%s13623_s2 + $0xb8] sm:$0xff] }
 0x609   :  { %422 = vst [vmem:[#allocation2 + $0x186] ss:$8 sm:$0xf] %v420_v32  ;;  %423 = vst [vmem:[#allocation2 + $0x186] ss:$8 sm:$0xf0] %v420_v32 }
 0x60a   :  { %6726 = vmatpush1.bf16.msra.mxu0 %v6725_v63  ;;  %6790 = vmatpush1.bf16.msra.mxu1 %v6789_v13  ;;  %v2976_v13 = vld [vmem:[#allocation2 + $0x178] sm:$0xff] }
 0x60b   :  { %6728 = vmatprep.subr.bf16.mxu0 %v6727_v14  ;;  %6792 = vmatprep.subr.bf16.mxu1 %v6791_v30 }
 0x60e   :  { %6730 = vmatpush1.bf16.msra.mxu0 %v6729_v1  ;;  %6794 = vmatpush1.bf16.msra.mxu1 %v6793_v2 }
 0x60f   :  { %6796 = vmatprep.subr.bf16.mxu0 %v6795_v17  ;;  %6860 = vmatprep.subr.bf16.mxu1 %v6859_v28 }
 0x664   :  { %v3299_v5 = vpop.f32.mrb[14].mxu0  ;;  %v3370_v34 = vpop.f32.mrb[18].mxu1 }
 0x665   :  { %v3301_v35 = vpop.f32.mrb[15].mxu0  ;;  %v3372_v40 = vpop.f32.mrb[19].mxu1  ;;  %v3517_v55 = vadd.f32 %v3299_v5, %v2969_v41  ;;  %v3519_v56 = vadd.f32 %v3370_v34, %v2971_v47 }
 0x666   :  { %v3518_v11 = vadd.f32 %v3301_v35, %v2970_v49  ;;  %v3520_v18 = vadd.f32 %v3372_v40, %v2972_v6 }
 0x667   :  { %v5369_v19 = vmul.f32 -1.442695, %v3517_v55  ;;  %v5371_v0 = vmul.f32 -1.442695, %v3519_v56 }
 0x668   :  { %v5370_v25 = vmul.f32 -1.442695, %v3518_v11  ;;  %v5372_v27 = vmul.f32 -1.442695, %v3520_v18  ;;  %v3595_v18 = vld [vmem:[%s13623_s2 + $0x60] sm:$0xff] }
 0x669   :  { %7404 = vpow2.f32 %v5369_v19  ;;  %v3589_v19 = vld [vmem:[%s13623_s2 + $0x30] sm:$0xff] }
 0x66a   :  { %7406 = vpow2.f32 %v5371_v0  ;;  %v3597_v0 = vld [vmem:[%s13623_s2 + $0x70] sm:$0xff] }
 0x66b   :  { %7408 = vpow2.f32 %v5370_v25  ;;  %v6861_v32 = vpack.c.bf16 %v3597_v0, %v3589_v19  ;;  %v3653_v19 = vld [vmem:[%s13623_s2 + $0x230] sm:$0xff] }
 0x66c   :  { %7410 = vpow2.f32 %v5372_v27  ;;  %v3612_v27 = vld [vmem:[%s13623_s2 + $0xe8] sm:$0xff]  ;;  %v3661_v0 = vld [vmem:[%s13623_s2 + $0x270] sm:$0xff] }
 0x673   :  { %v7405_v39 = vpop.eup %7404 }
 0x674   :  { %v7407_v57 = vpop.eup %7406  ;;  %v3531_v62 = vadd.f32 1.0, %v7405_v39  ;;  %v3611_v39 = vld [vmem:[%s13623_s2 + $0xe0] sm:$0xff] }
 0x675   :  { %v7409_v50 = vpop.eup %7408  ;;  %v3543_v3 = vadd.f32 1.0, %v7407_v57 }
 0x676   :  { %v7411_v61 = vpop.eup %7410  ;;  %v3532_v45 = vadd.f32 1.0, %v7409_v50  ;;  %7412 = vrcp.f32 %v3531_v62  ;;  %v3605_v50 = vld [vmem:[%s13623_s2 + $0xb0] sm:$0xff]  ;;  %v3620_v62 = vld [vmem:[%s13623_s2 + $0x128] sm:$0xff] }
 0x677   :  { %v3544_v63 = vadd.f32 1.0, %v7411_v61  ;;  %7414 = vrcp.f32 %v3543_v3  ;;  %v3613_v61 = vld [vmem:[%s13623_s2 + $0xf0] sm:$0xff]  ;;  %v6799_v3 = vpack.c.bf16 %v3612_v27, %v3604_v48  ;;  %v3676_v48 = vld [vmem:[%s13623_s2 + $0x2e8] sm:$0xff]  ;;  %v3678_v27 = vld [vmem:[%s13623_s2 + $0x2f8] sm:$0xff] }
 0x678   :  { %7416 = vrcp.f32 %v3532_v45  ;;  %v6863_v45 = vpack.c.bf16 %v3614_v36, %v3606_v33  ;;  %v6877_v36 = vpack.c.bf16 %v3661_v0, %v3653_v19  ;;  %v3732_v19 = vld [vmem:[%s13623_s2 + $0x4a8] sm:$0xff] }
 0x679   :  { %7418 = vrcp.f32 %v3544_v63  ;;  %v3628_v63 = vld [vmem:[%s13623_s2 + $0x168] sm:$0xff] }
 0x67a   :  { %v3740_v0 = vld [vmem:[%s13623_s2 + $0x4e8] sm:$0xff] }
 0x680   :  { %v7413_v7 = vpop.eup %7412 }
 0x681   :  { %v7415_v8 = vpop.eup %7414 }
 0x682   :  { %v7417_v15 = vpop.eup %7416  ;;  %v3563_v5 = vmul.f32 %v7415_v8, %v11279_v42  ;;  %v3587_v42 = vld [vmem:[%s13623_s2 + $0x20] sm:$0xff] }
 0x683   :  { %v7419_v17 = vpop.eup %7418  ;;  %v6797_v44 = vpack.c.bf16 %v3595_v18, %v3587_v42  ;;  %v3659_v42 = vld [vmem:[%s13623_s2 + $0x260] sm:$0xff] }
 0x684   :  { %v3564_v40 = vmul.f32 %v7419_v17, %v11281_v52  ;;  %v3643_v17 = vld [vmem:[%s13623_s2 + $0x1e0] sm:$0xff] }
 0x6a4   :  { %v3441_v14 = vpop.f32.mrb[16].mxu0  ;;  %v3512_v16 = vpop.f32.mrb[20].mxu1 }
 0x6a5   :  { %v3521_v21 = vadd.f32 %v3441_v14, %v2973_v4  ;;  %v3523_v23 = vadd.f32 %v3512_v16, %v2975_v9  ;;  %v3443_v30 = vpop.f32.mrb[17].mxu0  ;;  %v3514_v31 = vpop.f32.mrb[21].mxu1  ;;  %v3622_v4 = vld [vmem:[%s13623_s2 + $0x138] sm:$0xff]  ;;  %v3619_v14 = vld [vmem:[%s13623_s2 + $0x120] sm:$0xff] }
 0x6a6   :  { %v3522_v22 = vadd.f32 %v3443_v30, %v2974_v12  ;;  %v3524_v58 = vadd.f32 %v3514_v31, %v2976_v13  ;;  %v3630_v9 = vld [vmem:[%s13623_s2 + $0x178] sm:$0xff]  ;;  %v6801_v12 = vpack.c.bf16 %v3611_v39, %v3603_v37  ;;  %v6865_v13 = vpack.c.bf16 %v3613_v61, %v3605_v50  ;;  %v3627_v16 = vld [vmem:[%s13623_s2 + $0x160] sm:$0xff]  ;;  %v3621_v30 = vld [vmem:[%s13623_s2 + $0x130] sm:$0xff] }
 0x6a7   :  { %7420 = vtanh.f32 %v3521_v21  ;;  %v5373_v1 = vmul.f32 -1.442695, %v3523_v23  ;;  %v6803_v21 = vpack.c.bf16 %v3628_v63, %v3620_v62  ;;  %v6867_v23 = vpack.c.bf16 %v3630_v9, %v3622_v4  ;;  %v3629_v31 = vld [vmem:[%s13623_s2 + $0x170] sm:$0xff]  ;;  %v3684_v62 = vld [vmem:[%s13623_s2 + $0x328] sm:$0xff]  ;;  %v3694_v63 = vld [vmem:[%s13623_s2 + $0x378] sm:$0xff] }
 0x6a8   :  { %7422 = vtanh.f32 %v3522_v22  ;;  %v5374_v2 = vmul.f32 -1.442695, %v3524_v58  ;;  %v3636_v22 = vld [vmem:[%s13623_s2 + $0x1a8] sm:$0xff]  ;;  %v6869_v8 = vpack.c.bf16 %v3629_v31, %v3621_v30  ;;  %v3669_v50 = vld [vmem:[%s13623_s2 + $0x2b0] sm:$0xff] }
 0x6a9   :  { %7424 = vpow2.f32 %v5373_v1  ;;  %v3644_v58 = vld [vmem:[%s13623_s2 + $0x1e8] sm:$0xff]  ;;  %v3638_v1 = vld [vmem:[%s13623_s2 + $0x1b8] sm:$0xff]  ;;  %v3677_v61 = vld [vmem:[%s13623_s2 + $0x2f0] sm:$0xff] }
 0x6aa   :  { %7426 = vpow2.f32 %v5374_v2  ;;  %v3646_v2 = vld [vmem:[%s13623_s2 + $0x1f8] sm:$0xff]  ;;  %v6881_v9 = vpack.c.bf16 %v3677_v61, %v3669_v50  ;;  %v3700_v30 = vld [vmem:[%s13623_s2 + $0x3a8] sm:$0xff] }
 0x6ab   :  { %v3708_v31 = vld [vmem:[%s13623_s2 + $0x3e8] sm:$0xff] }
 0x6ac   :  { %v3748_v50 = vld [vmem:[%s13623_s2 + $0x528] sm:$0xff] }
 0x6ad   :  { %v3756_v61 = vld [vmem:[%s13623_s2 + $0x568] sm:$0xff] }
 0x6b1   :  { %v7421_v26 = vpop.eup %7420 }
 0x6b2   :  { %v7423_v28 = vpop.eup %7422  ;;  %v3565_v34 = vmul.f32 %v7421_v26, %v7413_v7  ;;  %v6805_v7 = vpack.c.bf16 %v3627_v16, %v3619_v14  ;;  %v6807_v26 = vpack.c.bf16 %v3644_v58, %v3636_v22  ;;  %v3702_v22 = vld [vmem:[%s13623_s2 + $0x3b8] sm:$0xff] }
 0x6b3   :  { %v7425_v35 = vpop.eup %7424  ;;  %v3566_v41 = vmul.f32 %v7423_v28, %v7417_v15  ;;  %v3635_v15 = vld [vmem:[%s13623_s2 + $0x1a0] sm:$0xff]  ;;  %v6871_v28 = vpack.c.bf16 %v3646_v2, %v3638_v1  ;;  %v3710_v58 = vld [vmem:[%s13623_s2 + $0x3f8] sm:$0xff] }
 0x6b4   :  { %v7427_v47 = vpop.eup %7426  ;;  %v12103_v49 = vadd.f32 %v3565_v34, %v3563_v5  ;;  %v3557_v55 = vadd.f32 1.0, %v7425_v35  ;;  %v3637_v5 = vld [vmem:[%s13623_s2 + $0x1b0] sm:$0xff]  ;;  %v3652_v35 = vld [vmem:[%s13623_s2 + $0x228] sm:$0xff] }
 0x6b5   :  { %v12105_v6 = vadd.f32 %v3566_v41, %v3564_v40  ;;  %v3558_v56 = vadd.f32 1.0, %v7427_v47  ;;  %v3645_v34 = vld [vmem:[%s13623_s2 + $0x1f0] sm:$0xff]  ;;  %v3660_v40 = vld [vmem:[%s13623_s2 + $0x268] sm:$0xff]  ;;  %v3654_v41 = vld [vmem:[%s13623_s2 + $0x238] sm:$0xff] }
 0x6b6   :  { %7428 = vtanh.f32 %v12103_v49  ;;  %v3662_v47 = vld [vmem:[%s13623_s2 + $0x278] sm:$0xff] }
 0x6b7   :  { %7430 = vrcp.f32 %v3557_v55  ;;  %v6809_v55 = vpack.c.bf16 %v3643_v17, %v3635_v15  ;;  %v6875_v18 = vpack.c.bf16 %v3662_v47, %v3654_v41  ;;  %v6823_v15 = vpack.c.bf16 %v3708_v31, %v3700_v30  ;;  %v3766_v30 = vld [vmem:[%s13623_s2 + $0x5b8] sm:$0xff] }
 0x6b8   :  { %7432 = vtanh.f32 %v12105_v6  ;;  %v6887_v17 = vpack.c.bf16 %v3710_v58, %v3702_v22  ;;  %v3774_v31 = vld [vmem:[%s13623_s2 + $0x5f8] sm:$0xff] }
 0x6b9   :  { %7434 = vrcp.f32 %v3558_v56  ;;  %v6873_v56 = vpack.c.bf16 %v3645_v34, %v3637_v5  ;;  %v3716_v5 = vld [vmem:[%s13623_s2 + $0x428] sm:$0xff] }
 0x6ba   :  { %v3724_v34 = vld [vmem:[%s13623_s2 + $0x468] sm:$0xff] }
 0x6c0   :  { %v7429_v11 = vpop.eup %7428 }
 0x6c1   :  { %v7431_v52 = vpop.eup %7430 }
 0x6c2   :  { %v7433_v10 = vpop.eup %7432  ;;  %v12141_v57 = vmul.f32 %v7431_v52, %v7429_v11  ;;  %v3651_v11 = vld [vmem:[%s13623_s2 + $0x220] sm:$0xff]  ;;  %v6811_v52 = vpack.c.bf16 %v3660_v40, %v3652_v35  ;;  %v3718_v35 = vld [vmem:[%s13623_s2 + $0x438] sm:$0xff] }
 0x6c3   :  { %v7435_v25 = vpop.eup %7434  ;;  %v6813_v33 = vpack.c.bf16 %v3659_v42, %v3651_v11  ;;  %v3726_v40 = vld [vmem:[%s13623_s2 + $0x478] sm:$0xff]  ;;  %v6827_v11 = vpack.c.bf16 %v3724_v34, %v3716_v5 }
 0x6c4   :  { %v12133_v43 = vmul.f32 %v7435_v25, %v7433_v10  ;;  %v3668_v10 = vld [vmem:[%s13623_s2 + $0x2a8] sm:$0xff]  ;;  %v3670_v25 = vld [vmem:[%s13623_s2 + $0x2b8] sm:$0xff]  ;;  %v6891_v42 = vpack.c.bf16 %v3726_v40, %v3718_v35 }
 0x6c5   :  { %v6815_v37 = vpack.c.bf16 %v3676_v48, %v3668_v10  ;;  %v6879_v39 = vpack.c.bf16 %v3678_v27, %v3670_v25  ;;  %v3734_v10 = vld [vmem:[%s13623_s2 + $0x4b8] sm:$0xff] }
 0x6c6   :  { %3903 = vmatprep.mubr.f32.mxu0 %v12133_v43  ;;  %3974 = vmatprep.mubr.f32.mxu1 %v12133_v43  ;;  %v3742_v48 = vld [vmem:[%s13623_s2 + $0x4f8] sm:$0xff] }
 0x6c7   :  { %3904 = vmatmul.mubr.f32.vlgmr.msra.gmra.mrb[18].mxu0 %v12141_v57  ;;  %3975 = vmatmul.mubr.f32.vlgmr.msra.gmra.mrb[22].mxu1 %v12141_v57  ;;  %v3782_v5 = vld [vmem:[%s13623_s2 + $0x638] sm:$0xff] }
 0x6c8   :  { %6798 = vmatpush1.bf16.msra.mxu0 %v6797_v44  ;;  %6862 = vmatpush1.bf16.msra.mxu1 %v6861_v32  ;;  %v3667_v44 = vld [vmem:[%s13623_s2 + $0x2a0] sm:$0xff]  ;;  %v3790_v34 = vld [vmem:[%s13623_s2 + $0x678] sm:$0xff] }
 0x6c9   :  { %4045 = vmatprep.mubr.f32.mxu0 %v12133_v43  ;;  %4116 = vmatprep.mubr.f32.mxu1 %v12133_v43  ;;  %v3675_v32 = vld [vmem:[%s13623_s2 + $0x2e0] sm:$0xff] }
 0x6ca   :  { %6800 = vmatprep.subr.bf16.mxu0 %v6799_v3  ;;  %6864 = vmatprep.subr.bf16.mxu1 %v6863_v45  ;;  %v3692_v3 = vld [vmem:[%s13623_s2 + $0x368] sm:$0xff]  ;;  %v3686_v45 = vld [vmem:[%s13623_s2 + $0x338] sm:$0xff]  ;;  %v6817_v4 = vpack.c.bf16 %v3675_v32, %v3667_v44  ;;  %v6831_v44 = vpack.c.bf16 %v3740_v0, %v3732_v19  ;;  %v6895_v32 = vpack.c.bf16 %v3742_v48, %v3734_v10 }
 0x6cb   :  { %v6819_v14 = vpack.c.bf16 %v3692_v3, %v3684_v62  ;;  %v6883_v16 = vpack.c.bf16 %v3694_v63, %v3686_v45  ;;  %v3750_v62 = vld [vmem:[%s13623_s2 + $0x538] sm:$0xff] }
 0x6cc   :  { %6802 = vmatpush1.bf16.msra.mxu0 %v6801_v12  ;;  %6866 = vmatpush1.bf16.msra.mxu1 %v6865_v13  ;;  %v3683_v12 = vld [vmem:[%s13623_s2 + $0x320] sm:$0xff]  ;;  %v3758_v3 = vld [vmem:[%s13623_s2 + $0x578] sm:$0xff] }
 0x6cd   :  { %6804 = vmatprep.subr.bf16.mxu0 %v6803_v21  ;;  %6868 = vmatprep.subr.bf16.mxu1 %v6867_v23  ;;  %v3691_v13 = vld [vmem:[%s13623_s2 + $0x360] sm:$0xff]  ;;  %v3685_v21 = vld [vmem:[%s13623_s2 + $0x330] sm:$0xff]  ;;  %v3798_v19 = vld [vmem:[%s13623_s2 + $0x6b8] sm:$0xff] }
 0x6ce   :  { %v3693_v23 = vld [vmem:[%s13623_s2 + $0x370] sm:$0xff]  ;;  %v6821_v1 = vpack.c.bf16 %v3691_v13, %v3683_v12  ;;  %v6835_v12 = vpack.c.bf16 %v3756_v61, %v3748_v50  ;;  %v6899_v13 = vpack.c.bf16 %v3758_v3, %v3750_v62  ;;  %v3806_v0 = vld [vmem:[%s13623_s2 + $0x6f8] sm:$0xff] }
 0x6cf   :  { %v6885_v2 = vpack.c.bf16 %v3693_v23, %v3685_v21  ;;  %v3764_v21 = vld [vmem:[%s13623_s2 + $0x5a8] sm:$0xff]  ;;  %v3814_v50 = vld [vmem:[%s13623_s2 + $0x738] sm:$0xff] }
 0x6d0   :  { %6806 = vmatpush1.bf16.msra.mxu0 %v6805_v7  ;;  %6870 = vmatpush1.bf16.msra.mxu1 %v6869_v8  ;;  %v3699_v7 = vld [vmem:[%s13623_s2 + $0x3a0] sm:$0xff]  ;;  %v3772_v23 = vld [vmem:[%s13623_s2 + $0x5e8] sm:$0xff]  ;;  %v3822_v61 = vld [vmem:[%s13623_s2 + $0x778] sm:$0xff] }
 0x6d1   :  { %6808 = vmatprep.subr.bf16.mxu0 %v6807_v26  ;;  %6872 = vmatprep.subr.bf16.mxu1 %v6871_v28  ;;  %v3707_v8 = vld [vmem:[%s13623_s2 + $0x3e0] sm:$0xff]  ;;  %v3701_v26 = vld [vmem:[%s13623_s2 + $0x3b0] sm:$0xff] }
 0x6d2   :  { %v3709_v28 = vld [vmem:[%s13623_s2 + $0x3f0] sm:$0xff]  ;;  %v6825_v41 = vpack.c.bf16 %v3707_v8, %v3699_v7  ;;  %v6839_v7 = vpack.c.bf16 %v3772_v23, %v3764_v21  ;;  %v6903_v8 = vpack.c.bf16 %v3774_v31, %v3766_v30  ;;  %v3830_v21 = vld [vmem:[%s13623_s2 + $0x7b8] sm:$0xff] }
 0x6d3   :  { %v6889_v47 = vpack.c.bf16 %v3709_v28, %v3701_v26  ;;  %v3780_v26 = vld [vmem:[%s13623_s2 + $0x628] sm:$0xff]  ;;  %v3838_v23 = vld [vmem:[%s13623_s2 + $0x7f8] sm:$0xff] }
 0x6d4   :  { %6810 = vmatpush1.bf16.msra.mxu0 %v6809_v55  ;;  %6874 = vmatpush1.bf16.msra.mxu1 %v6873_v56  ;;  %v3715_v55 = vld [vmem:[%s13623_s2 + $0x420] sm:$0xff]  ;;  %v3788_v28 = vld [vmem:[%s13623_s2 + $0x668] sm:$0xff] }
 0x6d5   :  { %6812 = vmatprep.subr.bf16.mxu0 %v6811_v52  ;;  %6876 = vmatprep.subr.bf16.mxu1 %v6875_v18  ;;  %v3723_v56 = vld [vmem:[%s13623_s2 + $0x460] sm:$0xff]  ;;  %v3717_v52 = vld [vmem:[%s13623_s2 + $0x430] sm:$0xff] }
 0x6d6   :  { %v3725_v18 = vld [vmem:[%s13623_s2 + $0x470] sm:$0xff]  ;;  %v6829_v25 = vpack.c.bf16 %v3723_v56, %v3715_v55  ;;  %v6843_v55 = vpack.c.bf16 %v3788_v28, %v3780_v26  ;;  %v6907_v56 = vpack.c.bf16 %v3790_v34, %v3782_v5  ;;  %v4190_v26 = vld [vmem:[%s13623_s2 + $0x8] sm:$0xff]  ;;  %v4192_v5 = vld [vmem:[%s13623_s2 + $0x18] sm:$0xff] }
 0x6d7   :  { %v6893_v27 = vpack.c.bf16 %v3725_v18, %v3717_v52  ;;  %v3796_v52 = vld [vmem:[%s13623_s2 + $0x6a8] sm:$0xff] }
 0x6d8   :  { %6814 = vmatpush1.bf16.msra.mxu0 %v6813_v33  ;;  %6878 = vmatpush1.bf16.msra.mxu1 %v6877_v36  ;;  %v3731_v33 = vld [vmem:[%s13623_s2 + $0x4a0] sm:$0xff]  ;;  %v3804_v18 = vld [vmem:[%s13623_s2 + $0x6e8] sm:$0xff] }
 0x6d9   :  { %6816 = vmatprep.subr.bf16.mxu0 %v6815_v37  ;;  %6880 = vmatprep.subr.bf16.mxu1 %v6879_v39  ;;  %v3739_v36 = vld [vmem:[%s13623_s2 + $0x4e0] sm:$0xff]  ;;  %v3733_v37 = vld [vmem:[%s13623_s2 + $0x4b0] sm:$0xff]  ;;  %v4198_v28 = vld [vmem:[%s13623_s2 + $0x48] sm:$0xff] }
 0x6da   :  { %v3741_v39 = vld [vmem:[%s13623_s2 + $0x4f0] sm:$0xff]  ;;  %v6833_v45 = vpack.c.bf16 %v3739_v36, %v3731_v33  ;;  %v6847_v33 = vpack.c.bf16 %v3804_v18, %v3796_v52  ;;  %v6911_v36 = vpack.c.bf16 %v3806_v0, %v3798_v19  ;;  %v6923_v34 = vpack.c.bf16 %v4198_v28, %v4190_v26  ;;  %v4214_v18 = vld [vmem:[%s13623_s2 + $0xc8] sm:$0xff]  ;;  %v4208_v19 = vld [vmem:[%s13623_s2 + $0x98] sm:$0xff] }
 0x6db   :  { %v6897_v63 = vpack.c.bf16 %v3741_v39, %v3733_v37  ;;  %v3812_v37 = vld [vmem:[%s13623_s2 + $0x728] sm:$0xff]  ;;  %v4216_v0 = vld [vmem:[%s13623_s2 + $0xd8] sm:$0xff] }
 0x6dc   :  { %6818 = vmatpush1.bf16.msra.mxu0 %v6817_v4  ;;  %6882 = vmatpush1.bf16.msra.mxu1 %v6881_v9  ;;  %v3747_v4 = vld [vmem:[%s13623_s2 + $0x520] sm:$0xff]  ;;  %v3820_v39 = vld [vmem:[%s13623_s2 + $0x768] sm:$0xff] }
 0x6dd   :  { %6820 = vmatprep.subr.bf16.mxu0 %v6819_v14  ;;  %6884 = vmatprep.subr.bf16.mxu1 %v6883_v16  ;;  %v3755_v9 = vld [vmem:[%s13623_s2 + $0x560] sm:$0xff]  ;;  %v3749_v14 = vld [vmem:[%s13623_s2 + $0x530] sm:$0xff] }
 0x6de   :  { %v3757_v16 = vld [vmem:[%s13623_s2 + $0x570] sm:$0xff]  ;;  %v6837_v22 = vpack.c.bf16 %v3755_v9, %v3747_v4  ;;  %v6851_v4 = vpack.c.bf16 %v3820_v39, %v3812_v37  ;;  %v6915_v9 = vpack.c.bf16 %v3822_v61, %v3814_v50  ;;  %v4230_v37 = vld [vmem:[%s13623_s2 + $0x148] sm:$0xff]  ;;  %v4224_v61 = vld [vmem:[%s13623_s2 + $0x118] sm:$0xff] }
 0x6df   :  { %v6901_v58 = vpack.c.bf16 %v3757_v16, %v3749_v14  ;;  %v3828_v14 = vld [vmem:[%s13623_s2 + $0x7a8] sm:$0xff] }
 0x6e0   :  { %6822 = vmatpush1.bf16.msra.mxu0 %v6821_v1  ;;  %6886 = vmatpush1.bf16.msra.mxu1 %v6885_v2  ;;  %v3763_v1 = vld [vmem:[%s13623_s2 + $0x5a0] sm:$0xff]  ;;  %v3836_v16 = vld [vmem:[%s13623_s2 + $0x7e8] sm:$0xff] }
 0x6e1   :  { %6824 = vmatprep.subr.bf16.mxu0 %v6823_v15  ;;  %6888 = vmatprep.subr.bf16.mxu1 %v6887_v17  ;;  %v3771_v2 = vld [vmem:[%s13623_s2 + $0x5e0] sm:$0xff]  ;;  %v3765_v15 = vld [vmem:[%s13623_s2 + $0x5b0] sm:$0xff] }
 0x6e2   :  { %v3773_v17 = vld [vmem:[%s13623_s2 + $0x5f0] sm:$0xff]  ;;  %v6841_v35 = vpack.c.bf16 %v3771_v2, %v3763_v1  ;;  %v6919_v1 = vpack.c.bf16 %v3838_v23, %v3830_v21  ;;  %v3835_v2 = vld [vmem:[%s13623_s2 + $0x7e0] sm:$0xff] }
 0x6e3   :  { %v6905_v40 = vpack.c.bf16 %v3773_v17, %v3765_v15 }
 0x6e4   :  { %6826 = vmatpush1.bf16.msra.mxu0 %v6825_v41  ;;  %6890 = vmatpush1.bf16.msra.mxu1 %v6889_v47  ;;  %v3779_v41 = vld [vmem:[%s13623_s2 + $0x620] sm:$0xff] }
 0x6e5   :  { %6828 = vmatprep.subr.bf16.mxu0 %v6827_v11  ;;  %6892 = vmatprep.subr.bf16.mxu1 %v6891_v42  ;;  %v3787_v47 = vld [vmem:[%s13623_s2 + $0x660] sm:$0xff]  ;;  %v3781_v11 = vld [vmem:[%s13623_s2 + $0x630] sm:$0xff] }
 0x6e6   :  { %v3789_v42 = vld [vmem:[%s13623_s2 + $0x670] sm:$0xff]  ;;  %v6845_v10 = vpack.c.bf16 %v3787_v47, %v3779_v41  ;;  %v4197_v41 = vld [vmem:[%s13623_s2 + $0x40] sm:$0xff] }
 0x6e7   :  { %v6909_v48 = vpack.c.bf16 %v3789_v42, %v3781_v11  ;;  %v4199_v11 = vld [vmem:[%s13623_s2 + $0x50] sm:$0xff]  ;;  %v4206_v42 = vld [vmem:[%s13623_s2 + $0x88] sm:$0xff] }
 0x6e8   :  { %6830 = vmatpush1.bf16.msra.mxu0 %v6829_v25  ;;  %6894 = vmatpush1.bf16.msra.mxu1 %v6893_v27  ;;  %v3795_v25 = vld [vmem:[%s13623_s2 + $0x6a0] sm:$0xff] }
 0x6e9   :  { %6832 = vmatprep.subr.bf16.mxu0 %v6831_v44  ;;  %6896 = vmatprep.subr.bf16.mxu1 %v6895_v32  ;;  %v3803_v27 = vld [vmem:[%s13623_s2 + $0x6e0] sm:$0xff]  ;;  %v3797_v44 = vld [vmem:[%s13623_s2 + $0x6b0] sm:$0xff] }
 0x6ea   :  { %v3805_v32 = vld [vmem:[%s13623_s2 + $0x6f0] sm:$0xff]  ;;  %v6849_v62 = vpack.c.bf16 %v3803_v27, %v3795_v25  ;;  %v4205_v25 = vld [vmem:[%s13623_s2 + $0x80] sm:$0xff] }
 0x6eb   :  { %v6913_v3 = vpack.c.bf16 %v3805_v32, %v3797_v44  ;;  %v4213_v27 = vld [vmem:[%s13623_s2 + $0xc0] sm:$0xff]  ;;  %v4215_v44 = vld [vmem:[%s13623_s2 + $0xd0] sm:$0xff]  ;;  %v4222_v32 = vld [vmem:[%s13623_s2 + $0x108] sm:$0xff] }
 0x6ec   :  { %6834 = vmatpush1.bf16.msra.mxu0 %v6833_v45  ;;  %6898 = vmatpush1.bf16.msra.mxu1 %v6897_v63  ;;  %v3811_v45 = vld [vmem:[%s13623_s2 + $0x720] sm:$0xff]  ;;  %v6931_v50 = vpack.c.bf16 %v4230_v37, %v4222_v32  ;;  %v4296_v32 = vld [vmem:[%s13623_s2 + $0x358] sm:$0xff] }
 0x6ed   :  { %6836 = vmatprep.subr.bf16.mxu0 %v6835_v12  ;;  %6900 = vmatprep.subr.bf16.mxu1 %v6899_v13  ;;  %v3819_v63 = vld [vmem:[%s13623_s2 + $0x760] sm:$0xff]  ;;  %v3813_v12 = vld [vmem:[%s13623_s2 + $0x730] sm:$0xff] }
 0x6ee   :  { %v3821_v13 = vld [vmem:[%s13623_s2 + $0x770] sm:$0xff]  ;;  %v6853_v30 = vpack.c.bf16 %v3819_v63, %v3811_v45  ;;  %v4229_v63 = vld [vmem:[%s13623_s2 + $0x140] sm:$0xff] }
 0x6ef   :  { %v6917_v31 = vpack.c.bf16 %v3821_v13, %v3813_v12  ;;  %v4238_v13 = vld [vmem:[%s13623_s2 + $0x188] sm:$0xff] }
 0x6f0   :  { %6838 = vmatpush1.bf16.msra.mxu0 %v6837_v22  ;;  %6902 = vmatpush1.bf16.msra.mxu1 %v6901_v58  ;;  %v3827_v22 = vld [vmem:[%s13623_s2 + $0x7a0] sm:$0xff]  ;;  %v6855_v58 = vpack.c.bf16 %v3836_v16, %v3828_v14  ;;  %v4246_v14 = vld [vmem:[%s13623_s2 + $0x1c8] sm:$0xff]  ;;  %v4240_v16 = vld [vmem:[%s13623_s2 + $0x198] sm:$0xff] }
 0x6f1   :  { %6840 = vmatprep.subr.bf16.mxu0 %v6839_v7  ;;  %6904 = vmatprep.subr.bf16.mxu1 %v6903_v8  ;;  %v3829_v7 = vld [vmem:[%s13623_s2 + $0x7b0] sm:$0xff]  ;;  %v6857_v15 = vpack.c.bf16 %v3835_v2, %v3827_v22  ;;  %v6935_v23 = vpack.c.bf16 %v4246_v14, %v4238_v13  ;;  %v4245_v22 = vld [vmem:[%s13623_s2 + $0x1c0] sm:$0xff]  ;;  %v4312_v13 = vld [vmem:[%s13623_s2 + $0x3d8] sm:$0xff] }
 0x6f2   :  { %v3837_v8 = vld [vmem:[%s13623_s2 + $0x7f0] sm:$0xff] }
 0x6f3   :  { %v6921_v17 = vpack.c.bf16 %v3837_v8, %v3829_v7  ;;  %v4247_v2 = vld [vmem:[%s13623_s2 + $0x1d0] sm:$0xff]  ;;  %v4254_v7 = vld [vmem:[%s13623_s2 + $0x208] sm:$0xff] }
 0x6f4   :  { %6842 = vmatpush1.bf16.msra.mxu0 %v6841_v35  ;;  %6906 = vmatpush1.bf16.msra.mxu1 %v6905_v40  ;;  %v4200_v35 = vld [vmem:[%s13623_s2 + $0x58] sm:$0xff]  ;;  %v4189_v40 = vld [vmem:[%s13623_s2] sm:$0xff]  ;;  %v4262_v8 = vld [vmem:[%s13623_s2 + $0x248] sm:$0xff] }
 0x6f5   :  { %6844 = vmatprep.subr.bf16.mxu0 %v6843_v55  ;;  %6908 = vmatprep.subr.bf16.mxu1 %v6907_v56  ;;  %v6987_v47 = vpack.c.bf16 %v4200_v35, %v4192_v5  ;;  %v6925_v55 = vpack.c.bf16 %v4197_v41, %v4189_v40  ;;  %v4191_v56 = vld [vmem:[%s13623_s2 + $0x10] sm:$0xff]  ;;  %v6939_v5 = vpack.c.bf16 %v4262_v8, %v4254_v7  ;;  %v4261_v35 = vld [vmem:[%s13623_s2 + $0x240] sm:$0xff]  ;;  %v4318_v7 = vld [vmem:[%s13623_s2 + $0x408] sm:$0xff] }
 0x6f6   :  { %v6989_v52 = vpack.c.bf16 %v4199_v11, %v4191_v56  ;;  %v4255_v40 = vld [vmem:[%s13623_s2 + $0x210] sm:$0xff]  ;;  %v4278_v56 = vld [vmem:[%s13623_s2 + $0x2c8] sm:$0xff]  ;;  %v4272_v11 = vld [vmem:[%s13623_s2 + $0x298] sm:$0xff] }
 0x6f7   :  { %v4326_v8 = vld [vmem:[%s13623_s2 + $0x448] sm:$0xff] }
 0x6f8   :  { %6846 = vmatpush1.bf16.msra.mxu0 %v6845_v10  ;;  %6910 = vmatpush1.bf16.msra.mxu1 %v6909_v48  ;;  %v6927_v10 = vpack.c.bf16 %v4214_v18, %v4206_v42  ;;  %v6991_v48 = vpack.c.bf16 %v4216_v0, %v4208_v19  ;;  %v4280_v42 = vld [vmem:[%s13623_s2 + $0x2d8] sm:$0xff]  ;;  %v4269_v0 = vld [vmem:[%s13623_s2 + $0x280] sm:$0xff] }
 0x6f9   :  { %6848 = vmatprep.subr.bf16.mxu0 %v6847_v33  ;;  %6912 = vmatprep.subr.bf16.mxu1 %v6911_v36  ;;  %v4207_v33 = vld [vmem:[%s13623_s2 + $0x90] sm:$0xff]  ;;  %v6929_v36 = vpack.c.bf16 %v4213_v27, %v4205_v25  ;;  %v7007_v25 = vpack.c.bf16 %v4280_v42, %v4272_v11  ;;  %v4336_v11 = vld [vmem:[%s13623_s2 + $0x498] sm:$0xff] }
 0x6fa   :  { %v6993_v39 = vpack.c.bf16 %v4215_v44, %v4207_v33  ;;  %v4279_v27 = vld [vmem:[%s13623_s2 + $0x2d0] sm:$0xff]  ;;  %v4286_v33 = vld [vmem:[%s13623_s2 + $0x308] sm:$0xff]  ;;  %v4288_v44 = vld [vmem:[%s13623_s2 + $0x318] sm:$0xff] }
 0x6fc   :  { %6850 = vmatpush1.bf16.msra.mxu0 %v6849_v62  ;;  %6914 = vmatpush1.bf16.msra.mxu1 %v6913_v3  ;;  %v4232_v62 = vld [vmem:[%s13623_s2 + $0x158] sm:$0xff]  ;;  %v4221_v3 = vld [vmem:[%s13623_s2 + $0x100] sm:$0xff] }
 0x6fd   :  { %6852 = vmatprep.subr.bf16.mxu0 %v6851_v4  ;;  %6916 = vmatprep.subr.bf16.mxu1 %v6915_v9  ;;  %v6995_v45 = vpack.c.bf16 %v4232_v62, %v4224_v61  ;;  %v4223_v4 = vld [vmem:[%s13623_s2 + $0x110] sm:$0xff]  ;;  %v6933_v12 = vpack.c.bf16 %v4229_v63, %v4221_v3  ;;  %v4285_v61 = vld [vmem:[%s13623_s2 + $0x300] sm:$0xff] }
 0x6fe   :  { %v4231_v9 = vld [vmem:[%s13623_s2 + $0x150] sm:$0xff]  ;;  %v4293_v62 = vld [vmem:[%s13623_s2 + $0x340] sm:$0xff] }
 0x6ff   :  { %v6997_v21 = vpack.c.bf16 %v4231_v9, %v4223_v4  ;;  %v4287_v3 = vld [vmem:[%s13623_s2 + $0x310] sm:$0xff]  ;;  %v4302_v4 = vld [vmem:[%s13623_s2 + $0x388] sm:$0xff]  ;;  %v6949_v14 = vpack.c.bf16 %v4293_v62, %v4285_v61 }
 0x700   :  { %6854 = vmatpush1.bf16.msra.mxu0 %v6853_v30  ;;  %6918 = vmatpush1.bf16.msra.mxu1 %v6917_v31  ;;  %v4248_v30 = vld [vmem:[%s13623_s2 + $0x1d8] sm:$0xff]  ;;  %v4237_v31 = vld [vmem:[%s13623_s2 + $0x180] sm:$0xff]  ;;  %v4295_v63 = vld [vmem:[%s13623_s2 + $0x350] sm:$0xff] }
 0x701   :  { %6856 = vmatprep.subr.bf16.mxu0 %v6855_v58  ;;  %6920 = vmatprep.subr.bf16.mxu1 %v6919_v1  ;;  %v6999_v58 = vpack.c.bf16 %v4248_v30, %v4240_v16  ;;  %v4239_v1 = vld [vmem:[%s13623_s2 + $0x190] sm:$0xff]  ;;  %v6937_v26 = vpack.c.bf16 %v4245_v22, %v4237_v31  ;;  %v4310_v9 = vld [vmem:[%s13623_s2 + $0x3c8] sm:$0xff]  ;;  %v7013_v16 = vpack.c.bf16 %v4295_v63, %v4287_v3  ;;  %v4309_v30 = vld [vmem:[%s13623_s2 + $0x3c0] sm:$0xff] }
 0x702   :  { %v7001_v28 = vpack.c.bf16 %v4247_v2, %v4239_v1  ;;  %v4303_v22 = vld [vmem:[%s13623_s2 + $0x390] sm:$0xff] }
 0x703   :  { %v4351_v3 = vld [vmem:[%s13623_s2 + $0x510] sm:$0xff] }
 0x704   :  { %6858 = vmatpush1.bf16.msra.mxu0 %v6857_v15  ;;  %6922 = vmatpush1.bf16.msra.mxu1 %v6921_v17  ;;  %v4256_v15 = vld [vmem:[%s13623_s2 + $0x218] sm:$0xff] }
 0x705   :  { %6924 = vmatprep.subr.bf16.mxu0 %v6923_v34  ;;  %6988 = vmatprep.subr.bf16.mxu1 %v6987_v47  ;;  %v4264_v17 = vld [vmem:[%s13623_s2 + $0x258] sm:$0xff]  ;;  %v4253_v34 = vld [vmem:[%s13623_s2 + $0x200] sm:$0xff]  ;;  %v4263_v47 = vld [vmem:[%s13623_s2 + $0x250] sm:$0xff] }
 0x706   :  { %v7003_v41 = vpack.c.bf16 %v4264_v17, %v4256_v15  ;;  %v7005_v18 = vpack.c.bf16 %v4263_v47, %v4255_v40  ;;  %v4320_v15 = vld [vmem:[%s13623_s2 + $0x418] sm:$0xff]  ;;  %v6955_v17 = vpack.c.bf16 %v4326_v8, %v4318_v7 }
 0x707   :  { %4046 = vmatmul.mubr.f32.vlgmr.msra.gmra.mrb[20].mxu0 %v12141_v57  ;;  %4117 = vmatmul.mubr.f32.vlgmr.msra.gmra.mrb[24].mxu1 %v12141_v57  ;;  %v4384_v7 = vld [vmem:[%s13623_s2 + $0x618] sm:$0xff] }
 0x708   :  { %6926 = vmatpush1.bf16.msra.mxu0 %v6925_v55  ;;  %6990 = vmatpush1.bf16.msra.mxu1 %v6989_v52  ;;  %v4270_v55 = vld [vmem:[%s13623_s2 + $0x288] sm:$0xff]  ;;  %v6941_v52 = vpack.c.bf16 %v4261_v35, %v4253_v34  ;;  %v4325_v34 = vld [vmem:[%s13623_s2 + $0x440] sm:$0xff]  ;;  %v4319_v35 = vld [vmem:[%s13623_s2 + $0x410] sm:$0xff] }
 0x709   :  { %6928 = vmatprep.subr.bf16.mxu0 %v6927_v10  ;;  %6992 = vmatprep.subr.bf16.mxu1 %v6991_v48  ;;  %v6943_v19 = vpack.c.bf16 %v4278_v56, %v4270_v55  ;;  %v4277_v10 = vld [vmem:[%s13623_s2 + $0x2c0] sm:$0xff]  ;;  %v4271_v48 = vld [vmem:[%s13623_s2 + $0x290] sm:$0xff]  ;;  %v4334_v55 = vld [vmem:[%s13623_s2 + $0x488] sm:$0xff] }
 0x70a   :  { %v6945_v37 = vpack.c.bf16 %v4277_v10, %v4269_v0  ;;  %v4342_v56 = vld [vmem:[%s13623_s2 + $0x4c8] sm:$0xff] }
 0x70b   :  { %v6959_v42 = vpack.c.bf16 %v4342_v56, %v4334_v55  ;;  %v4400_v55 = vld [vmem:[%s13623_s2 + $0x698] sm:$0xff] }
 0x70c   :  { %6930 = vmatpush1.bf16.msra.mxu0 %v6929_v36  ;;  %6994 = vmatpush1.bf16.msra.mxu1 %v6993_v39  ;;  %v4294_v36 = vld [vmem:[%s13623_s2 + $0x348] sm:$0xff]  ;;  %v7009_v39 = vpack.c.bf16 %v4279_v27, %v4271_v48  ;;  %v4335_v48 = vld [vmem:[%s13623_s2 + $0x490] sm:$0xff] }
 0x70d   :  { %6932 = vmatprep.subr.bf16.mxu0 %v6931_v50  ;;  %6996 = vmatprep.subr.bf16.mxu1 %v6995_v45  ;;  %v6947_v50 = vpack.c.bf16 %v4294_v36, %v4286_v33  ;;  %v7011_v45 = vpack.c.bf16 %v4296_v32, %v4288_v44  ;;  %v4350_v33 = vld [vmem:[%s13623_s2 + $0x508] sm:$0xff]  ;;  %v4352_v44 = vld [vmem:[%s13623_s2 + $0x518] sm:$0xff] }
 0x70e   :  { %v4358_v36 = vld [vmem:[%s13623_s2 + $0x548] sm:$0xff] }
 0x70f   :  { %v6963_v32 = vpack.c.bf16 %v4358_v36, %v4350_v33  ;;  %v4416_v33 = vld [vmem:[%s13623_s2 + $0x718] sm:$0xff] }
 0x710   :  { %6934 = vmatpush1.bf16.msra.mxu0 %v6933_v12  ;;  %6998 = vmatpush1.bf16.msra.mxu1 %v6997_v21  ;;  %v4304_v12 = vld [vmem:[%s13623_s2 + $0x398] sm:$0xff]  ;;  %v6951_v21 = vpack.c.bf16 %v4310_v9, %v4302_v4  ;;  %v4366_v4 = vld [vmem:[%s13623_s2 + $0x588] sm:$0xff] }
 0x711   :  { %6936 = vmatprep.subr.bf16.mxu0 %v6935_v23  ;;  %7000 = vmatprep.subr.bf16.mxu1 %v6999_v58  ;;  %v4301_v23 = vld [vmem:[%s13623_s2 + $0x380] sm:$0xff]  ;;  %v7015_v31 = vpack.c.bf16 %v4312_v13, %v4304_v12  ;;  %v4311_v58 = vld [vmem:[%s13623_s2 + $0x3d0] sm:$0xff]  ;;  %v4374_v9 = vld [vmem:[%s13623_s2 + $0x5c8] sm:$0xff] }
 0x712   :  { %v6953_v1 = vpack.c.bf16 %v4309_v30, %v4301_v23  ;;  %v7017_v2 = vpack.c.bf16 %v4311_v58, %v4303_v22  ;;  %v4368_v12 = vld [vmem:[%s13623_s2 + $0x598] sm:$0xff]  ;;  %v6967_v13 = vpack.c.bf16 %v4374_v9, %v4366_v4  ;;  %v4375_v22 = vld [vmem:[%s13623_s2 + $0x5d0] sm:$0xff] }
 0x713   :  { %v4424_v36 = vld [vmem:[%s13623_s2 + $0x758] sm:$0xff] }
 0x714   :  { %6938 = vmatpush1.bf16.msra.mxu0 %v6937_v26  ;;  %7002 = vmatpush1.bf16.msra.mxu1 %v7001_v28  ;;  %v4328_v26 = vld [vmem:[%s13623_s2 + $0x458] sm:$0xff] }
 0x715   :  { %6940 = vmatprep.subr.bf16.mxu0 %v6939_v5  ;;  %7004 = vmatprep.subr.bf16.mxu1 %v7003_v41  ;;  %v7019_v28 = vpack.c.bf16 %v4328_v26, %v4320_v15  ;;  %v4317_v5 = vld [vmem:[%s13623_s2 + $0x400] sm:$0xff]  ;;  %v4327_v41 = vld [vmem:[%s13623_s2 + $0x450] sm:$0xff]  ;;  %v4392_v15 = vld [vmem:[%s13623_s2 + $0x658] sm:$0xff] }
 0x716   :  { %v6957_v40 = vpack.c.bf16 %v4325_v34, %v4317_v5  ;;  %v7021_v47 = vpack.c.bf16 %v4327_v41, %v4319_v35  ;;  %v4389_v26 = vld [vmem:[%s13623_s2 + $0x640] sm:$0xff]  ;;  %v4383_v34 = vld [vmem:[%s13623_s2 + $0x610] sm:$0xff]  ;;  %v4398_v41 = vld [vmem:[%s13623_s2 + $0x688] sm:$0xff] }
 0x717   :  { %v4391_v35 = vld [vmem:[%s13623_s2 + $0x650] sm:$0xff]  ;;  %v4432_v9 = vld [vmem:[%s13623_s2 + $0x798] sm:$0xff] }
 0x718   :  { %6942 = vmatpush1.bf16.msra.mxu0 %v6941_v52  ;;  %7006 = vmatpush1.bf16.msra.mxu1 %v7005_v18  ;;  %v4344_v52 = vld [vmem:[%s13623_s2 + $0x4d8] sm:$0xff]  ;;  %v4333_v18 = vld [vmem:[%s13623_s2 + $0x480] sm:$0xff] }
 0x719   :  { %6944 = vmatprep.subr.bf16.mxu0 %v6943_v19  ;;  %7008 = vmatprep.subr.bf16.mxu1 %v7007_v25  ;;  %v4341_v19 = vld [vmem:[%s13623_s2 + $0x4c0] sm:$0xff]  ;;  %v7023_v0 = vpack.c.bf16 %v4344_v52, %v4336_v11  ;;  %v4343_v25 = vld [vmem:[%s13623_s2 + $0x4d0] sm:$0xff]  ;;  %v4408_v11 = vld [vmem:[%s13623_s2 + $0x6d8] sm:$0xff] }
 0x71a   :  { %v6961_v10 = vpack.c.bf16 %v4341_v19, %v4333_v18  ;;  %v7025_v27 = vpack.c.bf16 %v4343_v25, %v4335_v48  ;;  %v4405_v52 = vld [vmem:[%s13623_s2 + $0x6c0] sm:$0xff]  ;;  %v7039_v18 = vpack.c.bf16 %v4408_v11, %v4400_v55  ;;  %v4414_v48 = vld [vmem:[%s13623_s2 + $0x708] sm:$0xff] }
 0x71c   :  { %6946 = vmatpush1.bf16.msra.mxu0 %v6945_v37  ;;  %7010 = vmatpush1.bf16.msra.mxu1 %v7009_v39  ;;  %v4360_v37 = vld [vmem:[%s13623_s2 + $0x558] sm:$0xff]  ;;  %v4349_v39 = vld [vmem:[%s13623_s2 + $0x500] sm:$0xff] }
 0x71d   :  { %6948 = vmatprep.subr.bf16.mxu0 %v6947_v50  ;;  %7012 = vmatprep.subr.bf16.mxu1 %v7011_v45  ;;  %v4357_v50 = vld [vmem:[%s13623_s2 + $0x540] sm:$0xff]  ;;  %v7027_v61 = vpack.c.bf16 %v4360_v37, %v4352_v44  ;;  %v4359_v45 = vld [vmem:[%s13623_s2 + $0x550] sm:$0xff] }
 0x71e   :  { %v6965_v62 = vpack.c.bf16 %v4357_v50, %v4349_v39  ;;  %v7029_v63 = vpack.c.bf16 %v4359_v45, %v4351_v3  ;;  %v4413_v37 = vld [vmem:[%s13623_s2 + $0x700] sm:$0xff]  ;;  %v4415_v50 = vld [vmem:[%s13623_s2 + $0x710] sm:$0xff]  ;;  %v4430_v3 = vld [vmem:[%s13623_s2 + $0x788] sm:$0xff] }
 0x71f   :  { %v4421_v39 = vld [vmem:[%s13623_s2 + $0x740] sm:$0xff]  ;;  %v4438_v45 = vld [vmem:[%s13623_s2 + $0x7c8] sm:$0xff] }
 0x720   :  { %6950 = vmatpush1.bf16.msra.mxu0 %v6949_v14  ;;  %7014 = vmatpush1.bf16.msra.mxu1 %v7013_v16  ;;  %v4376_v14 = vld [vmem:[%s13623_s2 + $0x5d8] sm:$0xff]  ;;  %v4365_v16 = vld [vmem:[%s13623_s2 + $0x580] sm:$0xff]  ;;  %v6983_v4 = vpack.c.bf16 %v4438_v45, %v4430_v3 }
 0x721   :  { %6952 = vmatprep.subr.bf16.mxu0 %v6951_v21  ;;  %7016 = vmatprep.subr.bf16.mxu1 %v7015_v31  ;;  %v4373_v21 = vld [vmem:[%s13623_s2 + $0x5c0] sm:$0xff]  ;;  %v7031_v23 = vpack.c.bf16 %v4376_v14, %v4368_v12  ;;  %v4367_v31 = vld [vmem:[%s13623_s2 + $0x590] sm:$0xff]  ;;  %v4440_v12 = vld [vmem:[%s13623_s2 + $0x7d8] sm:$0xff] }
 0x722   :  { %v6969_v30 = vpack.c.bf16 %v4373_v21, %v4365_v16  ;;  %v7033_v58 = vpack.c.bf16 %v4375_v22, %v4367_v31  ;;  %v7047_v14 = vpack.c.bf16 %v4440_v12, %v4432_v9  ;;  %v4437_v16 = vld [vmem:[%s13623_s2 + $0x7c0] sm:$0xff]  ;;  %v4431_v21 = vld [vmem:[%s13623_s2 + $0x790] sm:$0xff]  ;;  %v4194_v22 = vld [vmem:[%s13623_s2 + $0x28] sm:$0xff] }
 0x724   :  { %6954 = vmatpush1.bf16.msra.mxu0 %v6953_v1  ;;  %7018 = vmatpush1.bf16.msra.mxu1 %v7017_v2  ;;  %v4382_v1 = vld [vmem:[%s13623_s2 + $0x608] sm:$0xff] }
 0x725   :  { %6956 = vmatprep.subr.bf16.mxu0 %v6955_v17  ;;  %7020 = vmatprep.subr.bf16.mxu1 %v7019_v28  ;;  %v4390_v2 = vld [vmem:[%s13623_s2 + $0x648] sm:$0xff]  ;;  %v4381_v17 = vld [vmem:[%s13623_s2 + $0x600] sm:$0xff]  ;;  %v7035_v28 = vpack.c.bf16 %v4392_v15, %v4384_v7  ;;  %v4204_v7 = vld [vmem:[%s13623_s2 + $0x78] sm:$0xff] }
 0x726   :  { %v6971_v8 = vpack.c.bf16 %v4390_v2, %v4382_v1  ;;  %v6973_v5 = vpack.c.bf16 %v4389_v26, %v4381_v17  ;;  %v4196_v1 = vld [vmem:[%s13623_s2 + $0x38] sm:$0xff] }
 0x728   :  { %6958 = vmatpush1.bf16.msra.mxu0 %v6957_v40  ;;  %7022 = vmatpush1.bf16.msra.mxu1 %v7021_v47  ;;  %v7037_v40 = vpack.c.bf16 %v4391_v35, %v4383_v34  ;;  %v4406_v47 = vld [vmem:[%s13623_s2 + $0x6c8] sm:$0xff]  ;;  %v3577_v34 = vld [vmem:[#allocation2 + $0x190] sm:$0xff] }
 0x729   :  { %6960 = vmatprep.subr.bf16.mxu0 %v6959_v42  ;;  %7024 = vmatprep.subr.bf16.mxu1 %v7023_v0  ;;  %v6975_v56 = vpack.c.bf16 %v4406_v47, %v4398_v41  ;;  %v4397_v42 = vld [vmem:[%s13623_s2 + $0x680] sm:$0xff]  ;;  %v4399_v0 = vld [vmem:[%s13623_s2 + $0x690] sm:$0xff]  ;;  %v3576_v35 = vld [vmem:[#allocation2 + $0x188] sm:$0xff] }
 0x72a   :  { %v6977_v19 = vpack.c.bf16 %v4405_v52, %v4397_v42  ;;  %v3578_v41 = vld [vmem:[#allocation2 + $0x198] sm:$0xff] }
 0x72c   :  { %6962 = vmatpush1.bf16.msra.mxu0 %v6961_v10  ;;  %7026 = vmatpush1.bf16.msra.mxu1 %v7025_v27  ;;  %v4407_v10 = vld [vmem:[%s13623_s2 + $0x6d0] sm:$0xff]  ;;  %v4422_v27 = vld [vmem:[%s13623_s2 + $0x748] sm:$0xff] }
 0x72d   :  { %6964 = vmatprep.subr.bf16.mxu0 %v6963_v32  ;;  %7028 = vmatprep.subr.bf16.mxu1 %v7027_v61  ;;  %v7041_v25 = vpack.c.bf16 %v4407_v10, %v4399_v0  ;;  %v6979_v44 = vpack.c.bf16 %v4422_v27, %v4414_v48  ;;  %v7043_v32 = vpack.c.bf16 %v4424_v36, %v4416_v33 }
 0x72e   :  { %v6981_v61 = vpack.c.bf16 %v4421_v39, %v4413_v37  ;;  %v3580_v37 = vld [vmem:[#allocation2 + $0x1a8] sm:$0xff]  ;;  %v3582_v39 = vld [vmem:[#allocation2 + $0x1b8] sm:$0xff] }
 0x730   :  { %6966 = vmatpush1.bf16.msra.mxu0 %v6965_v62  ;;  %7030 = vmatpush1.bf16.msra.mxu1 %v7029_v63  ;;  %v4423_v62 = vld [vmem:[%s13623_s2 + $0x750] sm:$0xff] }
 0x731   :  { %6968 = vmatprep.subr.bf16.mxu0 %v6967_v13  ;;  %7032 = vmatprep.subr.bf16.mxu1 %v7031_v23  ;;  %v7045_v63 = vpack.c.bf16 %v4423_v62, %v4415_v50  ;;  %v4429_v13 = vld [vmem:[%s13623_s2 + $0x780] sm:$0xff]  ;;  %v4439_v23 = vld [vmem:[%s13623_s2 + $0x7d0] sm:$0xff] }
 0x732   :  { %v7049_v31 = vpack.c.bf16 %v4439_v23, %v4431_v21 }
 0x734   :  { %6970 = vmatpush1.bf16.msra.mxu0 %v6969_v30  ;;  %7034 = vmatpush1.bf16.msra.mxu1 %v7033_v58  ;;  %v6985_v30 = vpack.c.bf16 %v4437_v16, %v4429_v13  ;;  %v4202_v58 = vld [vmem:[%s13623_s2 + $0x68] sm:$0xff] }
 0x735   :  { %6972 = vmatprep.subr.bf16.mxu0 %v6971_v8  ;;  %7036 = vmatprep.subr.bf16.mxu1 %v7035_v28  ;;  %v7051_v2 = vpack.c.bf16 %v4202_v58, %v4194_v22  ;;  %v7115_v8 = vpack.c.bf16 %v4204_v7, %v4196_v1 }
 0x738   :  { %6974 = vmatpush1.bf16.msra.mxu0 %v6973_v5  ;;  %7038 = vmatpush1.bf16.msra.mxu1 %v7037_v40  ;;  %v3575_v5 = vld [vmem:[#allocation2 + $0x180] sm:$0xff] }
 0x739   :  { %6976 = vmatprep.subr.bf16.mxu0 %v6975_v56  ;;  %7040 = vmatprep.subr.bf16.mxu1 %v7039_v18 }
 0x73c   :  { %6978 = vmatpush1.bf16.msra.mxu0 %v6977_v19  ;;  %7042 = vmatpush1.bf16.msra.mxu1 %v7041_v25 }
 0x73d   :  { %6980 = vmatprep.subr.bf16.mxu0 %v6979_v44  ;;  %7044 = vmatprep.subr.bf16.mxu1 %v7043_v32  ;;  %v3579_v44 = vld [vmem:[#allocation2 + $0x1a0] sm:$0xff]  ;;  %v3581_v32 = vld [vmem:[#allocation2 + $0x1b0] sm:$0xff] }
 0x740   :  { %6982 = vmatpush1.bf16.msra.mxu0 %v6981_v61  ;;  %7046 = vmatpush1.bf16.msra.mxu1 %v7045_v63 }
 0x741   :  { %6984 = vmatprep.subr.bf16.mxu0 %v6983_v4  ;;  %7048 = vmatprep.subr.bf16.mxu1 %v7047_v14 }
 0x744   :  { %6986 = vmatpush1.bf16.msra.mxu0 %v6985_v30  ;;  %7050 = vmatpush1.bf16.msra.mxu1 %v7049_v31 }
 0x745   :  { %7052 = vmatprep.subr.bf16.mxu0 %v7051_v2  ;;  %7116 = vmatprep.subr.bf16.mxu1 %v7115_v8 }
 0x79a   :  { %v3905_v15 = vpop.f32.mrb[18].mxu0  ;;  %v3976_v17 = vpop.f32.mrb[22].mxu1 }
 0x79b   :  { %v3907_v26 = vpop.f32.mrb[19].mxu0  ;;  %v3978_v28 = vpop.f32.mrb[23].mxu1  ;;  %v4123_v40 = vadd.f32 %v3905_v15, %v3575_v5  ;;  %v4125_v47 = vadd.f32 %v3976_v17, %v3577_v34  ;;  %v4201_v34 = vld [vmem:[%s13623_s2 + $0x60] sm:$0xff] }
 0x79c   :  { %v4124_v55 = vadd.f32 %v3907_v26, %v3576_v35  ;;  %v4126_v56 = vadd.f32 %v3978_v28, %v3578_v41  ;;  %v4195_v35 = vld [vmem:[%s13623_s2 + $0x30] sm:$0xff] }
 0x79d   :  { %v5375_v11 = vmul.f32 -1.442695, %v4123_v40  ;;  %v5377_v42 = vmul.f32 -1.442695, %v4125_v47  ;;  %v4203_v40 = vld [vmem:[%s13623_s2 + $0x70] sm:$0xff]  ;;  %v4210_v47 = vld [vmem:[%s13623_s2 + $0xa8] sm:$0xff] }
 0x79e   :  { %v5376_v52 = vmul.f32 -1.442695, %v4124_v55  ;;  %v5378_v18 = vmul.f32 -1.442695, %v4126_v56  ;;  %v4218_v56 = vld [vmem:[%s13623_s2 + $0xe8] sm:$0xff] }
 0x79f   :  { %7436 = vpow2.f32 %v5375_v11  ;;  %v4212_v11 = vld [vmem:[%s13623_s2 + $0xb8] sm:$0xff] }
 0x7a0   :  { %7438 = vpow2.f32 %v5377_v42  ;;  %v4220_v42 = vld [vmem:[%s13623_s2 + $0xf8] sm:$0xff] }
 0x7a1   :  { %7440 = vpow2.f32 %v5376_v52 }
 0x7a2   :  { %7442 = vpow2.f32 %v5378_v18 }
 0x7a9   :  { %v7437_v19 = vpop.eup %7436 }
 0x7aa   :  { %v7439_v0 = vpop.eup %7438  ;;  %v4137_v25 = vadd.f32 1.0, %v7437_v19  ;;  %v7117_v19 = vpack.c.bf16 %v4203_v40, %v4195_v35 }
 0x7ab   :  { %v7441_v10 = vpop.eup %7440  ;;  %v4149_v27 = vadd.f32 1.0, %v7439_v0  ;;  %v4209_v0 = vld [vmem:[%s13623_s2 + $0xa0] sm:$0xff] }
 0x7ac   :  { %v7443_v48 = vpop.eup %7442  ;;  %v4138_v33 = vadd.f32 1.0, %v7441_v10  ;;  %7444 = vrcp.f32 %v4137_v25  ;;  %v4217_v10 = vld [vmem:[%s13623_s2 + $0xe0] sm:$0xff]  ;;  %v4211_v25 = vld [vmem:[%s13623_s2 + $0xb0] sm:$0xff] }
 0x7ad   :  { %v4150_v36 = vadd.f32 1.0, %v7443_v48  ;;  %7446 = vrcp.f32 %v4149_v27  ;;  %v4219_v27 = vld [vmem:[%s13623_s2 + $0xf0] sm:$0xff] }
 0x7ae   :  { %7448 = vrcp.f32 %v4138_v33  ;;  %v4226_v33 = vld [vmem:[%s13623_s2 + $0x128] sm:$0xff] }
 0x7af   :  { %7450 = vrcp.f32 %v4150_v36  ;;  %v7055_v36 = vpack.c.bf16 %v4218_v56, %v4210_v47  ;;  %v4267_v47 = vld [vmem:[%s13623_s2 + $0x270] sm:$0xff]  ;;  %v4282_v56 = vld [vmem:[%s13623_s2 + $0x2e8] sm:$0xff] }
 0x7b6   :  { %v7445_v14 = vpop.eup %7444 }
 0x7b7   :  { %v7447_v16 = vpop.eup %7446 }
 0x7b8   :  { %v7449_v21 = vpop.eup %7448  ;;  %v4169_v22 = vmul.f32 %v7447_v16, %v12103_v49  ;;  %v4193_v49 = vld [vmem:[%s13623_s2 + $0x20] sm:$0xff]  ;;  %v4252_v16 = vld [vmem:[%s13623_s2 + $0x1f8] sm:$0xff] }
 0x7b9   :  { %v7451_v23 = vpop.eup %7450  ;;  %v7053_v18 = vpack.c.bf16 %v4201_v34, %v4193_v49  ;;  %v4265_v34 = vld [vmem:[%s13623_s2 + $0x260] sm:$0xff] }
 0x7ba   :  { %v4170_v2 = vmul.f32 %v7451_v23, %v12105_v6 }
 0x7da   :  { %v4047_v50 = vpop.f32.mrb[20].mxu0  ;;  %v4118_v61 = vpop.f32.mrb[24].mxu1 }
 0x7db   :  { %v4127_v62 = vadd.f32 %v4047_v50, %v3579_v44  ;;  %v4129_v3 = vadd.f32 %v4118_v61, %v3581_v32  ;;  %v4049_v45 = vpop.f32.mrb[21].mxu0  ;;  %v4120_v63 = vpop.f32.mrb[25].mxu1  ;;  %v7119_v44 = vpack.c.bf16 %v4220_v42, %v4212_v11  ;;  %v4234_v32 = vld [vmem:[%s13623_s2 + $0x168] sm:$0xff]  ;;  %v7057_v50 = vpack.c.bf16 %v4217_v10, %v4209_v0  ;;  %v4276_v11 = vld [vmem:[%s13623_s2 + $0x2b8] sm:$0xff]  ;;  %v4273_v0 = vld [vmem:[%s13623_s2 + $0x2a0] sm:$0xff] }
 0x7dc   :  { %v4128_v4 = vadd.f32 %v4049_v45, %v3580_v37  ;;  %v4130_v9 = vadd.f32 %v4120_v63, %v3582_v39  ;;  %v4228_v37 = vld [vmem:[%s13623_s2 + $0x138] sm:$0xff]  ;;  %v7121_v61 = vpack.c.bf16 %v4219_v27, %v4211_v25  ;;  %v7059_v45 = vpack.c.bf16 %v4234_v32, %v4226_v33  ;;  %v4281_v10 = vld [vmem:[%s13623_s2 + $0x2e0] sm:$0xff]  ;;  %v4275_v33 = vld [vmem:[%s13623_s2 + $0x2b0] sm:$0xff] }
 0x7dd   :  { %7452 = vtanh.f32 %v4127_v62  ;;  %v5379_v12 = vmul.f32 -1.442695, %v4129_v3  ;;  %v4236_v39 = vld [vmem:[%s13623_s2 + $0x178] sm:$0xff]  ;;  %v4225_v62 = vld [vmem:[%s13623_s2 + $0x120] sm:$0xff]  ;;  %v4298_v32 = vld [vmem:[%s13623_s2 + $0x368] sm:$0xff] }
 0x7de   :  { %7454 = vtanh.f32 %v4128_v4  ;;  %v5380_v13 = vmul.f32 -1.442695, %v4130_v9  ;;  %v4233_v3 = vld [vmem:[%s13623_s2 + $0x160] sm:$0xff]  ;;  %v7123_v63 = vpack.c.bf16 %v4236_v39, %v4228_v37  ;;  %v4227_v4 = vld [vmem:[%s13623_s2 + $0x130] sm:$0xff]  ;;  %v4284_v42 = vld [vmem:[%s13623_s2 + $0x2f8] sm:$0xff] }
 0x7df   :  { %7456 = vpow2.f32 %v5379_v12  ;;  %v4235_v9 = vld [vmem:[%s13623_s2 + $0x170] sm:$0xff]  ;;  %v4242_v12 = vld [vmem:[%s13623_s2 + $0x1a8] sm:$0xff]  ;;  %v7135_v27 = vpack.c.bf16 %v4284_v42, %v4276_v11  ;;  %v4292_v37 = vld [vmem:[%s13623_s2 + $0x338] sm:$0xff] }
 0x7e0   :  { %7458 = vpow2.f32 %v5380_v13  ;;  %v4250_v13 = vld [vmem:[%s13623_s2 + $0x1e8] sm:$0xff]  ;;  %v7125_v23 = vpack.c.bf16 %v4235_v9, %v4227_v4  ;;  %v4300_v39 = vld [vmem:[%s13623_s2 + $0x378] sm:$0xff]  ;;  %v4291_v4 = vld [vmem:[%s13623_s2 + $0x330] sm:$0xff] }
 0x7e1   :  { %v4299_v9 = vld [vmem:[%s13623_s2 + $0x370] sm:$0xff]  ;;  %v4340_v11 = vld [vmem:[%s13623_s2 + $0x4b8] sm:$0xff] }
 0x7e2   :  { %v4348_v42 = vld [vmem:[%s13623_s2 + $0x4f8] sm:$0xff] }
 0x7e7   :  { %v7453_v30 = vpop.eup %7452 }
 0x7e8   :  { %v7455_v31 = vpop.eup %7454  ;;  %v4171_v58 = vmul.f32 %v7453_v30, %v7445_v14  ;;  %v4244_v14 = vld [vmem:[%s13623_s2 + $0x1b8] sm:$0xff]  ;;  %v4241_v30 = vld [vmem:[%s13623_s2 + $0x1a0] sm:$0xff] }
 0x7e9   :  { %v7457_v1 = vpop.eup %7456  ;;  %v4172_v7 = vmul.f32 %v7455_v31, %v7449_v21  ;;  %v7061_v21 = vpack.c.bf16 %v4233_v3, %v4225_v62  ;;  %v4249_v31 = vld [vmem:[%s13623_s2 + $0x1e0] sm:$0xff] }
 0x7ea   :  { %v7459_v8 = vpop.eup %7458  ;;  %v12891_v15 = vadd.f32 %v4171_v58, %v4169_v22  ;;  %v4163_v17 = vadd.f32 1.0, %v7457_v1  ;;  %v7063_v22 = vpack.c.bf16 %v4250_v13, %v4242_v12  ;;  %v7127_v58 = vpack.c.bf16 %v4252_v16, %v4244_v14  ;;  %v4243_v1 = vld [vmem:[%s13623_s2 + $0x1b0] sm:$0xff]  ;;  %v4289_v62 = vld [vmem:[%s13623_s2 + $0x320] sm:$0xff]  ;;  %v4306_v12 = vld [vmem:[%s13623_s2 + $0x3a8] sm:$0xff] }
 0x7eb   :  { %v12893_v26 = vadd.f32 %v4172_v7, %v4170_v2  ;;  %v4164_v28 = vadd.f32 1.0, %v7459_v8  ;;  %v4251_v2 = vld [vmem:[%s13623_s2 + $0x1f0] sm:$0xff]  ;;  %v4258_v7 = vld [vmem:[%s13623_s2 + $0x228] sm:$0xff]  ;;  %v4297_v3 = vld [vmem:[%s13623_s2 + $0x360] sm:$0xff] }
 0x7ec   :  { %7460 = vtanh.f32 %v12891_v15  ;;  %v4266_v8 = vld [vmem:[%s13623_s2 + $0x268] sm:$0xff]  ;;  %v7129_v49 = vpack.c.bf16 %v4251_v2, %v4243_v1  ;;  %v4308_v14 = vld [vmem:[%s13623_s2 + $0x3b8] sm:$0xff]  ;;  %v4307_v1 = vld [vmem:[%s13623_s2 + $0x3b0] sm:$0xff] }
 0x7ed   :  { %7462 = vrcp.f32 %v4163_v17  ;;  %v4260_v17 = vld [vmem:[%s13623_s2 + $0x238] sm:$0xff]  ;;  %v7067_v35 = vpack.c.bf16 %v4266_v8, %v4258_v7  ;;  %v4314_v13 = vld [vmem:[%s13623_s2 + $0x3e8] sm:$0xff]  ;;  %v4315_v2 = vld [vmem:[%s13623_s2 + $0x3f0] sm:$0xff] }
 0x7ee   :  { %7464 = vtanh.f32 %v12893_v26  ;;  %v4316_v16 = vld [vmem:[%s13623_s2 + $0x3f8] sm:$0xff]  ;;  %v4322_v7 = vld [vmem:[%s13623_s2 + $0x428] sm:$0xff] }
 0x7ef   :  { %7466 = vrcp.f32 %v4164_v28  ;;  %v4268_v28 = vld [vmem:[%s13623_s2 + $0x278] sm:$0xff]  ;;  %v4330_v8 = vld [vmem:[%s13623_s2 + $0x468] sm:$0xff] }
 0x7f0   :  { %v7131_v40 = vpack.c.bf16 %v4268_v28, %v4260_v17  ;;  %v4324_v17 = vld [vmem:[%s13623_s2 + $0x438] sm:$0xff] }
 0x7f1   :  { %v4332_v28 = vld [vmem:[%s13623_s2 + $0x478] sm:$0xff] }
 0x7f6   :  { %v7461_v5 = vpop.eup %7460 }
 0x7f7   :  { %v7463_v6 = vpop.eup %7462 }
 0x7f8   :  { %v7465_v41 = vpop.eup %7464  ;;  %v12929_v48 = vmul.f32 %v7463_v6, %v7461_v5  ;;  %v7065_v5 = vpack.c.bf16 %v4249_v31, %v4241_v30  ;;  %v4257_v6 = vld [vmem:[%s13623_s2 + $0x220] sm:$0xff] }
 0x7f9   :  { %v7467_v55 = vpop.eup %7466  ;;  %v4305_v30 = vld [vmem:[%s13623_s2 + $0x3a0] sm:$0xff] }
 0x7fa   :  { %v12921_v52 = vmul.f32 %v7467_v55, %v7465_v41  ;;  %v4259_v41 = vld [vmem:[%s13623_s2 + $0x230] sm:$0xff]  ;;  %v4274_v55 = vld [vmem:[%s13623_s2 + $0x2a8] sm:$0xff]  ;;  %v4313_v31 = vld [vmem:[%s13623_s2 + $0x3e0] sm:$0xff] }
 0x7fb   :  { %v7071_v25 = vpack.c.bf16 %v4282_v56, %v4274_v55  ;;  %v4338_v55 = vld [vmem:[%s13623_s2 + $0x4a8] sm:$0xff] }
 0x7fc   :  { %4509 = vmatprep.mubr.f32.mxu0 %v12921_v52  ;;  %4580 = vmatprep.mubr.f32.mxu1 %v12921_v52  ;;  %v4346_v56 = vld [vmem:[%s13623_s2 + $0x4e8] sm:$0xff] }
 0x7fd   :  { %4510 = vmatmul.mubr.f32.vlgmr.msra.gmra.mrb[22].mxu0 %v12929_v48  ;;  %4581 = vmatmul.mubr.f32.vlgmr.msra.gmra.mrb[26].mxu1 %v12929_v48 }
 0x7fe   :  { %7054 = vmatpush1.bf16.msra.mxu0 %v7053_v18  ;;  %7118 = vmatpush1.bf16.msra.mxu1 %v7117_v19  ;;  %v7069_v18 = vpack.c.bf16 %v4265_v34, %v4257_v6  ;;  %v7133_v19 = vpack.c.bf16 %v4267_v47, %v4259_v41  ;;  %v7145_v6 = vpack.c.bf16 %v4315_v2, %v4307_v1  ;;  %v4329_v34 = vld [vmem:[%s13623_s2 + $0x460] sm:$0xff]  ;;  %v4331_v47 = vld [vmem:[%s13623_s2 + $0x470] sm:$0xff] }
 0x7ff   :  { %4651 = vmatprep.mubr.f32.mxu0 %v12921_v52  ;;  %4722 = vmatprep.mubr.f32.mxu1 %v12921_v52  ;;  %v7147_v41 = vpack.c.bf16 %v4332_v28, %v4324_v17  ;;  %v4371_v17 = vld [vmem:[%s13623_s2 + $0x5b0] sm:$0xff] }
 0x800   :  { %7056 = vmatprep.subr.bf16.mxu0 %v7055_v36  ;;  %7120 = vmatprep.subr.bf16.mxu1 %v7119_v44  ;;  %v4283_v36 = vld [vmem:[%s13623_s2 + $0x2f0] sm:$0xff]  ;;  %v4290_v44 = vld [vmem:[%s13623_s2 + $0x328] sm:$0xff] }
 0x801   :  { %v4379_v28 = vld [vmem:[%s13623_s2 + $0x5f0] sm:$0xff] }
 0x802   :  { %7058 = vmatpush1.bf16.msra.mxu0 %v7057_v50  ;;  %7122 = vmatpush1.bf16.msra.mxu1 %v7121_v61  ;;  %v7073_v50 = vpack.c.bf16 %v4281_v10, %v4273_v0  ;;  %v7137_v61 = vpack.c.bf16 %v4283_v36, %v4275_v33  ;;  %v4337_v0 = vld [vmem:[%s13623_s2 + $0x4a0] sm:$0xff]  ;;  %v4339_v33 = vld [vmem:[%s13623_s2 + $0x4b0] sm:$0xff] }
 0x803   :  { %7060 = vmatprep.subr.bf16.mxu0 %v7059_v45  ;;  %7124 = vmatprep.subr.bf16.mxu1 %v7123_v63  ;;  %v7075_v45 = vpack.c.bf16 %v4298_v32, %v4290_v44  ;;  %v7139_v63 = vpack.c.bf16 %v4300_v39, %v4292_v37  ;;  %v4345_v10 = vld [vmem:[%s13623_s2 + $0x4e0] sm:$0xff]  ;;  %v4347_v36 = vld [vmem:[%s13623_s2 + $0x4f0] sm:$0xff]  ;;  %v4354_v44 = vld [vmem:[%s13623_s2 + $0x528] sm:$0xff] }
 0x804   :  { %v4362_v32 = vld [vmem:[%s13623_s2 + $0x568] sm:$0xff]  ;;  %v4356_v37 = vld [vmem:[%s13623_s2 + $0x538] sm:$0xff] }
 0x805   :  { %v4364_v39 = vld [vmem:[%s13623_s2 + $0x578] sm:$0xff] }
 0x806   :  { %7062 = vmatpush1.bf16.msra.mxu0 %v7061_v21  ;;  %7126 = vmatpush1.bf16.msra.mxu1 %v7125_v23  ;;  %v7077_v21 = vpack.c.bf16 %v4297_v3, %v4289_v62  ;;  %v7141_v23 = vpack.c.bf16 %v4299_v9, %v4291_v4  ;;  %v441_v62 = vld [vmem:[%s440_s18] sm:$0xff]  ;;  %v7089_v3 = vpack.c.bf16 %v4345_v10, %v4337_v0  ;;  %v4355_v4 = vld [vmem:[%s13623_s2 + $0x530] sm:$0xff]  ;;  %s5334_s18 = sshll.u32 %s13124_s28, 3 }
 0x807   :  { %7064 = vmatprep.subr.bf16.mxu0 %v7063_v22  ;;  %7128 = vmatprep.subr.bf16.mxu1 %v7127_v58  ;;  %v7079_v22 = vpack.c.bf16 %v4314_v13, %v4306_v12  ;;  %v7143_v58 = vpack.c.bf16 %v4316_v16, %v4308_v14  ;;  %v4363_v9 = vld [vmem:[%s13623_s2 + $0x570] sm:$0xff]  ;;  %443 = vst [vmem:[#allocation2 + $0x1c1] ss:$8 sm:$0xf] %v441_v62  ;;  %v4370_v14 = vld [vmem:[%s13623_s2 + $0x5a8] sm:$0xff]  ;;  %v448_v16 = vld [vmem:[%s447_s14] sm:$0xff]  ;;  %s468_s12 = scalar_lea.vmem %s13622_s1, %s5334_s18 }
 0x808   :  { %444 = vst [vmem:[#allocation2 + $0x1c1] ss:$8 sm:$0xf0] %v441_v62  ;;  %v7091_v12 = vpack.c.bf16 %v4362_v32, %v4354_v44  ;;  %v7155_v13 = vpack.c.bf16 %v4364_v39, %v4356_v37  ;;  %450 = vst [vmem:[#allocation2 + $0x1c2] ss:$8 sm:$0xf] %v448_v16 }
 0x809   :  { %451 = vst [vmem:[#allocation2 + $0x1c2] ss:$8 sm:$0xf0] %v448_v16  ;;  %v469_v1 = vld [vmem:[%s468_s12] sm:$0xff]  ;;  %s5336_s14 = sshll.u32 %s13135_s25, 3  ;;  %v4387_v0 = vld [vmem:[%s13623_s2 + $0x630] sm:$0xff] }
 0x80a   :  { %7066 = vmatpush1.bf16.msra.mxu0 %v7065_v5  ;;  %7130 = vmatpush1.bf16.msra.mxu1 %v7129_v49  ;;  %v4321_v5 = vld [vmem:[%s13623_s2 + $0x420] sm:$0xff]  ;;  %v7081_v49 = vpack.c.bf16 %v4313_v31, %v4305_v30  ;;  %v4372_v30 = vld [vmem:[%s13623_s2 + $0x5b8] sm:$0xff]  ;;  %471 = vst [vmem:[#allocation2 + $0x1c5] ss:$8 sm:$0xf] %v469_v1  ;;  %s475_s23 = scalar_lea.vmem %s13622_s1, %s5336_s14  ;;  %v4395_v10 = vld [vmem:[%s13623_s2 + $0x670] sm:$0xff] }
 0x80b   :  { %7068 = vmatprep.subr.bf16.mxu0 %v7067_v35  ;;  %7132 = vmatprep.subr.bf16.mxu1 %v7131_v40  ;;  %v4323_v35 = vld [vmem:[%s13623_s2 + $0x430] sm:$0xff]  ;;  %v7083_v40 = vpack.c.bf16 %v4330_v8, %v4322_v7  ;;  %v4380_v31 = vld [vmem:[%s13623_s2 + $0x5f8] sm:$0xff]  ;;  %v7157_v7 = vpack.c.bf16 %v4363_v9, %v4355_v4  ;;  %v4377_v8 = vld [vmem:[%s13623_s2 + $0x5e0] sm:$0xff]  ;;  %472 = vst [vmem:[#allocation2 + $0x1c5] ss:$8 sm:$0xf0] %v469_v1 }
 0x80c   :  { %v7165_v32 = vpack.c.bf16 %v4395_v10, %v4387_v0  ;;  %v4401_v37 = vld [vmem:[%s13623_s2 + $0x6a0] sm:$0xff]  ;;  %v4403_v62 = vld [vmem:[%s13623_s2 + $0x6b0] sm:$0xff]  ;;  %v4420_v4 = vld [vmem:[%s13623_s2 + $0x738] sm:$0xff] }
 0x80d   :  { %v4409_v39 = vld [vmem:[%s13623_s2 + $0x6e0] sm:$0xff]  ;;  %v4428_v9 = vld [vmem:[%s13623_s2 + $0x778] sm:$0xff] }
 0x80e   :  { %7070 = vmatpush1.bf16.msra.mxu0 %v7069_v18  ;;  %7134 = vmatpush1.bf16.msra.mxu1 %v7133_v19  ;;  %v7085_v18 = vpack.c.bf16 %v4329_v34, %v4321_v5  ;;  %v7149_v19 = vpack.c.bf16 %v4331_v47, %v4323_v35  ;;  %v476_v34 = vld [vmem:[%s475_s23] sm:$0xff]  ;;  %v4396_v47 = vld [vmem:[%s13623_s2 + $0x678] sm:$0xff] }
 0x80f   :  { %7072 = vmatprep.subr.bf16.mxu0 %v7071_v25  ;;  %7136 = vmatprep.subr.bf16.mxu1 %v7135_v27  ;;  %v7087_v25 = vpack.c.bf16 %v4346_v56, %v4338_v55  ;;  %v7151_v27 = vpack.c.bf16 %v4348_v42, %v4340_v11  ;;  %v483_v35 = vld [vmem:[%s482_s15] sm:$0xff]  ;;  %478 = vst [vmem:[#allocation2 + $0x1c6] ss:$8 sm:$0xf] %v476_v34  ;;  %v4436_v1 = vld [vmem:[%s13623_s2 + $0x7b8] sm:$0xff] }
 0x810   :  { %485 = vst [vmem:[#allocation2 + $0x1c7] ss:$8 sm:$0xf] %v483_v35  ;;  %479 = vst [vmem:[#allocation2 + $0x1c6] ss:$8 sm:$0xf0] %v476_v34  ;;  %v7161_v56 = vpack.c.bf16 %v4379_v28, %v4371_v17 }
 0x811   :  { %486 = vst [vmem:[#allocation2 + $0x1c7] ss:$8 sm:$0xf0] %v483_v35  ;;  %v4385_v11 = vld [vmem:[%s13623_s2 + $0x620] sm:$0xff]  ;;  %v4443_v34 = vld [vmem:[%s13623_s2 + $0x7f0] sm:$0xff]  ;;  %v4804_v35 = vld [vmem:[%s13624_s3 + $0x8] sm:$0xff] }
 0x812   :  { %7074 = vmatpush1.bf16.msra.mxu0 %v7073_v50  ;;  %7138 = vmatpush1.bf16.msra.mxu1 %v7137_v61  ;;  %v13174_v50 = vld [vmem:[%s13623_s2 + $0x520] sm:$0xff] }
 0x813   :  { %7076 = vmatprep.subr.bf16.mxu0 %v7075_v45  ;;  %7140 = vmatprep.subr.bf16.mxu1 %v7139_v63  ;;  %v434_v61 = vld [vmem:[%s433_s13] sm:$0xff]  ;;  %v7153_v45 = vpack.c.bf16 %v4347_v36, %v4339_v33  ;;  %v4404_v33 = vld [vmem:[%s13623_s2 + $0x6b8] sm:$0xff] }
 0x814   :  { %v4361_v63 = vld [vmem:[%s13623_s2 + $0x560] sm:$0xff]  ;;  %436 = vst [vmem:[#allocation2 + $0x1c0] ss:$8 sm:$0xf] %v434_v61  ;;  %v4412_v36 = vld [vmem:[%s13623_s2 + $0x6f8] sm:$0xff] }
 0x815   :  { %437 = vst [vmem:[#allocation2 + $0x1c0] ss:$8 sm:$0xf0] %v434_v61  ;;  %v7093_v2 = vpack.c.bf16 %v4361_v63, %v13174_v50  ;;  %v4393_v42 = vld [vmem:[%s13623_s2 + $0x660] sm:$0xff]  ;;  %v7167_v61 = vpack.c.bf16 %v4412_v36, %v4404_v33  ;;  %v4426_v63 = vld [vmem:[%s13623_s2 + $0x768] sm:$0xff]  ;;  %v4814_v33 = vld [vmem:[%s13624_s3 + $0x58] sm:$0xff] }
 0x816   :  { %7078 = vmatpush1.bf16.msra.mxu0 %v7077_v21  ;;  %7142 = vmatpush1.bf16.msra.mxu1 %v7141_v23  ;;  %v455_v21 = vld [vmem:[%s454_s27] sm:$0xff]  ;;  %v4378_v23 = vld [vmem:[%s13623_s2 + $0x5e8] sm:$0xff]  ;;  %v7101_v44 = vpack.c.bf16 %v4393_v42, %v4385_v11  ;;  %v4805_v11 = vld [vmem:[%s13624_s3 + $0x10] sm:$0xff] }
 0x817   :  { %7080 = vmatprep.subr.bf16.mxu0 %v7079_v22  ;;  %7144 = vmatprep.subr.bf16.mxu1 %v7143_v58  ;;  %457 = vst [vmem:[#allocation2 + $0x1c3] ss:$8 sm:$0xf] %v455_v21  ;;  %458 = vst [vmem:[#allocation2 + $0x1c3] ss:$8 sm:$0xf0] %v455_v21  ;;  %v7095_v5 = vpack.c.bf16 %v4378_v23, %v4370_v14  ;;  %v7171_v23 = vpack.c.bf16 %v4428_v9, %v4420_v4 }
 0x818   :  { %v4369_v22 = vld [vmem:[%s13623_s2 + $0x5a0] sm:$0xff]  ;;  %v4808_v42 = vld [vmem:[%s13624_s3 + $0x28] sm:$0xff] }
 0x819   :  { %v462_v58 = vld [vmem:[%s461_s24] sm:$0xff]  ;;  %v7097_v55 = vpack.c.bf16 %v4377_v8, %v4369_v22  ;;  %v4434_v22 = vld [vmem:[%s13623_s2 + $0x7a8] sm:$0xff] }
 0x81a   :  { %7082 = vmatpush1.bf16.msra.mxu0 %v7081_v49  ;;  %7146 = vmatpush1.bf16.msra.mxu1 %v7145_v6  ;;  %464 = vst [vmem:[#allocation2 + $0x1c4] ss:$8 sm:$0xf] %v462_v58  ;;  %465 = vst [vmem:[#allocation2 + $0x1c4] ss:$8 sm:$0xf0] %v462_v58  ;;  %v7159_v49 = vpack.c.bf16 %v4380_v31, %v4372_v30 }
 0x81b   :  { %7084 = vmatprep.subr.bf16.mxu0 %v7083_v40  ;;  %7148 = vmatprep.subr.bf16.mxu1 %v7147_v41  ;;  %v4386_v6 = vld [vmem:[%s13623_s2 + $0x628] sm:$0xff]  ;;  %v4388_v41 = vld [vmem:[%s13623_s2 + $0x638] sm:$0xff]  ;;  %v4417_v14 = vld [vmem:[%s13623_s2 + $0x720] sm:$0xff] }
 0x81c   :  { %v4394_v40 = vld [vmem:[%s13623_s2 + $0x668] sm:$0xff]  ;;  %v4425_v16 = vld [vmem:[%s13623_s2 + $0x760] sm:$0xff]  ;;  %v4419_v30 = vld [vmem:[%s13623_s2 + $0x730] sm:$0xff] }
 0x81d   :  { %v4427_v31 = vld [vmem:[%s13623_s2 + $0x770] sm:$0xff]  ;;  %v4442_v58 = vld [vmem:[%s13623_s2 + $0x7e8] sm:$0xff]  ;;  %v4433_v17 = vld [vmem:[%s13623_s2 + $0x7a0] sm:$0xff] }
 0x81e   :  { %7086 = vmatpush1.bf16.msra.mxu0 %v7085_v18  ;;  %7150 = vmatpush1.bf16.msra.mxu1 %v7149_v19  ;;  %v7099_v18 = vpack.c.bf16 %v4394_v40, %v4386_v6  ;;  %v7163_v19 = vpack.c.bf16 %v4396_v47, %v4388_v41  ;;  %v7173_v8 = vpack.c.bf16 %v4427_v31, %v4419_v30  ;;  %v4435_v6 = vld [vmem:[%s13623_s2 + $0x7b0] sm:$0xff]  ;;  %v4806_v40 = vld [vmem:[%s13624_s3 + $0x18] sm:$0xff]  ;;  %v4807_v10 = vld [vmem:[%s13624_s3 + $0x20] sm:$0xff] }
 0x81f   :  { %7088 = vmatprep.subr.bf16.mxu0 %v7087_v25  ;;  %7152 = vmatprep.subr.bf16.mxu1 %v7151_v27  ;;  %v4402_v25 = vld [vmem:[%s13623_s2 + $0x6a8] sm:$0xff]  ;;  %v7111_v28 = vpack.c.bf16 %v4442_v58, %v4434_v22  ;;  %v7177_v47 = vpack.c.bf16 %v4443_v34, %v4435_v6  ;;  %v4823_v30 = vld [vmem:[%s13624_s3 + $0xa0] sm:$0xff]  ;;  %v4825_v31 = vld [vmem:[%s13624_s3 + $0xb0] sm:$0xff] }
 0x820   :  { %v4410_v27 = vld [vmem:[%s13623_s2 + $0x6e8] sm:$0xff]  ;;  %v4830_v58 = vld [vmem:[%s13624_s3 + $0xd8] sm:$0xff]  ;;  %v4831_v6 = vld [vmem:[%s13624_s3 + $0xe0] sm:$0xff] }
 0x821   :  { %v7103_v50 = vpack.c.bf16 %v4410_v27, %v4402_v25  ;;  %v4809_v25 = vld [vmem:[%s13624_s3 + $0x30] sm:$0xff]  ;;  %v4812_v27 = vld [vmem:[%s13624_s3 + $0x48] sm:$0xff] }
 0x822   :  { %7090 = vmatpush1.bf16.msra.mxu0 %v7089_v3  ;;  %7154 = vmatpush1.bf16.msra.mxu1 %v7153_v45  ;;  %v4411_v3 = vld [vmem:[%s13623_s2 + $0x6f0] sm:$0xff]  ;;  %v4418_v45 = vld [vmem:[%s13623_s2 + $0x728] sm:$0xff]  ;;  %v7185_v36 = vpack.c.bf16 %v4809_v25, %v4807_v10 }
 0x823   :  { %7092 = vmatprep.subr.bf16.mxu0 %v7091_v12  ;;  %7156 = vmatprep.subr.bf16.mxu1 %v7155_v13  ;;  %v7105_v12 = vpack.c.bf16 %v4409_v39, %v4401_v37  ;;  %v7169_v13 = vpack.c.bf16 %v4411_v3, %v4403_v62  ;;  %v7107_v21 = vpack.c.bf16 %v4426_v63, %v4418_v45  ;;  %v4813_v37 = vld [vmem:[%s13624_s3 + $0x50] sm:$0xff]  ;;  %v4816_v39 = vld [vmem:[%s13624_s3 + $0x68] sm:$0xff]  ;;  %v4815_v62 = vld [vmem:[%s13624_s3 + $0x60] sm:$0xff] }
 0x824   :  { %v4817_v3 = vld [vmem:[%s13624_s3 + $0x70] sm:$0xff]  ;;  %v4820_v45 = vld [vmem:[%s13624_s3 + $0x88] sm:$0xff]  ;;  %v4822_v63 = vld [vmem:[%s13624_s3 + $0x98] sm:$0xff] }
 0x825   :  { %v7193_v4 = vpack.c.bf16 %v4817_v3, %v4815_v62  ;;  %v7195_v9 = vpack.c.bf16 %v4822_v63, %v4820_v45  ;;  %v4828_v22 = vld [vmem:[%s13624_s3 + $0xc8] sm:$0xff]  ;;  %v4833_v34 = vld [vmem:[%s13624_s3 + $0xf0] sm:$0xff]  ;;  %v4854_v45 = vld [vmem:[%s13624_s3 + $0x198] sm:$0xff] }
 0x826   :  { %7094 = vmatpush1.bf16.msra.mxu0 %v7093_v2  ;;  %7158 = vmatpush1.bf16.msra.mxu1 %v7157_v7  ;;  %v4444_v2 = vld [vmem:[%s13623_s2 + $0x7f8] sm:$0xff]  ;;  %v7109_v7 = vpack.c.bf16 %v4425_v16, %v4417_v14  ;;  %v4824_v14 = vld [vmem:[%s13624_s3 + $0xa8] sm:$0xff]  ;;  %v4841_v10 = vld [vmem:[%s13624_s3 + $0x130] sm:$0xff] }
 0x827   :  { %7096 = vmatprep.subr.bf16.mxu0 %v7095_v5  ;;  %7160 = vmatprep.subr.bf16.mxu1 %v7159_v49  ;;  %v7175_v5 = vpack.c.bf16 %v4444_v2, %v4436_v1  ;;  %v4441_v49 = vld [vmem:[%s13623_s2 + $0x7e0] sm:$0xff]  ;;  %v4826_v16 = vld [vmem:[%s13624_s3 + $0xb8] sm:$0xff]  ;;  %v7201_v1 = vpack.c.bf16 %v4825_v31, %v4823_v30  ;;  %v7203_v2 = vpack.c.bf16 %v4830_v58, %v4828_v22  ;;  %v4844_v25 = vld [vmem:[%s13624_s3 + $0x148] sm:$0xff] }
 0x828   :  { %v7113_v41 = vpack.c.bf16 %v4441_v49, %v4433_v17  ;;  %v4832_v17 = vld [vmem:[%s13624_s3 + $0xe8] sm:$0xff]  ;;  %v4849_v62 = vld [vmem:[%s13624_s3 + $0x170] sm:$0xff]  ;;  %v4862_v22 = vld [vmem:[%s13624_s3 + $0x1d8] sm:$0xff] }
 0x829   :  { %v4852_v3 = vld [vmem:[%s13624_s3 + $0x188] sm:$0xff]  ;;  %v4857_v30 = vld [vmem:[%s13624_s3 + $0x1b0] sm:$0xff] }
 0x82a   :  { %7098 = vmatpush1.bf16.msra.mxu0 %v7097_v55  ;;  %7162 = vmatpush1.bf16.msra.mxu1 %v7161_v56  ;;  %v7179_v55 = vpack.c.bf16 %v4806_v40, %v4804_v35  ;;  %v4803_v56 = vld [vmem:[%s13624_s3] sm:$0xff]  ;;  %v4836_v35 = vld [vmem:[%s13624_s3 + $0x108] sm:$0xff]  ;;  %v4838_v40 = vld [vmem:[%s13624_s3 + $0x118] sm:$0xff] }
 0x82b   :  { %7100 = vmatprep.subr.bf16.mxu0 %v7099_v18  ;;  %7164 = vmatprep.subr.bf16.mxu1 %v7163_v19  ;;  %v4810_v18 = vld [vmem:[%s13624_s3 + $0x38] sm:$0xff]  ;;  %v7181_v19 = vpack.c.bf16 %v4805_v11, %v4803_v56  ;;  %v4837_v56 = vld [vmem:[%s13624_s3 + $0x110] sm:$0xff]  ;;  %v4840_v11 = vld [vmem:[%s13624_s3 + $0x128] sm:$0xff] }
 0x82c   :  { %v7183_v0 = vpack.c.bf16 %v4810_v18, %v4808_v42  ;;  %v4842_v42 = vld [vmem:[%s13624_s3 + $0x138] sm:$0xff]  ;;  %v4860_v31 = vld [vmem:[%s13624_s3 + $0x1c8] sm:$0xff] }
 0x82e   :  { %7102 = vmatpush1.bf16.msra.mxu0 %v7101_v44  ;;  %7166 = vmatpush1.bf16.msra.mxu1 %v7165_v32  ;;  %v7187_v44 = vpack.c.bf16 %v4814_v33, %v4812_v27  ;;  %v4811_v32 = vld [vmem:[%s13624_s3 + $0x40] sm:$0xff]  ;;  %v4846_v27 = vld [vmem:[%s13624_s3 + $0x158] sm:$0xff] }
 0x82f   :  { %7104 = vmatprep.subr.bf16.mxu0 %v7103_v50  ;;  %7168 = vmatprep.subr.bf16.mxu1 %v7167_v61  ;;  %v4818_v50 = vld [vmem:[%s13624_s3 + $0x78] sm:$0xff] }
 0x830   :  { %v7191_v61 = vpack.c.bf16 %v4818_v50, %v4816_v39  ;;  %v4850_v39 = vld [vmem:[%s13624_s3 + $0x178] sm:$0xff] }
 0x832   :  { %7106 = vmatpush1.bf16.msra.mxu0 %v7105_v12  ;;  %7170 = vmatpush1.bf16.msra.mxu1 %v7169_v13  ;;  %v4819_v12 = vld [vmem:[%s13624_s3 + $0x80] sm:$0xff]  ;;  %v4821_v13 = vld [vmem:[%s13624_s3 + $0x90] sm:$0xff] }
 0x833   :  { %7108 = vmatprep.subr.bf16.mxu0 %v7107_v21  ;;  %7172 = vmatprep.subr.bf16.mxu1 %v7171_v23  ;;  %v7197_v21 = vpack.c.bf16 %v4821_v13, %v4819_v12  ;;  %v7199_v23 = vpack.c.bf16 %v4826_v16, %v4824_v14  ;;  %v4853_v12 = vld [vmem:[%s13624_s3 + $0x190] sm:$0xff]  ;;  %v4856_v13 = vld [vmem:[%s13624_s3 + $0x1a8] sm:$0xff]  ;;  %v4858_v14 = vld [vmem:[%s13624_s3 + $0x1b8] sm:$0xff] }
 0x836   :  { %7110 = vmatpush1.bf16.msra.mxu0 %v7109_v7  ;;  %7174 = vmatpush1.bf16.msra.mxu1 %v7173_v8  ;;  %v4827_v7 = vld [vmem:[%s13624_s3 + $0xc0] sm:$0xff]  ;;  %v4829_v8 = vld [vmem:[%s13624_s3 + $0xd0] sm:$0xff] }
 0x837   :  { %7112 = vmatprep.subr.bf16.mxu0 %v7111_v28  ;;  %7176 = vmatprep.subr.bf16.mxu1 %v7175_v5  ;;  %v4834_v28 = vld [vmem:[%s13624_s3 + $0xf8] sm:$0xff]  ;;  %v7205_v5 = vpack.c.bf16 %v4829_v8, %v4827_v7  ;;  %v4861_v7 = vld [vmem:[%s13624_s3 + $0x1d0] sm:$0xff]  ;;  %v4864_v8 = vld [vmem:[%s13624_s3 + $0x1e8] sm:$0xff] }
 0x838   :  { %v7207_v49 = vpack.c.bf16 %v4834_v28, %v4832_v17  ;;  %v4866_v17 = vld [vmem:[%s13624_s3 + $0x1f8] sm:$0xff] }
 0x83a   :  { %7114 = vmatpush1.bf16.msra.mxu0 %v7113_v41  ;;  %7178 = vmatpush1.bf16.msra.mxu1 %v7177_v47  ;;  %v7209_v41 = vpack.c.bf16 %v4833_v34, %v4831_v6  ;;  %v7211_v47 = vpack.c.bf16 %v4838_v40, %v4836_v35  ;;  %v4865_v6 = vld [vmem:[%s13624_s3 + $0x1f0] sm:$0xff]  ;;  %v4182_v35 = vld [vmem:[#allocation2 + $0x1c8] sm:$0xff]  ;;  %v4184_v40 = vld [vmem:[#allocation2 + $0x1d8] sm:$0xff] }
 0x83b   :  { %7180 = vmatprep.subr.bf16.mxu0 %v7179_v55  ;;  %v4835_v55 = vld [vmem:[%s13624_s3 + $0x100] sm:$0xff] }
 0x83c   :  { %v7213_v18 = vpack.c.bf16 %v4837_v56, %v4835_v55 }
 0x83d   :  { %4652 = vmatmul.mubr.f32.vlgmr.msra.gmra.mrb[24].mxu0 %v12929_v48  ;;  %4723 = vmatmul.mubr.f32.vlgmr.msra.gmra.mrb[28].mxu1 %v12929_v48 }
 0x83e   :  { %7182 = vmatpush1.bf16.msra.mxu0 %v7181_v19  ;;  %4943 = vmatprep.mubr.f32.mxu0 %v8026_v54  ;;  %v7189_v54 = vpack.c.bf16 %v4813_v37, %v4811_v32  ;;  %v7215_v19 = vpack.c.bf16 %v4842_v42, %v4840_v11  ;;  %v4845_v32 = vld [vmem:[%s13624_s3 + $0x150] sm:$0xff]  ;;  %v4848_v37 = vld [vmem:[%s13624_s3 + $0x168] sm:$0xff] }
 0x83f   :  { %7184 = vmatprep.subr.bf16.mxu0 %v7183_v0  ;;  %v4839_v0 = vld [vmem:[%s13624_s3 + $0x120] sm:$0xff] }
 0x840   :  { %v7217_v33 = vpack.c.bf16 %v4841_v10, %v4839_v0  ;;  %v4185_v10 = vld [vmem:[#allocation2 + $0x1e0] sm:$0xff] }
 0x842   :  { %7186 = vmatpush1.bf16.msra.mxu0 %v7185_v36  ;;  %v7219_v36 = vpack.c.bf16 %v4846_v27, %v4844_v25  ;;  %v4187_v25 = vld [vmem:[#allocation2 + $0x1f0] sm:$0xff]  ;;  %v4186_v27 = vld [vmem:[#allocation2 + $0x1e8] sm:$0xff] }
 0x843   :  { %7188 = vmatprep.subr.bf16.mxu0 %v7187_v44  ;;  %v4843_v44 = vld [vmem:[%s13624_s3 + $0x140] sm:$0xff] }
 0x844   :  { %v7221_v50 = vpack.c.bf16 %v4845_v32, %v4843_v44 }
 0x846   :  { %7190 = vmatpush1.bf16.msra.mxu0 %v7189_v54  ;;  %v7223_v54 = vpack.c.bf16 %v4850_v39, %v4848_v37 }
 0x847   :  { %7192 = vmatprep.subr.bf16.mxu0 %v7191_v61  ;;  %v4847_v61 = vld [vmem:[%s13624_s3 + $0x160] sm:$0xff] }
 0x848   :  { %v7225_v63 = vpack.c.bf16 %v4849_v62, %v4847_v61 }
 0x84a   :  { %7194 = vmatpush1.bf16.msra.mxu0 %v7193_v4  ;;  %v7227_v4 = vpack.c.bf16 %v4854_v45, %v4852_v3 }
 0x84b   :  { %7196 = vmatprep.subr.bf16.mxu0 %v7195_v9  ;;  %v4851_v9 = vld [vmem:[%s13624_s3 + $0x180] sm:$0xff] }
 0x84c   :  { %v7229_v16 = vpack.c.bf16 %v4853_v12, %v4851_v9 }
 0x84e   :  { %7198 = vmatpush1.bf16.msra.mxu0 %v7197_v21  ;;  %v7231_v21 = vpack.c.bf16 %v4858_v14, %v4856_v13 }
 0x84f   :  { %7200 = vmatprep.subr.bf16.mxu0 %v7199_v23  ;;  %v4855_v23 = vld [vmem:[%s13624_s3 + $0x1a0] sm:$0xff] }
 0x850   :  { %v7233_v58 = vpack.c.bf16 %v4857_v30, %v4855_v23 }
 0x852   :  { %7202 = vmatpush1.bf16.msra.mxu0 %v7201_v1  ;;  %v7235_v1 = vpack.c.bf16 %v4862_v22, %v4860_v31 }
 0x853   :  { %7204 = vmatprep.subr.bf16.mxu0 %v7203_v2  ;;  %v4859_v2 = vld [vmem:[%s13624_s3 + $0x1c0] sm:$0xff] }
 0x854   :  { %v7237_v28 = vpack.c.bf16 %v4861_v7, %v4859_v2 }
 0x856   :  { %7206 = vmatpush1.bf16.msra.mxu0 %v7205_v5  ;;  %v7239_v5 = vpack.c.bf16 %v4866_v17, %v4864_v8 }
 0x857   :  { %7208 = vmatprep.subr.bf16.mxu0 %v7207_v49  ;;  %v4863_v49 = vld [vmem:[%s13624_s3 + $0x1e0] sm:$0xff] }
 0x858   :  { %v7241_v34 = vpack.c.bf16 %v4865_v6, %v4863_v49  ;;  %v4869_v49 = vlaneseq }
 0x85a   :  { %7210 = vmatpush1.bf16.msra.mxu0 %v7209_v41 }
 0x85b   :  { %7212 = vmatprep.subr.bf16.mxu0 %v7211_v47 }
 0x85e   :  { %7214 = vmatpush1.bf16.msra.mxu0 %v7213_v18 }
 0x85f   :  { %7216 = vmatprep.subr.bf16.mxu0 %v7215_v19 }
 0x862   :  { %7218 = vmatpush1.bf16.msra.mxu0 %v7217_v33  ;;  %v4188_v33 = vld [vmem:[#allocation2 + $0x1f8] sm:$0xff] }
 0x863   :  { %7220 = vmatprep.subr.bf16.mxu0 %v7219_v36 }
 0x866   :  { %7222 = vmatpush1.bf16.msra.mxu0 %v7221_v50 }
 0x867   :  { %7224 = vmatprep.subr.bf16.mxu0 %v7223_v54 }
 0x86a   :  { %7226 = vmatpush1.bf16.msra.mxu0 %v7225_v63 }
 0x86b   :  { %7228 = vmatprep.subr.bf16.mxu0 %v7227_v4 }
 0x86e   :  { %7230 = vmatpush1.bf16.msra.mxu0 %v7229_v16 }
 0x86f   :  { %7232 = vmatprep.subr.bf16.mxu0 %v7231_v21 }
 0x872   :  { %7234 = vmatpush1.bf16.msra.mxu0 %v7233_v58 }
 0x873   :  { %7236 = vmatprep.subr.bf16.mxu0 %v7235_v1 }
 0x876   :  { %7238 = vmatpush1.bf16.msra.mxu0 %v7237_v28 }
 0x877   :  { %7240 = vmatprep.subr.bf16.mxu0 %v7239_v5 }
 0x87a   :  { %7242 = vmatpush1.bf16.msra.mxu0 %v7241_v34  ;;  %v4867_v34 = vld [vmem:[%s13625_s4] sm:$0x3] }
 0x87d   :  { %4944 = vmatmul.mubr.f32.vlgmr.msra.gmra.mrb[26].mxu0 %v8038_v59 }
 0x87e   :  { %4949 = vmatprep.mubr.f32.mxu0 %v8835_v20 }
 0x881   :  { %4950 = vmatmul.mubr.f32.gmra.mrb[28].mxu0 %v8843_v29 }
 0x882   :  { %4955 = vmatprep.mubr.f32.mxu0 %v9661_v38 }
 0x885   :  { %4956 = vmatmul.mubr.f32.gmra.mrb[30].mxu0 %v9669_v46  ;;  %v4181_v46 = vld [vmem:[#allocation2 + $0x1c0] sm:$0xff] }
 0x886   :  { %4961 = vmatprep.mubr.f32.mxu0 %v10485_v53  ;;  %v4183_v53 = vld [vmem:[#allocation2 + $0x1d0] sm:$0xff] }
 0x889   :  { %4962 = vmatmul.mubr.f32.gmra.mrb[32].mxu0 %v10493_v51 }
 0x88a   :  { %4967 = vmatprep.mubr.f32.mxu0 %v11309_v24 }
 0x88d   :  { %4968 = vmatmul.mubr.f32.gmra.mrb[34].mxu0 %v11317_v60 }
 0x88e   :  { %4973 = vmatprep.mubr.f32.mxu0 %v12133_v43 }
 0x891   :  { %4974 = vmatmul.mubr.f32.gmra.mrb[36].mxu0 %v12141_v57 }
 0x892   :  { %4979 = vmatprep.mubr.f32.mxu0 %v12921_v52 }
 0x895   :  { %4980 = vmatmul.mubr.f32.gmra.mrb[38].mxu0 %v12929_v48 }
 0x8d0   :  { %v4511_v59 = vpop.f32.mrb[22].mxu0  ;;  %v4582_v20 = vpop.f32.mrb[26].mxu1 }
 0x8d1   :  { %v4513_v29 = vpop.f32.mrb[23].mxu0  ;;  %v4584_v38 = vpop.f32.mrb[27].mxu1  ;;  %v4729_v51 = vadd.f32 %v4511_v59, %v4181_v46  ;;  %v4731_v24 = vadd.f32 %v4582_v20, %v4183_v53 }
 0x8d2   :  { %v4730_v41 = vadd.f32 %v4513_v29, %v4182_v35  ;;  %v4732_v60 = vadd.f32 %v4584_v38, %v4184_v40  ;;  %v5008_v38 = vld [vmem:[%s13626_s5] sm:$0x3] }
 0x8d3   :  { %v5381_v47 = vmul.f32 -1.442695, %v4729_v51  ;;  %v5383_v43 = vmul.f32 -1.442695, %v4731_v24 }
 0x8d4   :  { %v5382_v55 = vmul.f32 -1.442695, %v4730_v41  ;;  %v5384_v57 = vmul.f32 -1.442695, %v4732_v60 }
 0x8d5   :  { %7468 = vpow2.f32 %v5381_v47 }
 0x8d6   :  { %7470 = vpow2.f32 %v5383_v43 }
 0x8d7   :  { %7472 = vpow2.f32 %v5382_v55 }
 0x8d8   :  { %7474 = vpow2.f32 %v5384_v57 }
 0x8df   :  { %v7469_v52 = vpop.eup %7468 }
 0x8e0   :  { %v7471_v48 = vpop.eup %7470  ;;  %v4743_v42 = vadd.f32 1.0, %v7469_v52 }
 0x8e1   :  { %v7473_v56 = vpop.eup %7472  ;;  %v4755_v18 = vadd.f32 1.0, %v7471_v48 }
 0x8e2   :  { %v7475_v11 = vpop.eup %7474  ;;  %v4744_v19 = vadd.f32 1.0, %v7473_v56  ;;  %7476 = vrcp.f32 %v4743_v42 }
 0x8e3   :  { %v4756_v0 = vadd.f32 1.0, %v7475_v11  ;;  %7478 = vrcp.f32 %v4755_v18 }
 0x8e4   :  { %7480 = vrcp.f32 %v4744_v19 }
 0x8e5   :  { %7482 = vrcp.f32 %v4756_v0 }
 0x8ec   :  { %v7477_v45 = vpop.eup %7476 }
 0x8ed   :  { %v7479_v63 = vpop.eup %7478 }
 0x8ee   :  { %v7481_v4 = vpop.eup %7480  ;;  %v4775_v14 = vmul.f32 %v7479_v63, %v12891_v15 }
 0x8ef   :  { %v7483_v9 = vpop.eup %7482 }
 0x8f0   :  { %v4776_v23 = vmul.f32 %v7483_v9, %v12893_v26  ;;  %v4870_v26 = vshrl.u32 %v4869_v49, 7 }
 0x8f2   :  { %v4871_v6 = vsub.s32 0, %v4870_v26  ;;  %v4875_v59 = vsub.s32 1, %v4870_v26 }
 0x8f4   :  { %v13543_v20 = vrot.slane %v4867_v34, %v4871_v6  ;;  %v13545_v29 = vrot.slane %v4867_v34, %v4875_v59  ;;  %v13551_v51 = vrot.slane %v5008_v38, %v4871_v6  ;;  %v13554_v24 = vrot.slane %v5008_v38, %v4875_v59 }
 0x910   :  { %v4653_v36 = vpop.f32.mrb[24].mxu0  ;;  %v4724_v44 = vpop.f32.mrb[28].mxu1 }
 0x911   :  { %v4733_v32 = vadd.f32 %v4653_v36, %v4185_v10  ;;  %v4735_v37 = vadd.f32 %v4724_v44, %v4187_v25  ;;  %v4655_v39 = vpop.f32.mrb[25].mxu0  ;;  %v4726_v50 = vpop.f32.mrb[29].mxu1 }
 0x912   :  { %v4734_v54 = vadd.f32 %v4655_v39, %v4186_v27  ;;  %v4736_v61 = vadd.f32 %v4726_v50, %v4188_v33 }
 0x913   :  { %7484 = vtanh.f32 %v4733_v32  ;;  %v5385_v62 = vmul.f32 -1.442695, %v4735_v37 }
 0x914   :  { %7486 = vtanh.f32 %v4734_v54  ;;  %v5386_v3 = vmul.f32 -1.442695, %v4736_v61 }
 0x915   :  { %7488 = vpow2.f32 %v5385_v62 }
 0x916   :  { %7490 = vpow2.f32 %v5386_v3 }
 0x91d   :  { %v7485_v12 = vpop.eup %7484 }
 0x91e   :  { %v7487_v13 = vpop.eup %7486  ;;  %v4777_v16 = vmul.f32 %v7485_v12, %v7477_v45 }
 0x91f   :  { %v7489_v21 = vpop.eup %7488  ;;  %v4778_v30 = vmul.f32 %v7487_v13, %v7481_v4 }
 0x920   :  { %v7491_v31 = vpop.eup %7490  ;;  %v4779_v22 = vadd.f32 %v4777_v16, %v4775_v14  ;;  %v4769_v58 = vadd.f32 1.0, %v7489_v21 }
 0x921   :  { %v4780_v1 = vadd.f32 %v4778_v30, %v4776_v23  ;;  %v4770_v2 = vadd.f32 1.0, %v7491_v31 }
 0x922   :  { %7492 = vtanh.f32 %v4779_v22 }
 0x923   :  { %7494 = vrcp.f32 %v4769_v58 }
 0x924   :  { %7496 = vtanh.f32 %v4780_v1 }
 0x925   :  { %7498 = vrcp.f32 %v4770_v2 }
 0x92c   :  { %v7493_v7 = vpop.eup %7492 }
 0x92d   :  { %v7495_v8 = vpop.eup %7494 }
 0x92e   :  { %v7497_v17 = vpop.eup %7496  ;;  %v4783_v28 = vmul.f32 %v7495_v8, %v7493_v7 }
 0x92f   :  { %v7499_v5 = vpop.eup %7498 }
 0x930   :  { %v4784_v15 = vmul.f32 %v7499_v5, %v7497_v17 }
 0x932   :  { %4985 = vmatprep.mubr.f32.mxu0 %v4784_v15 }
 0x933   :  { %4986 = vmatmul.mubr.f32.gmra.mrb[40].mxu0 %v4783_v28 }
 0x950   :  { %v4945_v46 = vpop.f32.mrb[26].mxu0 }
 0x951   :  { %v4946_v53 = vadd.f32 %v4945_v46, %v13543_v20  ;;  %v4947_v35 = vpop.f32.mrb[27].mxu0 }
 0x952   :  { %v4948_v40 = vadd.f32 %v4947_v35, %v13545_v29 }
 0x953   :  { %v4992_v41 = vmax.f32 %v4946_v53, 0.0 }
 0x954   :  { %v4993_v60 = vmax.f32 %v4948_v40, 0.0  ;;  %v4951_v47 = vpop.f32.mrb[28].mxu0  ;;  %v5061_v40 = vstv %s13627_s6 }
 0x955   :  { %v4952_v43 = vadd.f32 %v4951_v47, %v13543_v20  ;;  %v4953_v55 = vpop.f32.mrb[29].mxu0  ;;  %v5020_v57 = vmul.f32 %v13551_v51, %v4992_v41 }
 0x956   :  { %v4954_v52 = vadd.f32 %v4953_v55, %v13545_v29  ;;  %v5021_v48 = vmul.f32 %v13554_v24, %v4993_v60 }
 0x957   :  { %v4994_v56 = vmax.f32 %v4952_v43, 0.0 }
 0x958   :  { %v4995_v11 = vmax.f32 %v4954_v52, 0.0  ;;  %v4957_v42 = vpop.f32.mrb[30].mxu0  ;;  %v5036_v18 = vadd.f32 %v5021_v48, %v5020_v57 }
 0x959   :  { %v5022_v19 = vmul.f32 %v13551_v51, %v4994_v56  ;;  %v4958_v0 = vadd.f32 %v4957_v42, %v13543_v20  ;;  %v4959_v10 = vpop.f32.mrb[31].mxu0 }
 0x95a   :  { %v5023_v25 = vmul.f32 %v13554_v24, %v4995_v11  ;;  %v4960_v27 = vadd.f32 %v4959_v10, %v13545_v29  ;;  %5037 = vadd.xlane.f32.xlu0 %v5036_v18 }
 0x95b   :  { %v4996_v33 = vmax.f32 %v4958_v0, 0.0 }
 0x95c   :  { %v4997_v36 = vmax.f32 %v4960_v27, 0.0  ;;  %v4963_v44 = vpop.f32.mrb[32].mxu0  ;;  %v5039_v32 = vadd.f32 %v5023_v25, %v5022_v19 }
 0x95d   :  { %v4964_v37 = vadd.f32 %v4963_v44, %v13543_v20  ;;  %v4965_v39 = vpop.f32.mrb[33].mxu0  ;;  %v5024_v50 = vmul.f32 %v13551_v51, %v4996_v33 }
 0x95e   :  { %v4966_v54 = vadd.f32 %v4965_v39, %v13545_v29  ;;  %5040 = vadd.xlane.f32.xlu0 %v5039_v32  ;;  %v5025_v61 = vmul.f32 %v13554_v24, %v4997_v36 }
 0x95f   :  { %v4998_v62 = vmax.f32 %v4964_v37, 0.0 }
 0x960   :  { %v4999_v3 = vmax.f32 %v4966_v54, 0.0  ;;  %v4969_v45 = vpop.f32.mrb[34].mxu0  ;;  %v5042_v63 = vadd.f32 %v5025_v61, %v5024_v50 }
 0x961   :  { %v5026_v4 = vmul.f32 %v13551_v51, %v4998_v62  ;;  %v4970_v9 = vadd.f32 %v4969_v45, %v13543_v20  ;;  %v4971_v12 = vpop.f32.mrb[35].mxu0 }
 0x962   :  { %v5027_v13 = vmul.f32 %v13554_v24, %v4999_v3  ;;  %v4972_v14 = vadd.f32 %v4971_v12, %v13545_v29  ;;  %5043 = vadd.xlane.f32.xlu1 %v5042_v63 }
 0x963   :  { %v5000_v16 = vmax.f32 %v4970_v9, 0.0 }
 0x964   :  { %v5001_v21 = vmax.f32 %v4972_v14, 0.0  ;;  %v4975_v23 = vpop.f32.mrb[36].mxu0  ;;  %v5045_v30 = vadd.f32 %v5027_v13, %v5026_v4 }
 0x965   :  { %v5028_v31 = vmul.f32 %v13551_v51, %v5000_v16  ;;  %v4976_v22 = vadd.f32 %v4975_v23, %v13543_v20  ;;  %v4977_v58 = vpop.f32.mrb[37].mxu0 }
 0x966   :  { %v5029_v1 = vmul.f32 %v13554_v24, %v5001_v21  ;;  %v4978_v2 = vadd.f32 %v4977_v58, %v13545_v29  ;;  %5046 = vadd.xlane.f32.xlu1 %v5045_v30 }
 0x967   :  { %v5002_v7 = vmax.f32 %v4976_v22, 0.0 }
 0x968   :  { %v5003_v8 = vmax.f32 %v4978_v2, 0.0  ;;  %v4981_v17 = vpop.f32.mrb[38].mxu0  ;;  %v5048_v28 = vadd.f32 %v5029_v1, %v5028_v31 }
 0x969   :  { %v5030_v5 = vmul.f32 %v13551_v51, %v5002_v7  ;;  %v4982_v15 = vadd.f32 %v4981_v17, %v13543_v20  ;;  %v4983_v49 = vpop.f32.mrb[39].mxu0 }
 0x96a   :  { %v5031_v26 = vmul.f32 %v13554_v24, %v5003_v8  ;;  %v4984_v6 = vadd.f32 %v4983_v49, %v13545_v29  ;;  %5049 = vadd.xlane.f32.xlu0 %v5048_v28 }
 0x96b   :  { %v5004_v34 = vmax.f32 %v4982_v15, 0.0 }
 0x96c   :  { %v5005_v59 = vmax.f32 %v4984_v6, 0.0  ;;  %v5051_v38 = vadd.f32 %v5031_v26, %v5030_v5 }
 0x96d   :  { %v5032_v46 = vmul.f32 %v13551_v51, %v5004_v34 }
 0x96e   :  { %v5033_v53 = vmul.f32 %v13554_v24, %v5005_v59  ;;  %5052 = vadd.xlane.f32.xlu1 %v5051_v38 }
 0x970   :  { %v5054_v35 = vadd.f32 %v5033_v53, %v5032_v46 }
 0x972   :  { %5055 = vadd.xlane.f32.xlu0 %v5054_v35 }
 0x9e7   :  { %v5038_v41 = vpop.xlane.xlu0 %5037 }
 0x9e8   :  { %v5062_v60 = vadd.f32 %v5061_v40, %v5038_v41 }
 0x9ea   :  { %5071 = vst.msk [vmem:[%s13628_s7] sm:$0xff] %vm5070_vm0, %v5062_v60 }
 0x9eb   :  { %v5041_v47 = vpop.xlane.xlu0 %5040 }
 0x9ec   :  { %v5063_v43 = vadd.f32 %v5061_v40, %v5041_v47 }
 0x9ee   :  { %5072 = vst.msk [vmem:[%s13628_s7 + $0x8] sm:$0xff] %vm5070_vm0, %v5063_v43 }
 0x9ef   :  { %v5044_v55 = vpop.xlane.xlu1 %5043 }
 0x9f0   :  { %v5064_v57 = vadd.f32 %v5061_v40, %v5044_v55 }
 0x9f2   :  { %5073 = vst.msk [vmem:[%s13628_s7 + $0x10] sm:$0xff] %vm5070_vm0, %v5064_v57 }
 0x9f3   :  { %v5047_v52 = vpop.xlane.xlu1 %5046 }
 0x9f4   :  { %v5065_v48 = vadd.f32 %v5061_v40, %v5047_v52 }
 0x9f6   :  { %5074 = vst.msk [vmem:[%s13628_s7 + $0x18] sm:$0xff] %vm5070_vm0, %v5065_v48 }
 0x9f7   :  { %v5050_v56 = vpop.xlane.xlu0 %5049 }
 0x9f8   :  { %v5066_v11 = vadd.f32 %v5061_v40, %v5050_v56 }
 0x9fa   :  { %5075 = vst.msk [vmem:[%s13628_s7 + $0x20] sm:$0xff] %vm5070_vm0, %v5066_v11 }
 0x9fb   :  { %v5053_v42 = vpop.xlane.xlu1 %5052 }
 0x9fc   :  { %v5067_v18 = vadd.f32 %v5061_v40, %v5053_v42 }
 0x9fe   :  { %5076 = vst.msk [vmem:[%s13628_s7 + $0x28] sm:$0xff] %vm5070_vm0, %v5067_v18 }
 0x9ff   :  { %v5056_v19 = vpop.xlane.xlu0 %5055 }
 0xa00   :  { %v5068_v0 = vadd.f32 %v5061_v40, %v5056_v19 }
 0xa02   :  { %5077 = vst.msk [vmem:[%s13628_s7 + $0x30] sm:$0xff] %vm5070_vm0, %v5068_v0 }
 0xa06   :  { %v4987_v10 = vpop.f32.mrb[40].mxu0 }
 0xa07   :  { %v4988_v25 = vadd.f32 %v4987_v10, %v13543_v20  ;;  %v4989_v27 = vpop.f32.mrb[41].mxu0 }
 0xa08   :  { %v4990_v33 = vadd.f32 %v4989_v27, %v13545_v29 }
 0xa09   :  { %v5006_v36 = vmax.f32 %v4988_v25, 0.0 }
 0xa0a   :  { %v5007_v44 = vmax.f32 %v4990_v33, 0.0 }
 0xa0b   :  { %v5034_v32 = vmul.f32 %v13551_v51, %v5006_v36 }
 0xa0c   :  { %v5035_v37 = vmul.f32 %v13554_v24, %v5007_v44 }
 0xa0e   :  { %v5057_v39 = vadd.f32 %v5035_v37, %v5034_v32 }
 0xa10   :  { %5058 = vadd.xlane.f32.xlu1 %v5057_v39 }
 0xa9d   :  { %v5059_v50 = vpop.xlane.xlu1 %5058 }
 0xa9e   :  { %v5069_v54 = vadd.f32 %v5061_v40, %v5059_v50 }
 0xaa0   :  { %5078 = vst.msk [vmem:[%s13628_s7 + $0x38] sm:$0xff] %vm5070_vm0, %v5069_v54 }
 0xaa1   :  { %5083 = vsyncpa [#allocation6], 1 }

</bundles_post_ra>
